<compile_context>
chip_gen: v5e
topology: v5e:2x2
jax: 0.10.0
libtpu: 0.0.40
codegen_flags: <defaults>
</compile_context>

<pallas_src>
import jax
import jax.numpy as jnp
import numpy as np
from jax.experimental import pallas as pl
from jax.experimental.pallas import tpu as pltpu

HIDDEN = 64      # hidden_size
INPUT = 768      # input_size
LAYERS = 2       # num_layers
BATCH = 2
SEQ = 8


# ---------------------------------------------------------------------------
# Fused Pallas kernel
# ---------------------------------------------------------------------------
def _fused_bilstm_kernel(x_ref,                        # (T*B, KBLK) f32 K-block
                         wih0_ref, whh0_ref, b0_ref,   # layer-0 packed (bf16/bf16/f32)
                         wih1_ref, whh1_ref, b1_ref,   # layer-1 packed (bf16/bf16/f32)
                         wfc_ref, bfc_ref,             # fc (2H,1) f32, (1,1) f32
                         out_ref,                      # (B, 1) f32
                         xproj_sc, gx_sc, hall_sc, hsel_sc):
    B = out_ref.shape[0]
    TB = xproj_sc.shape[0]
    T = TB // B
    H2 = whh0_ref.shape[0]          # 2H: fwd||bwd hidden width (128 lanes)
    H = H2 // 2
    G = 4 * H2                      # combined gate width (both directions)
    S3 = 3 * H2                     # sigmoid-gate lanes [i|f|o]

    k = pl.program_id(0)
    nk = pl.num_programs(0)

    # --- gridded part: accumulate layer-0 input projection over K blocks ---
    @pl.when(k == 0)
    def _init():
        xproj_sc[...] = jnp.zeros_like(xproj_sc)

    xproj_sc[...] += jnp.dot(x_ref[...].astype(jnp.bfloat16), wih0_ref[...],
                             preferred_element_type=jnp.float32)

    # --- recurrence + epilogue only once the full projection is in VMEM ---
    @pl.when(k == nk - 1)
    def _run():
        # Lane masks, hoisted once (broadcast_in_dim is not CSE'd by JAX).
        lane_g = jax.lax.broadcasted_iota(jnp.int32, (1, G), 1)
        fwd_g = (lane_g % H2) < H               # fwd-direction gate lanes
        lane_h = jax.lax.broadcasted_iota(jnp.int32, (1, H2), 1)
        fwd_h = lane_h < H                      # fwd-direction hidden lanes

        def recurrence(whh_ref, store_hall):
            h = jnp.zeros((B, H2), jnp.float32)
            c = jnp.zeros((B, H2), jnp.float32)
            for s in range(T):                  # statically unrolled (T = 8)
                r = s * B
                gates = gx_sc[r:r + B, :] + jnp.dot(
                    h.astype(jnp.bfloat16), whh_ref[...],
                    preferred_element_type=jnp.float32)
                # packed gate order [i|f|o|g]: sigmoids are one contiguous slice
                sig = jax.nn.sigmoid(gates[:, :S3])
                i_g = sig[:, 0:H2]
                f_g = sig[:, H2:2 * H2]
                o_g = sig[:, 2 * H2:S3]
                g_g = jnp.tanh(gates[:, S3:])
                c = f_g * c + i_g * g_g
                h = o_g * jnp.tanh(c)
                if store_hall:
                    # one full-width 128-lane store per step
                    hall_sc[r:r + B, :] = h
            return h

        # ---------------- layer 0 ----------------
        # Hoisted fwd/bwd select: gx[step s] = fwd lanes from time s, bwd lanes
        # from time T-1-s; also converts batch-major xproj rows (b*T + t) to
        # time-major gx rows (s*B + b) and folds the bias in.  Off the serial
        # chain -> pipelines in vld/VPU/vst slots.
        b0 = b0_ref[...]
        for b in range(B):
            base = b * T
            for s in range(T):
                xf = xproj_sc[base + s:base + s + 1, :]
                xb = xproj_sc[base + (T - 1 - s):base + (T - 1 - s) + 1, :]
                row = s * B + b
                gx_sc[row:row + 1, :] = jnp.where(fwd_g, xf, xb) + b0
        recurrence(whh0_ref, store_hall=True)

        # ---------------- layer 1 ----------------
        # Time-aligned layer-1 input: fwd half of step t, bwd half of step T-1-t.
        for t in range(T):
            rt = t * B
            rr = (T - 1 - t) * B
            hsel_sc[rt:rt + B, :] = jnp.where(
                fwd_h, hall_sc[rt:rt + B, :], hall_sc[rr:rr + B, :])
        # Hoisted layer-1 input projection for ALL timesteps / both directions.
        xproj_sc[...] = jnp.dot(hsel_sc[...].astype(jnp.bfloat16), wih1_ref[...],
                                preferred_element_type=jnp.float32)
        b1 = b1_ref[...]
        for s in range(T):
            rf = s * B
            rb = (T - 1 - s) * B
            gx_sc[rf:rf + B, :] = jnp.where(
                fwd_g, xproj_sc[rf:rf + B, :], xproj_sc[rb:rb + B, :]) + b1
        h = recurrence(whh1_ref, store_hall=False)

        # ---------------- fc + sigmoid epilogue ----------------
        # h == concat([h_n[-2], h_n[-1]]) of the PyTorch module.
        z = jnp.dot(h, wfc_ref[...], preferred_element_type=jnp.float32) + bfc_ref[...]
        out_ref[...] = jax.nn.sigmoid(z)


# ---------------------------------------------------------------------------
# Wrapper
# ---------------------------------------------------------------------------
def model_forward(x, kp):
    """x: (B, T, INPUT) -> (B, 1).  kp: packed kernel params (see pack_params)."""
    B, T, D = x.shape
    H = HIDDEN
    H2 = 2 * H
    G = 8 * H
    KBLK = 256
    assert D % KBLK == 0
    nk = D // KBLK

    x2d = x.reshape(B * T, D)            # free reshape; batch-major rows b*T + t
    wih0, whh0, b0 = kp["l0"]
    wih1, whh1, b1 = kp["l1"]
    wfc, bfc = kp["fc"]

    grid_spec = pltpu.PrefetchScalarGridSpec(
        num_scalar_prefetch=0,
        grid=(nk,),
        in_specs=[
            pl.BlockSpec((B * T, KBLK), lambda k: (0, k)),   # x K-block
            pl.BlockSpec((KBLK, G), lambda k: (k, 0)),       # wih0 K-block (bf16)
            pl.BlockSpec((H2, G), lambda k: (0, 0)),         # whh0 (bf16)
            pl.BlockSpec((1, G), lambda k: (0, 0)),          # b0
            pl.BlockSpec((H2, G), lambda k: (0, 0)),         # wih1 (bf16)
            pl.BlockSpec((H2, G), lambda k: (0, 0)),         # whh1 (bf16)
            pl.BlockSpec((1, G), lambda k: (0, 0)),          # b1
            pl.BlockSpec((H2, 1), lambda k: (0, 0)),         # wfc
            pl.BlockSpec((1, 1), lambda k: (0, 0)),          # bfc
        ],
        out_specs=pl.BlockSpec((B, 1), lambda k: (0, 0)),
        scratch_shapes=[
            pltpu.VMEM((B * T, G), jnp.float32),    # xproj (l0 acc, reused for l1)
            pltpu.VMEM((B * T, G), jnp.float32),    # gx (pre-selected gate inputs)
            pltpu.VMEM((B * T, H2), jnp.float32),   # hall (layer-0 per-step h)
            pltpu.VMEM((B * T, H2), jnp.float32),   # hsel (layer-1 aligned input)
        ],
    )
    return pl.pallas_call(
        _fused_bilstm_kernel,
        out_shape=jax.ShapeDtypeStruct((B, 1), jnp.float32),
        grid_spec=grid_spec,
        compiler_params=pltpu.CompilerParams(dimension_semantics=("arbitrary",)),
    )(x2d, wih0, whh0, b0, wih1, whh1, b1, wfc, bfc)


# ---------------------------------------------------------------------------
# One-time weight packing: PyTorch layout -> kernel layout
#   W_ih_comb (Din, 8H) bf16, W_hh_comb (2H, 8H) bf16 block-diag per gate,
#   b_comb (1, 8H) f32.  Gate slot order [i|f|o|g], each slot = [fwd | bwd].
# ---------------------------------------------------------------------------
def pack_params(params):
    H = HIDDEN
    H2 = 2 * H
    G = 8 * H
    gate_order = (0, 1, 3, 2)       # packed slots (i, f, o, g) <- pytorch (i, f, g, o)
    packed = {}
    for l in range(LAYERS):
        din = INPUT if l == 0 else H2
        wih_f, whh_f, b_f = params[f"l{l}_fwd"]
        wih_b, whh_b, b_b = params[f"l{l}_bwd"]
        wih_c = jnp.zeros((din, G), jnp.float32)
        whh_c = jnp.zeros((H2, G), jnp.float32)
        b_c = jnp.zeros((1, G), jnp.float32)
        for slot, g in enumerate(gate_order):
            fs = slice(slot * H2, slot * H2 + H)          # fwd slot lanes
            bs = slice(slot * H2 + H, (slot + 1) * H2)    # bwd slot lanes
            gk = slice(g * H, (g + 1) * H)                # pytorch gate rows
            wih_c = wih_c.at[:, fs].set(wih_f[gk, :].T)
            wih_c = wih_c.at[:, bs].set(wih_b[gk, :].T)
            whh_c = whh_c.at[0:H, fs].set(whh_f[gk, :].T)
            whh_c = whh_c.at[H:H2, bs].set(whh_b[gk, :].T)
            b_c = b_c.at[:, fs].set(b_f[:, gk])
            b_c = b_c.at[:, bs].set(b_b[:, gk])
        packed[f"l{l}"] = (wih_c.astype(jnp.bfloat16),
                           whh_c.astype(jnp.bfloat16),
                           b_c)
    w_fc, b_fc = params["fc"]
    packed["fc"] = (w_fc.T, b_fc)          # f32 (2H, 1), (1, 1)
    return packed


# ---------------------------------------------------------------------------
# Deterministic parameter init (PyTorch-style U(-1/sqrt(H), 1/sqrt(H)))
# ---------------------------------------------------------------------------
def init_params(key):
    params = {}
    bound = 1.0 / np.sqrt(HIDDEN)
    keys = jax.random.split(key, 4 * LAYERS * 2 + 2)
    idx = 0
    for l in range(LAYERS):
        din = INPUT if l == 0 else 2 * HIDDEN
        for name in ("fwd", "bwd"):
            wih = jax.random.uniform(keys[idx], (4 * HIDDEN, din), jnp.float32, -bound, bound); idx += 1
            whh = jax.random.uniform(keys[idx], (4 * HIDDEN, HIDDEN), jnp.float32, -bound, bound); idx += 1
            bih = jax.random.uniform(keys[idx], (4 * HIDDEN,), jnp.float32, -bound, bound); idx += 1
            bhh = jax.random.uniform(keys[idx], (4 * HIDDEN,), jnp.float32, -bound, bound); idx += 1
            params[f"l{l}_{name}"] = (wih, whh, (bih + bhh).reshape(1, 4 * HIDDEN))
    w_fc = jax.random.uniform(keys[idx], (1, 2 * HIDDEN), jnp.float32, -bound, bound); idx += 1
    b_fc = jax.random.uniform(keys[idx], (1, 1), jnp.float32, -bound, bound)
    params["fc"] = (w_fc, b_fc)
    return params


# ---------------------------------------------------------------------------
# Pure-JAX reference (PyTorch-layout weights) for correctness check
# ---------------------------------------------------------------------------
def _ref_lstm_dir(x_tm, wih, whh, b):
    T, B, _ = x_tm.shape
    H = whh.shape[1]

    def step(carry, x_t):
        h, c = carry
        gates = x_t @ wih.T + h @ whh.T + b
        i, f, g, o = jnp.split(gates, 4, axis=-1)
        c = jax.nn.sigmoid(f) * c + jax.nn.sigmoid(i) * jnp.tanh(g)
        h = jax.nn.sigmoid(o) * jnp.tanh(c)
        return (h, c), h

    (h, _), hs = jax.lax.scan(step, (jnp.zeros((B, H)), jnp.zeros((B, H))), x_tm)
    return hs, h


def reference_forward(x, params):
    x_tm = jnp.transpose(x, (1, 0, 2))
    layer_in = x_tm
    h_finals = None
    for l in range(LAYERS):
        wih_f, whh_f, b_f = params[f"l{l}_fwd"]
        wih_b, whh_b, b_b = params[f"l{l}_bwd"]
        hseq_f, hfin_f = _ref_lstm_dir(layer_in, wih_f, whh_f, b_f)
        hseq_b_rev, hfin_b = _ref_lstm_dir(jnp.flip(layer_in, axis=0), wih_b, whh_b, b_b)
        layer_in = jnp.concatenate([hseq_f, jnp.flip(hseq_b_rev, axis=0)], axis=-1)
        h_finals = (hfin_f, hfin_b)
    h_cat = jnp.concatenate(h_finals, axis=-1)
    w_fc, b_fc = params["fc"]
    return jax.nn.sigmoid(h_cat @ w_fc.T + b_fc)


def quantize_like_kernel(params):
    """bf16-quantize the LSTM matmul weights (matching the kernel packing)."""
    def q(w):
        return w.astype(jnp.bfloat16).astype(jnp.float32)
    out = {}
    for k, v in params.items():
        if k == "fc":
            out[k] = v
        else:
            wih, whh, b = v
            out[k] = (q(wih), q(whh), b)
    return out


# ---------------------------------------------------------------------------
if __name__ == "__main__":
    key = jax.random.PRNGKey(0)
    k_param, k_x = jax.random.split(key)
    params = init_params(k_param)
    packed = pack_params(params)          # one-time host/XLA-side weight prep
    x = jax.random.normal(k_x, (BATCH, SEQ, INPUT), dtype=jnp.float32)

    out = jax.block_until_ready(jax.jit(model_forward)(x, packed))
    assert out.shape == (BATCH, 1), out.shape

    ref = jax.block_until_ready(reference_forward(x, quantize_like_kernel(params)))
    np.testing.assert_allclose(np.asarray(out), np.asarray(ref), rtol=1e-2, atol=5e-3)

    print("KERNEL_OK")
</pallas_src>

<mosaic_0001>
module attributes {stable_mosaic.version = 11 : i64} {
  func.func @_fused_bilstm_kernel(%arg0: i32, %arg1: memref<16x256xf32, #tpu.memory_space<vmem>>, %arg2: memref<256x512xbf16, #tpu.memory_space<vmem>>, %arg3: memref<128x512xbf16, #tpu.memory_space<vmem>>, %arg4: memref<1x512xf32, #tpu.memory_space<vmem>>, %arg5: memref<128x512xbf16, #tpu.memory_space<vmem>>, %arg6: memref<128x512xbf16, #tpu.memory_space<vmem>>, %arg7: memref<1x512xf32, #tpu.memory_space<vmem>>, %arg8: memref<128x1xf32, #tpu.memory_space<vmem>>, %arg9: memref<1x1xf32, #tpu.memory_space<vmem>>, %arg10: memref<2x1xf32, #tpu.memory_space<vmem>>, %arg11: memref<16x512xf32, #tpu.memory_space<vmem>>, %arg12: memref<16x512xf32, #tpu.memory_space<vmem>>, %arg13: memref<16x128xf32, #tpu.memory_space<vmem>>, %arg14: memref<16x128xf32, #tpu.memory_space<vmem>>) attributes {dimension_semantics = [#tpu.dimension_semantics<arbitrary>], iteration_bounds = array<i64: 3>, scalar_prefetch = 0 : i64, scratch_operands = 4 : i64, tpu.core_type = #tpu.core_type<tc>, window_params = [{transform_indices = @transform_0, window_bounds = array<i64: 16, 256>}, {transform_indices = @transform_1, window_bounds = array<i64: 256, 512>}, {pipeline_mode = #tpu.pipeline_mode<synchronous>, transform_indices = @transform_2, window_bounds = array<i64: 128, 512>}, {pipeline_mode = #tpu.pipeline_mode<synchronous>, transform_indices = @transform_3, window_bounds = array<i64: 1, 512>}, {pipeline_mode = #tpu.pipeline_mode<synchronous>, transform_indices = @transform_4, window_bounds = array<i64: 128, 512>}, {pipeline_mode = #tpu.pipeline_mode<synchronous>, transform_indices = @transform_5, window_bounds = array<i64: 128, 512>}, {pipeline_mode = #tpu.pipeline_mode<synchronous>, transform_indices = @transform_6, window_bounds = array<i64: 1, 512>}, {pipeline_mode = #tpu.pipeline_mode<synchronous>, transform_indices = @transform_7, window_bounds = array<i64: 128, 1>}, {pipeline_mode = #tpu.pipeline_mode<synchronous>, transform_indices = @transform_8, window_bounds = array<i64: 1, 1>}, {pipeline_mode = #tpu.pipeline_mode<synchronous>, transform_indices = @transform_9, window_bounds = array<i64: 2, 1>}]} {
    %c0_i32 = arith.constant 0 : i32
    %0 = arith.cmpi eq, %arg0, %c0_i32 : i32
    %1 = arith.extui %0 : i1 to i32
    %c0_i32_0 = arith.constant 0 : i32
    %2 = arith.cmpi ne, %1, %c0_i32_0 : i32
    scf.if %2 {
      %cst_9 = arith.constant 0.000000e+00 : f32
      %13 = vector.broadcast %cst_9 : f32 to vector<16x512xf32>
      %c0_10 = arith.constant 0 : index
      %c0_11 = arith.constant 0 : index
      %14 = vector.load %arg11[%c0_10, %c0_11] : memref<16x512xf32, #tpu.memory_space<vmem>>, vector<16x512xf32>
      tpu.vector_store %arg11[%c0_10, %c0_11], %13 {strides = array<i32>} : memref<16x512xf32, #tpu.memory_space<vmem>>, vector<16x512xf32>,
    } else {
    }
    %c0 = arith.constant 0 : index
    %c0_1 = arith.constant 0 : index
    %3 = vector.load %arg11[%c0, %c0_1] : memref<16x512xf32, #tpu.memory_space<vmem>>, vector<16x512xf32>
    %c0_2 = arith.constant 0 : index
    %c0_3 = arith.constant 0 : index
    %4 = vector.load %arg1[%c0_2, %c0_3] : memref<16x256xf32, #tpu.memory_space<vmem>>, vector<16x256xf32>
    %5 = arith.truncf %4 : vector<16x256xf32> to vector<16x256xbf16>
    %c0_4 = arith.constant 0 : index
    %c0_5 = arith.constant 0 : index
    %6 = vector.load %arg2[%c0_4, %c0_5] : memref<256x512xbf16, #tpu.memory_space<vmem>>, vector<256x512xbf16>
    %cst = arith.constant dense<0.000000e+00> : vector<16x512xf32>
    %7 = tpu.matmul %5, %6, %cst {dimension_numbers = #tpu.dot_dimension_numbers<[1], [0], [0], [1], [0, 0, 1, 1], [], []>} : vector<16x256xbf16>, vector<256x512xbf16>, vector<16x512xf32> -> vector<16x512xf32>
    %8 = arith.addf %3, %7 : vector<16x512xf32>
    %c0_6 = arith.constant 0 : index
    %c0_7 = arith.constant 0 : index
    %9 = vector.load %arg11[%c0_6, %c0_7] : memref<16x512xf32, #tpu.memory_space<vmem>>, vector<16x512xf32>
    tpu.vector_store %arg11[%c0_6, %c0_7], %8 {strides = array<i32>} : memref<16x512xf32, #tpu.memory_space<vmem>>, vector<16x512xf32>,
    %c2_i32 = arith.constant 2 : i32
    %10 = arith.cmpi eq, %arg0, %c2_i32 : i32
    %11 = arith.extui %10 : i1 to i32
    %c0_i32_8 = arith.constant 0 : i32
    %12 = arith.cmpi ne, %11, %c0_i32_8 : i32
    scf.if %12 {
      %13 = tpu.iota {dimensions = array<i32: 1>} : vector<1x512xi32>
      %c128_i32 = arith.constant 128 : i32
      %c0_i32_9 = arith.constant 0 : i32
      %14 = arith.cmpi eq, %c128_i32, %c0_i32_9 : i32
      %c1_i32 = arith.constant 1 : i32
      %15 = arith.select %14, %c1_i32, %c128_i32 : i32
      %16 = vector.broadcast %15 : i32 to vector<1x512xi32>
      %17 = arith.remsi %13, %16 : vector<1x512xi32>
      %c0_i32_10 = arith.constant 0 : i32
      %18 = vector.broadcast %c0_i32_10 : i32 to vector<1x512xi32>
      %19 = arith.cmpi ne, %17, %18 : vector<1x512xi32>
      %c0_i32_11 = arith.constant 0 : i32
      %20 = vector.broadcast %c0_i32_11 : i32 to vector<1x512xi32>
      %21 = arith.cmpi slt, %17, %20 : vector<1x512xi32>
      %c0_i32_12 = arith.constant 0 : i32
      %22 = arith.cmpi slt, %15, %c0_i32_12 : i32
      %23 = vector.broadcast %22 : i1 to vector<1x512xi1>
      %24 = vector.broadcast %23 : vector<1x512xi1> to vector<1x512xi1>
      %25 = arith.xori %21, %24 : vector<1x512xi1>
      %26 = arith.andi %25, %19 : vector<1x512xi1>
      %27 = vector.broadcast %15 : i32 to vector<1x512xi32>
      %28 = arith.addi %17, %27 : vector<1x512xi32>
      %29 = arith.select %26, %28, %17 : vector<1x512xi1>, vector<1x512xi32>
      %c64_i32 = arith.constant 64 : i32
      %30 = vector.broadcast %c64_i32 : i32 to vector<1x512xi32>
      %31 = arith.cmpi slt, %29, %30 : vector<1x512xi32>
      %32 = tpu.iota {dimensions = array<i32: 1>} : vector<1x128xi32>
      %c64_i32_13 = arith.constant 64 : i32
      %33 = vector.broadcast %c64_i32_13 : i32 to vector<1x128xi32>
      %34 = arith.cmpi slt, %32, %33 : vector<1x128xi32>
      %c0_14 = arith.constant 0 : index
      %c0_15 = arith.constant 0 : index
      %35 = vector.load %arg4[%c0_14, %c0_15] : memref<1x512xf32, #tpu.memory_space<vmem>>, vector<1x512xf32>
      %c0_16 = arith.constant 0 : index
      %c0_17 = arith.constant 0 : index
      %36 = vector.load %arg11[%c0_16, %c0_17] : memref<16x512xf32, #tpu.memory_space<vmem>>, vector<1x512xf32>
      %c7 = arith.constant 7 : index
      %c0_18 = arith.constant 0 : index
      %37 = vector.load %arg11[%c7, %c0_18] : memref<16x512xf32, #tpu.memory_space<vmem>>, vector<1x512xf32>
      %38 = arith.select %31, %36, %37 : vector<1x512xi1>, vector<1x512xf32>
      %39 = arith.addf %38, %35 : vector<1x512xf32>
      %c0_19 = arith.constant 0 : index
      %c0_20 = arith.constant 0 : index
      %40 = vector.load %arg12[%c0_19, %c0_20] : memref<16x512xf32, #tpu.memory_space<vmem>>, vector<1x512xf32>
      tpu.vector_store %arg12[%c0_19, %c0_20], %39 {strides = array<i32>} : memref<16x512xf32, #tpu.memory_space<vmem>>, vector<1x512xf32>,
      %c1 = arith.constant 1 : index
      %c0_21 = arith.constant 0 : index
      %41 = vector.load %arg11[%c1, %c0_21] : memref<16x512xf32, #tpu.memory_space<vmem>>, vector<1x512xf32>
      %c6 = arith.constant 6 : index
      %c0_22 = arith.constant 0 : index
      %42 = vector.load %arg11[%c6, %c0_22] : memref<16x512xf32, #tpu.memory_space<vmem>>, vector<1x512xf32>
      %43 = arith.select %31, %41, %42 : vector<1x512xi1>, vector<1x512xf32>
      %44 = arith.addf %43, %35 : vector<1x512xf32>
      %c2 = arith.constant 2 : index
      %c0_23 = arith.constant 0 : index
      %45 = vector.load %arg12[%c2, %c0_23] : memref<16x512xf32, #tpu.memory_space<vmem>>, vector<1x512xf32>
      tpu.vector_store %arg12[%c2, %c0_23], %44 {strides = array<i32>} : memref<16x512xf32, #tpu.memory_space<vmem>>, vector<1x512xf32>,
      %c2_24 = arith.constant 2 : index
      %c0_25 = arith.constant 0 : index
      %46 = vector.load %arg11[%c2_24, %c0_25] : memref<16x512xf32, #tpu.memory_space<vmem>>, vector<1x512xf32>
      %c5 = arith.constant 5 : index
      %c0_26 = arith.constant 0 : index
      %47 = vector.load %arg11[%c5, %c0_26] : memref<16x512xf32, #tpu.memory_space<vmem>>, vector<1x512xf32>
      %48 = arith.select %31, %46, %47 : vector<1x512xi1>, vector<1x512xf32>
      %49 = arith.addf %48, %35 : vector<1x512xf32>
      %c4 = arith.constant 4 : index
      %c0_27 = arith.constant 0 : index
      %50 = vector.load %arg12[%c4, %c0_27] : memref<16x512xf32, #tpu.memory_space<vmem>>, vector<1x512xf32>
      tpu.vector_store %arg12[%c4, %c0_27], %49 {strides = array<i32>} : memref<16x512xf32, #tpu.memory_space<vmem>>, vector<1x512xf32>,
      %c3 = arith.constant 3 : index
      %c0_28 = arith.constant 0 : index
      %51 = vector.load %arg11[%c3, %c0_28] : memref<16x512xf32, #tpu.memory_space<vmem>>, vector<1x512xf32>
      %c4_29 = arith.constant 4 : index
      %c0_30 = arith.constant 0 : index
      %52 = vector.load %arg11[%c4_29, %c0_30] : memref<16x512xf32, #tpu.memory_space<vmem>>, vector<1x512xf32>
      %53 = arith.select %31, %51, %52 : vector<1x512xi1>, vector<1x512xf32>
      %54 = arith.addf %53, %35 : vector<1x512xf32>
      %c6_31 = arith.constant 6 : index
      %c0_32 = arith.constant 0 : index
      %55 = vector.load %arg12[%c6_31, %c0_32] : memref<16x512xf32, #tpu.memory_space<vmem>>, vector<1x512xf32>
      tpu.vector_store %arg12[%c6_31, %c0_32], %54 {strides = array<i32>} : memref<16x512xf32, #tpu.memory_space<vmem>>, vector<1x512xf32>,
      %c4_33 = arith.constant 4 : index
      %c0_34 = arith.constant 0 : index
      %56 = vector.load %arg11[%c4_33, %c0_34] : memref<16x512xf32, #tpu.memory_space<vmem>>, vector<1x512xf32>
      %c3_35 = arith.constant 3 : index
      %c0_36 = arith.constant 0 : index
      %57 = vector.load %arg11[%c3_35, %c0_36] : memref<16x512xf32, #tpu.memory_space<vmem>>, vector<1x512xf32>
      %58 = arith.select %31, %56, %57 : vector<1x512xi1>, vector<1x512xf32>
      %59 = arith.addf %58, %35 : vector<1x512xf32>
      %c8 = arith.constant 8 : index
      %c0_37 = arith.constant 0 : index
      %60 = vector.load %arg12[%c8, %c0_37] : memref<16x512xf32, #tpu.memory_space<vmem>>, vector<1x512xf32>
      tpu.vector_store %arg12[%c8, %c0_37], %59 {strides = array<i32>} : memref<16x512xf32, #tpu.memory_space<vmem>>, vector<1x512xf32>,
      %c5_38 = arith.constant 5 : index
      %c0_39 = arith.constant 0 : index
      %61 = vector.load %arg11[%c5_38, %c0_39] : memref<16x512xf32, #tpu.memory_space<vmem>>, vector<1x512xf32>
      %c2_40 = arith.constant 2 : index
      %c0_41 = arith.constant 0 : index
      %62 = vector.load %arg11[%c2_40, %c0_41] : memref<16x512xf32, #tpu.memory_space<vmem>>, vector<1x512xf32>
      %63 = arith.select %31, %61, %62 : vector<1x512xi1>, vector<1x512xf32>
      %64 = arith.addf %63, %35 : vector<1x512xf32>
      %c10 = arith.constant 10 : index
      %c0_42 = arith.constant 0 : index
      %65 = vector.load %arg12[%c10, %c0_42] : memref<16x512xf32, #tpu.memory_space<vmem>>, vector<1x512xf32>
      tpu.vector_store %arg12[%c10, %c0_42], %64 {strides = array<i32>} : memref<16x512xf32, #tpu.memory_space<vmem>>, vector<1x512xf32>,
      %c6_43 = arith.constant 6 : index
      %c0_44 = arith.constant 0 : index
      %66 = vector.load %arg11[%c6_43, %c0_44] : memref<16x512xf32, #tpu.memory_space<vmem>>, vector<1x512xf32>
      %c1_45 = arith.constant 1 : index
      %c0_46 = arith.constant 0 : index
      %67 = vector.load %arg11[%c1_45, %c0_46] : memref<16x512xf32, #tpu.memory_space<vmem>>, vector<1x512xf32>
      %68 = arith.select %31, %66, %67 : vector<1x512xi1>, vector<1x512xf32>
      %69 = arith.addf %68, %35 : vector<1x512xf32>
      %c12 = arith.constant 12 : index
      %c0_47 = arith.constant 0 : index
      %70 = vector.load %arg12[%c12, %c0_47] : memref<16x512xf32, #tpu.memory_space<vmem>>, vector<1x512xf32>
      tpu.vector_store %arg12[%c12, %c0_47], %69 {strides = array<i32>} : memref<16x512xf32, #tpu.memory_space<vmem>>, vector<1x512xf32>,
      %c7_48 = arith.constant 7 : index
      %c0_49 = arith.constant 0 : index
      %71 = vector.load %arg11[%c7_48, %c0_49] : memref<16x512xf32, #tpu.memory_space<vmem>>, vector<1x512xf32>
      %c0_50 = arith.constant 0 : index
      %c0_51 = arith.constant 0 : index
      %72 = vector.load %arg11[%c0_50, %c0_51] : memref<16x512xf32, #tpu.memory_space<vmem>>, vector<1x512xf32>
      %73 = arith.select %31, %71, %72 : vector<1x512xi1>, vector<1x512xf32>
      %74 = arith.addf %73, %35 : vector<1x512xf32>
      %c14 = arith.constant 14 : index
      %c0_52 = arith.constant 0 : index
      %75 = vector.load %arg12[%c14, %c0_52] : memref<16x512xf32, #tpu.memory_space<vmem>>, vector<1x512xf32>
      tpu.vector_store %arg12[%c14, %c0_52], %74 {strides = array<i32>} : memref<16x512xf32, #tpu.memory_space<vmem>>, vector<1x512xf32>,
      %c8_53 = arith.constant 8 : index
      %c0_54 = arith.constant 0 : index
      %76 = vector.load %arg11[%c8_53, %c0_54] : memref<16x512xf32, #tpu.memory_space<vmem>>, vector<1x512xf32>
      %c15 = arith.constant 15 : index
      %c0_55 = arith.constant 0 : index
      %77 = vector.load %arg11[%c15, %c0_55] : memref<16x512xf32, #tpu.memory_space<vmem>>, vector<1x512xf32>
      %78 = arith.select %31, %76, %77 : vector<1x512xi1>, vector<1x512xf32>
      %79 = arith.addf %78, %35 : vector<1x512xf32>
      %c1_56 = arith.constant 1 : index
      %c0_57 = arith.constant 0 : index
      %80 = vector.load %arg12[%c1_56, %c0_57] : memref<16x512xf32, #tpu.memory_space<vmem>>, vector<1x512xf32>
      tpu.vector_store %arg12[%c1_56, %c0_57], %79 {strides = array<i32>} : memref<16x512xf32, #tpu.memory_space<vmem>>, vector<1x512xf32>,
      %c9 = arith.constant 9 : index
      %c0_58 = arith.constant 0 : index
      %81 = vector.load %arg11[%c9, %c0_58] : memref<16x512xf32, #tpu.memory_space<vmem>>, vector<1x512xf32>
      %c14_59 = arith.constant 14 : index
      %c0_60 = arith.constant 0 : index
      %82 = vector.load %arg11[%c14_59, %c0_60] : memref<16x512xf32, #tpu.memory_space<vmem>>, vector<1x512xf32>
      %83 = arith.select %31, %81, %82 : vector<1x512xi1>, vector<1x512xf32>
      %84 = arith.addf %83, %35 : vector<1x512xf32>
      %c3_61 = arith.constant 3 : index
      %c0_62 = arith.constant 0 : index
      %85 = vector.load %arg12[%c3_61, %c0_62] : memref<16x512xf32, #tpu.memory_space<vmem>>, vector<1x512xf32>
      tpu.vector_store %arg12[%c3_61, %c0_62], %84 {strides = array<i32>} : memref<16x512xf32, #tpu.memory_space<vmem>>, vector<1x512xf32>,
      %c10_63 = arith.constant 10 : index
      %c0_64 = arith.constant 0 : index
      %86 = vector.load %arg11[%c10_63, %c0_64] : memref<16x512xf32, #tpu.memory_space<vmem>>, vector<1x512xf32>
      %c13 = arith.constant 13 : index
      %c0_65 = arith.constant 0 : index
      %87 = vector.load %arg11[%c13, %c0_65] : memref<16x512xf32, #tpu.memory_space<vmem>>, vector<1x512xf32>
      %88 = arith.select %31, %86, %87 : vector<1x512xi1>, vector<1x512xf32>
      %89 = arith.addf %88, %35 : vector<1x512xf32>
      %c5_66 = arith.constant 5 : index
      %c0_67 = arith.constant 0 : index
      %90 = vector.load %arg12[%c5_66, %c0_67] : memref<16x512xf32, #tpu.memory_space<vmem>>, vector<1x512xf32>
      tpu.vector_store %arg12[%c5_66, %c0_67], %89 {strides = array<i32>} : memref<16x512xf32, #tpu.memory_space<vmem>>, vector<1x512xf32>,
      %c11 = arith.constant 11 : index
      %c0_68 = arith.constant 0 : index
      %91 = vector.load %arg11[%c11, %c0_68] : memref<16x512xf32, #tpu.memory_space<vmem>>, vector<1x512xf32>
      %c12_69 = arith.constant 12 : index
      %c0_70 = arith.constant 0 : index
      %92 = vector.load %arg11[%c12_69, %c0_70] : memref<16x512xf32, #tpu.memory_space<vmem>>, vector<1x512xf32>
      %93 = arith.select %31, %91, %92 : vector<1x512xi1>, vector<1x512xf32>
      %94 = arith.addf %93, %35 : vector<1x512xf32>
      %c7_71 = arith.constant 7 : index
      %c0_72 = arith.constant 0 : index
      %95 = vector.load %arg12[%c7_71, %c0_72] : memref<16x512xf32, #tpu.memory_space<vmem>>, vector<1x512xf32>
      tpu.vector_store %arg12[%c7_71, %c0_72], %94 {strides = array<i32>} : memref<16x512xf32, #tpu.memory_space<vmem>>, vector<1x512xf32>,
      %c12_73 = arith.constant 12 : index
      %c0_74 = arith.constant 0 : index
      %96 = vector.load %arg11[%c12_73, %c0_74] : memref<16x512xf32, #tpu.memory_space<vmem>>, vector<1x512xf32>
      %c11_75 = arith.constant 11 : index
      %c0_76 = arith.constant 0 : index
      %97 = vector.load %arg11[%c11_75, %c0_76] : memref<16x512xf32, #tpu.memory_space<vmem>>, vector<1x512xf32>
      %98 = arith.select %31, %96, %97 : vector<1x512xi1>, vector<1x512xf32>
      %99 = arith.addf %98, %35 : vector<1x512xf32>
      %c9_77 = arith.constant 9 : index
      %c0_78 = arith.constant 0 : index
      %100 = vector.load %arg12[%c9_77, %c0_78] : memref<16x512xf32, #tpu.memory_space<vmem>>, vector<1x512xf32>
      tpu.vector_store %arg12[%c9_77, %c0_78], %99 {strides = array<i32>} : memref<16x512xf32, #tpu.memory_space<vmem>>, vector<1x512xf32>,
      %c13_79 = arith.constant 13 : index
      %c0_80 = arith.constant 0 : index
      %101 = vector.load %arg11[%c13_79, %c0_80] : memref<16x512xf32, #tpu.memory_space<vmem>>, vector<1x512xf32>
      %c10_81 = arith.constant 10 : index
      %c0_82 = arith.constant 0 : index
      %102 = vector.load %arg11[%c10_81, %c0_82] : memref<16x512xf32, #tpu.memory_space<vmem>>, vector<1x512xf32>
      %103 = arith.select %31, %101, %102 : vector<1x512xi1>, vector<1x512xf32>
      %104 = arith.addf %103, %35 : vector<1x512xf32>
      %c11_83 = arith.constant 11 : index
      %c0_84 = arith.constant 0 : index
      %105 = vector.load %arg12[%c11_83, %c0_84] : memref<16x512xf32, #tpu.memory_space<vmem>>, vector<1x512xf32>
      tpu.vector_store %arg12[%c11_83, %c0_84], %104 {strides = array<i32>} : memref<16x512xf32, #tpu.memory_space<vmem>>, vector<1x512xf32>,
      %c14_85 = arith.constant 14 : index
      %c0_86 = arith.constant 0 : index
      %106 = vector.load %arg11[%c14_85, %c0_86] : memref<16x512xf32, #tpu.memory_space<vmem>>, vector<1x512xf32>
      %c9_87 = arith.constant 9 : index
      %c0_88 = arith.constant 0 : index
      %107 = vector.load %arg11[%c9_87, %c0_88] : memref<16x512xf32, #tpu.memory_space<vmem>>, vector<1x512xf32>
      %108 = arith.select %31, %106, %107 : vector<1x512xi1>, vector<1x512xf32>
      %109 = arith.addf %108, %35 : vector<1x512xf32>
      %c13_89 = arith.constant 13 : index
      %c0_90 = arith.constant 0 : index
      %110 = vector.load %arg12[%c13_89, %c0_90] : memref<16x512xf32, #tpu.memory_space<vmem>>, vector<1x512xf32>
      tpu.vector_store %arg12[%c13_89, %c0_90], %109 {strides = array<i32>} : memref<16x512xf32, #tpu.memory_space<vmem>>, vector<1x512xf32>,
      %c15_91 = arith.constant 15 : index
      %c0_92 = arith.constant 0 : index
      %111 = vector.load %arg11[%c15_91, %c0_92] : memref<16x512xf32, #tpu.memory_space<vmem>>, vector<1x512xf32>
      %c8_93 = arith.constant 8 : index
      %c0_94 = arith.constant 0 : index
      %112 = vector.load %arg11[%c8_93, %c0_94] : memref<16x512xf32, #tpu.memory_space<vmem>>, vector<1x512xf32>
      %113 = arith.select %31, %111, %112 : vector<1x512xi1>, vector<1x512xf32>
      %114 = arith.addf %113, %35 : vector<1x512xf32>
      %c15_95 = arith.constant 15 : index
      %c0_96 = arith.constant 0 : index
      %115 = vector.load %arg12[%c15_95, %c0_96] : memref<16x512xf32, #tpu.memory_space<vmem>>, vector<1x512xf32>
      tpu.vector_store %arg12[%c15_95, %c0_96], %114 {strides = array<i32>} : memref<16x512xf32, #tpu.memory_space<vmem>>, vector<1x512xf32>,
      %cst_97 = arith.constant 0.000000e+00 : f32
      %116 = vector.broadcast %cst_97 : f32 to vector<2x128xf32>
      %cst_98 = arith.constant 0.000000e+00 : f32
      %117 = vector.broadcast %cst_98 : f32 to vector<2x128xf32>
      %c0_99 = arith.constant 0 : index
      %c0_100 = arith.constant 0 : index
      %118 = vector.load %arg12[%c0_99, %c0_100] : memref<16x512xf32, #tpu.memory_space<vmem>>, vector<2x512xf32>
      %119 = arith.truncf %116 : vector<2x128xf32> to vector<2x128xbf16>
      %c0_101 = arith.constant 0 : index
      %c0_102 = arith.constant 0 : index
      %120 = vector.load %arg3[%c0_101, %c0_102] : memref<128x512xbf16, #tpu.memory_space<vmem>>, vector<128x512xbf16>
      %cst_103 = arith.constant dense<0.000000e+00> : vector<2x512xf32>
      %121 = tpu.matmul %119, %120, %cst_103 {dimension_numbers = #tpu.dot_dimension_numbers<[1], [0], [0], [1], [0, 0, 1, 1], [], []>} : vector<2x128xbf16>, vector<128x512xbf16>, vector<2x512xf32> -> vector<2x512xf32>
      %122 = arith.addf %118, %121 : vector<2x512xf32>
      %123 = vector.extract_strided_slice %122 {offsets = [0, 0], sizes = [2, 384], strides = [1, 1]} : vector<2x512xf32> to vector<2x384xf32>
      %124 = arith.negf %123 : vector<2x384xf32>
      %125 = math.exp %124 : vector<2x384xf32>
      %cst_104 = arith.constant 1.000000e+00 : f32
      %126 = vector.broadcast %cst_104 : f32 to vector<2x384xf32>
      %127 = arith.addf %126, %125 : vector<2x384xf32>
      %128 = arith.divf %126, %127 : vector<2x384xf32>
      %129 = vector.extract_strided_slice %128 {offsets = [0, 0], sizes = [2, 128], strides = [1, 1]} : vector<2x384xf32> to vector<2x128xf32>
      %130 = vector.extract_strided_slice %128 {offsets = [0, 128], sizes = [2, 128], strides = [1, 1]} : vector<2x384xf32> to vector<2x128xf32>
      %131 = vector.extract_strided_slice %128 {offsets = [0, 256], sizes = [2, 128], strides = [1, 1]} : vector<2x384xf32> to vector<2x128xf32>
      %132 = vector.extract_strided_slice %122 {offsets = [0, 384], sizes = [2, 128], strides = [1, 1]} : vector<2x512xf32> to vector<2x128xf32>
      %133 = math.tanh %132 : vector<2x128xf32>
      %134 = arith.mulf %130, %117 : vector<2x128xf32>
      %135 = arith.mulf %129, %133 : vector<2x128xf32>
      %136 = arith.addf %134, %135 : vector<2x128xf32>
      %137 = math.tanh %136 : vector<2x128xf32>
      %138 = arith.mulf %131, %137 : vector<2x128xf32>
      %c0_105 = arith.constant 0 : index
      %c0_106 = arith.constant 0 : index
      %139 = vector.load %arg13[%c0_105, %c0_106] : memref<16x128xf32, #tpu.memory_space<vmem>>, vector<2x128xf32>
      tpu.vector_store %arg13[%c0_105, %c0_106], %138 {strides = array<i32>} : memref<16x128xf32, #tpu.memory_space<vmem>>, vector<2x128xf32>,
      %c2_107 = arith.constant 2 : index
      %c0_108 = arith.constant 0 : index
      %140 = vector.load %arg12[%c2_107, %c0_108] : memref<16x512xf32, #tpu.memory_space<vmem>>, vector<2x512xf32>
      %141 = arith.truncf %138 : vector<2x128xf32> to vector<2x128xbf16>
      %c0_109 = arith.constant 0 : index
      %c0_110 = arith.constant 0 : index
      %142 = vector.load %arg3[%c0_109, %c0_110] : memref<128x512xbf16, #tpu.memory_space<vmem>>, vector<128x512xbf16>
      %cst_111 = arith.constant dense<0.000000e+00> : vector<2x512xf32>
      %143 = tpu.matmul %141, %142, %cst_111 {dimension_numbers = #tpu.dot_dimension_numbers<[1], [0], [0], [1], [0, 0, 1, 1], [], []>} : vector<2x128xbf16>, vector<128x512xbf16>, vector<2x512xf32> -> vector<2x512xf32>
      %144 = arith.addf %140, %143 : vector<2x512xf32>
      %145 = vector.extract_strided_slice %144 {offsets = [0, 0], sizes = [2, 384], strides = [1, 1]} : vector<2x512xf32> to vector<2x384xf32>
      %146 = arith.negf %145 : vector<2x384xf32>
      %147 = math.exp %146 : vector<2x384xf32>
      %cst_112 = arith.constant 1.000000e+00 : f32
      %148 = vector.broadcast %cst_112 : f32 to vector<2x384xf32>
      %149 = arith.addf %148, %147 : vector<2x384xf32>
      %150 = arith.divf %148, %149 : vector<2x384xf32>
      %151 = vector.extract_strided_slice %150 {offsets = [0, 0], sizes = [2, 128], strides = [1, 1]} : vector<2x384xf32> to vector<2x128xf32>
      %152 = vector.extract_strided_slice %150 {offsets = [0, 128], sizes = [2, 128], strides = [1, 1]} : vector<2x384xf32> to vector<2x128xf32>
      %153 = vector.extract_strided_slice %150 {offsets = [0, 256], sizes = [2, 128], strides = [1, 1]} : vector<2x384xf32> to vector<2x128xf32>
      %154 = vector.extract_strided_slice %144 {offsets = [0, 384], sizes = [2, 128], strides = [1, 1]} : vector<2x512xf32> to vector<2x128xf32>
      %155 = math.tanh %154 : vector<2x128xf32>
      %156 = arith.mulf %152, %136 : vector<2x128xf32>
      %157 = arith.mulf %151, %155 : vector<2x128xf32>
      %158 = arith.addf %156, %157 : vector<2x128xf32>
      %159 = math.tanh %158 : vector<2x128xf32>
      %160 = arith.mulf %153, %159 : vector<2x128xf32>
      %c2_113 = arith.constant 2 : index
      %c0_114 = arith.constant 0 : index
      %161 = vector.load %arg13[%c2_113, %c0_114] : memref<16x128xf32, #tpu.memory_space<vmem>>, vector<2x128xf32>
      tpu.vector_store %arg13[%c2_113, %c0_114], %160 {strides = array<i32>} : memref<16x128xf32, #tpu.memory_space<vmem>>, vector<2x128xf32>,
      %c4_115 = arith.constant 4 : index
      %c0_116 = arith.constant 0 : index
      %162 = vector.load %arg12[%c4_115, %c0_116] : memref<16x512xf32, #tpu.memory_space<vmem>>, vector<2x512xf32>
      %163 = arith.truncf %160 : vector<2x128xf32> to vector<2x128xbf16>
      %c0_117 = arith.constant 0 : index
      %c0_118 = arith.constant 0 : index
      %164 = vector.load %arg3[%c0_117, %c0_118] : memref<128x512xbf16, #tpu.memory_space<vmem>>, vector<128x512xbf16>
      %cst_119 = arith.constant dense<0.000000e+00> : vector<2x512xf32>
      %165 = tpu.matmul %163, %164, %cst_119 {dimension_numbers = #tpu.dot_dimension_numbers<[1], [0], [0], [1], [0, 0, 1, 1], [], []>} : vector<2x128xbf16>, vector<128x512xbf16>, vector<2x512xf32> -> vector<2x512xf32>
      %166 = arith.addf %162, %165 : vector<2x512xf32>
      %167 = vector.extract_strided_slice %166 {offsets = [0, 0], sizes = [2, 384], strides = [1, 1]} : vector<2x512xf32> to vector<2x384xf32>
      %168 = arith.negf %167 : vector<2x384xf32>
      %169 = math.exp %168 : vector<2x384xf32>
      %cst_120 = arith.constant 1.000000e+00 : f32
      %170 = vector.broadcast %cst_120 : f32 to vector<2x384xf32>
      %171 = arith.addf %170, %169 : vector<2x384xf32>
      %172 = arith.divf %170, %171 : vector<2x384xf32>
      %173 = vector.extract_strided_slice %172 {offsets = [0, 0], sizes = [2, 128], strides = [1, 1]} : vector<2x384xf32> to vector<2x128xf32>
      %174 = vector.extract_strided_slice %172 {offsets = [0, 128], sizes = [2, 128], strides = [1, 1]} : vector<2x384xf32> to vector<2x128xf32>
      %175 = vector.extract_strided_slice %172 {offsets = [0, 256], sizes = [2, 128], strides = [1, 1]} : vector<2x384xf32> to vector<2x128xf32>
      %176 = vector.extract_strided_slice %166 {offsets = [0, 384], sizes = [2, 128], strides = [1, 1]} : vector<2x512xf32> to vector<2x128xf32>
      %177 = math.tanh %176 : vector<2x128xf32>
      %178 = arith.mulf %174, %158 : vector<2x128xf32>
      %179 = arith.mulf %173, %177 : vector<2x128xf32>
      %180 = arith.addf %178, %179 : vector<2x128xf32>
      %181 = math.tanh %180 : vector<2x128xf32>
      %182 = arith.mulf %175, %181 : vector<2x128xf32>
      %c4_121 = arith.constant 4 : index
      %c0_122 = arith.constant 0 : index
      %183 = vector.load %arg13[%c4_121, %c0_122] : memref<16x128xf32, #tpu.memory_space<vmem>>, vector<2x128xf32>
      tpu.vector_store %arg13[%c4_121, %c0_122], %182 {strides = array<i32>} : memref<16x128xf32, #tpu.memory_space<vmem>>, vector<2x128xf32>,
      %c6_123 = arith.constant 6 : index
      %c0_124 = arith.constant 0 : index
      %184 = vector.load %arg12[%c6_123, %c0_124] : memref<16x512xf32, #tpu.memory_space<vmem>>, vector<2x512xf32>
      %185 = arith.truncf %182 : vector<2x128xf32> to vector<2x128xbf16>
      %c0_125 = arith.constant 0 : index
      %c0_126 = arith.constant 0 : index
      %186 = vector.load %arg3[%c0_125, %c0_126] : memref<128x512xbf16, #tpu.memory_space<vmem>>, vector<128x512xbf16>
      %cst_127 = arith.constant dense<0.000000e+00> : vector<2x512xf32>
      %187 = tpu.matmul %185, %186, %cst_127 {dimension_numbers = #tpu.dot_dimension_numbers<[1], [0], [0], [1], [0, 0, 1, 1], [], []>} : vector<2x128xbf16>, vector<128x512xbf16>, vector<2x512xf32> -> vector<2x512xf32>
      %188 = arith.addf %184, %187 : vector<2x512xf32>
      %189 = vector.extract_strided_slice %188 {offsets = [0, 0], sizes = [2, 384], strides = [1, 1]} : vector<2x512xf32> to vector<2x384xf32>
      %190 = arith.negf %189 : vector<2x384xf32>
      %191 = math.exp %190 : vector<2x384xf32>
      %cst_128 = arith.constant 1.000000e+00 : f32
      %192 = vector.broadcast %cst_128 : f32 to vector<2x384xf32>
      %193 = arith.addf %192, %191 : vector<2x384xf32>
      %194 = arith.divf %192, %193 : vector<2x384xf32>
      %195 = vector.extract_strided_slice %194 {offsets = [0, 0], sizes = [2, 128], strides = [1, 1]} : vector<2x384xf32> to vector<2x128xf32>
      %196 = vector.extract_strided_slice %194 {offsets = [0, 128], sizes = [2, 128], strides = [1, 1]} : vector<2x384xf32> to vector<2x128xf32>
      %197 = vector.extract_strided_slice %194 {offsets = [0, 256], sizes = [2, 128], strides = [1, 1]} : vector<2x384xf32> to vector<2x128xf32>
      %198 = vector.extract_strided_slice %188 {offsets = [0, 384], sizes = [2, 128], strides = [1, 1]} : vector<2x512xf32> to vector<2x128xf32>
      %199 = math.tanh %198 : vector<2x128xf32>
      %200 = arith.mulf %196, %180 : vector<2x128xf32>
      %201 = arith.mulf %195, %199 : vector<2x128xf32>
      %202 = arith.addf %200, %201 : vector<2x128xf32>
      %203 = math.tanh %202 : vector<2x128xf32>
      %204 = arith.mulf %197, %203 : vector<2x128xf32>
      %c6_129 = arith.constant 6 : index
      %c0_130 = arith.constant 0 : index
      %205 = vector.load %arg13[%c6_129, %c0_130] : memref<16x128xf32, #tpu.memory_space<vmem>>, vector<2x128xf32>
      tpu.vector_store %arg13[%c6_129, %c0_130], %204 {strides = array<i32>} : memref<16x128xf32, #tpu.memory_space<vmem>>, vector<2x128xf32>,
      %c8_131 = arith.constant 8 : index
      %c0_132 = arith.constant 0 : index
      %206 = vector.load %arg12[%c8_131, %c0_132] : memref<16x512xf32, #tpu.memory_space<vmem>>, vector<2x512xf32>
      %207 = arith.truncf %204 : vector<2x128xf32> to vector<2x128xbf16>
      %c0_133 = arith.constant 0 : index
      %c0_134 = arith.constant 0 : index
      %208 = vector.load %arg3[%c0_133, %c0_134] : memref<128x512xbf16, #tpu.memory_space<vmem>>, vector<128x512xbf16>
      %cst_135 = arith.constant dense<0.000000e+00> : vector<2x512xf32>
      %209 = tpu.matmul %207, %208, %cst_135 {dimension_numbers = #tpu.dot_dimension_numbers<[1], [0], [0], [1], [0, 0, 1, 1], [], []>} : vector<2x128xbf16>, vector<128x512xbf16>, vector<2x512xf32> -> vector<2x512xf32>
      %210 = arith.addf %206, %209 : vector<2x512xf32>
      %211 = vector.extract_strided_slice %210 {offsets = [0, 0], sizes = [2, 384], strides = [1, 1]} : vector<2x512xf32> to vector<2x384xf32>
      %212 = arith.negf %211 : vector<2x384xf32>
      %213 = math.exp %212 : vector<2x384xf32>
      %cst_136 = arith.constant 1.000000e+00 : f32
      %214 = vector.broadcast %cst_136 : f32 to vector<2x384xf32>
      %215 = arith.addf %214, %213 : vector<2x384xf32>
      %216 = arith.divf %214, %215 : vector<2x384xf32>
      %217 = vector.extract_strided_slice %216 {offsets = [0, 0], sizes = [2, 128], strides = [1, 1]} : vector<2x384xf32> to vector<2x128xf32>
      %218 = vector.extract_strided_slice %216 {offsets = [0, 128], sizes = [2, 128], strides = [1, 1]} : vector<2x384xf32> to vector<2x128xf32>
      %219 = vector.extract_strided_slice %216 {offsets = [0, 256], sizes = [2, 128], strides = [1, 1]} : vector<2x384xf32> to vector<2x128xf32>
      %220 = vector.extract_strided_slice %210 {offsets = [0, 384], sizes = [2, 128], strides = [1, 1]} : vector<2x512xf32> to vector<2x128xf32>
      %221 = math.tanh %220 : vector<2x128xf32>
      %222 = arith.mulf %218, %202 : vector<2x128xf32>
      %223 = arith.mulf %217, %221 : vector<2x128xf32>
      %224 = arith.addf %222, %223 : vector<2x128xf32>
      %225 = math.tanh %224 : vector<2x128xf32>
      %226 = arith.mulf %219, %225 : vector<2x128xf32>
      %c8_137 = arith.constant 8 : index
      %c0_138 = arith.constant 0 : index
      %227 = vector.load %arg13[%c8_137, %c0_138] : memref<16x128xf32, #tpu.memory_space<vmem>>, vector<2x128xf32>
      tpu.vector_store %arg13[%c8_137, %c0_138], %226 {strides = array<i32>} : memref<16x128xf32, #tpu.memory_space<vmem>>, vector<2x128xf32>,
      %c10_139 = arith.constant 10 : index
      %c0_140 = arith.constant 0 : index
      %228 = vector.load %arg12[%c10_139, %c0_140] : memref<16x512xf32, #tpu.memory_space<vmem>>, vector<2x512xf32>
      %229 = arith.truncf %226 : vector<2x128xf32> to vector<2x128xbf16>
      %c0_141 = arith.constant 0 : index
      %c0_142 = arith.constant 0 : index
      %230 = vector.load %arg3[%c0_141, %c0_142] : memref<128x512xbf16, #tpu.memory_space<vmem>>, vector<128x512xbf16>
      %cst_143 = arith.constant dense<0.000000e+00> : vector<2x512xf32>
      %231 = tpu.matmul %229, %230, %cst_143 {dimension_numbers = #tpu.dot_dimension_numbers<[1], [0], [0], [1], [0, 0, 1, 1], [], []>} : vector<2x128xbf16>, vector<128x512xbf16>, vector<2x512xf32> -> vector<2x512xf32>
      %232 = arith.addf %228, %231 : vector<2x512xf32>
      %233 = vector.extract_strided_slice %232 {offsets = [0, 0], sizes = [2, 384], strides = [1, 1]} : vector<2x512xf32> to vector<2x384xf32>
      %234 = arith.negf %233 : vector<2x384xf32>
      %235 = math.exp %234 : vector<2x384xf32>
      %cst_144 = arith.constant 1.000000e+00 : f32
      %236 = vector.broadcast %cst_144 : f32 to vector<2x384xf32>
      %237 = arith.addf %236, %235 : vector<2x384xf32>
      %238 = arith.divf %236, %237 : vector<2x384xf32>
      %239 = vector.extract_strided_slice %238 {offsets = [0, 0], sizes = [2, 128], strides = [1, 1]} : vector<2x384xf32> to vector<2x128xf32>
      %240 = vector.extract_strided_slice %238 {offsets = [0, 128], sizes = [2, 128], strides = [1, 1]} : vector<2x384xf32> to vector<2x128xf32>
      %241 = vector.extract_strided_slice %238 {offsets = [0, 256], sizes = [2, 128], strides = [1, 1]} : vector<2x384xf32> to vector<2x128xf32>
      %242 = vector.extract_strided_slice %232 {offsets = [0, 384], sizes = [2, 128], strides = [1, 1]} : vector<2x512xf32> to vector<2x128xf32>
      %243 = math.tanh %242 : vector<2x128xf32>
      %244 = arith.mulf %240, %224 : vector<2x128xf32>
      %245 = arith.mulf %239, %243 : vector<2x128xf32>
      %246 = arith.addf %244, %245 : vector<2x128xf32>
      %247 = math.tanh %246 : vector<2x128xf32>
      %248 = arith.mulf %241, %247 : vector<2x128xf32>
      %c10_145 = arith.constant 10 : index
      %c0_146 = arith.constant 0 : index
      %249 = vector.load %arg13[%c10_145, %c0_146] : memref<16x128xf32, #tpu.memory_space<vmem>>, vector<2x128xf32>
      tpu.vector_store %arg13[%c10_145, %c0_146], %248 {strides = array<i32>} : memref<16x128xf32, #tpu.memory_space<vmem>>, vector<2x128xf32>,
      %c12_147 = arith.constant 12 : index
      %c0_148 = arith.constant 0 : index
      %250 = vector.load %arg12[%c12_147, %c0_148] : memref<16x512xf32, #tpu.memory_space<vmem>>, vector<2x512xf32>
      %251 = arith.truncf %248 : vector<2x128xf32> to vector<2x128xbf16>
      %c0_149 = arith.constant 0 : index
      %c0_150 = arith.constant 0 : index
      %252 = vector.load %arg3[%c0_149, %c0_150] : memref<128x512xbf16, #tpu.memory_space<vmem>>, vector<128x512xbf16>
      %cst_151 = arith.constant dense<0.000000e+00> : vector<2x512xf32>
      %253 = tpu.matmul %251, %252, %cst_151 {dimension_numbers = #tpu.dot_dimension_numbers<[1], [0], [0], [1], [0, 0, 1, 1], [], []>} : vector<2x128xbf16>, vector<128x512xbf16>, vector<2x512xf32> -> vector<2x512xf32>
      %254 = arith.addf %250, %253 : vector<2x512xf32>
      %255 = vector.extract_strided_slice %254 {offsets = [0, 0], sizes = [2, 384], strides = [1, 1]} : vector<2x512xf32> to vector<2x384xf32>
      %256 = arith.negf %255 : vector<2x384xf32>
      %257 = math.exp %256 : vector<2x384xf32>
      %cst_152 = arith.constant 1.000000e+00 : f32
      %258 = vector.broadcast %cst_152 : f32 to vector<2x384xf32>
      %259 = arith.addf %258, %257 : vector<2x384xf32>
      %260 = arith.divf %258, %259 : vector<2x384xf32>
      %261 = vector.extract_strided_slice %260 {offsets = [0, 0], sizes = [2, 128], strides = [1, 1]} : vector<2x384xf32> to vector<2x128xf32>
      %262 = vector.extract_strided_slice %260 {offsets = [0, 128], sizes = [2, 128], strides = [1, 1]} : vector<2x384xf32> to vector<2x128xf32>
      %263 = vector.extract_strided_slice %260 {offsets = [0, 256], sizes = [2, 128], strides = [1, 1]} : vector<2x384xf32> to vector<2x128xf32>
      %264 = vector.extract_strided_slice %254 {offsets = [0, 384], sizes = [2, 128], strides = [1, 1]} : vector<2x512xf32> to vector<2x128xf32>
      %265 = math.tanh %264 : vector<2x128xf32>
      %266 = arith.mulf %262, %246 : vector<2x128xf32>
      %267 = arith.mulf %261, %265 : vector<2x128xf32>
      %268 = arith.addf %266, %267 : vector<2x128xf32>
      %269 = math.tanh %268 : vector<2x128xf32>
      %270 = arith.mulf %263, %269 : vector<2x128xf32>
      %c12_153 = arith.constant 12 : index
      %c0_154 = arith.constant 0 : index
      %271 = vector.load %arg13[%c12_153, %c0_154] : memref<16x128xf32, #tpu.memory_space<vmem>>, vector<2x128xf32>
      tpu.vector_store %arg13[%c12_153, %c0_154], %270 {strides = array<i32>} : memref<16x128xf32, #tpu.memory_space<vmem>>, vector<2x128xf32>,
      %c14_155 = arith.constant 14 : index
      %c0_156 = arith.constant 0 : index
      %272 = vector.load %arg12[%c14_155, %c0_156] : memref<16x512xf32, #tpu.memory_space<vmem>>, vector<2x512xf32>
      %273 = arith.truncf %270 : vector<2x128xf32> to vector<2x128xbf16>
      %c0_157 = arith.constant 0 : index
      %c0_158 = arith.constant 0 : index
      %274 = vector.load %arg3[%c0_157, %c0_158] : memref<128x512xbf16, #tpu.memory_space<vmem>>, vector<128x512xbf16>
      %cst_159 = arith.constant dense<0.000000e+00> : vector<2x512xf32>
      %275 = tpu.matmul %273, %274, %cst_159 {dimension_numbers = #tpu.dot_dimension_numbers<[1], [0], [0], [1], [0, 0, 1, 1], [], []>} : vector<2x128xbf16>, vector<128x512xbf16>, vector<2x512xf32> -> vector<2x512xf32>
      %276 = arith.addf %272, %275 : vector<2x512xf32>
      %277 = vector.extract_strided_slice %276 {offsets = [0, 0], sizes = [2, 384], strides = [1, 1]} : vector<2x512xf32> to vector<2x384xf32>
      %278 = arith.negf %277 : vector<2x384xf32>
      %279 = math.exp %278 : vector<2x384xf32>
      %cst_160 = arith.constant 1.000000e+00 : f32
      %280 = vector.broadcast %cst_160 : f32 to vector<2x384xf32>
      %281 = arith.addf %280, %279 : vector<2x384xf32>
      %282 = arith.divf %280, %281 : vector<2x384xf32>
      %283 = vector.extract_strided_slice %282 {offsets = [0, 0], sizes = [2, 128], strides = [1, 1]} : vector<2x384xf32> to vector<2x128xf32>
      %284 = vector.extract_strided_slice %282 {offsets = [0, 128], sizes = [2, 128], strides = [1, 1]} : vector<2x384xf32> to vector<2x128xf32>
      %285 = vector.extract_strided_slice %282 {offsets = [0, 256], sizes = [2, 128], strides = [1, 1]} : vector<2x384xf32> to vector<2x128xf32>
      %286 = vector.extract_strided_slice %276 {offsets = [0, 384], sizes = [2, 128], strides = [1, 1]} : vector<2x512xf32> to vector<2x128xf32>
      %287 = math.tanh %286 : vector<2x128xf32>
      %288 = arith.mulf %284, %268 : vector<2x128xf32>
      %289 = arith.mulf %283, %287 : vector<2x128xf32>
      %290 = arith.addf %288, %289 : vector<2x128xf32>
      %291 = math.tanh %290 : vector<2x128xf32>
      %292 = arith.mulf %285, %291 : vector<2x128xf32>
      %c14_161 = arith.constant 14 : index
      %c0_162 = arith.constant 0 : index
      %293 = vector.load %arg13[%c14_161, %c0_162] : memref<16x128xf32, #tpu.memory_space<vmem>>, vector<2x128xf32>
      tpu.vector_store %arg13[%c14_161, %c0_162], %292 {strides = array<i32>} : memref<16x128xf32, #tpu.memory_space<vmem>>, vector<2x128xf32>,
      %c0_163 = arith.constant 0 : index
      %c0_164 = arith.constant 0 : index
      %294 = vector.load %arg13[%c0_163, %c0_164] : memref<16x128xf32, #tpu.memory_space<vmem>>, vector<2x128xf32>
      %c14_165 = arith.constant 14 : index
      %c0_166 = arith.constant 0 : index
      %295 = vector.load %arg13[%c14_165, %c0_166] : memref<16x128xf32, #tpu.memory_space<vmem>>, vector<2x128xf32>
      %296 = vector.shape_cast %34 : vector<1x128xi1> to vector<1x128xi1>
      %297 = vector.broadcast %296 : vector<1x128xi1> to vector<2x128xi1>
      %298 = arith.select %297, %294, %295 : vector<2x128xi1>, vector<2x128xf32>
      %c0_167 = arith.constant 0 : index
      %c0_168 = arith.constant 0 : index
      %299 = vector.load %arg14[%c0_167, %c0_168] : memref<16x128xf32, #tpu.memory_space<vmem>>, vector<2x128xf32>
      tpu.vector_store %arg14[%c0_167, %c0_168], %298 {strides = array<i32>} : memref<16x128xf32, #tpu.memory_space<vmem>>, vector<2x128xf32>,
      %c2_169 = arith.constant 2 : index
      %c0_170 = arith.constant 0 : index
      %300 = vector.load %arg13[%c2_169, %c0_170] : memref<16x128xf32, #tpu.memory_space<vmem>>, vector<2x128xf32>
      %c12_171 = arith.constant 12 : index
      %c0_172 = arith.constant 0 : index
      %301 = vector.load %arg13[%c12_171, %c0_172] : memref<16x128xf32, #tpu.memory_space<vmem>>, vector<2x128xf32>
      %302 = vector.shape_cast %34 : vector<1x128xi1> to vector<1x128xi1>
      %303 = vector.broadcast %302 : vector<1x128xi1> to vector<2x128xi1>
      %304 = arith.select %303, %300, %301 : vector<2x128xi1>, vector<2x128xf32>
      %c2_173 = arith.constant 2 : index
      %c0_174 = arith.constant 0 : index
      %305 = vector.load %arg14[%c2_173, %c0_174] : memref<16x128xf32, #tpu.memory_space<vmem>>, vector<2x128xf32>
      tpu.vector_store %arg14[%c2_173, %c0_174], %304 {strides = array<i32>} : memref<16x128xf32, #tpu.memory_space<vmem>>, vector<2x128xf32>,
      %c4_175 = arith.constant 4 : index
      %c0_176 = arith.constant 0 : index
      %306 = vector.load %arg13[%c4_175, %c0_176] : memref<16x128xf32, #tpu.memory_space<vmem>>, vector<2x128xf32>
      %c10_177 = arith.constant 10 : index
      %c0_178 = arith.constant 0 : index
      %307 = vector.load %arg13[%c10_177, %c0_178] : memref<16x128xf32, #tpu.memory_space<vmem>>, vector<2x128xf32>
      %308 = vector.shape_cast %34 : vector<1x128xi1> to vector<1x128xi1>
      %309 = vector.broadcast %308 : vector<1x128xi1> to vector<2x128xi1>
      %310 = arith.select %309, %306, %307 : vector<2x128xi1>, vector<2x128xf32>
      %c4_179 = arith.constant 4 : index
      %c0_180 = arith.constant 0 : index
      %311 = vector.load %arg14[%c4_179, %c0_180] : memref<16x128xf32, #tpu.memory_space<vmem>>, vector<2x128xf32>
      tpu.vector_store %arg14[%c4_179, %c0_180], %310 {strides = array<i32>} : memref<16x128xf32, #tpu.memory_space<vmem>>, vector<2x128xf32>,
      %c6_181 = arith.constant 6 : index
      %c0_182 = arith.constant 0 : index
      %312 = vector.load %arg13[%c6_181, %c0_182] : memref<16x128xf32, #tpu.memory_space<vmem>>, vector<2x128xf32>
      %c8_183 = arith.constant 8 : index
      %c0_184 = arith.constant 0 : index
      %313 = vector.load %arg13[%c8_183, %c0_184] : memref<16x128xf32, #tpu.memory_space<vmem>>, vector<2x128xf32>
      %314 = vector.shape_cast %34 : vector<1x128xi1> to vector<1x128xi1>
      %315 = vector.broadcast %314 : vector<1x128xi1> to vector<2x128xi1>
      %316 = arith.select %315, %312, %313 : vector<2x128xi1>, vector<2x128xf32>
      %c6_185 = arith.constant 6 : index
      %c0_186 = arith.constant 0 : index
      %317 = vector.load %arg14[%c6_185, %c0_186] : memref<16x128xf32, #tpu.memory_space<vmem>>, vector<2x128xf32>
      tpu.vector_store %arg14[%c6_185, %c0_186], %316 {strides = array<i32>} : memref<16x128xf32, #tpu.memory_space<vmem>>, vector<2x128xf32>,
      %c8_187 = arith.constant 8 : index
      %c0_188 = arith.constant 0 : index
      %318 = vector.load %arg13[%c8_187, %c0_188] : memref<16x128xf32, #tpu.memory_space<vmem>>, vector<2x128xf32>
      %c6_189 = arith.constant 6 : index
      %c0_190 = arith.constant 0 : index
      %319 = vector.load %arg13[%c6_189, %c0_190] : memref<16x128xf32, #tpu.memory_space<vmem>>, vector<2x128xf32>
      %320 = vector.shape_cast %34 : vector<1x128xi1> to vector<1x128xi1>
      %321 = vector.broadcast %320 : vector<1x128xi1> to vector<2x128xi1>
      %322 = arith.select %321, %318, %319 : vector<2x128xi1>, vector<2x128xf32>
      %c8_191 = arith.constant 8 : index
      %c0_192 = arith.constant 0 : index
      %323 = vector.load %arg14[%c8_191, %c0_192] : memref<16x128xf32, #tpu.memory_space<vmem>>, vector<2x128xf32>
      tpu.vector_store %arg14[%c8_191, %c0_192], %322 {strides = array<i32>} : memref<16x128xf32, #tpu.memory_space<vmem>>, vector<2x128xf32>,
      %c10_193 = arith.constant 10 : index
      %c0_194 = arith.constant 0 : index
      %324 = vector.load %arg13[%c10_193, %c0_194] : memref<16x128xf32, #tpu.memory_space<vmem>>, vector<2x128xf32>
      %c4_195 = arith.constant 4 : index
      %c0_196 = arith.constant 0 : index
      %325 = vector.load %arg13[%c4_195, %c0_196] : memref<16x128xf32, #tpu.memory_space<vmem>>, vector<2x128xf32>
      %326 = vector.shape_cast %34 : vector<1x128xi1> to vector<1x128xi1>
      %327 = vector.broadcast %326 : vector<1x128xi1> to vector<2x128xi1>
      %328 = arith.select %327, %324, %325 : vector<2x128xi1>, vector<2x128xf32>
      %c10_197 = arith.constant 10 : index
      %c0_198 = arith.constant 0 : index
      %329 = vector.load %arg14[%c10_197, %c0_198] : memref<16x128xf32, #tpu.memory_space<vmem>>, vector<2x128xf32>
      tpu.vector_store %arg14[%c10_197, %c0_198], %328 {strides = array<i32>} : memref<16x128xf32, #tpu.memory_space<vmem>>, vector<2x128xf32>,
      %c12_199 = arith.constant 12 : index
      %c0_200 = arith.constant 0 : index
      %330 = vector.load %arg13[%c12_199, %c0_200] : memref<16x128xf32, #tpu.memory_space<vmem>>, vector<2x128xf32>
      %c2_201 = arith.constant 2 : index
      %c0_202 = arith.constant 0 : index
      %331 = vector.load %arg13[%c2_201, %c0_202] : memref<16x128xf32, #tpu.memory_space<vmem>>, vector<2x128xf32>
      %332 = vector.shape_cast %34 : vector<1x128xi1> to vector<1x128xi1>
      %333 = vector.broadcast %332 : vector<1x128xi1> to vector<2x128xi1>
      %334 = arith.select %333, %330, %331 : vector<2x128xi1>, vector<2x128xf32>
      %c12_203 = arith.constant 12 : index
      %c0_204 = arith.constant 0 : index
      %335 = vector.load %arg14[%c12_203, %c0_204] : memref<16x128xf32, #tpu.memory_space<vmem>>, vector<2x128xf32>
      tpu.vector_store %arg14[%c12_203, %c0_204], %334 {strides = array<i32>} : memref<16x128xf32, #tpu.memory_space<vmem>>, vector<2x128xf32>,
      %c14_205 = arith.constant 14 : index
      %c0_206 = arith.constant 0 : index
      %336 = vector.load %arg13[%c14_205, %c0_206] : memref<16x128xf32, #tpu.memory_space<vmem>>, vector<2x128xf32>
      %c0_207 = arith.constant 0 : index
      %c0_208 = arith.constant 0 : index
      %337 = vector.load %arg13[%c0_207, %c0_208] : memref<16x128xf32, #tpu.memory_space<vmem>>, vector<2x128xf32>
      %338 = vector.shape_cast %34 : vector<1x128xi1> to vector<1x128xi1>
      %339 = vector.broadcast %338 : vector<1x128xi1> to vector<2x128xi1>
      %340 = arith.select %339, %336, %337 : vector<2x128xi1>, vector<2x128xf32>
      %c14_209 = arith.constant 14 : index
      %c0_210 = arith.constant 0 : index
      %341 = vector.load %arg14[%c14_209, %c0_210] : memref<16x128xf32, #tpu.memory_space<vmem>>, vector<2x128xf32>
      tpu.vector_store %arg14[%c14_209, %c0_210], %340 {strides = array<i32>} : memref<16x128xf32, #tpu.memory_space<vmem>>, vector<2x128xf32>,
      %c0_211 = arith.constant 0 : index
      %c0_212 = arith.constant 0 : index
      %342 = vector.load %arg14[%c0_211, %c0_212] : memref<16x128xf32, #tpu.memory_space<vmem>>, vector<16x128xf32>
      %343 = arith.truncf %342 : vector<16x128xf32> to vector<16x128xbf16>
      %c0_213 = arith.constant 0 : index
      %c0_214 = arith.constant 0 : index
      %344 = vector.load %arg5[%c0_213, %c0_214] : memref<128x512xbf16, #tpu.memory_space<vmem>>, vector<128x512xbf16>
      %cst_215 = arith.constant dense<0.000000e+00> : vector<16x512xf32>
      %345 = tpu.matmul %343, %344, %cst_215 {dimension_numbers = #tpu.dot_dimension_numbers<[1], [0], [0], [1], [0, 0, 1, 1], [], []>} : vector<16x128xbf16>, vector<128x512xbf16>, vector<16x512xf32> -> vector<16x512xf32>
      %c0_216 = arith.constant 0 : index
      %c0_217 = arith.constant 0 : index
      %346 = vector.load %arg11[%c0_216, %c0_217] : memref<16x512xf32, #tpu.memory_space<vmem>>, vector<16x512xf32>
      tpu.vector_store %arg11[%c0_216, %c0_217], %345 {strides = array<i32>} : memref<16x512xf32, #tpu.memory_space<vmem>>, vector<16x512xf32>,
      %c0_218 = arith.constant 0 : index
      %c0_219 = arith.constant 0 : index
      %347 = vector.load %arg7[%c0_218, %c0_219] : memref<1x512xf32, #tpu.memory_space<vmem>>, vector<1x512xf32>
      %c0_220 = arith.constant 0 : index
      %c0_221 = arith.constant 0 : index
      %348 = vector.load %arg11[%c0_220, %c0_221] : memref<16x512xf32, #tpu.memory_space<vmem>>, vector<2x512xf32>
      %c14_222 = arith.constant 14 : index
      %c0_223 = arith.constant 0 : index
      %349 = vector.load %arg11[%c14_222, %c0_223] : memref<16x512xf32, #tpu.memory_space<vmem>>, vector<2x512xf32>
      %350 = vector.shape_cast %31 : vector<1x512xi1> to vector<1x512xi1>
      %351 = vector.broadcast %350 : vector<1x512xi1> to vector<2x512xi1>
      %352 = arith.select %351, %348, %349 : vector<2x512xi1>, vector<2x512xf32>
      %353 = vector.broadcast %347 : vector<1x512xf32> to vector<2x512xf32>
      %354 = arith.addf %352, %353 : vector<2x512xf32>
      %c0_224 = arith.constant 0 : index
      %c0_225 = arith.constant 0 : index
      %355 = vector.load %arg12[%c0_224, %c0_225] : memref<16x512xf32, #tpu.memory_space<vmem>>, vector<2x512xf32>
      tpu.vector_store %arg12[%c0_224, %c0_225], %354 {strides = array<i32>} : memref<16x512xf32, #tpu.memory_space<vmem>>, vector<2x512xf32>,
      %c2_226 = arith.constant 2 : index
      %c0_227 = arith.constant 0 : index
      %356 = vector.load %arg11[%c2_226, %c0_227] : memref<16x512xf32, #tpu.memory_space<vmem>>, vector<2x512xf32>
      %c12_228 = arith.constant 12 : index
      %c0_229 = arith.constant 0 : index
      %357 = vector.load %arg11[%c12_228, %c0_229] : memref<16x512xf32, #tpu.memory_space<vmem>>, vector<2x512xf32>
      %358 = vector.shape_cast %31 : vector<1x512xi1> to vector<1x512xi1>
      %359 = vector.broadcast %358 : vector<1x512xi1> to vector<2x512xi1>
      %360 = arith.select %359, %356, %357 : vector<2x512xi1>, vector<2x512xf32>
      %361 = vector.broadcast %347 : vector<1x512xf32> to vector<2x512xf32>
      %362 = arith.addf %360, %361 : vector<2x512xf32>
      %c2_230 = arith.constant 2 : index
      %c0_231 = arith.constant 0 : index
      %363 = vector.load %arg12[%c2_230, %c0_231] : memref<16x512xf32, #tpu.memory_space<vmem>>, vector<2x512xf32>
      tpu.vector_store %arg12[%c2_230, %c0_231], %362 {strides = array<i32>} : memref<16x512xf32, #tpu.memory_space<vmem>>, vector<2x512xf32>,
      %c4_232 = arith.constant 4 : index
      %c0_233 = arith.constant 0 : index
      %364 = vector.load %arg11[%c4_232, %c0_233] : memref<16x512xf32, #tpu.memory_space<vmem>>, vector<2x512xf32>
      %c10_234 = arith.constant 10 : index
      %c0_235 = arith.constant 0 : index
      %365 = vector.load %arg11[%c10_234, %c0_235] : memref<16x512xf32, #tpu.memory_space<vmem>>, vector<2x512xf32>
      %366 = vector.shape_cast %31 : vector<1x512xi1> to vector<1x512xi1>
      %367 = vector.broadcast %366 : vector<1x512xi1> to vector<2x512xi1>
      %368 = arith.select %367, %364, %365 : vector<2x512xi1>, vector<2x512xf32>
      %369 = vector.broadcast %347 : vector<1x512xf32> to vector<2x512xf32>
      %370 = arith.addf %368, %369 : vector<2x512xf32>
      %c4_236 = arith.constant 4 : index
      %c0_237 = arith.constant 0 : index
      %371 = vector.load %arg12[%c4_236, %c0_237] : memref<16x512xf32, #tpu.memory_space<vmem>>, vector<2x512xf32>
      tpu.vector_store %arg12[%c4_236, %c0_237], %370 {strides = array<i32>} : memref<16x512xf32, #tpu.memory_space<vmem>>, vector<2x512xf32>,
      %c6_238 = arith.constant 6 : index
      %c0_239 = arith.constant 0 : index
      %372 = vector.load %arg11[%c6_238, %c0_239] : memref<16x512xf32, #tpu.memory_space<vmem>>, vector<2x512xf32>
      %c8_240 = arith.constant 8 : index
      %c0_241 = arith.constant 0 : index
      %373 = vector.load %arg11[%c8_240, %c0_241] : memref<16x512xf32, #tpu.memory_space<vmem>>, vector<2x512xf32>
      %374 = vector.shape_cast %31 : vector<1x512xi1> to vector<1x512xi1>
      %375 = vector.broadcast %374 : vector<1x512xi1> to vector<2x512xi1>
      %376 = arith.select %375, %372, %373 : vector<2x512xi1>, vector<2x512xf32>
      %377 = vector.broadcast %347 : vector<1x512xf32> to vector<2x512xf32>
      %378 = arith.addf %376, %377 : vector<2x512xf32>
      %c6_242 = arith.constant 6 : index
      %c0_243 = arith.constant 0 : index
      %379 = vector.load %arg12[%c6_242, %c0_243] : memref<16x512xf32, #tpu.memory_space<vmem>>, vector<2x512xf32>
      tpu.vector_store %arg12[%c6_242, %c0_243], %378 {strides = array<i32>} : memref<16x512xf32, #tpu.memory_space<vmem>>, vector<2x512xf32>,
      %c8_244 = arith.constant 8 : index
      %c0_245 = arith.constant 0 : index
      %380 = vector.load %arg11[%c8_244, %c0_245] : memref<16x512xf32, #tpu.memory_space<vmem>>, vector<2x512xf32>
      %c6_246 = arith.constant 6 : index
      %c0_247 = arith.constant 0 : index
      %381 = vector.load %arg11[%c6_246, %c0_247] : memref<16x512xf32, #tpu.memory_space<vmem>>, vector<2x512xf32>
      %382 = vector.shape_cast %31 : vector<1x512xi1> to vector<1x512xi1>
      %383 = vector.broadcast %382 : vector<1x512xi1> to vector<2x512xi1>
      %384 = arith.select %383, %380, %381 : vector<2x512xi1>, vector<2x512xf32>
      %385 = vector.broadcast %347 : vector<1x512xf32> to vector<2x512xf32>
      %386 = arith.addf %384, %385 : vector<2x512xf32>
      %c8_248 = arith.constant 8 : index
      %c0_249 = arith.constant 0 : index
      %387 = vector.load %arg12[%c8_248, %c0_249] : memref<16x512xf32, #tpu.memory_space<vmem>>, vector<2x512xf32>
      tpu.vector_store %arg12[%c8_248, %c0_249], %386 {strides = array<i32>} : memref<16x512xf32, #tpu.memory_space<vmem>>, vector<2x512xf32>,
      %c10_250 = arith.constant 10 : index
      %c0_251 = arith.constant 0 : index
      %388 = vector.load %arg11[%c10_250, %c0_251] : memref<16x512xf32, #tpu.memory_space<vmem>>, vector<2x512xf32>
      %c4_252 = arith.constant 4 : index
      %c0_253 = arith.constant 0 : index
      %389 = vector.load %arg11[%c4_252, %c0_253] : memref<16x512xf32, #tpu.memory_space<vmem>>, vector<2x512xf32>
      %390 = vector.shape_cast %31 : vector<1x512xi1> to vector<1x512xi1>
      %391 = vector.broadcast %390 : vector<1x512xi1> to vector<2x512xi1>
      %392 = arith.select %391, %388, %389 : vector<2x512xi1>, vector<2x512xf32>
      %393 = vector.broadcast %347 : vector<1x512xf32> to vector<2x512xf32>
      %394 = arith.addf %392, %393 : vector<2x512xf32>
      %c10_254 = arith.constant 10 : index
      %c0_255 = arith.constant 0 : index
      %395 = vector.load %arg12[%c10_254, %c0_255] : memref<16x512xf32, #tpu.memory_space<vmem>>, vector<2x512xf32>
      tpu.vector_store %arg12[%c10_254, %c0_255], %394 {strides = array<i32>} : memref<16x512xf32, #tpu.memory_space<vmem>>, vector<2x512xf32>,
      %c12_256 = arith.constant 12 : index
      %c0_257 = arith.constant 0 : index
      %396 = vector.load %arg11[%c12_256, %c0_257] : memref<16x512xf32, #tpu.memory_space<vmem>>, vector<2x512xf32>
      %c2_258 = arith.constant 2 : index
      %c0_259 = arith.constant 0 : index
      %397 = vector.load %arg11[%c2_258, %c0_259] : memref<16x512xf32, #tpu.memory_space<vmem>>, vector<2x512xf32>
      %398 = vector.shape_cast %31 : vector<1x512xi1> to vector<1x512xi1>
      %399 = vector.broadcast %398 : vector<1x512xi1> to vector<2x512xi1>
      %400 = arith.select %399, %396, %397 : vector<2x512xi1>, vector<2x512xf32>
      %401 = vector.broadcast %347 : vector<1x512xf32> to vector<2x512xf32>
      %402 = arith.addf %400, %401 : vector<2x512xf32>
      %c12_260 = arith.constant 12 : index
      %c0_261 = arith.constant 0 : index
      %403 = vector.load %arg12[%c12_260, %c0_261] : memref<16x512xf32, #tpu.memory_space<vmem>>, vector<2x512xf32>
      tpu.vector_store %arg12[%c12_260, %c0_261], %402 {strides = array<i32>} : memref<16x512xf32, #tpu.memory_space<vmem>>, vector<2x512xf32>,
      %c14_262 = arith.constant 14 : index
      %c0_263 = arith.constant 0 : index
      %404 = vector.load %arg11[%c14_262, %c0_263] : memref<16x512xf32, #tpu.memory_space<vmem>>, vector<2x512xf32>
      %c0_264 = arith.constant 0 : index
      %c0_265 = arith.constant 0 : index
      %405 = vector.load %arg11[%c0_264, %c0_265] : memref<16x512xf32, #tpu.memory_space<vmem>>, vector<2x512xf32>
      %406 = vector.shape_cast %31 : vector<1x512xi1> to vector<1x512xi1>
      %407 = vector.broadcast %406 : vector<1x512xi1> to vector<2x512xi1>
      %408 = arith.select %407, %404, %405 : vector<2x512xi1>, vector<2x512xf32>
      %409 = vector.broadcast %347 : vector<1x512xf32> to vector<2x512xf32>
      %410 = arith.addf %408, %409 : vector<2x512xf32>
      %c14_266 = arith.constant 14 : index
      %c0_267 = arith.constant 0 : index
      %411 = vector.load %arg12[%c14_266, %c0_267] : memref<16x512xf32, #tpu.memory_space<vmem>>, vector<2x512xf32>
      tpu.vector_store %arg12[%c14_266, %c0_267], %410 {strides = array<i32>} : memref<16x512xf32, #tpu.memory_space<vmem>>, vector<2x512xf32>,
      %cst_268 = arith.constant 0.000000e+00 : f32
      %412 = vector.broadcast %cst_268 : f32 to vector<2x128xf32>
      %cst_269 = arith.constant 0.000000e+00 : f32
      %413 = vector.broadcast %cst_269 : f32 to vector<2x128xf32>
      %c0_270 = arith.constant 0 : index
      %c0_271 = arith.constant 0 : index
      %414 = vector.load %arg12[%c0_270, %c0_271] : memref<16x512xf32, #tpu.memory_space<vmem>>, vector<2x512xf32>
      %415 = arith.truncf %412 : vector<2x128xf32> to vector<2x128xbf16>
      %c0_272 = arith.constant 0 : index
      %c0_273 = arith.constant 0 : index
      %416 = vector.load %arg6[%c0_272, %c0_273] : memref<128x512xbf16, #tpu.memory_space<vmem>>, vector<128x512xbf16>
      %cst_274 = arith.constant dense<0.000000e+00> : vector<2x512xf32>
      %417 = tpu.matmul %415, %416, %cst_274 {dimension_numbers = #tpu.dot_dimension_numbers<[1], [0], [0], [1], [0, 0, 1, 1], [], []>} : vector<2x128xbf16>, vector<128x512xbf16>, vector<2x512xf32> -> vector<2x512xf32>
      %418 = arith.addf %414, %417 : vector<2x512xf32>
      %419 = vector.extract_strided_slice %418 {offsets = [0, 0], sizes = [2, 384], strides = [1, 1]} : vector<2x512xf32> to vector<2x384xf32>
      %420 = arith.negf %419 : vector<2x384xf32>
      %421 = math.exp %420 : vector<2x384xf32>
      %cst_275 = arith.constant 1.000000e+00 : f32
      %422 = vector.broadcast %cst_275 : f32 to vector<2x384xf32>
      %423 = arith.addf %422, %421 : vector<2x384xf32>
      %424 = arith.divf %422, %423 : vector<2x384xf32>
      %425 = vector.extract_strided_slice %424 {offsets = [0, 0], sizes = [2, 128], strides = [1, 1]} : vector<2x384xf32> to vector<2x128xf32>
      %426 = vector.extract_strided_slice %424 {offsets = [0, 128], sizes = [2, 128], strides = [1, 1]} : vector<2x384xf32> to vector<2x128xf32>
      %427 = vector.extract_strided_slice %424 {offsets = [0, 256], sizes = [2, 128], strides = [1, 1]} : vector<2x384xf32> to vector<2x128xf32>
      %428 = vector.extract_strided_slice %418 {offsets = [0, 384], sizes = [2, 128], strides = [1, 1]} : vector<2x512xf32> to vector<2x128xf32>
      %429 = math.tanh %428 : vector<2x128xf32>
      %430 = arith.mulf %426, %413 : vector<2x128xf32>
      %431 = arith.mulf %425, %429 : vector<2x128xf32>
      %432 = arith.addf %430, %431 : vector<2x128xf32>
      %433 = math.tanh %432 : vector<2x128xf32>
      %434 = arith.mulf %427, %433 : vector<2x128xf32>
      %c2_276 = arith.constant 2 : index
      %c0_277 = arith.constant 0 : index
      %435 = vector.load %arg12[%c2_276, %c0_277] : memref<16x512xf32, #tpu.memory_space<vmem>>, vector<2x512xf32>
      %436 = arith.truncf %434 : vector<2x128xf32> to vector<2x128xbf16>
      %c0_278 = arith.constant 0 : index
      %c0_279 = arith.constant 0 : index
      %437 = vector.load %arg6[%c0_278, %c0_279] : memref<128x512xbf16, #tpu.memory_space<vmem>>, vector<128x512xbf16>
      %cst_280 = arith.constant dense<0.000000e+00> : vector<2x512xf32>
      %438 = tpu.matmul %436, %437, %cst_280 {dimension_numbers = #tpu.dot_dimension_numbers<[1], [0], [0], [1], [0, 0, 1, 1], [], []>} : vector<2x128xbf16>, vector<128x512xbf16>, vector<2x512xf32> -> vector<2x512xf32>
      %439 = arith.addf %435, %438 : vector<2x512xf32>
      %440 = vector.extract_strided_slice %439 {offsets = [0, 0], sizes = [2, 384], strides = [1, 1]} : vector<2x512xf32> to vector<2x384xf32>
      %441 = arith.negf %440 : vector<2x384xf32>
      %442 = math.exp %441 : vector<2x384xf32>
      %cst_281 = arith.constant 1.000000e+00 : f32
      %443 = vector.broadcast %cst_281 : f32 to vector<2x384xf32>
      %444 = arith.addf %443, %442 : vector<2x384xf32>
      %445 = arith.divf %443, %444 : vector<2x384xf32>
      %446 = vector.extract_strided_slice %445 {offsets = [0, 0], sizes = [2, 128], strides = [1, 1]} : vector<2x384xf32> to vector<2x128xf32>
      %447 = vector.extract_strided_slice %445 {offsets = [0, 128], sizes = [2, 128], strides = [1, 1]} : vector<2x384xf32> to vector<2x128xf32>
      %448 = vector.extract_strided_slice %445 {offsets = [0, 256], sizes = [2, 128], strides = [1, 1]} : vector<2x384xf32> to vector<2x128xf32>
      %449 = vector.extract_strided_slice %439 {offsets = [0, 384], sizes = [2, 128], strides = [1, 1]} : vector<2x512xf32> to vector<2x128xf32>
      %450 = math.tanh %449 : vector<2x128xf32>
      %451 = arith.mulf %447, %432 : vector<2x128xf32>
      %452 = arith.mulf %446, %450 : vector<2x128xf32>
      %453 = arith.addf %451, %452 : vector<2x128xf32>
      %454 = math.tanh %453 : vector<2x128xf32>
      %455 = arith.mulf %448, %454 : vector<2x128xf32>
      %c4_282 = arith.constant 4 : index
      %c0_283 = arith.constant 0 : index
      %456 = vector.load %arg12[%c4_282, %c0_283] : memref<16x512xf32, #tpu.memory_space<vmem>>, vector<2x512xf32>
      %457 = arith.truncf %455 : vector<2x128xf32> to vector<2x128xbf16>
      %c0_284 = arith.constant 0 : index
      %c0_285 = arith.constant 0 : index
      %458 = vector.load %arg6[%c0_284, %c0_285] : memref<128x512xbf16, #tpu.memory_space<vmem>>, vector<128x512xbf16>
      %cst_286 = arith.constant dense<0.000000e+00> : vector<2x512xf32>
      %459 = tpu.matmul %457, %458, %cst_286 {dimension_numbers = #tpu.dot_dimension_numbers<[1], [0], [0], [1], [0, 0, 1, 1], [], []>} : vector<2x128xbf16>, vector<128x512xbf16>, vector<2x512xf32> -> vector<2x512xf32>
      %460 = arith.addf %456, %459 : vector<2x512xf32>
      %461 = vector.extract_strided_slice %460 {offsets = [0, 0], sizes = [2, 384], strides = [1, 1]} : vector<2x512xf32> to vector<2x384xf32>
      %462 = arith.negf %461 : vector<2x384xf32>
      %463 = math.exp %462 : vector<2x384xf32>
      %cst_287 = arith.constant 1.000000e+00 : f32
      %464 = vector.broadcast %cst_287 : f32 to vector<2x384xf32>
      %465 = arith.addf %464, %463 : vector<2x384xf32>
      %466 = arith.divf %464, %465 : vector<2x384xf32>
      %467 = vector.extract_strided_slice %466 {offsets = [0, 0], sizes = [2, 128], strides = [1, 1]} : vector<2x384xf32> to vector<2x128xf32>
      %468 = vector.extract_strided_slice %466 {offsets = [0, 128], sizes = [2, 128], strides = [1, 1]} : vector<2x384xf32> to vector<2x128xf32>
      %469 = vector.extract_strided_slice %466 {offsets = [0, 256], sizes = [2, 128], strides = [1, 1]} : vector<2x384xf32> to vector<2x128xf32>
      %470 = vector.extract_strided_slice %460 {offsets = [0, 384], sizes = [2, 128], strides = [1, 1]} : vector<2x512xf32> to vector<2x128xf32>
      %471 = math.tanh %470 : vector<2x128xf32>
      %472 = arith.mulf %468, %453 : vector<2x128xf32>
      %473 = arith.mulf %467, %471 : vector<2x128xf32>
      %474 = arith.addf %472, %473 : vector<2x128xf32>
      %475 = math.tanh %474 : vector<2x128xf32>
      %476 = arith.mulf %469, %475 : vector<2x128xf32>
      %c6_288 = arith.constant 6 : index
      %c0_289 = arith.constant 0 : index
      %477 = vector.load %arg12[%c6_288, %c0_289] : memref<16x512xf32, #tpu.memory_space<vmem>>, vector<2x512xf32>
      %478 = arith.truncf %476 : vector<2x128xf32> to vector<2x128xbf16>
      %c0_290 = arith.constant 0 : index
      %c0_291 = arith.constant 0 : index
      %479 = vector.load %arg6[%c0_290, %c0_291] : memref<128x512xbf16, #tpu.memory_space<vmem>>, vector<128x512xbf16>
      %cst_292 = arith.constant dense<0.000000e+00> : vector<2x512xf32>
      %480 = tpu.matmul %478, %479, %cst_292 {dimension_numbers = #tpu.dot_dimension_numbers<[1], [0], [0], [1], [0, 0, 1, 1], [], []>} : vector<2x128xbf16>, vector<128x512xbf16>, vector<2x512xf32> -> vector<2x512xf32>
      %481 = arith.addf %477, %480 : vector<2x512xf32>
      %482 = vector.extract_strided_slice %481 {offsets = [0, 0], sizes = [2, 384], strides = [1, 1]} : vector<2x512xf32> to vector<2x384xf32>
      %483 = arith.negf %482 : vector<2x384xf32>
      %484 = math.exp %483 : vector<2x384xf32>
      %cst_293 = arith.constant 1.000000e+00 : f32
      %485 = vector.broadcast %cst_293 : f32 to vector<2x384xf32>
      %486 = arith.addf %485, %484 : vector<2x384xf32>
      %487 = arith.divf %485, %486 : vector<2x384xf32>
      %488 = vector.extract_strided_slice %487 {offsets = [0, 0], sizes = [2, 128], strides = [1, 1]} : vector<2x384xf32> to vector<2x128xf32>
      %489 = vector.extract_strided_slice %487 {offsets = [0, 128], sizes = [2, 128], strides = [1, 1]} : vector<2x384xf32> to vector<2x128xf32>
      %490 = vector.extract_strided_slice %487 {offsets = [0, 256], sizes = [2, 128], strides = [1, 1]} : vector<2x384xf32> to vector<2x128xf32>
      %491 = vector.extract_strided_slice %481 {offsets = [0, 384], sizes = [2, 128], strides = [1, 1]} : vector<2x512xf32> to vector<2x128xf32>
      %492 = math.tanh %491 : vector<2x128xf32>
      %493 = arith.mulf %489, %474 : vector<2x128xf32>
      %494 = arith.mulf %488, %492 : vector<2x128xf32>
      %495 = arith.addf %493, %494 : vector<2x128xf32>
      %496 = math.tanh %495 : vector<2x128xf32>
      %497 = arith.mulf %490, %496 : vector<2x128xf32>
      %c8_294 = arith.constant 8 : index
      %c0_295 = arith.constant 0 : index
      %498 = vector.load %arg12[%c8_294, %c0_295] : memref<16x512xf32, #tpu.memory_space<vmem>>, vector<2x512xf32>
      %499 = arith.truncf %497 : vector<2x128xf32> to vector<2x128xbf16>
      %c0_296 = arith.constant 0 : index
      %c0_297 = arith.constant 0 : index
      %500 = vector.load %arg6[%c0_296, %c0_297] : memref<128x512xbf16, #tpu.memory_space<vmem>>, vector<128x512xbf16>
      %cst_298 = arith.constant dense<0.000000e+00> : vector<2x512xf32>
      %501 = tpu.matmul %499, %500, %cst_298 {dimension_numbers = #tpu.dot_dimension_numbers<[1], [0], [0], [1], [0, 0, 1, 1], [], []>} : vector<2x128xbf16>, vector<128x512xbf16>, vector<2x512xf32> -> vector<2x512xf32>
      %502 = arith.addf %498, %501 : vector<2x512xf32>
      %503 = vector.extract_strided_slice %502 {offsets = [0, 0], sizes = [2, 384], strides = [1, 1]} : vector<2x512xf32> to vector<2x384xf32>
      %504 = arith.negf %503 : vector<2x384xf32>
      %505 = math.exp %504 : vector<2x384xf32>
      %cst_299 = arith.constant 1.000000e+00 : f32
      %506 = vector.broadcast %cst_299 : f32 to vector<2x384xf32>
      %507 = arith.addf %506, %505 : vector<2x384xf32>
      %508 = arith.divf %506, %507 : vector<2x384xf32>
      %509 = vector.extract_strided_slice %508 {offsets = [0, 0], sizes = [2, 128], strides = [1, 1]} : vector<2x384xf32> to vector<2x128xf32>
      %510 = vector.extract_strided_slice %508 {offsets = [0, 128], sizes = [2, 128], strides = [1, 1]} : vector<2x384xf32> to vector<2x128xf32>
      %511 = vector.extract_strided_slice %508 {offsets = [0, 256], sizes = [2, 128], strides = [1, 1]} : vector<2x384xf32> to vector<2x128xf32>
      %512 = vector.extract_strided_slice %502 {offsets = [0, 384], sizes = [2, 128], strides = [1, 1]} : vector<2x512xf32> to vector<2x128xf32>
      %513 = math.tanh %512 : vector<2x128xf32>
      %514 = arith.mulf %510, %495 : vector<2x128xf32>
      %515 = arith.mulf %509, %513 : vector<2x128xf32>
      %516 = arith.addf %514, %515 : vector<2x128xf32>
      %517 = math.tanh %516 : vector<2x128xf32>
      %518 = arith.mulf %511, %517 : vector<2x128xf32>
      %c10_300 = arith.constant 10 : index
      %c0_301 = arith.constant 0 : index
      %519 = vector.load %arg12[%c10_300, %c0_301] : memref<16x512xf32, #tpu.memory_space<vmem>>, vector<2x512xf32>
      %520 = arith.truncf %518 : vector<2x128xf32> to vector<2x128xbf16>
      %c0_302 = arith.constant 0 : index
      %c0_303 = arith.constant 0 : index
      %521 = vector.load %arg6[%c0_302, %c0_303] : memref<128x512xbf16, #tpu.memory_space<vmem>>, vector<128x512xbf16>
      %cst_304 = arith.constant dense<0.000000e+00> : vector<2x512xf32>
      %522 = tpu.matmul %520, %521, %cst_304 {dimension_numbers = #tpu.dot_dimension_numbers<[1], [0], [0], [1], [0, 0, 1, 1], [], []>} : vector<2x128xbf16>, vector<128x512xbf16>, vector<2x512xf32> -> vector<2x512xf32>
      %523 = arith.addf %519, %522 : vector<2x512xf32>
      %524 = vector.extract_strided_slice %523 {offsets = [0, 0], sizes = [2, 384], strides = [1, 1]} : vector<2x512xf32> to vector<2x384xf32>
      %525 = arith.negf %524 : vector<2x384xf32>
      %526 = math.exp %525 : vector<2x384xf32>
      %cst_305 = arith.constant 1.000000e+00 : f32
      %527 = vector.broadcast %cst_305 : f32 to vector<2x384xf32>
      %528 = arith.addf %527, %526 : vector<2x384xf32>
      %529 = arith.divf %527, %528 : vector<2x384xf32>
      %530 = vector.extract_strided_slice %529 {offsets = [0, 0], sizes = [2, 128], strides = [1, 1]} : vector<2x384xf32> to vector<2x128xf32>
      %531 = vector.extract_strided_slice %529 {offsets = [0, 128], sizes = [2, 128], strides = [1, 1]} : vector<2x384xf32> to vector<2x128xf32>
      %532 = vector.extract_strided_slice %529 {offsets = [0, 256], sizes = [2, 128], strides = [1, 1]} : vector<2x384xf32> to vector<2x128xf32>
      %533 = vector.extract_strided_slice %523 {offsets = [0, 384], sizes = [2, 128], strides = [1, 1]} : vector<2x512xf32> to vector<2x128xf32>
      %534 = math.tanh %533 : vector<2x128xf32>
      %535 = arith.mulf %531, %516 : vector<2x128xf32>
      %536 = arith.mulf %530, %534 : vector<2x128xf32>
      %537 = arith.addf %535, %536 : vector<2x128xf32>
      %538 = math.tanh %537 : vector<2x128xf32>
      %539 = arith.mulf %532, %538 : vector<2x128xf32>
      %c12_306 = arith.constant 12 : index
      %c0_307 = arith.constant 0 : index
      %540 = vector.load %arg12[%c12_306, %c0_307] : memref<16x512xf32, #tpu.memory_space<vmem>>, vector<2x512xf32>
      %541 = arith.truncf %539 : vector<2x128xf32> to vector<2x128xbf16>
      %c0_308 = arith.constant 0 : index
      %c0_309 = arith.constant 0 : index
      %542 = vector.load %arg6[%c0_308, %c0_309] : memref<128x512xbf16, #tpu.memory_space<vmem>>, vector<128x512xbf16>
      %cst_310 = arith.constant dense<0.000000e+00> : vector<2x512xf32>
      %543 = tpu.matmul %541, %542, %cst_310 {dimension_numbers = #tpu.dot_dimension_numbers<[1], [0], [0], [1], [0, 0, 1, 1], [], []>} : vector<2x128xbf16>, vector<128x512xbf16>, vector<2x512xf32> -> vector<2x512xf32>
      %544 = arith.addf %540, %543 : vector<2x512xf32>
      %545 = vector.extract_strided_slice %544 {offsets = [0, 0], sizes = [2, 384], strides = [1, 1]} : vector<2x512xf32> to vector<2x384xf32>
      %546 = arith.negf %545 : vector<2x384xf32>
      %547 = math.exp %546 : vector<2x384xf32>
      %cst_311 = arith.constant 1.000000e+00 : f32
      %548 = vector.broadcast %cst_311 : f32 to vector<2x384xf32>
      %549 = arith.addf %548, %547 : vector<2x384xf32>
      %550 = arith.divf %548, %549 : vector<2x384xf32>
      %551 = vector.extract_strided_slice %550 {offsets = [0, 0], sizes = [2, 128], strides = [1, 1]} : vector<2x384xf32> to vector<2x128xf32>
      %552 = vector.extract_strided_slice %550 {offsets = [0, 128], sizes = [2, 128], strides = [1, 1]} : vector<2x384xf32> to vector<2x128xf32>
      %553 = vector.extract_strided_slice %550 {offsets = [0, 256], sizes = [2, 128], strides = [1, 1]} : vector<2x384xf32> to vector<2x128xf32>
      %554 = vector.extract_strided_slice %544 {offsets = [0, 384], sizes = [2, 128], strides = [1, 1]} : vector<2x512xf32> to vector<2x128xf32>
      %555 = math.tanh %554 : vector<2x128xf32>
      %556 = arith.mulf %552, %537 : vector<2x128xf32>
      %557 = arith.mulf %551, %555 : vector<2x128xf32>
      %558 = arith.addf %556, %557 : vector<2x128xf32>
      %559 = math.tanh %558 : vector<2x128xf32>
      %560 = arith.mulf %553, %559 : vector<2x128xf32>
      %c14_312 = arith.constant 14 : index
      %c0_313 = arith.constant 0 : index
      %561 = vector.load %arg12[%c14_312, %c0_313] : memref<16x512xf32, #tpu.memory_space<vmem>>, vector<2x512xf32>
      %562 = arith.truncf %560 : vector<2x128xf32> to vector<2x128xbf16>
      %c0_314 = arith.constant 0 : index
      %c0_315 = arith.constant 0 : index
      %563 = vector.load %arg6[%c0_314, %c0_315] : memref<128x512xbf16, #tpu.memory_space<vmem>>, vector<128x512xbf16>
      %cst_316 = arith.constant dense<0.000000e+00> : vector<2x512xf32>
      %564 = tpu.matmul %562, %563, %cst_316 {dimension_numbers = #tpu.dot_dimension_numbers<[1], [0], [0], [1], [0, 0, 1, 1], [], []>} : vector<2x128xbf16>, vector<128x512xbf16>, vector<2x512xf32> -> vector<2x512xf32>
      %565 = arith.addf %561, %564 : vector<2x512xf32>
      %566 = vector.extract_strided_slice %565 {offsets = [0, 0], sizes = [2, 384], strides = [1, 1]} : vector<2x512xf32> to vector<2x384xf32>
      %567 = arith.negf %566 : vector<2x384xf32>
      %568 = math.exp %567 : vector<2x384xf32>
      %cst_317 = arith.constant 1.000000e+00 : f32
      %569 = vector.broadcast %cst_317 : f32 to vector<2x384xf32>
      %570 = arith.addf %569, %568 : vector<2x384xf32>
      %571 = arith.divf %569, %570 : vector<2x384xf32>
      %572 = vector.extract_strided_slice %571 {offsets = [0, 0], sizes = [2, 128], strides = [1, 1]} : vector<2x384xf32> to vector<2x128xf32>
      %573 = vector.extract_strided_slice %571 {offsets = [0, 128], sizes = [2, 128], strides = [1, 1]} : vector<2x384xf32> to vector<2x128xf32>
      %574 = vector.extract_strided_slice %571 {offsets = [0, 256], sizes = [2, 128], strides = [1, 1]} : vector<2x384xf32> to vector<2x128xf32>
      %575 = vector.extract_strided_slice %565 {offsets = [0, 384], sizes = [2, 128], strides = [1, 1]} : vector<2x512xf32> to vector<2x128xf32>
      %576 = math.tanh %575 : vector<2x128xf32>
      %577 = arith.mulf %573, %558 : vector<2x128xf32>
      %578 = arith.mulf %572, %576 : vector<2x128xf32>
      %579 = arith.addf %577, %578 : vector<2x128xf32>
      %580 = math.tanh %579 : vector<2x128xf32>
      %581 = arith.mulf %574, %580 : vector<2x128xf32>
      %c0_318 = arith.constant 0 : index
      %c0_319 = arith.constant 0 : index
      %582 = vector.load %arg8[%c0_318, %c0_319] : memref<128x1xf32, #tpu.memory_space<vmem>>, vector<128x1xf32>
      %cst_320 = arith.constant dense<0.000000e+00> : vector<2x1xf32>
      %583 = tpu.matmul %581, %582, %cst_320 {dimension_numbers = #tpu.dot_dimension_numbers<[1], [0], [0], [1], [0, 0, 1, 1], [], []>} : vector<2x128xf32>, vector<128x1xf32>, vector<2x1xf32> -> vector<2x1xf32>
      %c0_321 = arith.constant 0 : index
      %c0_322 = arith.constant 0 : index
      %584 = vector.load %arg9[%c0_321, %c0_322] : memref<1x1xf32, #tpu.memory_space<vmem>>, vector<1x1xf32>
      %585 = vector.broadcast %584 : vector<1x1xf32> to vector<2x1xf32>
      %586 = arith.addf %583, %585 : vector<2x1xf32>
      %587 = arith.negf %586 : vector<2x1xf32>
      %588 = math.exp %587 : vector<2x1xf32>
      %cst_323 = arith.constant 1.000000e+00 : f32
      %589 = vector.broadcast %cst_323 : f32 to vector<2x1xf32>
      %590 = arith.addf %589, %588 : vector<2x1xf32>
      %591 = arith.divf %589, %590 : vector<2x1xf32>
      %c0_324 = arith.constant 0 : index
      %c0_325 = arith.constant 0 : index
      %592 = vector.load %arg10[%c0_324, %c0_325] : memref<2x1xf32, #tpu.memory_space<vmem>>, vector<2x1xf32>
      tpu.vector_store %arg10[%c0_324, %c0_325], %591 {strides = array<i32>} : memref<2x1xf32, #tpu.memory_space<vmem>>, vector<2x1xf32>,
    } else {
    }
    return
  }
  func.func @transform_0(%arg0: i32) -> (i32, i32) {
    %c0_i32 = arith.constant 0 : i32
    %c0_i32_0 = arith.constant 0 : i32
    return %c0_i32, %arg0 : i32, i32
  }
  func.func @transform_1(%arg0: i32) -> (i32, i32) {
    %c0_i32 = arith.constant 0 : i32
    %c0_i32_0 = arith.constant 0 : i32
    return %arg0, %c0_i32 : i32, i32
  }
  func.func @transform_2(%arg0: i32) -> (i32, i32) {
    %c0_i32 = arith.constant 0 : i32
    %c0_i32_0 = arith.constant 0 : i32
    %c0_i32_1 = arith.constant 0 : i32
    return %c0_i32, %c0_i32_0 : i32, i32
  }
  func.func @transform_3(%arg0: i32) -> (i32, i32) {
    %c0_i32 = arith.constant 0 : i32
    %c0_i32_0 = arith.constant 0 : i32
    %c0_i32_1 = arith.constant 0 : i32
    return %c0_i32, %c0_i32_0 : i32, i32
  }
  func.func @transform_4(%arg0: i32) -> (i32, i32) {
    %c0_i32 = arith.constant 0 : i32
    %c0_i32_0 = arith.constant 0 : i32
    %c0_i32_1 = arith.constant 0 : i32
    return %c0_i32, %c0_i32_0 : i32, i32
  }
  func.func @transform_5(%arg0: i32) -> (i32, i32) {
    %c0_i32 = arith.constant 0 : i32
    %c0_i32_0 = arith.constant 0 : i32
    %c0_i32_1 = arith.constant 0 : i32
    return %c0_i32, %c0_i32_0 : i32, i32
  }
  func.func @transform_6(%arg0: i32) -> (i32, i32) {
    %c0_i32 = arith.constant 0 : i32
    %c0_i32_0 = arith.constant 0 : i32
    %c0_i32_1 = arith.constant 0 : i32
    return %c0_i32, %c0_i32_0 : i32, i32
  }
  func.func @transform_7(%arg0: i32) -> (i32, i32) {
    %c0_i32 = arith.constant 0 : i32
    %c0_i32_0 = arith.constant 0 : i32
    %c0_i32_1 = arith.constant 0 : i32
    return %c0_i32, %c0_i32_0 : i32, i32
  }
  func.func @transform_8(%arg0: i32) -> (i32, i32) {
    %c0_i32 = arith.constant 0 : i32
    %c0_i32_0 = arith.constant 0 : i32
    %c0_i32_1 = arith.constant 0 : i32
    return %c0_i32, %c0_i32_0 : i32, i32
  }
  func.func @transform_9(%arg0: i32) -> (i32, i32) {
    %c0_i32 = arith.constant 0 : i32
    %c0_i32_0 = arith.constant 0 : i32
    %c0_i32_1 = arith.constant 0 : i32
    return %c0_i32, %c0_i32_0 : i32, i32
  }
}

</mosaic_0001>

<bundles_post_ra>
// kernel: model_forward.1
= control target key start
LH: loop header
LB: loop body
LE: loop exit
PB: predicated region body
PF: predicated region fallthrough
CT: control target
= control target key end

     0   :  { %s10575_s0 = inlined_call_operand.vmem [shape: f32[16,768], index: 0, kind: input, shape index: {}]   ;;  %s10576_s1 = inlined_call_operand.hbm [shape: bf16[768,512], index: 1, kind: input, shape index: {}]   ;;  %s10577_s2 = inlined_call_operand.hbm [shape: bf16[128,512], index: 2, kind: input, shape index: {}]   ;;  %s10578_s3 = inlined_call_operand.vmem [shape: f32[1,512], index: 3, kind: input, shape index: {}]   ;;  %s10579_s4 = inlined_call_operand.hbm [shape: bf16[128,512], index: 4, kind: input, shape index: {}]   ;;  %s10580_s5 = inlined_call_operand.hbm [shape: bf16[128,512], index: 5, kind: input, shape index: {}]   ;;  %s10581_s6 = inlined_call_operand.vmem [shape: f32[1,512], index: 6, kind: input, shape index: {}]   ;;  %s10582_s7 = inlined_call_operand.vmem [shape: f32[128,1], index: 7, kind: input, shape index: {}]   ;;  %s10583_s8 = inlined_call_operand.<no memory space> [shape: f32[1,1], index: 8, kind: input, shape index: {}]   ;;  %s10584_s9 = inlined_call_operand.vmem [shape: f32[2,1], index: 9, kind: output, shape index: {}]  }
   0x1   :  { %10603 = sst [smem:[#allocation27_spill]] %s10575_s0  ;;  %v14_v0 = vstv %s10583_s8 }
   0x2   :  { %10604 = sst [smem:[#allocation28_spill]] %s10577_s2  ;;  %15 = vst [vmem:[#allocation6] sm:$0x1] %v14_v0 }
   0x3   :  { %16 = vsyncpa [#allocation9], 0 }
   0x4   :  { %18 = vsyncpa [#allocation9 + $0x1], 0 }
   0x5   :  { %19 = vsyncpa [#allocation11], 0 }
   0x6   :  { %20 = vsyncpa [#allocation14], 0  ;;  %s8947_s11 = smov 0   ;;  %s8949_s12 = smov 0  }
   0x7   :  { %s8951_s13 = smov 0   ;;  %s8953_s14 = smov 0  }
   0x8 LB: > { %s8966_s8 = sadd.s32 4294967295, %s8883_s14   ;;  %s8969_s15 = sadd.s32 1, %s8883_s14   ;;  %s8883_s14 = sphi %s8953_s14, %s10686_s14   ;;  %s8879_s13 = sphi %s8951_s13, %s10685_s13   ;;  %s8875_s12 = sphi %s8949_s12, %s10684_s12   ;;  %s8871_s11 = sphi %s8947_s11, %s10683_s11  }
   0x9   : > { %s30_s16 = ssub.s32 %s8883_s14, %s8969_s15  ;;  %s33_s17 = sadd.s32 1, %s8879_s13 }
   0xa   : > { %p31_p0 = scmp.eq.s32.totalorder %s30_s16, 0  ;;  %p40_p1 = scmp.ne.s32.totalorder %s8879_s13, %s8875_s12 }
   0xb   : > { %p41_p2 = scmp.eq.s32.totalorder %s8883_s14, 0  ;;  %p72_p3 = scmp.ne.s32.totalorder %s8875_s12, %s8871_s11 }
   0xc   : > { %s8979_s18 = scalar_select %p31_p0, %s8879_s13, %s33_s17  }
   0xd   : > { %p8981_p4 = por %p41_p2, %p40_p1  ;;  %p73_p5 = scmp.eq.s32.totalorder %s8966_s8, 0 }
   0xe   : > { %p6397_p6 = scmp.ge.s32.totalorder %s8883_s14, 1  ;;  %p251_p7 = scmp.lt.s32.totalorder %s8883_s14, 4 }
   0xf   : > { %p8990_p8 = por %p73_p5, %p72_p3  ;;  %p6398_p9 = scmp.ne.s32.totalorder %s8966_s8, 0 }
  0x10   : > { %p8995_p10 = pnand %p6397_p6, %p251_p7  ;;  %s10608_s2 = sld [smem:[#allocation28_spill]] }
  0x11   : > { %s8885_s25 = smov [#allocation10]   ;;  %s279_s30 = sshll.u32 %s10579_s4, 4  ;;  %s280_s30 = int_to_ptr.hbm [resolvable:$true] %s279_s30 }
  0x12   : > { %p8405_p11 = pneg %p8995_p10  ;;  %s264_s26 = sshll.u32 %s8885_s25, 4  ;;  %s265_s26 = int_to_ptr.vmem [resolvable:$true] %s264_s26 }
  0x13   : > { %s8886_s10 = smov 256   ;;  %s8887_s11 = smov 16  }
  0x14   : > { %p9006_p12 = pnand %p8405_p11, %p73_p5  ;;  %s8888_s16 = smov [#allocation12]  }
  0x15   : > { %s281_s17 = sshll.u32 %s8888_s16, 4  ;;  %s293_s25 = sshll.u32 %s10580_s5, 4  ;;  %s282_s17 = int_to_ptr.vmem [resolvable:$true] %s281_s17  ;;  %s294_s25 = int_to_ptr.hbm [resolvable:$true] %s293_s25 }
  0x16   : > { %s262_s24 = sshll.u32 %s10608_s2, 4  ;;  %s8889_s28 = smov [#allocation13]   ;;  %s263_s24 = int_to_ptr.hbm [resolvable:$true] %s262_s24 }
  0x17   : > { %8408 = dma.hbm_to_vmem [thread:$0]  (!%p9006_p12), %s263_s24, 4096, %s265_s26, [#allocation11], %s8886_s10, %s8886_s10, %s8887_s11  }
  0x18   : > { %8411 = dma.hbm_to_vmem [thread:$0]  (!%p9006_p12), %s280_s30, 4096, %s282_s17, [#allocation11], %s8886_s10, %s8886_s10, %s8887_s11  }
  0x19   : > { %s295_s29 = sshll.u32 %s8889_s28, 4  ;;  %p6401_p13 = scmp.ge.s32.totalorder %s8883_s14, 3  ;;  %s296_s29 = int_to_ptr.vmem [resolvable:$true] %s295_s29 }
  0x1a   : > { %8414 = dma.hbm_to_vmem [thread:$0]  (!%p9006_p12), %s294_s25, 4096, %s296_s29, [#allocation14], %s8886_s10, %s8886_s10, %s8887_s11  }
  0x1b   : > { %314 = sbr.rel (%p6401_p13) target bundleno = 63 (0x3f), region = 44 }
  0x20   : > { %317 = sbr.rel (!%p8981_p4) target bundleno = 46 (0x2e), region = 48  ;;  %s319_s24 = sand.u32 (%p8981_p4), 1, %s8879_s13  }
  0x21   : > { %s8004_s26 = sshll.u32 (%p8981_p4), %s8883_s14, 4  ;;  %s6402_s16 = sshll.u32 (%p8981_p4), %s319_s24, 5 }
  0x22   : > { %s10610_s0 = sld [smem:[#allocation27_spill]] (%p8981_p4)  ;;  %s321_s27 = scalar_lea.vmem (%p8981_p4), [#allocation7], %s6402_s16 }
  0x28   : > { %s324_s30 = scalar_lea.vmem %s10610_s0, %s8004_s26 }
  0x29   : > { %v337_v1 = vld [vmem:[%s324_s30] sm:$0xff]  ;;  %v339_v2 = vld [vmem:[%s324_s30 + $0x8] sm:$0xff]  ;;  %v341_v3 = vld [vmem:[%s324_s30 + $0x30] sm:$0xff] }
  0x2a   : > { %338 = vst [vmem:[%s321_s27] sm:$0xff] %v337_v1  ;;  %v343_v4 = vld [vmem:[%s324_s30 + $0x38] sm:$0xff] }
  0x2b   : > { %340 = vst [vmem:[%s321_s27 + $0x8] sm:$0xff] %v339_v2 }
  0x2c   : > { %342 = vst [vmem:[%s321_s27 + $0x10] sm:$0xff] %v341_v3 }
  0x2d   : > { %344 = vst [vmem:[%s321_s27 + $0x18] sm:$0xff] %v343_v4 }
  0x2e PF: > { %s351_s10 = sand.u32 1, %s8879_s13   ;;  %s8006_s11 = sshll.u32 %s8883_s14, 9 }
  0x2f   : > { %s6405_s17 = sshll.u32 %s351_s10, 9  ;;  %s361_s29 = scalar_lea.hbm %s10576_s1, %s8006_s11 }
  0x30   : > { %s362_s24 = sshll.u32 %s361_s29, 4  ;;  %s355_s26 = scalar_lea.vmem [#allocation8], %s6405_s17  ;;  %s363_s24 = int_to_ptr.hbm [resolvable:$true] %s362_s24 }
  0x31   : > { %s364_s22 = sshll.u32 %s355_s26, 4  ;;  %s352_s16 = scalar_lea.sflag [#allocation9], %s351_s10  ;;  %s365_s22 = int_to_ptr.vmem [resolvable:$true] %s364_s22 }
  0x32   : > { %s8813_s23 = sshra.s32 %s363_s24, 4  ;;  %s8819_s0 = scalar_lea.hbm %s10576_s1, 1536  ;;  %s8814_s23 = int_to_ptr.hbm [resolvable:$true] %s8813_s23 }
  0x33   : > { %s8815_s30 = scalar_lea.hbm %s8814_s23, 512  ;;  %p8820_p3 = scmp.lt.s32.totalorder %s8814_s23, %s10576_s1 }
  0x34   : > { %p8816_p0 = scmp.ne.s32.totalorder %s8814_s23, %s8815_s30  ;;  %p8821_p6 = scmp.lt.s32.totalorder %s8819_s0, %s8815_s30 }
  0x36   : > { %p8817_p1 = pnand %p8816_p0, %p8981_p4  ;;  %p8822_p7 = por %p8821_p6, %p8820_p3 }
  0x38   : > { %p8818_p2 = pneg %p8817_p1 }
  0x3a   : > { %p8823_p11 = pnand %p8822_p7, %p8818_p2 }
  0x3c   : > { %8826 = shalt.err (!%p8823_p11)
}
  0x3d   : > { %s8890_s10 = smov 256   ;;  %s8891_s11 = smov 16  }
  0x3e   : > { %8397 = dma.hbm_to_vmem [thread:$0]  (%p8981_p4), %s363_s24, 8192, %s365_s22, %s352_s16, %s8890_s10, %s8890_s10, %s8891_s11  }
  0x3f PF: > { %376 = sbr.rel (%p8995_p10) target bundleno = 3336 (0xd08), region = 75  ;;  %s379_s17 = sand.u32 (!%p8995_p10), 1, %s8875_s12  }
  0x40   : > { %s6410_s28 = sshll.u32 (!%p8995_p10), %s379_s17, 5  ;;  %s6411_s29 = sshll.u32 (!%p8995_p10), %s379_s17, 9 }
  0x41   : > { %s9048_s2 = scalar_lea.vmem (!%p8995_p10), [#allocation7], %s6410_s28  ;;  %s386_s0 = scalar_lea.sflag (!%p8995_p10), [#allocation9], %s379_s17 }
  0x42   : > { %s9050_s26 = scalar_lea.vmem (!%p8995_p10), [#allocation8], %s6411_s29 }
  0x44   : > { %8858 = dma.done.wait (%p8990_p8), %s386_s0, 8192  }
  0x45   : > { %8860 = vsyncadd (%p8990_p8), %s386_s0, 4294959104 }
  0x46   : > { %8862 = dma.done.wait (%p73_p5), [#allocation11], 8192  }
  0x47   : > { %8864 = vsyncadd (%p73_p5), [#allocation11], 4294959104 }
  0x48   : > { %8866 = dma.done.wait (%p73_p5), [#allocation14], 4096  }
  0x49   : > { %8868 = vsyncadd (%p73_p5), [#allocation14], 4294963200  ;;  %445 = sbr.rel (%p6398_p9) target bundleno = 87 (0x57), region = 99 }
  0x4e   : > { %v8892_v5 = vmov 0.0  }
  0x4f   : > { %446 = vst [vmem:[#allocation2] sm:$0xff] %v8892_v5 }
  0x50   : > { %447 = vst [vmem:[#allocation2 + $0x8] sm:$0xff] %v8892_v5 }
  0x51   : > { %448 = vst [vmem:[#allocation2 + $0x10] sm:$0xff] %v8892_v5 }
  0x52   : > { %449 = vst [vmem:[#allocation2 + $0x18] sm:$0xff] %v8892_v5 }
  0x53   : > { %450 = vst [vmem:[#allocation2 + $0x20] sm:$0xff] %v8892_v5 }
  0x54   : > { %451 = vst [vmem:[#allocation2 + $0x28] sm:$0xff] %v8892_v5 }
  0x55   : > { %452 = vst [vmem:[#allocation2 + $0x30] sm:$0xff] %v8892_v5 }
  0x56   : > { %453 = vst [vmem:[#allocation2 + $0x38] sm:$0xff] %v8892_v5 }
  0x57 PF: > { %v6530_v6 = vld [vmem:[%s9050_s26 + $0xe0] sm:$0xf]  ;;  %v8037_v7 = vld [vmem:[%s9050_s26 + $0xec] sm:$0xf0]  ;;  %v8035_v11 = vld [vmem:[%s9050_s26 + $0xe4] sm:$0xf] }
  0x58   : > { %v6658_v8 = vld [vmem:[%s9050_s26 + $0x1e0] sm:$0xf]  ;;  %v6531_v9 = vor.u32 %v8037_v7, %v6530_v6  ;;  %v8069_v10 = vld [vmem:[%s9050_s26 + $0x1ec] sm:$0xf0]  ;;  %v6532_v12 = vld [vmem:[%s9050_s26 + $0xf0] sm:$0xf0] }
  0x59   : > { %v6659_v13 = vor.u32 %v8069_v10, %v6658_v8  ;;  %v6535_v14 = vor.u32 %v8035_v11, %v6532_v12  ;;  %v8067_v15 = vld [vmem:[%s9050_s26 + $0x1e4] sm:$0xf]  ;;  %v6660_v16 = vld [vmem:[%s9050_s26 + $0x1f0] sm:$0xf0]  ;;  %v6514_v17 = vld [vmem:[%s9050_s26 + $0xc0] sm:$0xf] }
  0x5a   : > { %852 = vmatpush.bf16.msra.mxu0 %v6531_v9  ;;  %v6663_v18 = vor.u32 %v8067_v15, %v6660_v16  ;;  %v8033_v19 = vld [vmem:[%s9050_s26 + $0xcc] sm:$0xf0]  ;;  %v6642_v20 = vld [vmem:[%s9050_s26 + $0x1c0] sm:$0xf]  ;;  %v8031_v24 = vld [vmem:[%s9050_s26 + $0xc4] sm:$0xf] }
  0x5b   : > { %v8065_v21 = vld [vmem:[%s9050_s26 + $0x1cc] sm:$0xf0]  ;;  %866 = vmatpush.bf16.msra.mxu1 %v6659_v13  ;;  %880 = vmatpush.bf16.msra.mxu2 %v6535_v14  ;;  %v6515_v22 = vor.u32 %v8033_v19, %v6514_v17  ;;  %v6516_v25 = vld [vmem:[%s9050_s26 + $0xd0] sm:$0xf0]  ;;  %v8063_v26 = vld [vmem:[%s9050_s26 + $0x1c4] sm:$0xf] }
  0x5c   : > { %v6643_v23 = vor.u32 %v8065_v21, %v6642_v20  ;;  %894 = vmatpush.bf16.msra.mxu3 %v6663_v18  ;;  %v6519_v27 = vor.u32 %v8031_v24, %v6516_v25  ;;  %v6644_v28 = vld [vmem:[%s9050_s26 + $0x1d0] sm:$0xf0]  ;;  %v6498_v29 = vld [vmem:[%s9050_s26 + $0xa0] sm:$0xf]  ;;  %v8029_v30 = vld [vmem:[%s9050_s26 + $0xac] sm:$0xf0] }
  0x5d   : > { %v6647_v31 = vor.u32 %v8063_v26, %v6644_v28  ;;  %v6626_v32 = vld [vmem:[%s9050_s26 + $0x1a0] sm:$0xf]  ;;  %v8061_v33 = vld [vmem:[%s9050_s26 + $0x1ac] sm:$0xf0]  ;;  %v8027_v34 = vld [vmem:[%s9050_s26 + $0xa4] sm:$0xf]  ;;  %v6499_v35 = vor.u32 %v8029_v30, %v6498_v29 }
  0x5e   : > { %853 = vmatpush.bf16.msra.mxu0 %v6515_v22  ;;  %v6500_v36 = vld [vmem:[%s9050_s26 + $0xb0] sm:$0xf0]  ;;  %v8059_v37 = vld [vmem:[%s9050_s26 + $0x1a4] sm:$0xf]  ;;  %v6627_v39 = vor.u32 %v8061_v33, %v6626_v32  ;;  %v6482_v41 = vld [vmem:[%s9050_s26 + $0x80] sm:$0xf] }
  0x5f   : > { %v6628_v38 = vld [vmem:[%s9050_s26 + $0x1b0] sm:$0xf0]  ;;  %867 = vmatpush.bf16.msra.mxu1 %v6643_v23  ;;  %881 = vmatpush.bf16.msra.mxu2 %v6519_v27  ;;  %v6503_v40 = vor.u32 %v8027_v34, %v6500_v36  ;;  %v8025_v42 = vld [vmem:[%s9050_s26 + $0x8c] sm:$0xf0]  ;;  %v6610_v43 = vld [vmem:[%s9050_s26 + $0x180] sm:$0xf] }
  0x60   : > { %895 = vmatpush.bf16.msra.mxu3 %v6647_v31  ;;  %v6631_v44 = vor.u32 %v8059_v37, %v6628_v38  ;;  %v8057_v45 = vld [vmem:[%s9050_s26 + $0x18c] sm:$0xf0]  ;;  %v8023_v46 = vld [vmem:[%s9050_s26 + $0x84] sm:$0xf]  ;;  %v6484_v47 = vld [vmem:[%s9050_s26 + $0x90] sm:$0xf0]  ;;  %v6483_v50 = vor.u32 %v8025_v42, %v6482_v41 }
  0x61   : > { %v8055_v48 = vld [vmem:[%s9050_s26 + $0x184] sm:$0xf]  ;;  %v6612_v49 = vld [vmem:[%s9050_s26 + $0x190] sm:$0xf0]  ;;  %v6611_v51 = vor.u32 %v8057_v45, %v6610_v43  ;;  %v6487_v52 = vor.u32 %v8023_v46, %v6484_v47  ;;  %v6466_v53 = vld [vmem:[%s9050_s26 + $0x60] sm:$0xf] }
  0x62   : > { %854 = vmatpush.bf16.msra.mxu0 %v6499_v35  ;;  %v8021_v54 = vld [vmem:[%s9050_s26 + $0x6c] sm:$0xf0]  ;;  %v6594_v55 = vld [vmem:[%s9050_s26 + $0x160] sm:$0xf]  ;;  %v6615_v56 = vor.u32 %v8055_v48, %v6612_v49  ;;  %v8019_v58 = vld [vmem:[%s9050_s26 + $0x64] sm:$0xf] }
  0x63   : > { %868 = vmatpush.bf16.msra.mxu1 %v6627_v39  ;;  %882 = vmatpush.bf16.msra.mxu2 %v6503_v40  ;;  %v8053_v57 = vld [vmem:[%s9050_s26 + $0x16c] sm:$0xf0]  ;;  %v6468_v59 = vld [vmem:[%s9050_s26 + $0x70] sm:$0xf0]  ;;  %v8051_v60 = vld [vmem:[%s9050_s26 + $0x164] sm:$0xf]  ;;  %v6467_v62 = vor.u32 %v8021_v54, %v6466_v53 }
  0x64   : > { %896 = vmatpush.bf16.msra.mxu3 %v6631_v44  ;;  %v6596_v61 = vld [vmem:[%s9050_s26 + $0x170] sm:$0xf0]  ;;  %v6595_v63 = vor.u32 %v8053_v57, %v6594_v55  ;;  %v6471_v0 = vor.u32 %v8019_v58, %v6468_v59  ;;  %v6450_v1 = vld [vmem:[%s9050_s26 + $0x40] sm:$0xf]  ;;  %v8017_v2 = vld [vmem:[%s9050_s26 + $0x4c] sm:$0xf0] }
  0x65   : > { %v6578_v3 = vld [vmem:[%s9050_s26 + $0x140] sm:$0xf]  ;;  %v6599_v4 = vor.u32 %v8051_v60, %v6596_v61  ;;  %v8049_v5 = vld [vmem:[%s9050_s26 + $0x14c] sm:$0xf0]  ;;  %v8015_v6 = vld [vmem:[%s9050_s26 + $0x44] sm:$0xf]  ;;  %v6451_v10 = vor.u32 %v8017_v2, %v6450_v1 }
  0x66   : > { %855 = vmatpush.bf16.msra.mxu0 %v6483_v50  ;;  %v6452_v7 = vld [vmem:[%s9050_s26 + $0x50] sm:$0xf0]  ;;  %v8047_v8 = vld [vmem:[%s9050_s26 + $0x144] sm:$0xf]  ;;  %v6579_v11 = vor.u32 %v8049_v5, %v6578_v3  ;;  %v6434_v13 = vld [vmem:[%s9050_s26 + $0x20] sm:$0xf] }
  0x67   : > { %869 = vmatpush.bf16.msra.mxu1 %v6611_v51  ;;  %883 = vmatpush.bf16.msra.mxu2 %v6487_v52  ;;  %v6580_v9 = vld [vmem:[%s9050_s26 + $0x150] sm:$0xf0]  ;;  %v6455_v12 = vor.u32 %v8015_v6, %v6452_v7  ;;  %v8013_v14 = vld [vmem:[%s9050_s26 + $0x2c] sm:$0xf0]  ;;  %v6562_v15 = vld [vmem:[%s9050_s26 + $0x120] sm:$0xf] }
  0x68   : > { %897 = vmatpush.bf16.msra.mxu3 %v6615_v56  ;;  %v6583_v16 = vor.u32 %v8047_v8, %v6580_v9  ;;  %v8045_v17 = vld [vmem:[%s9050_s26 + $0x12c] sm:$0xf0]  ;;  %v8011_v18 = vld [vmem:[%s9050_s26 + $0x24] sm:$0xf]  ;;  %v6436_v19 = vld [vmem:[%s9050_s26 + $0x30] sm:$0xf0]  ;;  %v6435_v22 = vor.u32 %v8013_v14, %v6434_v13 }
  0x69   : > { %v8043_v20 = vld [vmem:[%s9050_s26 + $0x124] sm:$0xf]  ;;  %v6564_v21 = vld [vmem:[%s9050_s26 + $0x130] sm:$0xf0]  ;;  %v6418_v23 = vld [vmem:[%s9050_s26] sm:$0xf]  ;;  %v6563_v26 = vor.u32 %v8045_v17, %v6562_v15  ;;  %v6439_v27 = vor.u32 %v8011_v18, %v6436_v19 }
  0x6a   : > { %856 = vmatpush.bf16.msra.mxu0 %v6467_v62  ;;  %v8009_v24 = vld [vmem:[%s9050_s26 + $0xc] sm:$0xf0]  ;;  %v6546_v25 = vld [vmem:[%s9050_s26 + $0x100] sm:$0xf]  ;;  %v8007_v29 = vld [vmem:[%s9050_s26 + $0x4] sm:$0xf]  ;;  %v6567_v31 = vor.u32 %v8043_v20, %v6564_v21 }
  0x6b   : > { %870 = vmatpush.bf16.msra.mxu1 %v6595_v63  ;;  %884 = vmatpush.bf16.msra.mxu2 %v6471_v0  ;;  %v8041_v28 = vld [vmem:[%s9050_s26 + $0x10c] sm:$0xf0]  ;;  %v6420_v30 = vld [vmem:[%s9050_s26 + $0x10] sm:$0xf0]  ;;  %v8039_v32 = vld [vmem:[%s9050_s26 + $0x104] sm:$0xf]  ;;  %v6419_v38 = vor.u32 %v8009_v24, %v6418_v23 }
  0x6c   : > { %898 = vmatpush.bf16.msra.mxu3 %v6599_v4  ;;  %v6548_v33 = vld [vmem:[%s9050_s26 + $0x110] sm:$0xf0]  ;;  %v6538_v34 = vld [vmem:[%s9050_s26 + $0xe8] sm:$0xf]  ;;  %v8038_v35 = vld [vmem:[%s9050_s26 + $0xf4] sm:$0xf0]  ;;  %v6547_v42 = vor.u32 %v8041_v28, %v6546_v25  ;;  %v6423_v43 = vor.u32 %v8007_v29, %v6420_v30 }
  0x6d   : > { %v6666_v36 = vld [vmem:[%s9050_s26 + $0x1e8] sm:$0xf]  ;;  %v8070_v37 = vld [vmem:[%s9050_s26 + $0x1f4] sm:$0xf0]  ;;  %v8036_v39 = vld [vmem:[%s9050_s26 + $0xec] sm:$0xf]  ;;  %v6551_v47 = vor.u32 %v8039_v32, %v6548_v33  ;;  %v6539_v48 = vor.u32 %v8038_v35, %v6538_v34 }
  0x6e   : > { %857 = vmatpush.bf16.msra.mxu0 %v6451_v10  ;;  %v6540_v40 = vld [vmem:[%s9050_s26 + $0xf8] sm:$0xf0]  ;;  %v8068_v41 = vld [vmem:[%s9050_s26 + $0x1ec] sm:$0xf]  ;;  %v462_v45 = vld [vmem:[%s9048_s2] sm:$0xff]  ;;  %v6667_v51 = vor.u32 %v8070_v37, %v6666_v36  ;;  %p6672_p4 = scmp.ne.s32.totalorder %s8966_s8, 2 }
  0x6f   : > { %871 = vmatpush.bf16.msra.mxu1 %v6579_v11  ;;  %885 = vmatpush.bf16.msra.mxu2 %v6455_v12  ;;  %v6668_v44 = vld [vmem:[%s9050_s26 + $0x1f8] sm:$0xf0]  ;;  %v464_v46 = vld [vmem:[%s9048_s2 + $0x10] sm:$0xff]  ;;  %v463_v49 = vld [vmem:[%s9048_s2 + $0x8] sm:$0xff]  ;;  %v6543_v52 = vor.u32 %v8036_v39, %v6540_v40 }
  0x70   : > { %899 = vmatpush.bf16.msra.mxu3 %v6583_v16  ;;  %v465_v50 = vld [vmem:[%s9048_s2 + $0x18] sm:$0xff]  ;;  %v6522_v53 = vld [vmem:[%s9050_s26 + $0xc8] sm:$0xf]  ;;  %v6671_v56 = vor.u32 %v8068_v41, %v6668_v44  ;;  %v8032_v58 = vld [vmem:[%s9050_s26 + $0xcc] sm:$0xf]  ;;  %v9148_v60 = vpack.c.bf16 %v464_v46, %v462_v45 }
  0x71   : > { %v8034_v54 = vld [vmem:[%s9050_s26 + $0xd4] sm:$0xf0]  ;;  %v6650_v55 = vld [vmem:[%s9050_s26 + $0x1c8] sm:$0xf]  ;;  %v6524_v59 = vld [vmem:[%s9050_s26 + $0xd8] sm:$0xf0]  ;;  %v9152_v63 = vpack.c.bf16 %v465_v50, %v463_v49 }
  0x72   : > { %858 = vmatpush.bf16.msra.mxu0 %v6435_v22  ;;  %v8066_v57 = vld [vmem:[%s9050_s26 + $0x1d4] sm:$0xf0]  ;;  %v8064_v61 = vld [vmem:[%s9050_s26 + $0x1cc] sm:$0xf]  ;;  %v6652_v62 = vld [vmem:[%s9050_s26 + $0x1d8] sm:$0xf0]  ;;  %v6523_v0 = vor.u32 %v8034_v54, %v6522_v53  ;;  %v6527_v2 = vor.u32 %v8032_v58, %v6524_v59 }
  0x73   : > { %872 = vmatpush.bf16.msra.mxu1 %v6563_v26  ;;  %886 = vmatpush.bf16.msra.mxu2 %v6439_v27  ;;  %v6651_v1 = vor.u32 %v8066_v57, %v6650_v55  ;;  %v6506_v3 = vld [vmem:[%s9050_s26 + $0xa8] sm:$0xf]  ;;  %v8030_v4 = vld [vmem:[%s9050_s26 + $0xb4] sm:$0xf0]  ;;  %v6655_v6 = vor.u32 %v8064_v61, %v6652_v62  ;;  %v8028_v8 = vld [vmem:[%s9050_s26 + $0xac] sm:$0xf] }
  0x74   : > { %900 = vmatpush.bf16.msra.mxu3 %v6567_v31  ;;  %v6634_v5 = vld [vmem:[%s9050_s26 + $0x1a8] sm:$0xf]  ;;  %v8062_v7 = vld [vmem:[%s9050_s26 + $0x1b4] sm:$0xf0]  ;;  %v6508_v9 = vld [vmem:[%s9050_s26 + $0xb8] sm:$0xf0]  ;;  %v6507_v12 = vor.u32 %v8030_v4, %v6506_v3 }
  0x75   : > { %v8060_v10 = vld [vmem:[%s9050_s26 + $0x1ac] sm:$0xf]  ;;  %v6636_v11 = vld [vmem:[%s9050_s26 + $0x1b8] sm:$0xf0]  ;;  %v6635_v13 = vor.u32 %v8062_v7, %v6634_v5  ;;  %v6511_v14 = vor.u32 %v8028_v8, %v6508_v9  ;;  %v6490_v15 = vld [vmem:[%s9050_s26 + $0x88] sm:$0xf] }
  0x76   : > { %859 = vmatpush.bf16.msra.mxu0 %v6419_v38  ;;  %v8026_v16 = vld [vmem:[%s9050_s26 + $0x94] sm:$0xf0]  ;;  %v6618_v17 = vld [vmem:[%s9050_s26 + $0x188] sm:$0xf]  ;;  %v6639_v18 = vor.u32 %v8060_v10, %v6636_v11  ;;  %v8024_v20 = vld [vmem:[%s9050_s26 + $0x8c] sm:$0xf] }
  0x77   : > { %873 = vmatpush.bf16.msra.mxu1 %v6547_v42  ;;  %887 = vmatpush.bf16.msra.mxu2 %v6423_v43  ;;  %v8058_v19 = vld [vmem:[%s9050_s26 + $0x194] sm:$0xf0]  ;;  %v6492_v21 = vld [vmem:[%s9050_s26 + $0x98] sm:$0xf0]  ;;  %v8056_v22 = vld [vmem:[%s9050_s26 + $0x18c] sm:$0xf]  ;;  %v6491_v24 = vor.u32 %v8026_v16, %v6490_v15 }
  0x78   : > { %901 = vmatpush.bf16.msra.mxu3 %v6551_v47  ;;  %v6620_v23 = vld [vmem:[%s9050_s26 + $0x198] sm:$0xf0]  ;;  %v6619_v25 = vor.u32 %v8058_v19, %v6618_v17  ;;  %v6495_v26 = vor.u32 %v8024_v20, %v6492_v21  ;;  %v6474_v27 = vld [vmem:[%s9050_s26 + $0x68] sm:$0xf]  ;;  %v8022_v28 = vld [vmem:[%s9050_s26 + $0x74] sm:$0xf0] }
  0x79   : > { %860 = vmatmul.bf16.vlgmr.msra.gmra.mxu0 %v9148_v60  ;;  %v6602_v29 = vld [vmem:[%s9050_s26 + $0x168] sm:$0xf]  ;;  %v6623_v30 = vor.u32 %v8056_v22, %v6620_v23  ;;  %v8054_v31 = vld [vmem:[%s9050_s26 + $0x174] sm:$0xf0]  ;;  %v8020_v32 = vld [vmem:[%s9050_s26 + $0x6c] sm:$0xf]  ;;  %v6475_v36 = vor.u32 %v8022_v28, %v6474_v27 }
  0x7a   : > { %908 = vmatpush.bf16.msrb.mxu0 %v6539_v48  ;;  %888 = vmatmul.bf16.vlgmr.msra.gmra.mxu2 %v9148_v60  ;;  %v6476_v33 = vld [vmem:[%s9050_s26 + $0x78] sm:$0xf0]  ;;  %v8052_v34 = vld [vmem:[%s9050_s26 + $0x16c] sm:$0xf]  ;;  %v6603_v37 = vor.u32 %v8054_v31, %v6602_v29  ;;  %v6458_v39 = vld [vmem:[%s9050_s26 + $0x48] sm:$0xf] }
  0x7b   : > { %922 = vmatpush.bf16.msrb.mxu1 %v6667_v51  ;;  %936 = vmatpush.bf16.msrb.mxu2 %v6543_v52  ;;  %v6604_v35 = vld [vmem:[%s9050_s26 + $0x178] sm:$0xf0]  ;;  %v6479_v38 = vor.u32 %v8020_v32, %v6476_v33  ;;  %v8018_v40 = vld [vmem:[%s9050_s26 + $0x54] sm:$0xf0]  ;;  %v6586_v41 = vld [vmem:[%s9050_s26 + $0x148] sm:$0xf] }
  0x7c   : > { %950 = vmatpush.bf16.msrb.mxu3 %v6671_v56  ;;  %874 = vmatmul.bf16.vlgmr.msra.gmra.mxu1 %v9152_v63  ;;  %v6607_v42 = vor.u32 %v8052_v34, %v6604_v35  ;;  %v8050_v43 = vld [vmem:[%s9050_s26 + $0x154] sm:$0xf0]  ;;  %v8016_v44 = vld [vmem:[%s9050_s26 + $0x4c] sm:$0xf]  ;;  %v6460_v45 = vld [vmem:[%s9050_s26 + $0x58] sm:$0xf0]  ;;  %v6459_v48 = vor.u32 %v8018_v40, %v6458_v39 }
  0x7d   : > { %902 = vmatmul.bf16.vlgmr.msra.gmra.mxu3 %v9152_v63  ;;  %v8048_v46 = vld [vmem:[%s9050_s26 + $0x14c] sm:$0xf]  ;;  %v6588_v47 = vld [vmem:[%s9050_s26 + $0x158] sm:$0xf0]  ;;  %v6587_v49 = vor.u32 %v8050_v43, %v6586_v41  ;;  %v6463_v50 = vor.u32 %v8016_v44, %v6460_v45  ;;  %v6442_v51 = vld [vmem:[%s9050_s26 + $0x28] sm:$0xf] }
  0x7e   : > { %909 = vmatpush.bf16.msrb.mxu0 %v6523_v0  ;;  %v8014_v52 = vld [vmem:[%s9050_s26 + $0x34] sm:$0xf0]  ;;  %v6570_v53 = vld [vmem:[%s9050_s26 + $0x128] sm:$0xf]  ;;  %v6591_v54 = vor.u32 %v8048_v46, %v6588_v47  ;;  %v8012_v56 = vld [vmem:[%s9050_s26 + $0x2c] sm:$0xf] }
  0x7f   : > { %923 = vmatpush.bf16.msrb.mxu1 %v6651_v1  ;;  %937 = vmatpush.bf16.msrb.mxu2 %v6527_v2  ;;  %v8046_v55 = vld [vmem:[%s9050_s26 + $0x134] sm:$0xf0]  ;;  %v6444_v57 = vld [vmem:[%s9050_s26 + $0x38] sm:$0xf0]  ;;  %v8044_v58 = vld [vmem:[%s9050_s26 + $0x12c] sm:$0xf]  ;;  %v6443_v61 = vor.u32 %v8014_v52, %v6442_v51 }
  0x80   : > { %951 = vmatpush.bf16.msrb.mxu3 %v6655_v6  ;;  %v6572_v59 = vld [vmem:[%s9050_s26 + $0x138] sm:$0xf0]  ;;  %v6571_v62 = vor.u32 %v8046_v55, %v6570_v53  ;;  %v6447_v0 = vor.u32 %v8012_v56, %v6444_v57  ;;  %v6426_v1 = vld [vmem:[%s9050_s26 + $0x8] sm:$0xf]  ;;  %v8010_v2 = vld [vmem:[%s9050_s26 + $0x14] sm:$0xf0] }
  0x81   : > { %v6554_v3 = vld [vmem:[%s9050_s26 + $0x108] sm:$0xf]  ;;  %v6575_v4 = vor.u32 %v8044_v58, %v6572_v59  ;;  %v8042_v5 = vld [vmem:[%s9050_s26 + $0x114] sm:$0xf0]  ;;  %v8008_v6 = vld [vmem:[%s9050_s26 + $0xc] sm:$0xf]  ;;  %v6427_v10 = vor.u32 %v8010_v2, %v6426_v1 }
  0x82   : > { %910 = vmatpush.bf16.msrb.mxu0 %v6507_v12  ;;  %v6428_v7 = vld [vmem:[%s9050_s26 + $0x18] sm:$0xf0]  ;;  %v8040_v8 = vld [vmem:[%s9050_s26 + $0x10c] sm:$0xf]  ;;  %v6555_v11 = vor.u32 %v8042_v5, %v6554_v3 }
  0x83   : > { %924 = vmatpush.bf16.msrb.mxu1 %v6635_v13  ;;  %938 = vmatpush.bf16.msrb.mxu2 %v6511_v14  ;;  %v6556_v9 = vld [vmem:[%s9050_s26 + $0x118] sm:$0xf0]  ;;  %v6431_v12 = vor.u32 %v8008_v6, %v6428_v7  ;;  %v455_v20 = vld [vmem:[#allocation2 + $0x8] sm:$0xff]  ;;  %v456_v33 = vld [vmem:[#allocation2 + $0x10] sm:$0xff] }
  0x84   : > { %952 = vmatpush.bf16.msrb.mxu3 %v6639_v18  ;;  %v6559_v13 = vor.u32 %v8040_v8, %v6556_v9  ;;  %v454_v15 = vld [vmem:[#allocation2] sm:$0xff] }
  0x86   : > { %911 = vmatpush.bf16.msrb.mxu0 %v6491_v24 }
  0x87   : > { %925 = vmatpush.bf16.msrb.mxu1 %v6619_v25  ;;  %939 = vmatpush.bf16.msrb.mxu2 %v6495_v26  ;;  %v458_v25 = vld [vmem:[#allocation2 + $0x20] sm:$0xff] }
  0x88   : > { %953 = vmatpush.bf16.msrb.mxu3 %v6623_v30 }
  0x8a   : > { %912 = vmatpush.bf16.msrb.mxu0 %v6475_v36 }
  0x8b   : > { %926 = vmatpush.bf16.msrb.mxu1 %v6603_v37  ;;  %940 = vmatpush.bf16.msrb.mxu2 %v6479_v38  ;;  %v457_v38 = vld [vmem:[#allocation2 + $0x18] sm:$0xff] }
  0x8c   : > { %954 = vmatpush.bf16.msrb.mxu3 %v6607_v42  ;;  %v460_v42 = vld [vmem:[#allocation2 + $0x30] sm:$0xff] }
  0x8e   : > { %913 = vmatpush.bf16.msrb.mxu0 %v6459_v48  ;;  %v461_v48 = vld [vmem:[#allocation2 + $0x38] sm:$0xff] }
  0x8f   : > { %927 = vmatpush.bf16.msrb.mxu1 %v6587_v49  ;;  %941 = vmatpush.bf16.msrb.mxu2 %v6463_v50 }
  0x90   : > { %955 = vmatpush.bf16.msrb.mxu3 %v6591_v54 }
  0x92   : > { %914 = vmatpush.bf16.msrb.mxu0 %v6443_v61 }
  0x93   : > { %928 = vmatpush.bf16.msrb.mxu1 %v6571_v62  ;;  %942 = vmatpush.bf16.msrb.mxu2 %v6447_v0 }
  0x94   : > { %956 = vmatpush.bf16.msrb.mxu3 %v6575_v4 }
  0x96   : > { %915 = vmatpush.bf16.msrb.mxu0 %v6427_v10 }
  0x97   : > { %929 = vmatpush.bf16.msrb.mxu1 %v6555_v11  ;;  %943 = vmatpush.bf16.msrb.mxu2 %v6431_v12 }
  0x98   : > { %957 = vmatpush.bf16.msrb.mxu3 %v6559_v13 }
  0x99   : > { %916 = vmatmul.bf16.vlgmr.msrb.gmra.mxu0 %v9148_v60 }
  0x9a   : > { %930 = vmatmul.bf16.vlgmr.msrb.gmra.mxu1 %v9152_v63  ;;  %944 = vmatmul.bf16.vlgmr.msrb.gmra.mxu2 %v9148_v60 }
  0x9b   : > { %958 = vmatmul.bf16.vlgmr.msrb.gmra.mxu3 %v9152_v63  ;;  %v459_v63 = vld [vmem:[#allocation2 + $0x28] sm:$0xff] }
  0xf6   : > { %v861_v14 = vpop.f32.mrf.mxu0 }
  0xf9   : > { %v875_v16 = vpop.f32.mrf.mxu1 }
  0xfa   : > { %v876_v17 = vadd.f32 %v875_v16, %v861_v14 }
  0xfc   : > { %v964_v18 = vadd.f32 %v876_v17, %v454_v15 }
  0xfd   : > { %v889_v19 = vpop.f32.mrf.mxu2 }
  0xfe   : > { %972 = vst [vmem:[#allocation2] sm:$0xff] %v964_v18  ;;  %v863_v23 = vpop.f32.mrf.mxu0 }
 0x100   : > { %v903_v21 = vpop.f32.mrf.mxu3 }
 0x101   : > { %v904_v22 = vadd.f32 %v903_v21, %v889_v19  ;;  %v877_v26 = vpop.f32.mrf.mxu1 }
 0x102   : > { %v878_v27 = vadd.f32 %v877_v26, %v863_v23 }
 0x103   : > { %v965_v24 = vadd.f32 %v904_v22, %v455_v20 }
 0x104   : > { %v968_v28 = vadd.f32 %v878_v27, %v458_v25 }
 0x105   : > { %973 = vst [vmem:[#allocation2 + $0x8] sm:$0xff] %v965_v24  ;;  %v891_v60 = vpop.f32.mrf.mxu2 }
 0x106   : > { %976 = vst [vmem:[#allocation2 + $0x20] sm:$0xff] %v968_v28 }
 0x108   : > { %v905_v29 = vpop.f32.mrf.mxu3 }
 0x109   : > { %v906_v30 = vadd.f32 %v905_v29, %v891_v60 }
 0x10b   : > { %v969_v31 = vadd.f32 %v906_v30, %v459_v63 }
 0x10d   : > { %977 = vst [vmem:[#allocation2 + $0x28] sm:$0xff] %v969_v31 }
 0x116   : > { %v917_v32 = vpop.f32.mrf.mxu0 }
 0x117   : > { %v931_v34 = vpop.f32.mrf.mxu1 }
 0x118   : > { %v932_v35 = vadd.f32 %v931_v34, %v917_v32 }
 0x11a   : > { %v966_v36 = vadd.f32 %v932_v35, %v456_v33 }
 0x11c   : > { %974 = vst [vmem:[#allocation2 + $0x10] sm:$0xff] %v966_v36 }
 0x11d   : > { %v945_v37 = vpop.f32.mrf.mxu2 }
 0x11e   : > { %v959_v39 = vpop.f32.mrf.mxu3  ;;  %v919_v40 = vpop.f32.mrf.mxu0 }
 0x11f   : > { %v960_v41 = vadd.f32 %v959_v39, %v945_v37  ;;  %v933_v43 = vpop.f32.mrf.mxu1 }
 0x120   : > { %v934_v44 = vadd.f32 %v933_v43, %v919_v40 }
 0x121   : > { %v967_v45 = vadd.f32 %v960_v41, %v457_v38 }
 0x122   : > { %v970_v46 = vadd.f32 %v934_v44, %v460_v42 }
 0x123   : > { %975 = vst [vmem:[#allocation2 + $0x18] sm:$0xff] %v967_v45 }
 0x124   : > { %978 = vst [vmem:[#allocation2 + $0x30] sm:$0xff] %v970_v46 }
 0x125   : > { %v947_v47 = vpop.f32.mrf.mxu2 }
 0x126   : > { %v961_v49 = vpop.f32.mrf.mxu3 }
 0x127   : > { %v962_v50 = vadd.f32 %v961_v49, %v947_v47  ;;  %983 = sbr.rel (%p6672_p4) target bundleno = 3336 (0xd08), region = 103 }
 0x129   : > { %v971_v51 = vadd.f32 %v962_v50, %v461_v48 }
 0x12b   : > { %979 = vst [vmem:[#allocation2 + $0x38] sm:$0xff] %v971_v51 }
 0x12c   : > { %v6787_v52 = vld [vmem:[#allocation10 + $0xe0] sm:$0xf]  ;;  %v8101_v53 = vld [vmem:[#allocation10 + $0xec] sm:$0xf0]  ;;  %v8099_v54 = vld [vmem:[#allocation10 + $0xe4] sm:$0xf] }
 0x12d   : > { %v6788_v55 = vor.u32 %v8101_v53, %v6787_v52  ;;  %v6789_v56 = vld [vmem:[#allocation10 + $0xf0] sm:$0xf0]  ;;  %v6795_v57 = vld [vmem:[#allocation10 + $0xe8] sm:$0xf]  ;;  %v8102_v58 = vld [vmem:[#allocation10 + $0xf4] sm:$0xf0] }
 0x12e   : > { %v6792_v59 = vor.u32 %v8099_v54, %v6789_v56  ;;  %v6796_v61 = vor.u32 %v8102_v58, %v6795_v57  ;;  %v6771_v62 = vld [vmem:[#allocation10 + $0xc0] sm:$0xf]  ;;  %v8097_v0 = vld [vmem:[#allocation10 + $0xcc] sm:$0xf0]  ;;  %v8095_v1 = vld [vmem:[#allocation10 + $0xc4] sm:$0xf]  ;;  %v984_v58 = vlaneseq }
 0x12f   : > { %1941 = vmatpush.bf16.msra.mxu0 %v6788_v55  ;;  %v6772_v2 = vor.u32 %v8097_v0, %v6771_v62  ;;  %v6773_v3 = vld [vmem:[#allocation10 + $0xd0] sm:$0xf0]  ;;  %v6779_v4 = vld [vmem:[#allocation10 + $0xc8] sm:$0xf]  ;;  %v8098_v5 = vld [vmem:[#allocation10 + $0xd4] sm:$0xf0] }
 0x130   : > { %1954 = vmatpush.bf16.msra.mxu1 %v6792_v59  ;;  %1967 = vmatpush.bf16.msra.mxu2 %v6796_v61  ;;  %v6776_v6 = vor.u32 %v8095_v1, %v6773_v3  ;;  %v6780_v7 = vor.u32 %v8098_v5, %v6779_v4  ;;  %v8100_v8 = vld [vmem:[#allocation10 + $0xec] sm:$0xf]  ;;  %v6797_v9 = vld [vmem:[#allocation10 + $0xf8] sm:$0xf0]  ;;  %v6755_v10 = vld [vmem:[#allocation10 + $0xa0] sm:$0xf] }
 0x131   : > { %v6800_v11 = vor.u32 %v8100_v8, %v6797_v9  ;;  %v8093_v12 = vld [vmem:[#allocation10 + $0xac] sm:$0xf0]  ;;  %v8091_v13 = vld [vmem:[#allocation10 + $0xa4] sm:$0xf]  ;;  %v6757_v14 = vld [vmem:[#allocation10 + $0xb0] sm:$0xf0] }
 0x132   : > { %v6763_v15 = vld [vmem:[#allocation10 + $0xa8] sm:$0xf]  ;;  %v8094_v16 = vld [vmem:[#allocation10 + $0xb4] sm:$0xf0]  ;;  %v8096_v17 = vld [vmem:[#allocation10 + $0xcc] sm:$0xf]  ;;  %v6756_v18 = vor.u32 %v8093_v12, %v6755_v10  ;;  %v6760_v22 = vor.u32 %v8091_v13, %v6757_v14 }
 0x133   : > { %1942 = vmatpush.bf16.msra.mxu0 %v6772_v2  ;;  %1980 = vmatpush.bf16.msra.mxu3 %v6800_v11  ;;  %v6781_v19 = vld [vmem:[#allocation10 + $0xd8] sm:$0xf0]  ;;  %v6739_v20 = vld [vmem:[#allocation10 + $0x80] sm:$0xf]  ;;  %v8089_v21 = vld [vmem:[#allocation10 + $0x8c] sm:$0xf0]  ;;  %v6764_v23 = vor.u32 %v8094_v16, %v6763_v15 }
 0x134   : > { %1955 = vmatpush.bf16.msra.mxu1 %v6776_v6  ;;  %1968 = vmatpush.bf16.msra.mxu2 %v6780_v7  ;;  %v6784_v24 = vor.u32 %v8096_v17, %v6781_v19  ;;  %v8087_v25 = vld [vmem:[#allocation10 + $0x84] sm:$0xf]  ;;  %v6741_v26 = vld [vmem:[#allocation10 + $0x90] sm:$0xf0]  ;;  %v6747_v27 = vld [vmem:[#allocation10 + $0x88] sm:$0xf]  ;;  %v6740_v30 = vor.u32 %v8089_v21, %v6739_v20 }
 0x135   : > { %v8090_v28 = vld [vmem:[#allocation10 + $0x94] sm:$0xf0]  ;;  %v8092_v60 = vld [vmem:[#allocation10 + $0xac] sm:$0xf]  ;;  %v6765_v63 = vld [vmem:[#allocation10 + $0xb8] sm:$0xf0]  ;;  %v6744_v35 = vor.u32 %v8087_v25, %v6741_v26 }
 0x136   : > { %v6723_v29 = vld [vmem:[#allocation10 + $0x60] sm:$0xf]  ;;  %v6768_v31 = vor.u32 %v8092_v60, %v6765_v63  ;;  %v8085_v32 = vld [vmem:[#allocation10 + $0x6c] sm:$0xf0]  ;;  %v8083_v33 = vld [vmem:[#allocation10 + $0x64] sm:$0xf]  ;;  %v6748_v36 = vor.u32 %v8090_v28, %v6747_v27 }
 0x137   : > { %1943 = vmatpush.bf16.msra.mxu0 %v6756_v18  ;;  %1981 = vmatpush.bf16.msra.mxu3 %v6784_v24  ;;  %v6725_v34 = vld [vmem:[#allocation10 + $0x70] sm:$0xf0]  ;;  %v6731_v37 = vld [vmem:[#allocation10 + $0x68] sm:$0xf]  ;;  %v8088_v38 = vld [vmem:[#allocation10 + $0x8c] sm:$0xf]  ;;  %v6724_v48 = vor.u32 %v8085_v32, %v6723_v29 }
 0x138   : > { %1956 = vmatpush.bf16.msra.mxu1 %v6760_v22  ;;  %1969 = vmatpush.bf16.msra.mxu2 %v6764_v23  ;;  %v6749_v39 = vld [vmem:[#allocation10 + $0x98] sm:$0xf0]  ;;  %v8086_v40 = vld [vmem:[#allocation10 + $0x74] sm:$0xf0]  ;;  %v6707_v41 = vld [vmem:[#allocation10 + $0x40] sm:$0xf]  ;;  %v6728_v53 = vor.u32 %v8083_v33, %v6725_v34 }
 0x139   : > { %v8081_v42 = vld [vmem:[#allocation10 + $0x4c] sm:$0xf0]  ;;  %v8079_v43 = vld [vmem:[#allocation10 + $0x44] sm:$0xf]  ;;  %v6709_v44 = vld [vmem:[#allocation10 + $0x50] sm:$0xf0]  ;;  %v6752_v49 = vor.u32 %v8088_v38, %v6749_v39  ;;  %v6732_v54 = vor.u32 %v8086_v40, %v6731_v37 }
 0x13a   : > { %v6715_v45 = vld [vmem:[#allocation10 + $0x48] sm:$0xf]  ;;  %v8082_v46 = vld [vmem:[#allocation10 + $0x54] sm:$0xf0]  ;;  %v8084_v47 = vld [vmem:[#allocation10 + $0x6c] sm:$0xf]  ;;  %v6708_v0 = vor.u32 %v8081_v42, %v6707_v41  ;;  %v6712_v4 = vor.u32 %v8079_v43, %v6709_v44 }
 0x13b   : > { %1944 = vmatpush.bf16.msra.mxu0 %v6740_v30  ;;  %1982 = vmatpush.bf16.msra.mxu3 %v6768_v31  ;;  %v6733_v50 = vld [vmem:[#allocation10 + $0x78] sm:$0xf0]  ;;  %v9211_v51 = vld [vmem:[#allocation10 + $0x20] sm:$0xf]  ;;  %v9213_v52 = vld [vmem:[#allocation10 + $0x2c] sm:$0xf0]  ;;  %v6716_v5 = vor.u32 %v8082_v46, %v6715_v45 }
 0x13c   : > { %1957 = vmatpush.bf16.msra.mxu1 %v6744_v35  ;;  %1970 = vmatpush.bf16.msra.mxu2 %v6748_v36  ;;  %v9215_v55 = vld [vmem:[#allocation10 + $0x24] sm:$0xf]  ;;  %v9217_v56 = vld [vmem:[#allocation10 + $0x30] sm:$0xf0]  ;;  %v9219_v57 = vld [vmem:[#allocation10 + $0x28] sm:$0xf]  ;;  %v6736_v6 = vor.u32 %v8084_v47, %v6733_v50  ;;  %v6692_v10 = vor.u32 %v9213_v52, %v9211_v51 }
 0x13d   : > { %v8078_v59 = vld [vmem:[#allocation10 + $0x34] sm:$0xf0]  ;;  %v8080_v61 = vld [vmem:[#allocation10 + $0x4c] sm:$0xf]  ;;  %v6717_v62 = vld [vmem:[#allocation10 + $0x58] sm:$0xf0]  ;;  %v6696_v11 = vor.u32 %v9215_v55, %v9217_v56 }
 0x13e   : > { %v9221_v1 = vld [vmem:[#allocation10] sm:$0xf]  ;;  %v9223_v2 = vld [vmem:[#allocation10 + $0xc] sm:$0xf0]  ;;  %v9225_v3 = vld [vmem:[#allocation10 + $0x4] sm:$0xf]  ;;  %v6700_v12 = vor.u32 %v8078_v59, %v9219_v57  ;;  %v6720_v16 = vor.u32 %v8080_v61, %v6717_v62 }
 0x13f   : > { %1945 = vmatpush.bf16.msra.mxu0 %v6724_v48  ;;  %1983 = vmatpush.bf16.msra.mxu3 %v6752_v49  ;;  %v9227_v7 = vld [vmem:[#allocation10 + $0x10] sm:$0xf0]  ;;  %v9229_v8 = vld [vmem:[#allocation10 + $0x8] sm:$0xf]  ;;  %v9231_v9 = vld [vmem:[#allocation10 + $0x14] sm:$0xf0]  ;;  %v6676_v17 = vor.u32 %v9223_v2, %v9221_v1 }
 0x140   : > { %1958 = vmatpush.bf16.msra.mxu1 %v6728_v53  ;;  %1971 = vmatpush.bf16.msra.mxu2 %v6732_v54  ;;  %v8076_v13 = vld [vmem:[#allocation10 + $0x2c] sm:$0xf]  ;;  %v6701_v14 = vld [vmem:[#allocation10 + $0x38] sm:$0xf0]  ;;  %v9239_v15 = vand.u32 127, %v984_v58  ;;  %v6680_v18 = vor.u32 %v9225_v3, %v9227_v7  ;;  %v6684_v19 = vor.u32 %v9231_v9, %v9229_v8  ;;  %vm1088_vm4 = vcmask 1040384  }
 0x141   : > { %v1043_v23 = vld [vmem:[#allocation2] ss:$8 sm:$0xf]  ;;  %v6704_v24 = vor.u32 %v8076_v13, %v6701_v14  ;;  %v1045_v25 = vld [vmem:[#allocation2 + $0x7] ss:$8 sm:$0xf] }
 0x142   : > { %v986_v20 = vadd.s32 128, %v9239_v15  ;;  %v987_v21 = vadd.s32 256, %v9239_v15  ;;  %v988_v22 = vadd.s32 384, %v9239_v15  ;;  %vm1037_vm0 = vcmp.lt.s32.totalorder %v9239_v15, 64  ;;  %v9251_v28 = vld [vmem:[#allocation10 + $0xc] sm:$0xf] }
 0x143   : > { %1946 = vmatpush.bf16.msra.mxu0 %v6708_v0  ;;  %1984 = vmatpush.bf16.msra.mxu3 %v6736_v6  ;;  %v1047_v26 = vperm.slane %v1043_v23, 0  ;;  %v1048_v27 = vperm.slane %v1043_v23, 1  ;;  %v1049_v30 = vperm.slane %v1043_v23, 2  ;;  %v1042_v31 = vld [vmem:[%s10578_s3] sm:$0xf]  ;;  %v1050_v32 = vperm.slane %v1043_v23, 3 }
 0x144   : > { %1959 = vmatpush.bf16.msra.mxu1 %v6712_v4  ;;  %1972 = vmatpush.bf16.msra.mxu2 %v6716_v5  ;;  %v1000_v60 = vand.u32 127, %v986_v20  ;;  %v1007_v63 = vand.u32 127, %v987_v21  ;;  %v1014_v29 = vand.u32 127, %v988_v22  ;;  %v1056_v33 = vperm.slane %v1045_v25, 0  ;;  %v6685_v36 = vld [vmem:[#allocation10 + $0x18] sm:$0xf0] }
 0x145   : > { %v1057_v34 = vperm.slane %v1045_v25, 1  ;;  %v1058_v35 = vperm.slane %v1045_v25, 2  ;;  %v1059_v40 = vperm.slane %v1045_v25, 3  ;;  %v9274_v44 = vperm.slane %v1042_v31, 0  ;;  %v6918_v25 = vld [vmem:[#allocation10 + $0xe0] sm:$0xf] }
 0x146   : > { %vm9256_vm1 = vcmp.lt.s32.totalorder %v1000_v60, 64  ;;  %vm9260_vm2 = vcmp.lt.s32.totalorder %v1007_v63, 64  ;;  %vm9264_vm3 = vcmp.lt.s32.totalorder %v1014_v29, 64  ;;  %v1064_v41 = vsel %vm1037_vm0, %v1047_v26, %v1056_v33  ;;  %v1402_v49 = vld [vmem:[#allocation2 + $0x20] ss:$8 sm:$0xf] }
 0x147   : > { %1947 = vmatpush.bf16.msra.mxu0 %v6692_v10  ;;  %1985 = vmatpush.bf16.msra.mxu3 %v6720_v16  ;;  %v1065_v42 = vsel %vm9256_vm1, %v1048_v27, %v1057_v34  ;;  %v1066_v43 = vsel %vm9260_vm2, %v1049_v30, %v1058_v35  ;;  %v1067_v45 = vsel %vm9264_vm3, %v1050_v32, %v1059_v40  ;;  %v9278_v46 = vperm.slane %v1042_v31, 1  ;;  %v1404_v55 = vld [vmem:[#allocation2 + $0x27] ss:$8 sm:$0xf]  ;;  %v8133_v26 = vld [vmem:[#allocation10 + $0xec] sm:$0xf0] }
 0x148   : > { %1960 = vmatpush.bf16.msra.mxu1 %v6696_v11  ;;  %1973 = vmatpush.bf16.msra.mxu2 %v6700_v12  ;;  %v9280_v47 = vperm.slane %v1042_v31, 2  ;;  %v9282_v48 = vperm.slane %v1042_v31, 3  ;;  %v6688_v50 = vor.u32 %v9251_v28, %v6685_v36  ;;  %v1077_v51 = vadd.f32 %v9274_v44, %v1064_v41  ;;  %v8131_v27 = vld [vmem:[#allocation10 + $0xe4] sm:$0xf]  ;;  %v6920_v60 = vld [vmem:[#allocation10 + $0xf0] sm:$0xf0] }
 0x149   : > { %vm1090_vm5 = vcmask 1042434   ;;  %v1078_v52 = vadd.f32 %v9278_v46, %v1065_v42  ;;  %vm1092_vm6 = vcmask 1041408   ;;  %v1406_v56 = vperm.slane %v1402_v49, 0  ;;  %v6926_v63 = vld [vmem:[#allocation10 + $0xe8] sm:$0xf] }
 0x14a   : > { %v1079_v53 = vadd.f32 %v9280_v47, %v1066_v43  ;;  %v1080_v54 = vadd.f32 %v9282_v48, %v1067_v45  ;;  %v1407_v57 = vperm.slane %v1402_v49, 1  ;;  %v1408_v59 = vperm.slane %v1402_v49, 2  ;;  %v8134_v29 = vld [vmem:[#allocation10 + $0xf4] sm:$0xf0]  ;;  %v8132_v32 = vld [vmem:[#allocation10 + $0xec] sm:$0xf] }
 0x14b   : > { %1948 = vmatpush.bf16.msra.mxu0 %v6676_v17  ;;  %1986 = vmatpush.bf16.msra.mxu3 %v6704_v24  ;;  %v1409_v61 = vperm.slane %v1402_v49, 3  ;;  %v1085_v62 = vrot.slane %v1078_v52, 7  ;;  %v1415_v2 = vperm.slane %v1404_v55, 0  ;;  %vm9290_vm7 = vcmp.lt.s32.totalorder %v984_v58, 512  ;;  %v6928_v33 = vld [vmem:[#allocation10 + $0xf8] sm:$0xf0] }
 0x14c   : > { %1961 = vmatpush.bf16.msra.mxu1 %v6680_v18  ;;  %1974 = vmatpush.bf16.msra.mxu2 %v6684_v19  ;;  %v1086_v0 = vrot.slane %v1079_v53, 6  ;;  %v1087_v1 = vrot.slane %v1080_v54, 5  ;;  %v1416_v4 = vperm.slane %v1404_v55, 1  ;;  %v1417_v5 = vperm.slane %v1404_v55, 2  ;;  %v6902_v35 = vld [vmem:[#allocation10 + $0xc0] sm:$0xf] }
 0x14d   : > { %v1418_v6 = vperm.slane %v1404_v55, 3  ;;  %v8893_v7 = vmov 0   ;;  %v1089_v8 = vsel %vm1088_vm4, %v1077_v51, %v1085_v62  ;;  %v1423_v10 = vsel %vm1037_vm0, %v1406_v56, %v1415_v2  ;;  %v8129_v36 = vld [vmem:[#allocation10 + $0xcc] sm:$0xf0]  ;;  %v8127_v40 = vld [vmem:[#allocation10 + $0xc4] sm:$0xf] }
 0x14e   : > { %1949 = vmatmul.bf16.vlgmr.msra.gmra.mxu0 %v8893_v7  ;;  %v1091_v9 = vsel %vm1090_vm5, %v1086_v0, %v1087_v1  ;;  %v1424_v11 = vsel %vm9256_vm1, %v1407_v57, %v1416_v4  ;;  %v1425_v12 = vsel %vm9260_vm2, %v1408_v59, %v1417_v5  ;;  %v1427_v14 = vadd.f32 %v1423_v10, %v9274_v44  ;;  %v6904_v42 = vld [vmem:[#allocation10 + $0xd0] sm:$0xf0]  ;;  %v6910_v43 = vld [vmem:[#allocation10 + $0xc8] sm:$0xf]  ;;  %v8130_v45 = vld [vmem:[#allocation10 + $0xd4] sm:$0xf0] }
 0x14f   : > { %1962 = vmatmul.bf16.vlgmr.msra.gmra.mxu1 %v8893_v7  ;;  %1975 = vmatmul.bf16.vlgmr.msra.gmra.mxu2 %v8893_v7  ;;  %v1093_v58 = vsel %vm1092_vm6, %v1089_v8, %v1091_v9  ;;  %v1426_v13 = vsel %vm9264_vm3, %v1409_v61, %v1418_v6  ;;  %v1428_v16 = vadd.f32 %v1424_v11, %v9278_v46  ;;  %v8128_v51 = vld [vmem:[#allocation10 + $0xcc] sm:$0xf]  ;;  %v6912_v52 = vld [vmem:[#allocation10 + $0xd8] sm:$0xf0]  ;;  %v6886_v54 = vld [vmem:[#allocation10 + $0xa0] sm:$0xf] }
 0x150   : > { %1987 = vmatpush.bf16.msra.mxu3 %v6688_v50  ;;  %1099 = vst.msk [vmem:[#allocation3] ss:$8 sm:$0xf] %vm9290_vm7, %v1093_v58  ;;  %v1429_v17 = vadd.f32 %v1425_v12, %v9280_v47  ;;  %v1430_v18 = vadd.f32 %v1426_v13, %v9282_v48  ;;  %v6919_v28 = vor.u32 %v8133_v26, %v6918_v25  ;;  %v8125_v55 = vld [vmem:[#allocation10 + $0xac] sm:$0xf0] }
 0x151   : > { %v1435_v19 = vrot.slane %v1428_v16, 7  ;;  %v6923_v30 = vor.u32 %v8131_v27, %v6920_v60  ;;  %v6927_v31 = vor.u32 %v8134_v29, %v6926_v63  ;;  %v6931_v34 = vor.u32 %v8132_v32, %v6928_v33  ;;  %v8123_v56 = vld [vmem:[#allocation10 + $0xa4] sm:$0xf]  ;;  %v6888_v59 = vld [vmem:[#allocation10 + $0xb0] sm:$0xf0] }
 0x152   : > { %v1436_v20 = vrot.slane %v1429_v17, 6  ;;  %v1437_v21 = vrot.slane %v1430_v18, 5  ;;  %2258 = vmatpush.bf16.msrb.mxu0 %v6919_v28  ;;  %v6903_v41 = vor.u32 %v8129_v36, %v6902_v35  ;;  %v6907_v49 = vor.u32 %v8127_v40, %v6904_v42  ;;  %v6894_v61 = vld [vmem:[#allocation10 + $0xa8] sm:$0xf]  ;;  %v8126_v0 = vld [vmem:[#allocation10 + $0xb4] sm:$0xf0] }
 0x153   : > { %1988 = vmatmul.bf16.vlgmr.msra.gmra.mxu3 %v8893_v7  ;;  %v1438_v22 = vsel %vm1088_vm4, %v1427_v14, %v1435_v19  ;;  %2271 = vmatpush.bf16.msrb.mxu1 %v6923_v30  ;;  %v6911_v50 = vor.u32 %v8130_v45, %v6910_v43  ;;  %v6915_v53 = vor.u32 %v8128_v51, %v6912_v52  ;;  %v8124_v1 = vld [vmem:[#allocation10 + $0xac] sm:$0xf]  ;;  %v6896_v2 = vld [vmem:[#allocation10 + $0xb8] sm:$0xf0]  ;;  %v6870_v6 = vld [vmem:[#allocation10 + $0x80] sm:$0xf] }
 0x154   : > { %v1439_v23 = vsel %vm1090_vm5, %v1436_v20, %v1437_v21  ;;  %2284 = vmatpush.bf16.msrb.mxu2 %v6927_v31  ;;  %2297 = vmatpush.bf16.msrb.mxu3 %v6931_v34  ;;  %v6887_v57 = vor.u32 %v8125_v55, %v6886_v54  ;;  %v6891_v62 = vor.u32 %v8123_v56, %v6888_v59  ;;  %v8121_v8 = vld [vmem:[#allocation10 + $0x8c] sm:$0xf0]  ;;  %v8119_v9 = vld [vmem:[#allocation10 + $0x84] sm:$0xf]  ;;  %v6872_v58 = vld [vmem:[#allocation10 + $0x90] sm:$0xf0] }
 0x155   : > { %v1440_v24 = vsel %vm1092_vm6, %v1438_v22, %v1439_v23  ;;  %v6895_v4 = vor.u32 %v8126_v0, %v6894_v61  ;;  %v6899_v5 = vor.u32 %v8124_v1, %v6896_v2  ;;  %v6871_v10 = vor.u32 %v8121_v8, %v6870_v6  ;;  %v6878_v11 = vld [vmem:[#allocation10 + $0x88] sm:$0xf]  ;;  %v8122_v12 = vld [vmem:[#allocation10 + $0x94] sm:$0xf0]  ;;  %v8120_v16 = vld [vmem:[#allocation10 + $0x8c] sm:$0xf] }
 0x156   : > { %1443 = vst.msk [vmem:[#allocation3 + $0x1] ss:$8 sm:$0xf] %vm9290_vm7, %v1440_v24  ;;  %2259 = vmatpush.bf16.msrb.mxu0 %v6903_v41  ;;  %v6875_v13 = vor.u32 %v8119_v9, %v6872_v58  ;;  %v6879_v14 = vor.u32 %v8122_v12, %v6878_v11  ;;  %v6880_v17 = vld [vmem:[#allocation10 + $0x98] sm:$0xf0] }
 0x157   : > { %2272 = vmatpush.bf16.msrb.mxu1 %v6907_v49  ;;  %v6883_v19 = vor.u32 %v8120_v16, %v6880_v17  ;;  %v6854_v20 = vld [vmem:[#allocation10 + $0x60] sm:$0xf]  ;;  %v8117_v21 = vld [vmem:[#allocation10 + $0x6c] sm:$0xf0]  ;;  %v8115_v22 = vld [vmem:[#allocation10 + $0x64] sm:$0xf] }
 0x158   : > { %2285 = vmatpush.bf16.msrb.mxu2 %v6911_v50  ;;  %2298 = vmatpush.bf16.msrb.mxu3 %v6915_v53  ;;  %v6855_v23 = vor.u32 %v8117_v21, %v6854_v20  ;;  %v6856_v24 = vld [vmem:[#allocation10 + $0x70] sm:$0xf0]  ;;  %v6862_v25 = vld [vmem:[#allocation10 + $0x68] sm:$0xf]  ;;  %v8118_v26 = vld [vmem:[#allocation10 + $0x74] sm:$0xf0] }
 0x159   : > { %v6859_v28 = vor.u32 %v8115_v22, %v6856_v24  ;;  %v6863_v60 = vor.u32 %v8118_v26, %v6862_v25  ;;  %v8116_v63 = vld [vmem:[#allocation10 + $0x6c] sm:$0xf]  ;;  %v6864_v29 = vld [vmem:[#allocation10 + $0x78] sm:$0xf0]  ;;  %v6838_v34 = vld [vmem:[#allocation10 + $0x40] sm:$0xf] }
 0x15a   : > { %2260 = vmatpush.bf16.msrb.mxu0 %v6887_v57  ;;  %v6867_v31 = vor.u32 %v8116_v63, %v6864_v29  ;;  %v8113_v35 = vld [vmem:[#allocation10 + $0x4c] sm:$0xf0]  ;;  %v8111_v36 = vld [vmem:[#allocation10 + $0x44] sm:$0xf]  ;;  %v6840_v42 = vld [vmem:[#allocation10 + $0x50] sm:$0xf0] }
 0x15b   : > { %2273 = vmatpush.bf16.msrb.mxu1 %v6891_v62  ;;  %v6839_v41 = vor.u32 %v8113_v35, %v6838_v34  ;;  %v6846_v43 = vld [vmem:[#allocation10 + $0x48] sm:$0xf]  ;;  %v8114_v45 = vld [vmem:[#allocation10 + $0x54] sm:$0xf0]  ;;  %v6843_v51 = vor.u32 %v8111_v36, %v6840_v42  ;;  %v8112_v53 = vld [vmem:[#allocation10 + $0x4c] sm:$0xf] }
 0x15c   : > { %2286 = vmatpush.bf16.msrb.mxu2 %v6895_v4  ;;  %2299 = vmatpush.bf16.msrb.mxu3 %v6899_v5  ;;  %v6847_v52 = vor.u32 %v8114_v45, %v6846_v43  ;;  %v6848_v54 = vld [vmem:[#allocation10 + $0x58] sm:$0xf0]  ;;  %v6822_v57 = vld [vmem:[#allocation10 + $0x20] sm:$0xf]  ;;  %v8109_v59 = vld [vmem:[#allocation10 + $0x2c] sm:$0xf0] }
 0x15d   : > { %v1745_v18 = vld [vmem:[#allocation3] sm:$0x3]  ;;  %v1746_v27 = vld [vmem:[#allocation3 + $0x8] sm:$0x3]  ;;  %v1747_v50 = vld [vmem:[#allocation3 + $0x10] sm:$0x3]  ;;  %v6851_v56 = vor.u32 %v8112_v53, %v6848_v54  ;;  %v6823_v61 = vor.u32 %v8109_v59, %v6822_v57 }
 0x15e   : > { %2261 = vmatpush.bf16.msrb.mxu0 %v6871_v10  ;;  %v8107_v62 = vld [vmem:[#allocation10 + $0x24] sm:$0xf]  ;;  %v6824_v0 = vld [vmem:[#allocation10 + $0x30] sm:$0xf0]  ;;  %v6830_v1 = vld [vmem:[#allocation10 + $0x28] sm:$0xf] }
 0x15f   : > { %2274 = vmatpush.bf16.msrb.mxu1 %v6875_v13  ;;  %v6827_v2 = vor.u32 %v8107_v62, %v6824_v0  ;;  %v8110_v4 = vld [vmem:[#allocation10 + $0x34] sm:$0xf0]  ;;  %v8108_v5 = vld [vmem:[#allocation10 + $0x2c] sm:$0xf]  ;;  %v6832_v6 = vld [vmem:[#allocation10 + $0x38] sm:$0xf0] }
 0x160   : > { %2287 = vmatpush.bf16.msrb.mxu2 %v6879_v14  ;;  %2300 = vmatpush.bf16.msrb.mxu3 %v6883_v19  ;;  %v6831_v9 = vor.u32 %v8110_v4, %v6830_v1  ;;  %v6835_v10 = vor.u32 %v8108_v5, %v6832_v6  ;;  %v6806_v58 = vld [vmem:[#allocation10] sm:$0xf]  ;;  %v8105_v11 = vld [vmem:[#allocation10 + $0xc] sm:$0xf0]  ;;  %v8103_v12 = vld [vmem:[#allocation10 + $0x4] sm:$0xf] }
 0x161   : > { %v6807_v16 = vor.u32 %v8105_v11, %v6806_v58  ;;  %v6808_v17 = vld [vmem:[#allocation10 + $0x10] sm:$0xf0]  ;;  %v8106_v19 = vld [vmem:[#allocation10 + $0x14] sm:$0xf0]  ;;  %v8104_v22 = vld [vmem:[#allocation10 + $0xc] sm:$0xf] }
 0x162   : > { %2262 = vmatpush.bf16.msrb.mxu0 %v6855_v23  ;;  %v6811_v21 = vor.u32 %v8103_v12, %v6808_v17  ;;  %v6816_v23 = vld [vmem:[#allocation10 + $0x18] sm:$0xf0]  ;;  %v7835_v3 = vld [vmem:[#allocation12 + $0xe0] sm:$0xf] }
 0x163   : > { %2275 = vmatpush.bf16.msrb.mxu1 %v6859_v28  ;;  %v6819_v26 = vor.u32 %v8104_v22, %v6816_v23 }
 0x164   : > { %2288 = vmatpush.bf16.msrb.mxu2 %v6863_v60  ;;  %2301 = vmatpush.bf16.msrb.mxu3 %v6867_v31 }
 0x166   : > { %2263 = vmatpush.bf16.msrb.mxu0 %v6839_v41 }
 0x167   : > { %2276 = vmatpush.bf16.msrb.mxu1 %v6843_v51 }
 0x168   : > { %2289 = vmatpush.bf16.msrb.mxu2 %v6847_v52  ;;  %2302 = vmatpush.bf16.msrb.mxu3 %v6851_v56 }
 0x16a   : > { %2264 = vmatpush.bf16.msrb.mxu0 %v6823_v61 }
 0x16b   : > { %2277 = vmatpush.bf16.msrb.mxu1 %v6827_v2 }
 0x16c   : > { %2290 = vmatpush.bf16.msrb.mxu2 %v6831_v9  ;;  %2303 = vmatpush.bf16.msrb.mxu3 %v6835_v10  ;;  %v1446_v10 = vld [vmem:[#allocation2 + $0x21] ss:$8 sm:$0xf] }
 0x16e   : > { %2265 = vmatpush.bf16.msrb.mxu0 %v6807_v16 }
 0x16f   : > { %2278 = vmatpush.bf16.msrb.mxu1 %v6811_v21 }
 0x170   : > { %2304 = vmatpush.bf16.msrb.mxu3 %v6819_v26 }
 0x1cb   : > { %v1950_v30 = vpop.f32.mrf.mxu0 }
 0x1cc   : > { %v1993_v32 = vadd.f32 %v1950_v30, %v1745_v18  ;;  %v1963_v33 = vpop.f32.mrf.mxu1  ;;  %v6814_v18 = vld [vmem:[#allocation10 + $0x8] sm:$0xf]  ;;  %v1748_v30 = vld [vmem:[#allocation3 + $0x18] sm:$0x3] }
 0x1cd   : > { %v1994_v40 = vadd.f32 %v1963_v33, %v1746_v27  ;;  %v6815_v25 = vor.u32 %v8106_v19, %v6814_v18  ;;  %v1102_v33 = vld [vmem:[#allocation2 + $0x1] ss:$8 sm:$0xf]  ;;  %v1450_v19 = vperm.slane %v1446_v10, 0 }
 0x1ce   : > { %v6801_v49 = vmul.f32 -1.442695, %v1993_v32  ;;  %v1106_v41 = vperm.slane %v1102_v33, 0  ;;  %v1107_v43 = vperm.slane %v1102_v33, 1  ;;  %v1108_v45 = vperm.slane %v1102_v33, 2 }
 0x1cf   : > { %v6802_v55 = vmul.f32 -1.442695, %v1994_v40  ;;  %2291 = vmatpush.bf16.msrb.mxu2 %v6815_v25  ;;  %v1104_v40 = vld [vmem:[#allocation2 + $0x6] ss:$8 sm:$0xf] }
 0x1d0   : > { %8463 = vpow2.f32 %v6801_v49  ;;  %v1109_v49 = vperm.slane %v1102_v33, 3  ;;  %v1116_v53 = vperm.slane %v1104_v40, 1  ;;  %v1117_v54 = vperm.slane %v1104_v40, 2 }
 0x1d1   : > { %8465 = vpow2.f32 %v6802_v55  ;;  %v1118_v55 = vperm.slane %v1104_v40, 3 }
 0x1d2   : > { %v1976_v8 = vpop.f32.mrf.mxu2  ;;  %v1124_v6 = vsel %vm9256_vm1, %v1107_v43, %v1116_v53 }
 0x1d3   : > { %v1995_v13 = vadd.f32 %v1976_v8, %v1747_v50  ;;  %v1952_v14 = vpop.f32.mrf.mxu0  ;;  %v1115_v50 = vperm.slane %v1104_v40, 0  ;;  %v1125_v8 = vsel %vm9260_vm2, %v1108_v45, %v1117_v54  ;;  %v1126_v9 = vsel %vm9264_vm3, %v1109_v49, %v1118_v55 }
 0x1d4   : > { %v1965_v20 = vpop.f32.mrf.mxu1  ;;  %v1128_v14 = vadd.f32 %v1124_v6, %v9278_v46  ;;  %v1129_v16 = vadd.f32 %v1125_v8, %v9280_v47  ;;  %v1130_v17 = vadd.f32 %v1126_v9, %v9282_v48 }
 0x1d5   : > { %v6803_v24 = vmul.f32 -1.442695, %v1995_v13  ;;  %v1123_v0 = vsel %vm1037_vm0, %v1106_v41, %v1115_v50  ;;  %v1451_v20 = vperm.slane %v1446_v10, 1 }
 0x1d6   : > { %v8464_v27 = vpop.eup %8463  ;;  %v1989_v28 = vpop.f32.mrf.mxu3  ;;  %v1127_v12 = vadd.f32 %v1123_v0, %v9274_v44  ;;  %v1135_v23 = vrot.slane %v1128_v14, 7  ;;  %v1137_v25 = vrot.slane %v1130_v17, 5  ;;  %v7049_v17 = vld [vmem:[#allocation10 + $0xe0] sm:$0xf] }
 0x1d7   : > { %v8466_v60 = vpop.eup %8465  ;;  %v9320_v63 = vadd.f32 1.0, %v8464_v27  ;;  %8467 = vpow2.f32 %v6803_v24  ;;  %v1996_v35 = vadd.f32 %v1989_v28, %v1748_v30  ;;  %v1136_v24 = vrot.slane %v1129_v16, 6 }
 0x1d8   : > { %v9322_v29 = vadd.f32 1.0, %v8466_v60  ;;  %v1448_v60 = vld [vmem:[#allocation2 + $0x26] ss:$8 sm:$0xf]  ;;  %v1452_v30 = vperm.slane %v1446_v10, 2  ;;  %v1138_v33 = vsel %vm1088_vm4, %v1127_v12, %v1135_v23 }
 0x1d9   : > { %8469 = vrcp.f32 %v9320_v63  ;;  %v2018_v32 = vand.u32 2147483647, %v9320_v63  ;;  %v2020_v36 = vand.u32 2147483648, %v9320_v63  ;;  %vm2014_vm9 = vweird.f32 %v9320_v63  ;;  %v8166_v23 = vld [vmem:[#allocation10 + $0xf4] sm:$0xf0] }
 0x1da   : > { %8471 = vrcp.f32 %v9322_v29  ;;  %v1978_v31 = vpop.f32.mrf.mxu2  ;;  %v2035_v34 = vand.u32 2147483648, %v9322_v29  ;;  %vm2029_vm8 = vweird.f32 %v9322_v29  ;;  %v2033_v57 = vand.u32 2147483647, %v9322_v29 }
 0x1db   : > { %vm9336_vm10 = vcmp.eq.f32.partialorder %v2018_v32, 8.507059e+37  ;;  %v2021_v4 = vor.u32 1.1754944e-38, %v2020_v36  ;;  %v1453_v31 = vperm.slane %v1446_v10, 3  ;;  %v1461_v45 = vperm.slane %v1448_v60, 2 }
 0x1dc   : > { %v2036_v2 = vor.u32 1.1754944e-38, %v2035_v34  ;;  %vm9349_vm12 = vcmp.eq.f32.partialorder %v2033_v57, 8.507059e+37  ;;  %v1139_v34 = vsel %vm1090_vm5, %v1136_v24, %v1137_v25 }
 0x1dd   : > { %v8468_v42 = vpop.eup %8467  ;;  %v1140_v41 = vsel %vm1092_vm6, %v1138_v33, %v1139_v34  ;;  %v1469_v55 = vsel %vm9260_vm2, %v1452_v30, %v1461_v45  ;;  %v8161_v30 = vld [vmem:[#allocation10 + $0xcc] sm:$0xf0]  ;;  %v7035_v33 = vld [vmem:[#allocation10 + $0xd0] sm:$0xf0]  ;;  %v7041_v34 = vld [vmem:[#allocation10 + $0xc8] sm:$0xf] }
 0x1de   : > { %v9329_v51 = vadd.f32 1.0, %v8468_v42  ;;  %v1991_v52 = vpop.f32.mrf.mxu3  ;;  %1143 = vst.msk [vmem:[#allocation3 + $0x2] ss:$8 sm:$0xf] %vm9290_vm7, %v1140_v41  ;;  %v1473_v0 = vadd.f32 %v1469_v55, %v9280_v47  ;;  %v7043_v41 = vld [vmem:[#allocation10 + $0xd8] sm:$0xf0] }
 0x1df   : > { %v8470_v56 = vpop.eup %8469  ;;  %v1462_v52 = vperm.slane %v1448_v60, 3  ;;  %v8155_v45 = vld [vmem:[#allocation10 + $0xa4] sm:$0xf] }
 0x1e0   : > { %v8472_v59 = vpop.eup %8471  ;;  %v2010_v61 = vmul.f32 %v8470_v56, %v9320_v63  ;;  %8473 = vrcp.f32 %v9329_v51  ;;  %vm2015_vm11 = vweird.f32 %v8470_v56  ;;  %v1480_v6 = vrot.slane %v1473_v0, 6  ;;  %v8153_v0 = vld [vmem:[#allocation10 + $0x8c] sm:$0xf0] }
 0x1e1   : > { %v2025_v1 = vmul.f32 %v8472_v59, %v9322_v29  ;;  %8475 = vtanh.f32 %v1996_v35  ;;  %vm2030_vm13 = vweird.f32 %v8472_v59  ;;  %vm2016_vm14 = vmor %vm2014_vm9, %vm2015_vm11  ;;  %v1459_v35 = vperm.slane %v1448_v60, 0 }
 0x1e2   : > { %v2011_v5 = vsub.f32 1.0, %v2010_v61  ;;  %vm2031_vm15 = vmor %vm2029_vm8, %vm2030_vm13  ;;  %v1460_v29 = vperm.slane %v1448_v60, 1  ;;  %v1470_v57 = vsel %vm9264_vm3, %v1453_v31, %v1462_v52  ;;  %vm2044_vm9 = vweird.f32 %v9329_v51  ;;  %v7033_v60 = vld [vmem:[#allocation10 + $0xc0] sm:$0xf]  ;;  %v8159_v31 = vld [vmem:[#allocation10 + $0xc4] sm:$0xf] }
 0x1e3   : > { %v2026_v58 = vsub.f32 1.0, %v2025_v1  ;;  %v1467_v53 = vsel %vm1037_vm0, %v1450_v19, %v1459_v35  ;;  %v1474_v1 = vadd.f32 %v1470_v57, %v9282_v48  ;;  %v8163_v19 = vld [vmem:[#allocation10 + $0xe4] sm:$0xf]  ;;  %v8162_v35 = vld [vmem:[#allocation10 + $0xd4] sm:$0xf0] }
 0x1e4   : > { %v2012_v13 = vmul.f32 %v8470_v56, %v2011_v5  ;;  %v1468_v54 = vsel %vm9256_vm1, %v1451_v20, %v1460_v29  ;;  %v2048_v5 = vand.u32 2147483647, %v9329_v51  ;;  %v8157_v29 = vld [vmem:[#allocation10 + $0xac] sm:$0xf0]  ;;  %v7025_v52 = vld [vmem:[#allocation10 + $0xa8] sm:$0xf] }
 0x1e5   : > { %v2027_v18 = vmul.f32 %v8472_v59, %v2026_v58  ;;  %v1472_v61 = vadd.f32 %v1468_v54, %v9278_v46  ;;  %v1481_v8 = vrot.slane %v1474_v1, 5  ;;  %v8156_v57 = vld [vmem:[#allocation10 + $0xac] sm:$0xf]  ;;  %v8151_v1 = vld [vmem:[#allocation10 + $0x84] sm:$0xf] }
 0x1e6   : > { %v8474_v21 = vpop.eup %8473  ;;  %v2013_v22 = vadd.f32 %v8470_v56, %v2012_v13  ;;  %vm2049_vm11 = vcmp.eq.f32.partialorder %v2048_v5, 8.507059e+37  ;;  %v7009_v5 = vld [vmem:[#allocation10 + $0x88] sm:$0xf] }
 0x1e7   : > { %v8476_v26 = vpop.eup %8475  ;;  %v2040_v27 = vmul.f32 %v8474_v21, %v9329_v51  ;;  %v2028_v28 = vadd.f32 %v8472_v59, %v2027_v18  ;;  %vm2045_vm8 = vweird.f32 %v8474_v21  ;;  %v1483_v58 = vsel %vm1090_vm5, %v1480_v6, %v1481_v8  ;;  %v8165_v18 = vld [vmem:[#allocation10 + $0xec] sm:$0xf0]  ;;  %v8154_v6 = vld [vmem:[#allocation10 + $0x94] sm:$0xf0] }
 0x1e8   : > { %v2017_v32 = vsel %vm2016_vm14, %v8470_v56, %v2013_v22  ;;  %v7050_v20 = vor.u32 %v8165_v18, %v7049_v17  ;;  %v7057_v22 = vld [vmem:[#allocation10 + $0xe8] sm:$0xf]  ;;  %v6985_v18 = vld [vmem:[#allocation10 + $0x60] sm:$0xf] }
 0x1e9   : > { %v2041_v36 = vsub.f32 1.0, %v2040_v27  ;;  %v2022_v40 = vsel %vm9336_vm10, %v2021_v4, %v2017_v32  ;;  %v2032_v63 = vsel %vm2031_vm15, %v8472_v59, %v2028_v28  ;;  %v1471_v59 = vadd.f32 %v1467_v53, %v9274_v44  ;;  %vm2046_vm10 = vmor %vm2044_vm9, %vm2045_vm8  ;;  %v7059_v27 = vld [vmem:[#allocation10 + $0xf8] sm:$0xf0]  ;;  %v8158_v53 = vld [vmem:[#allocation10 + $0xb4] sm:$0xf0] }
 0x1ea   : > { %v2037_v42 = vsel %vm9349_vm12, %v2036_v2, %v2032_v63  ;;  %v2056_v43 = vmul.f32 %v8476_v26, %v2022_v40  ;;  %v2050_v2 = vand.u32 2147483648, %v9329_v51  ;;  %v1479_v4 = vrot.slane %v1472_v61, 7  ;;  %v8164_v26 = vld [vmem:[#allocation10 + $0xec] sm:$0xf]  ;;  %2593 = vmatpush.bf16.msra.mxu0 %v7050_v20 }
 0x1eb   : > { %v2042_v49 = vmul.f32 %v8474_v21, %v2041_v36  ;;  %v2055_v50 = vmul.f32 0.0, %v2037_v42  ;;  %v7058_v25 = vor.u32 %v8166_v23, %v7057_v22  ;;  %v7062_v28 = vor.u32 %v8164_v26, %v7059_v27  ;;  %v8160_v63 = vld [vmem:[#allocation10 + $0xcc] sm:$0xf]  ;;  %v6987_v22 = vld [vmem:[#allocation10 + $0x70] sm:$0xf0] }
 0x1ec   : > { %v1482_v9 = vsel %vm1088_vm4, %v1471_v59, %v1479_v4  ;;  %v2051_v11 = vor.u32 1.1754944e-38, %v2050_v2  ;;  %v7034_v32 = vor.u32 %v8161_v30, %v7033_v60  ;;  %v7038_v36 = vor.u32 %v8159_v31, %v7035_v33  ;;  %v7027_v59 = vld [vmem:[#allocation10 + $0xb8] sm:$0xf0]  ;;  %v7003_v4 = vld [vmem:[#allocation10 + $0x90] sm:$0xf0] }
 0x1ed   : > { %v9379_v56 = vadd.f32 %v2056_v43, %v2055_v50  ;;  %v2043_v62 = vadd.f32 %v8474_v21, %v2042_v49  ;;  %v1484_v12 = vsel %vm1092_vm6, %v1482_v9, %v1483_v58  ;;  %2619 = vmatpush.bf16.msra.mxu2 %v7058_v25  ;;  %2632 = vmatpush.bf16.msra.mxu3 %v7062_v28  ;;  %v7017_v43 = vld [vmem:[#allocation10 + $0xa0] sm:$0xf]  ;;  %v7019_v50 = vld [vmem:[#allocation10 + $0xb0] sm:$0xf0]  ;;  %v7011_v58 = vld [vmem:[#allocation10 + $0x98] sm:$0xf0] }
 0x1ee   : > { %1487 = vst.msk [vmem:[#allocation3 + $0x3] ss:$8 sm:$0xf] %vm9290_vm7, %v1484_v12  ;;  %v7042_v40 = vor.u32 %v8162_v35, %v7041_v34  ;;  %2594 = vmatpush.bf16.msra.mxu0 %v7034_v32  ;;  %v7046_v42 = vor.u32 %v8160_v63, %v7043_v41  ;;  %v7018_v49 = vor.u32 %v8157_v29, %v7017_v43  ;;  %v6993_v23 = vld [vmem:[#allocation10 + $0x68] sm:$0xf] }
 0x1ef   : > { %8477 = vtanh.f32 %v9379_v56  ;;  %v2047_v10 = vsel %vm2046_vm10, %v8474_v21, %v2043_v62  ;;  %v7051_v21 = vld [vmem:[#allocation10 + $0xf0] sm:$0xf0]  ;;  %v7022_v54 = vor.u32 %v8155_v45, %v7019_v50  ;;  %v7026_v55 = vor.u32 %v8158_v53, %v7025_v52  ;;  %v7001_v62 = vld [vmem:[#allocation10 + $0x80] sm:$0xf]  ;;  %v8150_v27 = vld [vmem:[#allocation10 + $0x74] sm:$0xf0] }
 0x1f0   : > { %v2052_v14 = vsel %vm2049_vm11, %v2051_v11, %v2047_v10  ;;  %v7054_v24 = vor.u32 %v8163_v19, %v7051_v21  ;;  %v7030_v61 = vor.u32 %v8156_v57, %v7027_v59  ;;  %v7002_v2 = vor.u32 %v8153_v0, %v7001_v62  ;;  %v8152_v10 = vld [vmem:[#allocation10 + $0x8c] sm:$0xf]  ;;  %v8149_v19 = vld [vmem:[#allocation10 + $0x6c] sm:$0xf0]  ;;  %v8147_v21 = vld [vmem:[#allocation10 + $0x64] sm:$0xf] }
 0x1f1   : > { %2620 = vmatpush.bf16.msra.mxu2 %v7042_v40  ;;  %2633 = vmatpush.bf16.msra.mxu3 %v7046_v42  ;;  %v7006_v8 = vor.u32 %v8151_v1, %v7003_v4  ;;  %v7010_v9 = vor.u32 %v8154_v6, %v7009_v5  ;;  %v6986_v20 = vor.u32 %v8149_v19, %v6985_v18  ;;  %v8148_v28 = vld [vmem:[#allocation10 + $0x6c] sm:$0xf]  ;;  %v6995_v60 = vld [vmem:[#allocation10 + $0x78] sm:$0xf0]  ;;  %v6969_v35 = vld [vmem:[#allocation10 + $0x40] sm:$0xf] }
 0x1f2   : > { %2606 = vmatpush.bf16.msra.mxu1 %v7054_v24  ;;  %2595 = vmatpush.bf16.msra.mxu0 %v7018_v49  ;;  %v6990_v26 = vor.u32 %v8147_v21, %v6987_v22  ;;  %v6994_v30 = vor.u32 %v8150_v27, %v6993_v23  ;;  %v6998_v31 = vor.u32 %v8148_v28, %v6995_v60  ;;  %v8143_v40 = vld [vmem:[#allocation10 + $0x44] sm:$0xf]  ;;  %v6971_v63 = vld [vmem:[#allocation10 + $0x50] sm:$0xf0]  ;;  %v6977_v45 = vld [vmem:[#allocation10 + $0x48] sm:$0xf] }
 0x1f3   : > { %v6974_v29 = vor.u32 %v8143_v40, %v6971_v63  ;;  %v8146_v49 = vld [vmem:[#allocation10 + $0x54] sm:$0xf0]  ;;  %v8144_v50 = vld [vmem:[#allocation10 + $0x4c] sm:$0xf]  ;;  %v6979_v59 = vld [vmem:[#allocation10 + $0x58] sm:$0xf0] }
 0x1f4   : > { %v6978_v57 = vor.u32 %v8146_v49, %v6977_v45  ;;  %v6982_v62 = vor.u32 %v8144_v50, %v6979_v59  ;;  %v8141_v0 = vld [vmem:[#allocation10 + $0x2c] sm:$0xf0]  ;;  %v8139_v1 = vld [vmem:[#allocation10 + $0x24] sm:$0xf]  ;;  %v6939_v18 = vld [vmem:[#allocation10 + $0x10] sm:$0xf0] }
 0x1f5   : > { %v8478_v13 = vpop.eup %8477  ;;  %2621 = vmatpush.bf16.msra.mxu2 %v7026_v55  ;;  %2634 = vmatpush.bf16.msra.mxu3 %v7030_v61  ;;  %v2061_v11 = vld [vmem:[#allocation3] sm:$0xc]  ;;  %v2063_v34 = vld [vmem:[#allocation3 + $0x10] sm:$0xc]  ;;  %v6945_v22 = vld [vmem:[#allocation10 + $0x8] sm:$0xf] }
 0x1f6   : > { %v2059_v16 = vmul.f32 %v8478_v13, %v2052_v14  ;;  %2607 = vmatpush.bf16.msra.mxu1 %v7038_v36  ;;  %v2062_v13 = vld [vmem:[#allocation3 + $0x8] sm:$0xc]  ;;  %2596 = vmatpush.bf16.msra.mxu0 %v7002_v2  ;;  %v8145_v36 = vld [vmem:[#allocation10 + $0x4c] sm:$0xf0]  ;;  %v6953_v61 = vld [vmem:[#allocation10 + $0x20] sm:$0xf] }
 0x1f7   : > { %v6970_v43 = vor.u32 %v8145_v36, %v6969_v35  ;;  %v6955_v2 = vld [vmem:[#allocation10 + $0x30] sm:$0xf0]  ;;  %v6954_v5 = vor.u32 %v8141_v0, %v6953_v61  ;;  %v8138_v23 = vld [vmem:[#allocation10 + $0x14] sm:$0xf0]  ;;  %v6947_v28 = vld [vmem:[#allocation10 + $0x18] sm:$0xf0] }
 0x1f8   : > { %2060 = vst [vmem:[#allocation4] sm:$0x3] %v2059_v16  ;;  %v2065_v51 = vpack.c.bf16 %v2059_v16, %v2059_v16  ;;  %v7014_v16 = vor.u32 %v8152_v10, %v7011_v58  ;;  %v6958_v6 = vor.u32 %v8139_v1, %v6955_v2  ;;  %v8140_v10 = vld [vmem:[#allocation10 + $0x2c] sm:$0xf]  ;;  %v2064_v58 = vld [vmem:[#allocation3 + $0x18] sm:$0xc]  ;;  %v6946_v27 = vor.u32 %v8138_v23, %v6945_v22 }
 0x1f9   : > { %2622 = vmatpush.bf16.msra.mxu2 %v7010_v9  ;;  %v8142_v9 = vld [vmem:[#allocation10 + $0x34] sm:$0xf0] }
 0x1fa   : > { %2266 = vmatmul.bf16.vlgmr.msrb.gmra.mxu0 %v2065_v51  ;;  %2279 = vmatmul.bf16.vlgmr.msrb.gmra.mxu1 %v2065_v51 }
 0x1fb   : > { %2292 = vmatmul.bf16.vlgmr.msrb.gmra.mxu2 %v2065_v51  ;;  %2305 = vmatmul.bf16.vlgmr.msrb.gmra.mxu3 %v2065_v51 }
 0x1fc   : > { %2608 = vmatpush.bf16.msra.mxu1 %v7022_v54  ;;  %2635 = vmatpush.bf16.msra.mxu3 %v7014_v16 }
 0x1fd   : > { %2597 = vmatpush.bf16.msra.mxu0 %v6986_v20  ;;  %2623 = vmatpush.bf16.msra.mxu2 %v6994_v30 }
 0x200   : > { %2609 = vmatpush.bf16.msra.mxu1 %v7006_v8  ;;  %2636 = vmatpush.bf16.msra.mxu3 %v6998_v31  ;;  %v6961_v8 = vld [vmem:[#allocation10 + $0x28] sm:$0xf] }
 0x201   : > { %2598 = vmatpush.bf16.msra.mxu0 %v6970_v43  ;;  %2624 = vmatpush.bf16.msra.mxu2 %v6978_v57 }
 0x204   : > { %2610 = vmatpush.bf16.msra.mxu1 %v6990_v26  ;;  %2637 = vmatpush.bf16.msra.mxu3 %v6982_v62 }
 0x205   : > { %2599 = vmatpush.bf16.msra.mxu0 %v6954_v5 }
 0x208   : > { %2611 = vmatpush.bf16.msra.mxu1 %v6974_v29 }
 0x20c   : > { %2612 = vmatpush.bf16.msra.mxu1 %v6958_v6 }
 0x277   : > { %v2267_v12 = vpop.f32.mrf.mxu0  ;;  %v2280_v14 = vpop.f32.mrf.mxu1 }
 0x278   : > { %v2314_v51 = vrot.slane %v2267_v12, 6  ;;  %v2315_v17 = vrot.slane %v2280_v14, 6  ;;  %v6963_v12 = vld [vmem:[#allocation10 + $0x38] sm:$0xf0]  ;;  %v8137_v14 = vld [vmem:[#allocation10 + $0xc] sm:$0xf0] }
 0x27a   : > { %v2322_v24 = vadd.f32 %v2314_v51, %v2061_v11  ;;  %v2323_v25 = vadd.f32 %v2315_v17, %v2062_v13  ;;  %v6962_v11 = vor.u32 %v8142_v9, %v6961_v8  ;;  %v6937_v13 = vld [vmem:[#allocation10] sm:$0xf]  ;;  %v6966_v51 = vor.u32 %v8140_v10, %v6963_v12  ;;  %v8135_v17 = vld [vmem:[#allocation10 + $0x4] sm:$0xf] }
 0x27b   : > { %v6938_v20 = vor.u32 %v8137_v14, %v6937_v13  ;;  %v6942_v21 = vor.u32 %v8135_v17, %v6939_v18  ;;  %v1490_v12 = vld [vmem:[#allocation2 + $0x22] ss:$8 sm:$0xf] }
 0x27c   : > { %v6932_v32 = vmul.f32 -1.442695, %v2322_v24  ;;  %v6933_v33 = vmul.f32 -1.442695, %v2323_v25  ;;  %v8136_v24 = vld [vmem:[#allocation10 + $0xc] sm:$0xf]  ;;  %2625 = vmatpush.bf16.msra.mxu2 %v6962_v11  ;;  %2638 = vmatpush.bf16.msra.mxu3 %v6966_v51 }
 0x27d   : > { %2600 = vmatpush.bf16.msra.mxu0 %v6938_v20  ;;  %2613 = vmatpush.bf16.msra.mxu1 %v6942_v21  ;;  %v1494_v23 = vperm.slane %v1490_v12, 0 }
 0x27e   : > { %8479 = vpow2.f32 %v6932_v32  ;;  %v2293_v41 = vpop.f32.mrf.mxu2  ;;  %v2306_v42 = vpop.f32.mrf.mxu3  ;;  %v6950_v32 = vor.u32 %v8136_v24, %v6947_v28  ;;  %v1495_v24 = vperm.slane %v1490_v12, 1 }
 0x27f   : > { %8481 = vpow2.f32 %v6933_v33  ;;  %v2316_v52 = vrot.slane %v2293_v41, 6  ;;  %v2317_v53 = vrot.slane %v2306_v42, 6  ;;  %v2269_v54 = vpop.f32.mrf.mxu0  ;;  %v2282_v55 = vpop.f32.mrf.mxu1  ;;  %v1146_v41 = vld [vmem:[#allocation2 + $0x2] ss:$8 sm:$0xf] }
 0x280   : > { %2626 = vmatpush.bf16.msra.mxu2 %v6946_v27  ;;  %2639 = vmatpush.bf16.msra.mxu3 %v6950_v32  ;;  %v1148_v42 = vld [vmem:[#allocation2 + $0x5] ss:$8 sm:$0xf]  ;;  %v1150_v45 = vperm.slane %v1146_v41, 0  ;;  %v1151_v49 = vperm.slane %v1146_v41, 1  ;;  %v1153_v61 = vperm.slane %v1146_v41, 3 }
 0x281   : > { %v2324_v4 = vadd.f32 %v2316_v52, %v2063_v34  ;;  %v2325_v33 = vadd.f32 %v2317_v53, %v2064_v58  ;;  %v2385_v34 = vrot.slane %v9379_v56, 6  ;;  %v1152_v52 = vperm.slane %v1146_v41, 2 }
 0x282   : > { %v1159_v53 = vperm.slane %v1148_v42, 0  ;;  %v1160_v54 = vperm.slane %v1148_v42, 1  ;;  %v1161_v55 = vperm.slane %v1148_v42, 2  ;;  %v1162_v5 = vperm.slane %v1148_v42, 3 }
 0x283   : > { %v6934_v16 = vmul.f32 -1.442695, %v2324_v4 }
 0x284   : > { %v8480_v19 = vpop.eup %8479  ;;  %v1167_v6 = vsel %vm1037_vm0, %v1150_v45, %v1159_v53  ;;  %v1168_v8 = vsel %vm9256_vm1, %v1151_v49, %v1160_v54  ;;  %v1169_v11 = vsel %vm9260_vm2, %v1152_v52, %v1161_v55  ;;  %v1170_v14 = vsel %vm9264_vm3, %v1153_v61, %v1162_v5 }
 0x285   : > { %v8482_v25 = vpop.eup %8481  ;;  %v9396_v26 = vadd.f32 1.0, %v8480_v19  ;;  %8483 = vpow2.f32 %v6934_v16  ;;  %v1171_v16 = vadd.f32 %v1167_v6, %v9274_v44  ;;  %v1172_v51 = vadd.f32 %v1168_v8, %v9278_v46 }
 0x286   : > { %v9398_v60 = vadd.f32 1.0, %v8482_v25  ;;  %v2295_v30 = vpop.f32.mrf.mxu2  ;;  %v2308_v31 = vpop.f32.mrf.mxu3  ;;  %v1173_v18 = vadd.f32 %v1169_v11, %v9280_v47  ;;  %v1174_v19 = vadd.f32 %v1170_v14, %v9282_v48 }
 0x287   : > { %8485 = vrcp.f32 %v9396_v26  ;;  %v2347_v36 = vand.u32 2147483647, %v9396_v26  ;;  %v2349_v40 = vand.u32 2147483648, %v9396_v26  ;;  %vm2343_vm12 = vweird.f32 %v9396_v26  ;;  %v1492_v30 = vld [vmem:[#allocation2 + $0x25] ss:$8 sm:$0xf] }
 0x288   : > { %8487 = vrcp.f32 %v9398_v60  ;;  %v2364_v35 = vand.u32 2147483648, %v9398_v60  ;;  %v2362_v29 = vand.u32 2147483647, %v9398_v60  ;;  %vm2358_vm13 = vweird.f32 %v9398_v60 }
 0x289   : > { %8489 = vtanh.f32 %v2325_v33  ;;  %vm9414_vm14 = vcmp.eq.f32.partialorder %v2347_v36, 8.507059e+37  ;;  %v2350_v2 = vor.u32 1.1754944e-38, %v2349_v40  ;;  %v1179_v22 = vrot.slane %v1172_v51, 7 }
 0x28a   : > { %v2365_v0 = vor.u32 1.1754944e-38, %v2364_v35  ;;  %vm9422_vm8 = vcmp.eq.f32.partialorder %v2362_v29, 8.507059e+37  ;;  %v1180_v28 = vrot.slane %v1173_v18, 6  ;;  %v1496_v31 = vperm.slane %v1490_v12, 2  ;;  %v7180_v18 = vld [vmem:[#allocation10 + $0xe0] sm:$0xf] }
 0x28b   : > { %v8484_v63 = vpop.eup %8483  ;;  %v1181_v33 = vrot.slane %v1174_v19, 5  ;;  %v1182_v35 = vsel %vm1088_vm4, %v1171_v16, %v1179_v22  ;;  %v1497_v36 = vperm.slane %v1490_v12, 3  ;;  %v1503_v42 = vperm.slane %v1492_v30, 0  ;;  %v8197_v19 = vld [vmem:[#allocation10 + $0xec] sm:$0xf0] }
 0x28c   : > { %v9406_v43 = vadd.f32 1.0, %v8484_v63  ;;  %v1504_v49 = vperm.slane %v1492_v30, 1  ;;  %v1505_v53 = vperm.slane %v1492_v30, 2  ;;  %v1506_v54 = vperm.slane %v1492_v30, 3  ;;  %v7182_v22 = vld [vmem:[#allocation10 + $0xf0] sm:$0xf0] }
 0x28d   : > { %v8486_v50 = vpop.eup %8485  ;;  %v1183_v45 = vsel %vm1090_vm5, %v1180_v28, %v1181_v33  ;;  %v1511_v55 = vsel %vm1037_vm0, %v1494_v23, %v1503_v42  ;;  %v7188_v23 = vld [vmem:[#allocation10 + $0xe8] sm:$0xf]  ;;  %v8196_v28 = vld [vmem:[#allocation10 + $0xec] sm:$0xf]  ;;  %v7190_v30 = vld [vmem:[#allocation10 + $0xf8] sm:$0xf0] }
 0x28e   : > { %v8488_v57 = vpop.eup %8487  ;;  %v2339_v59 = vmul.f32 %v8486_v50, %v9396_v26  ;;  %8491 = vrcp.f32 %v9406_v43  ;;  %vm2344_vm15 = vweird.f32 %v8486_v50  ;;  %v1184_v52 = vsel %vm1092_vm6, %v1182_v35, %v1183_v45  ;;  %v8193_v33 = vld [vmem:[#allocation10 + $0xcc] sm:$0xf0]  ;;  %v8191_v35 = vld [vmem:[#allocation10 + $0xc4] sm:$0xf]  ;;  %v7174_v45 = vld [vmem:[#allocation10 + $0xd8] sm:$0xf0] }
 0x28f   : > { %v2354_v62 = vmul.f32 %v8488_v57, %v9398_v60  ;;  %v8490_v9 = vpop.eup %8489  ;;  %vm2359_vm9 = vweird.f32 %v8488_v57  ;;  %vm2345_vm10 = vmor %vm2343_vm12, %vm2344_vm15  ;;  %1187 = vst.msk [vmem:[#allocation3 + $0x4] ss:$8 sm:$0xf] %vm9290_vm7, %v1184_v52  ;;  %v1513_v56 = vsel %vm9260_vm2, %v1496_v31, %v1505_v53  ;;  %v2377_v5 = vand.u32 2147483647, %v9406_v43 }
 0x290   : > { %v2340_v4 = vsub.f32 1.0, %v2339_v59  ;;  %vm2360_vm11 = vmor %vm2358_vm13, %vm2359_vm9  ;;  %v1517_v1 = vadd.f32 %v1513_v56, %v9280_v47  ;;  %vm2373_vm13 = vweird.f32 %v9406_v43  ;;  %v7193_v31 = vor.u32 %v8196_v28, %v7190_v30  ;;  %v8187_v52 = vld [vmem:[#allocation10 + $0xa4] sm:$0xf]  ;;  %v8182_v30 = vld [vmem:[#allocation10 + $0x74] sm:$0xf0] }
 0x291   : > { %v2355_v10 = vsub.f32 1.0, %v2354_v62  ;;  %v1515_v62 = vadd.f32 %v1511_v55, %v9274_v44  ;;  %vm2378_vm15 = vcmp.eq.f32.partialorder %v2377_v5, 8.507059e+37  ;;  %v7156_v55 = vld [vmem:[#allocation10 + $0xa8] sm:$0xf] }
 0x292   : > { %v2341_v13 = vmul.f32 %v8486_v50, %v2340_v4  ;;  %v1524_v8 = vrot.slane %v1517_v1, 6  ;;  %2967 = vmatpush.bf16.msrb.mxu3 %v7193_v31  ;;  %v7132_v1 = vld [vmem:[#allocation10 + $0x80] sm:$0xf]  ;;  %v8180_v31 = vld [vmem:[#allocation10 + $0x6c] sm:$0xf] }
 0x293   : > { %v2356_v17 = vmul.f32 %v8488_v57, %v2355_v10 }
 0x294   : > { %v8492_v20 = vpop.eup %8491  ;;  %v2342_v21 = vadd.f32 %v8486_v50, %v2341_v13 }
 0x295   : > { %v2369_v25 = vmul.f32 %v8492_v20, %v9406_v43  ;;  %v2357_v27 = vadd.f32 %v8488_v57, %v2356_v17  ;;  %vm2374_vm12 = vweird.f32 %v8492_v20 }
 0x296   : > { %v2346_v32 = vsel %vm2345_vm10, %v8486_v50, %v2342_v21  ;;  %v7181_v21 = vor.u32 %v8197_v19, %v7180_v18  ;;  %v7116_v19 = vld [vmem:[#allocation10 + $0x60] sm:$0xf] }
 0x297   : > { %v2370_v40 = vsub.f32 1.0, %v2369_v25  ;;  %v2351_v63 = vsel %vm9414_vm14, %v2350_v2, %v2346_v32  ;;  %v2361_v41 = vsel %vm2360_vm11, %v8488_v57, %v2357_v27  ;;  %v1512_v57 = vsel %vm9256_vm1, %v1495_v24, %v1504_v49  ;;  %vm2375_vm14 = vmor %vm2373_vm13, %vm2374_vm12  ;;  %v8198_v24 = vld [vmem:[#allocation10 + $0xf4] sm:$0xf0]  ;;  %v7164_v32 = vld [vmem:[#allocation10 + $0xc0] sm:$0xf] }
 0x298   : > { %v2366_v26 = vsel %vm9422_vm8, %v2365_v0, %v2361_v41  ;;  %v2388_v29 = vmul.f32 %v8490_v9, %v2351_v63  ;;  %v1516_v0 = vadd.f32 %v1512_v57, %v9278_v46  ;;  %v2379_v2 = vand.u32 2147483648, %v9406_v43  ;;  %2928 = vmatpush.bf16.msrb.mxu0 %v7181_v21  ;;  %v7172_v63 = vld [vmem:[#allocation10 + $0xc8] sm:$0xf]  ;;  %v8194_v41 = vld [vmem:[#allocation10 + $0xd4] sm:$0xf0] }
 0x299   : > { %v2387_v60 = vmul.f32 %v2385_v34, %v2366_v26  ;;  %v2371_v50 = vmul.f32 %v8492_v20, %v2370_v40  ;;  %v1514_v34 = vsel %vm9264_vm3, %v1497_v36, %v1506_v54  ;;  %v7189_v27 = vor.u32 %v8198_v24, %v7188_v23  ;;  %v7166_v40 = vld [vmem:[#allocation10 + $0xd0] sm:$0xf0]  ;;  %v8190_v57 = vld [vmem:[#allocation10 + $0xb4] sm:$0xf0]  ;;  %v7124_v24 = vld [vmem:[#allocation10 + $0x68] sm:$0xf] }
 0x29a   : > { %v1518_v4 = vadd.f32 %v1514_v34, %v9282_v48  ;;  %v1523_v6 = vrot.slane %v1516_v0, 7  ;;  %v2380_v11 = vor.u32 1.1754944e-38, %v2379_v2  ;;  %v7165_v36 = vor.u32 %v8193_v33, %v7164_v32  ;;  %v7150_v54 = vld [vmem:[#allocation10 + $0xb0] sm:$0xf0]  ;;  %v8188_v34 = vld [vmem:[#allocation10 + $0xac] sm:$0xf] }
 0x29b   : > { %v9455_v59 = vadd.f32 %v2388_v29, %v2387_v60  ;;  %v2372_v61 = vadd.f32 %v8492_v20, %v2371_v50  ;;  %2954 = vmatpush.bf16.msrb.mxu2 %v7189_v27  ;;  %v7169_v42 = vor.u32 %v8191_v35, %v7166_v40  ;;  %v7173_v26 = vor.u32 %v8194_v41, %v7172_v63  ;;  %v8192_v29 = vld [vmem:[#allocation10 + $0xcc] sm:$0xf]  ;;  %v7148_v60 = vld [vmem:[#allocation10 + $0xa0] sm:$0xf]  ;;  %v8189_v50 = vld [vmem:[#allocation10 + $0xac] sm:$0xf0] }
 0x29c   : > { %v1525_v9 = vrot.slane %v1518_v4, 5  ;;  %v1526_v58 = vsel %vm1088_vm4, %v1515_v62, %v1523_v6  ;;  %2929 = vmatpush.bf16.msrb.mxu0 %v7165_v36  ;;  %v7177_v49 = vor.u32 %v8192_v29, %v7174_v45  ;;  %v7149_v53 = vor.u32 %v8189_v50, %v7148_v60  ;;  %v7158_v62 = vld [vmem:[#allocation10 + $0xb8] sm:$0xf0]  ;;  %v8185_v2 = vld [vmem:[#allocation10 + $0x8c] sm:$0xf0] }
 0x29d   : > { %8493 = vtanh.f32 %v9455_v59  ;;  %v2376_v10 = vsel %vm2375_vm14, %v8492_v20, %v2372_v61  ;;  %v8195_v20 = vld [vmem:[#allocation10 + $0xe4] sm:$0xf]  ;;  %v7153_v61 = vor.u32 %v8187_v52, %v7150_v54  ;;  %v7157_v56 = vor.u32 %v8190_v57, %v7156_v55  ;;  %v7134_v6 = vld [vmem:[#allocation10 + $0x90] sm:$0xf0]  ;;  %v7126_v32 = vld [vmem:[#allocation10 + $0x78] sm:$0xf0] }
 0x29e   : > { %v1527_v12 = vsel %vm1090_vm5, %v1524_v8, %v1525_v9  ;;  %v2381_v16 = vsel %vm2378_vm15, %v2380_v11, %v2376_v10  ;;  %v7185_v25 = vor.u32 %v8195_v20, %v7182_v22  ;;  %2968 = vmatpush.bf16.msrb.mxu3 %v7177_v49  ;;  %v7161_v0 = vor.u32 %v8188_v34, %v7158_v62  ;;  %v8183_v4 = vld [vmem:[#allocation10 + $0x84] sm:$0xf]  ;;  %v7140_v8 = vld [vmem:[#allocation10 + $0x88] sm:$0xf]  ;;  %v8186_v9 = vld [vmem:[#allocation10 + $0x94] sm:$0xf0] }
 0x29f   : > { %v1528_v13 = vsel %vm1092_vm6, %v1526_v58, %v1527_v12  ;;  %2955 = vmatpush.bf16.msrb.mxu2 %v7173_v26  ;;  %v7133_v5 = vor.u32 %v8185_v2, %v7132_v1  ;;  %v7137_v10 = vor.u32 %v8183_v4, %v7134_v6  ;;  %v7141_v58 = vor.u32 %v8186_v9, %v7140_v8  ;;  %v8184_v11 = vld [vmem:[#allocation10 + $0x8c] sm:$0xf]  ;;  %v7142_v12 = vld [vmem:[#allocation10 + $0x98] sm:$0xf0]  ;;  %v8181_v20 = vld [vmem:[#allocation10 + $0x6c] sm:$0xf0] }
 0x2a0   : > { %1531 = vst.msk [vmem:[#allocation3 + $0x5] ss:$8 sm:$0xf] %vm9290_vm7, %v1528_v13  ;;  %2941 = vmatpush.bf16.msrb.mxu1 %v7185_v25  ;;  %2930 = vmatpush.bf16.msrb.mxu0 %v7149_v53  ;;  %v7117_v21 = vor.u32 %v8181_v20, %v7116_v19  ;;  %v8179_v22 = vld [vmem:[#allocation10 + $0x64] sm:$0xf]  ;;  %v7125_v33 = vor.u32 %v8182_v30, %v7124_v24 }
 0x2a1   : > { %v7118_v23 = vld [vmem:[#allocation10 + $0x70] sm:$0xf0]  ;;  %v7129_v35 = vor.u32 %v8180_v31, %v7126_v32  ;;  %v7100_v41 = vld [vmem:[#allocation10 + $0x40] sm:$0xf]  ;;  %v8175_v26 = vld [vmem:[#allocation10 + $0x44] sm:$0xf] }
 0x2a2   : > { %2969 = vmatpush.bf16.msrb.mxu3 %v7161_v0  ;;  %v7121_v28 = vor.u32 %v8179_v22, %v7118_v23  ;;  %v7102_v29 = vld [vmem:[#allocation10 + $0x50] sm:$0xf0]  ;;  %v7108_v52 = vld [vmem:[#allocation10 + $0x48] sm:$0xf]  ;;  %v8178_v53 = vld [vmem:[#allocation10 + $0x54] sm:$0xf0] }
 0x2a3   : > { %v8494_v14 = vpop.eup %8493  ;;  %2956 = vmatpush.bf16.msrb.mxu2 %v7157_v56  ;;  %v7105_v50 = vor.u32 %v8175_v26, %v7102_v29  ;;  %v8176_v54 = vld [vmem:[#allocation10 + $0x4c] sm:$0xf]  ;;  %v7109_v34 = vor.u32 %v8178_v53, %v7108_v52  ;;  %v7110_v62 = vld [vmem:[#allocation10 + $0x58] sm:$0xf0]  ;;  %v7084_v0 = vld [vmem:[#allocation10 + $0x20] sm:$0xf] }
 0x2a4   : > { %v2391_v51 = vmul.f32 %v8494_v14, %v2381_v16  ;;  %2942 = vmatpush.bf16.msrb.mxu1 %v7169_v42  ;;  %2931 = vmatpush.bf16.msrb.mxu0 %v7133_v5  ;;  %v8177_v42 = vld [vmem:[#allocation10 + $0x4c] sm:$0xf0]  ;;  %v7113_v1 = vor.u32 %v8176_v54, %v7110_v62  ;;  %v8171_v4 = vld [vmem:[#allocation10 + $0x24] sm:$0xf]  ;;  %v7086_v5 = vld [vmem:[#allocation10 + $0x30] sm:$0xf0] }
 0x2a5   : > { %v7101_v60 = vor.u32 %v8177_v42, %v7100_v41  ;;  %v8173_v2 = vld [vmem:[#allocation10 + $0x2c] sm:$0xf0]  ;;  %v7089_v9 = vor.u32 %v8171_v4, %v7086_v5  ;;  %v7070_v19 = vld [vmem:[#allocation10 + $0x10] sm:$0xf0]  ;;  %v7076_v23 = vld [vmem:[#allocation10 + $0x8] sm:$0xf] }
 0x2a6   : > { %2392 = vst [vmem:[#allocation4] sm:$0xc] %v2391_v51  ;;  %v2397_v43 = vpack.c.bf16 %v2391_v51, %v2391_v51  ;;  %v7085_v8 = vor.u32 %v8173_v2, %v7084_v0  ;;  %v8170_v24 = vld [vmem:[#allocation10 + $0x14] sm:$0xf0]  ;;  %v7078_v31 = vld [vmem:[#allocation10 + $0x18] sm:$0xf0] }
 0x2a7   : > { %v2393_v13 = vld [vmem:[#allocation3] sm:$0x30]  ;;  %v2394_v16 = vld [vmem:[#allocation3 + $0x8] sm:$0x30]  ;;  %2957 = vmatpush.bf16.msrb.mxu2 %v7141_v58  ;;  %v2395_v63 = vld [vmem:[#allocation3 + $0x10] sm:$0x30]  ;;  %v7077_v30 = vor.u32 %v8170_v24, %v7076_v23 }
 0x2a8   : > { %v2431_v17 = vrot.slane %v2397_v43, 1  ;;  %2943 = vmatpush.bf16.msrb.mxu1 %v7153_v61  ;;  %v7145_v43 = vor.u32 %v8184_v11, %v7142_v12  ;;  %2932 = vmatpush.bf16.msrb.mxu0 %v7117_v21  ;;  %v8174_v58 = vld [vmem:[#allocation10 + $0x34] sm:$0xf0]  ;;  %v8172_v11 = vld [vmem:[#allocation10 + $0x2c] sm:$0xf] }
 0x2a9   : > { %v2396_v12 = vld [vmem:[#allocation3 + $0x18] sm:$0x30] }
 0x2aa   : > { %2601 = vmatmul.bf16.vlgmr.msra.gmra.mxu0 %v2431_v17  ;;  %2614 = vmatmul.bf16.vlgmr.msra.gmra.mxu1 %v2431_v17 }
 0x2ab   : > { %2627 = vmatmul.bf16.vlgmr.msra.gmra.mxu2 %v2431_v17  ;;  %2640 = vmatmul.bf16.vlgmr.msra.gmra.mxu3 %v2431_v17 }
 0x2ac   : > { %2944 = vmatpush.bf16.msrb.mxu1 %v7137_v10  ;;  %2970 = vmatpush.bf16.msrb.mxu3 %v7145_v43  ;;  %v7092_v10 = vld [vmem:[#allocation10 + $0x28] sm:$0xf] }
 0x2ad   : > { %2958 = vmatpush.bf16.msrb.mxu2 %v7125_v33  ;;  %2933 = vmatpush.bf16.msrb.mxu0 %v7101_v60 }
 0x2b0   : > { %2945 = vmatpush.bf16.msrb.mxu1 %v7121_v28  ;;  %2971 = vmatpush.bf16.msrb.mxu3 %v7129_v35 }
 0x2b1   : > { %2959 = vmatpush.bf16.msrb.mxu2 %v7109_v34  ;;  %2934 = vmatpush.bf16.msrb.mxu0 %v7085_v8 }
 0x2b4   : > { %2946 = vmatpush.bf16.msrb.mxu1 %v7105_v50  ;;  %2972 = vmatpush.bf16.msrb.mxu3 %v7113_v1 }
 0x2b8   : > { %2947 = vmatpush.bf16.msrb.mxu1 %v7089_v9 }
 0x327   : > { %v2602_v14 = vpop.f32.mrf.mxu0  ;;  %v2615_v51 = vpop.f32.mrf.mxu1 }
 0x328   : > { %v2649_v17 = vrot.slane %v2602_v14, 4  ;;  %v2650_v18 = vrot.slane %v2615_v51, 4  ;;  %v7094_v14 = vld [vmem:[#allocation10 + $0x38] sm:$0xf0]  ;;  %v8169_v51 = vld [vmem:[#allocation10 + $0xc] sm:$0xf0] }
 0x32a   : > { %v2657_v25 = vadd.f32 %v2649_v17, %v2393_v13  ;;  %v2658_v27 = vadd.f32 %v2650_v18, %v2394_v16  ;;  %v7093_v13 = vor.u32 %v8174_v58, %v7092_v10  ;;  %v7068_v16 = vld [vmem:[#allocation10] sm:$0xf]  ;;  %v7097_v17 = vor.u32 %v8172_v11, %v7094_v14  ;;  %v8167_v18 = vld [vmem:[#allocation10 + $0x4] sm:$0xf] }
 0x32b   : > { %v7069_v21 = vor.u32 %v8169_v51, %v7068_v16  ;;  %v7073_v22 = vor.u32 %v8167_v18, %v7070_v19  ;;  %v1534_v14 = vld [vmem:[#allocation2 + $0x23] ss:$8 sm:$0xf] }
 0x32c   : > { %v7063_v36 = vmul.f32 -1.442695, %v2657_v25  ;;  %v7064_v40 = vmul.f32 -1.442695, %v2658_v27  ;;  %v8168_v25 = vld [vmem:[#allocation10 + $0xc] sm:$0xf]  ;;  %2960 = vmatpush.bf16.msrb.mxu2 %v7093_v13  ;;  %2973 = vmatpush.bf16.msrb.mxu3 %v7097_v17 }
 0x32d   : > { %2935 = vmatpush.bf16.msrb.mxu0 %v7069_v21  ;;  %2948 = vmatpush.bf16.msrb.mxu1 %v7073_v22  ;;  %v1538_v24 = vperm.slane %v1534_v14, 0 }
 0x32e   : > { %8495 = vpow2.f32 %v7063_v36  ;;  %v2628_v45 = vpop.f32.mrf.mxu2  ;;  %v2641_v49 = vpop.f32.mrf.mxu3  ;;  %v7081_v36 = vor.u32 %v8168_v25, %v7078_v31  ;;  %v1539_v25 = vperm.slane %v1534_v14, 1 }
 0x32f   : > { %8497 = vpow2.f32 %v7064_v40  ;;  %v2651_v55 = vrot.slane %v2628_v45, 4  ;;  %v2652_v57 = vrot.slane %v2641_v49, 4  ;;  %v2604_v61 = vpop.f32.mrf.mxu0  ;;  %v2617_v56 = vpop.f32.mrf.mxu1  ;;  %v1190_v45 = vld [vmem:[#allocation2 + $0x3] ss:$8 sm:$0xf] }
 0x330   : > { %2961 = vmatpush.bf16.msrb.mxu2 %v7077_v30  ;;  %2974 = vmatpush.bf16.msrb.mxu3 %v7081_v36  ;;  %v1192_v49 = vld [vmem:[#allocation2 + $0x4] ss:$8 sm:$0xf]  ;;  %v1194_v52 = vperm.slane %v1190_v45, 0  ;;  %v1195_v53 = vperm.slane %v1190_v45, 1  ;;  %v1197_v0 = vperm.slane %v1190_v45, 3 }
 0x331   : > { %v2659_v6 = vadd.f32 %v2651_v55, %v2395_v63  ;;  %v2660_v40 = vadd.f32 %v2652_v57, %v2396_v12  ;;  %v2720_v63 = vrot.slane %v9455_v59, 6  ;;  %v1196_v55 = vperm.slane %v1190_v45, 2 }
 0x332   : > { %v1203_v57 = vperm.slane %v1192_v49, 0  ;;  %v1204_v61 = vperm.slane %v1192_v49, 1  ;;  %v1205_v56 = vperm.slane %v1192_v49, 2  ;;  %v1206_v8 = vperm.slane %v1192_v49, 3 }
 0x333   : > { %v7065_v43 = vmul.f32 -1.442695, %v2659_v6 }
 0x334   : > { %v8496_v20 = vpop.eup %8495  ;;  %v1211_v9 = vsel %vm1037_vm0, %v1194_v52, %v1203_v57  ;;  %v1212_v10 = vsel %vm9256_vm1, %v1195_v53, %v1204_v61  ;;  %v1213_v13 = vsel %vm9260_vm2, %v1196_v55, %v1205_v56  ;;  %v1214_v51 = vsel %vm9264_vm3, %v1197_v0, %v1206_v8 }
 0x335   : > { %v8498_v27 = vpop.eup %8497  ;;  %v9474_v28 = vadd.f32 1.0, %v8496_v20  ;;  %8499 = vpow2.f32 %v7065_v43  ;;  %v1215_v43 = vadd.f32 %v1211_v9, %v9274_v44  ;;  %v1216_v17 = vadd.f32 %v1212_v10, %v9278_v46 }
 0x336   : > { %v9476_v32 = vadd.f32 1.0, %v8498_v27  ;;  %v2630_v33 = vpop.f32.mrf.mxu2  ;;  %v2643_v35 = vpop.f32.mrf.mxu3  ;;  %v1217_v19 = vadd.f32 %v1213_v13, %v9280_v47  ;;  %v1218_v20 = vadd.f32 %v1214_v51, %v9282_v48 }
 0x337   : > { %8501 = vrcp.f32 %v9474_v28  ;;  %v2682_v42 = vand.u32 2147483647, %v9474_v28  ;;  %v2684_v26 = vand.u32 2147483648, %v9474_v28  ;;  %vm2678_vm8 = vweird.f32 %v9474_v28  ;;  %v1536_v33 = vld [vmem:[#allocation2 + $0x24] ss:$8 sm:$0xf] }
 0x338   : > { %8503 = vrcp.f32 %v9476_v32  ;;  %v2699_v41 = vand.u32 2147483648, %v9476_v32  ;;  %v2697_v50 = vand.u32 2147483647, %v9476_v32  ;;  %vm2693_vm9 = vweird.f32 %v9476_v32 }
 0x339   : > { %8505 = vtanh.f32 %v2660_v40  ;;  %vm9492_vm10 = vcmp.eq.f32.partialorder %v2682_v42, 8.507059e+37  ;;  %v2685_v5 = vor.u32 1.1754944e-38, %v2684_v26  ;;  %v1223_v23 = vrot.slane %v1216_v17, 7 }
 0x33a   : > { %v2700_v2 = vor.u32 1.1754944e-38, %v2699_v41  ;;  %vm9500_vm12 = vcmp.eq.f32.partialorder %v2697_v50, 8.507059e+37  ;;  %v1224_v31 = vrot.slane %v1217_v19, 6  ;;  %v1540_v35 = vperm.slane %v1534_v14, 2  ;;  %v7311_v19 = vld [vmem:[#allocation10 + $0xe0] sm:$0xf] }
 0x33b   : > { %v8500_v29 = vpop.eup %8499  ;;  %v1225_v40 = vrot.slane %v1218_v20, 5  ;;  %v1226_v41 = vsel %vm1088_vm4, %v1215_v43, %v1223_v23  ;;  %v1541_v42 = vperm.slane %v1534_v14, 3  ;;  %v1547_v49 = vperm.slane %v1536_v33, 0  ;;  %v8229_v20 = vld [vmem:[#allocation10 + $0xec] sm:$0xf0] }
 0x33c   : > { %v9484_v60 = vadd.f32 1.0, %v8500_v29  ;;  %v1548_v53 = vperm.slane %v1536_v33, 1  ;;  %v1549_v57 = vperm.slane %v1536_v33, 2  ;;  %v1550_v61 = vperm.slane %v1536_v33, 3  ;;  %v7313_v23 = vld [vmem:[#allocation10 + $0xf0] sm:$0xf0] }
 0x33d   : > { %v8502_v54 = vpop.eup %8501  ;;  %v1227_v52 = vsel %vm1090_vm5, %v1224_v31, %v1225_v40  ;;  %v1555_v56 = vsel %vm1037_vm0, %v1538_v24, %v1547_v49  ;;  %v7319_v24 = vld [vmem:[#allocation10 + $0xe8] sm:$0xf]  ;;  %v8228_v31 = vld [vmem:[#allocation10 + $0xec] sm:$0xf]  ;;  %v7321_v33 = vld [vmem:[#allocation10 + $0xf8] sm:$0xf0] }
 0x33e   : > { %v8504_v34 = vpop.eup %8503  ;;  %v2674_v62 = vmul.f32 %v8502_v54, %v9474_v28  ;;  %8507 = vrcp.f32 %v9484_v60  ;;  %vm2679_vm11 = vweird.f32 %v8502_v54  ;;  %v1228_v55 = vsel %vm1092_vm6, %v1226_v41, %v1227_v52  ;;  %v8225_v40 = vld [vmem:[#allocation10 + $0xcc] sm:$0xf0]  ;;  %v8223_v41 = vld [vmem:[#allocation10 + $0xc4] sm:$0xf]  ;;  %v7305_v52 = vld [vmem:[#allocation10 + $0xd8] sm:$0xf0] }
 0x33f   : > { %v2689_v1 = vmul.f32 %v8504_v34, %v9476_v32  ;;  %v8506_v58 = vpop.eup %8505  ;;  %vm2694_vm13 = vweird.f32 %v8504_v34  ;;  %vm2680_vm14 = vmor %vm2678_vm8, %vm2679_vm11  ;;  %1231 = vst.msk [vmem:[#allocation3 + $0x6] ss:$8 sm:$0xf] %vm9290_vm7, %v1228_v55  ;;  %v1557_v59 = vsel %vm9260_vm2, %v1540_v35, %v1549_v57  ;;  %v2712_v8 = vand.u32 2147483647, %v9484_v60 }
 0x340   : > { %v2675_v6 = vsub.f32 1.0, %v2674_v62  ;;  %vm2695_vm15 = vmor %vm2693_vm9, %vm2694_vm13  ;;  %v1561_v4 = vadd.f32 %v1557_v59, %v9280_v47  ;;  %vm2708_vm9 = vweird.f32 %v9484_v60  ;;  %v7324_v35 = vor.u32 %v8228_v31, %v7321_v33  ;;  %v8219_v55 = vld [vmem:[#allocation10 + $0xa4] sm:$0xf]  ;;  %v8214_v33 = vld [vmem:[#allocation10 + $0x74] sm:$0xf0] }
 0x341   : > { %v2690_v11 = vsub.f32 1.0, %v2689_v1  ;;  %v1559_v1 = vadd.f32 %v1555_v56, %v9274_v44  ;;  %vm2713_vm11 = vcmp.eq.f32.partialorder %v2712_v8, 8.507059e+37  ;;  %v7287_v56 = vld [vmem:[#allocation10 + $0xa8] sm:$0xf] }
 0x342   : > { %v2676_v16 = vmul.f32 %v8502_v54, %v2675_v6  ;;  %v1568_v10 = vrot.slane %v1561_v4, 6  ;;  %3302 = vmatpush.bf16.msra.mxu3 %v7324_v35  ;;  %v7263_v4 = vld [vmem:[#allocation10 + $0x80] sm:$0xf]  ;;  %v8212_v35 = vld [vmem:[#allocation10 + $0x6c] sm:$0xf] }
 0x343   : > { %v2691_v18 = vmul.f32 %v8504_v34, %v2690_v11 }
 0x344   : > { %v8508_v21 = vpop.eup %8507  ;;  %v2677_v22 = vadd.f32 %v8502_v54, %v2676_v16 }
 0x345   : > { %v2704_v27 = vmul.f32 %v8508_v21, %v9484_v60  ;;  %v2692_v30 = vadd.f32 %v8504_v34, %v2691_v18  ;;  %vm2709_vm8 = vweird.f32 %v8508_v21 }
 0x346   : > { %v2681_v36 = vsel %vm2680_vm14, %v8502_v54, %v2677_v22  ;;  %v7312_v22 = vor.u32 %v8229_v20, %v7311_v19  ;;  %v7247_v20 = vld [vmem:[#allocation10 + $0x60] sm:$0xf] }
 0x347   : > { %v2705_v26 = vsub.f32 1.0, %v2704_v27  ;;  %v2686_v29 = vsel %vm9492_vm10, %v2685_v5, %v2681_v36  ;;  %v2696_v45 = vsel %vm2695_vm15, %v8504_v34, %v2692_v30  ;;  %v1556_v34 = vsel %vm9256_vm1, %v1539_v25, %v1548_v53  ;;  %vm2710_vm10 = vmor %vm2708_vm9, %vm2709_vm8  ;;  %v8230_v25 = vld [vmem:[#allocation10 + $0xf4] sm:$0xf0]  ;;  %v7295_v36 = vld [vmem:[#allocation10 + $0xc0] sm:$0xf] }
 0x348   : > { %v2701_v28 = vsel %vm9500_vm12, %v2700_v2, %v2696_v45  ;;  %v2723_v50 = vmul.f32 %v8506_v58, %v2686_v29  ;;  %v1560_v2 = vadd.f32 %v1556_v34, %v9278_v46  ;;  %v2714_v5 = vand.u32 2147483648, %v9484_v60  ;;  %3263 = vmatpush.bf16.msra.mxu0 %v7312_v22  ;;  %v7303_v29 = vld [vmem:[#allocation10 + $0xc8] sm:$0xf]  ;;  %v8226_v45 = vld [vmem:[#allocation10 + $0xd4] sm:$0xf0] }
 0x349   : > { %v2722_v32 = vmul.f32 %v2720_v63, %v2701_v28  ;;  %v2706_v54 = vmul.f32 %v8508_v21, %v2705_v26  ;;  %v1558_v63 = vsel %vm9264_vm3, %v1541_v42, %v1550_v61  ;;  %v7320_v30 = vor.u32 %v8230_v25, %v7319_v24  ;;  %v7297_v26 = vld [vmem:[#allocation10 + $0xd0] sm:$0xf0]  ;;  %v8222_v34 = vld [vmem:[#allocation10 + $0xb4] sm:$0xf0]  ;;  %v7255_v25 = vld [vmem:[#allocation10 + $0x68] sm:$0xf] }
 0x34a   : > { %v1562_v6 = vadd.f32 %v1558_v63, %v9282_v48  ;;  %v1567_v9 = vrot.slane %v1560_v2, 7  ;;  %v2715_v13 = vor.u32 1.1754944e-38, %v2714_v5  ;;  %v7296_v42 = vor.u32 %v8225_v40, %v7295_v36  ;;  %v7281_v61 = vld [vmem:[#allocation10 + $0xb0] sm:$0xf0]  ;;  %v8220_v63 = vld [vmem:[#allocation10 + $0xac] sm:$0xf] }
 0x34b   : > { %v9533_v62 = vadd.f32 %v2723_v50, %v2722_v32  ;;  %v2707_v0 = vadd.f32 %v8508_v21, %v2706_v54  ;;  %3289 = vmatpush.bf16.msra.mxu2 %v7320_v30  ;;  %v7300_v49 = vor.u32 %v8223_v41, %v7297_v26  ;;  %v7304_v28 = vor.u32 %v8226_v45, %v7303_v29  ;;  %v8224_v50 = vld [vmem:[#allocation10 + $0xcc] sm:$0xf]  ;;  %v7279_v32 = vld [vmem:[#allocation10 + $0xa0] sm:$0xf]  ;;  %v8221_v54 = vld [vmem:[#allocation10 + $0xac] sm:$0xf0] }
 0x34c   : > { %v1569_v58 = vrot.slane %v1562_v6, 5  ;;  %v1570_v12 = vsel %vm1088_vm4, %v1559_v1, %v1567_v9  ;;  %3264 = vmatpush.bf16.msra.mxu0 %v7296_v42  ;;  %v7308_v53 = vor.u32 %v8224_v50, %v7305_v52  ;;  %v7280_v57 = vor.u32 %v8221_v54, %v7279_v32  ;;  %v7289_v1 = vld [vmem:[#allocation10 + $0xb8] sm:$0xf0]  ;;  %v8217_v5 = vld [vmem:[#allocation10 + $0x8c] sm:$0xf0] }
 0x34d   : > { %8509 = vtanh.f32 %v9533_v62  ;;  %v2711_v11 = vsel %vm2710_vm10, %v8508_v21, %v2707_v0  ;;  %v8227_v21 = vld [vmem:[#allocation10 + $0xe4] sm:$0xf]  ;;  %v7284_v0 = vor.u32 %v8219_v55, %v7281_v61  ;;  %v7288_v59 = vor.u32 %v8222_v34, %v7287_v56  ;;  %v7265_v9 = vld [vmem:[#allocation10 + $0x90] sm:$0xf0]  ;;  %v7257_v36 = vld [vmem:[#allocation10 + $0x78] sm:$0xf0] }
 0x34e   : > { %v1571_v14 = vsel %vm1090_vm5, %v1568_v10, %v1569_v58  ;;  %v2716_v43 = vsel %vm2713_vm11, %v2715_v13, %v2711_v11  ;;  %v7316_v27 = vor.u32 %v8227_v21, %v7313_v23  ;;  %3303 = vmatpush.bf16.msra.mxu3 %v7308_v53  ;;  %v7292_v2 = vor.u32 %v8220_v63, %v7289_v1  ;;  %v8215_v6 = vld [vmem:[#allocation10 + $0x84] sm:$0xf]  ;;  %v7271_v10 = vld [vmem:[#allocation10 + $0x88] sm:$0xf]  ;;  %v8218_v58 = vld [vmem:[#allocation10 + $0x94] sm:$0xf0] }
 0x34f   : > { %v1572_v16 = vsel %vm1092_vm6, %v1570_v12, %v1571_v14  ;;  %3290 = vmatpush.bf16.msra.mxu2 %v7304_v28  ;;  %v7264_v8 = vor.u32 %v8217_v5, %v7263_v4  ;;  %v7268_v11 = vor.u32 %v8215_v6, %v7265_v9  ;;  %v7272_v12 = vor.u32 %v8218_v58, %v7271_v10  ;;  %v8216_v13 = vld [vmem:[#allocation10 + $0x8c] sm:$0xf]  ;;  %v7273_v14 = vld [vmem:[#allocation10 + $0x98] sm:$0xf0]  ;;  %v8213_v21 = vld [vmem:[#allocation10 + $0x6c] sm:$0xf0] }
 0x350   : > { %1575 = vst.msk [vmem:[#allocation3 + $0x7] ss:$8 sm:$0xf] %vm9290_vm7, %v1572_v16  ;;  %3276 = vmatpush.bf16.msra.mxu1 %v7316_v27  ;;  %3265 = vmatpush.bf16.msra.mxu0 %v7280_v57  ;;  %v7248_v22 = vor.u32 %v8213_v21, %v7247_v20  ;;  %v8211_v23 = vld [vmem:[#allocation10 + $0x64] sm:$0xf]  ;;  %v7256_v40 = vor.u32 %v8214_v33, %v7255_v25 }
 0x351   : > { %v7249_v24 = vld [vmem:[#allocation10 + $0x70] sm:$0xf0]  ;;  %v7260_v41 = vor.u32 %v8212_v35, %v7257_v36  ;;  %v7231_v45 = vld [vmem:[#allocation10 + $0x40] sm:$0xf]  ;;  %v8207_v28 = vld [vmem:[#allocation10 + $0x44] sm:$0xf] }
 0x352   : > { %3304 = vmatpush.bf16.msra.mxu3 %v7292_v2  ;;  %v7252_v31 = vor.u32 %v8211_v23, %v7249_v24  ;;  %v7233_v50 = vld [vmem:[#allocation10 + $0x50] sm:$0xf0]  ;;  %v7239_v55 = vld [vmem:[#allocation10 + $0x48] sm:$0xf]  ;;  %v8210_v57 = vld [vmem:[#allocation10 + $0x54] sm:$0xf0] }
 0x353   : > { %v8510_v51 = vpop.eup %8509  ;;  %3291 = vmatpush.bf16.msra.mxu2 %v7288_v59  ;;  %v7236_v54 = vor.u32 %v8207_v28, %v7233_v50  ;;  %v8208_v61 = vld [vmem:[#allocation10 + $0x4c] sm:$0xf]  ;;  %v7240_v63 = vor.u32 %v8210_v57, %v7239_v55  ;;  %v7241_v1 = vld [vmem:[#allocation10 + $0x58] sm:$0xf0]  ;;  %v7215_v2 = vld [vmem:[#allocation10 + $0x20] sm:$0xf] }
 0x354   : > { %v2726_v17 = vmul.f32 %v8510_v51, %v2716_v43  ;;  %3277 = vmatpush.bf16.msra.mxu1 %v7300_v49  ;;  %3266 = vmatpush.bf16.msra.mxu0 %v7264_v8  ;;  %v8209_v49 = vld [vmem:[#allocation10 + $0x4c] sm:$0xf0]  ;;  %v7244_v4 = vor.u32 %v8208_v61, %v7241_v1  ;;  %v8203_v6 = vld [vmem:[#allocation10 + $0x24] sm:$0xf]  ;;  %v7217_v8 = vld [vmem:[#allocation10 + $0x30] sm:$0xf0] }
 0x355   : > { %v7232_v32 = vor.u32 %v8209_v49, %v7231_v45  ;;  %v8205_v5 = vld [vmem:[#allocation10 + $0x2c] sm:$0xf0]  ;;  %v7220_v58 = vor.u32 %v8203_v6, %v7217_v8  ;;  %v7201_v20 = vld [vmem:[#allocation10 + $0x10] sm:$0xf0]  ;;  %v7207_v24 = vld [vmem:[#allocation10 + $0x8] sm:$0xf] }
 0x356   : > { %2727 = vst [vmem:[#allocation4] sm:$0x30] %v2726_v17  ;;  %v2732_v60 = vpack.c.bf16 %v2726_v17, %v2726_v17  ;;  %v7216_v10 = vor.u32 %v8205_v5, %v7215_v2  ;;  %v8202_v25 = vld [vmem:[#allocation10 + $0x14] sm:$0xf0]  ;;  %v7209_v35 = vld [vmem:[#allocation10 + $0x18] sm:$0xf0] }
 0x357   : > { %v2728_v16 = vld [vmem:[#allocation3] sm:$0xc0]  ;;  %v2729_v43 = vld [vmem:[#allocation3 + $0x8] sm:$0xc0]  ;;  %3292 = vmatpush.bf16.msra.mxu2 %v7272_v12  ;;  %v2730_v29 = vld [vmem:[#allocation3 + $0x10] sm:$0xc0]  ;;  %v7208_v33 = vor.u32 %v8202_v25, %v7207_v24 }
 0x358   : > { %v2766_v18 = vrot.slane %v2732_v60, 2  ;;  %3278 = vmatpush.bf16.msra.mxu1 %v7284_v0  ;;  %v7276_v60 = vor.u32 %v8216_v13, %v7273_v14  ;;  %3267 = vmatpush.bf16.msra.mxu0 %v7248_v22  ;;  %v8206_v12 = vld [vmem:[#allocation10 + $0x34] sm:$0xf0]  ;;  %v8204_v13 = vld [vmem:[#allocation10 + $0x2c] sm:$0xf] }
 0x359   : > { %v2731_v14 = vld [vmem:[#allocation3 + $0x18] sm:$0xc0] }
 0x35a   : > { %2936 = vmatmul.bf16.vlgmr.msrb.gmra.mxu0 %v2766_v18  ;;  %2949 = vmatmul.bf16.vlgmr.msrb.gmra.mxu1 %v2766_v18 }
 0x35b   : > { %2962 = vmatmul.bf16.vlgmr.msrb.gmra.mxu2 %v2766_v18  ;;  %2975 = vmatmul.bf16.vlgmr.msrb.gmra.mxu3 %v2766_v18 }
 0x35c   : > { %3279 = vmatpush.bf16.msra.mxu1 %v7268_v11  ;;  %3305 = vmatpush.bf16.msra.mxu3 %v7276_v60  ;;  %v7223_v11 = vld [vmem:[#allocation10 + $0x28] sm:$0xf] }
 0x35d   : > { %3293 = vmatpush.bf16.msra.mxu2 %v7256_v40  ;;  %3268 = vmatpush.bf16.msra.mxu0 %v7232_v32 }
 0x360   : > { %3280 = vmatpush.bf16.msra.mxu1 %v7252_v31  ;;  %3306 = vmatpush.bf16.msra.mxu3 %v7260_v41 }
 0x361   : > { %3294 = vmatpush.bf16.msra.mxu2 %v7240_v63  ;;  %3269 = vmatpush.bf16.msra.mxu0 %v7216_v10 }
 0x364   : > { %3281 = vmatpush.bf16.msra.mxu1 %v7236_v54  ;;  %3307 = vmatpush.bf16.msra.mxu3 %v7244_v4 }
 0x368   : > { %3282 = vmatpush.bf16.msra.mxu1 %v7220_v58 }
 0x3d7   : > { %v2937_v51 = vpop.f32.mrf.mxu0  ;;  %v2950_v17 = vpop.f32.mrf.mxu1 }
 0x3d8   : > { %v2984_v18 = vrot.slane %v2937_v51, 2  ;;  %v2985_v19 = vrot.slane %v2950_v17, 2  ;;  %v7225_v51 = vld [vmem:[#allocation10 + $0x38] sm:$0xf0]  ;;  %v8201_v17 = vld [vmem:[#allocation10 + $0xc] sm:$0xf0] }
 0x3da   : > { %v2992_v27 = vadd.f32 %v2984_v18, %v2728_v16  ;;  %v2993_v30 = vadd.f32 %v2985_v19, %v2729_v43  ;;  %v7224_v16 = vor.u32 %v8206_v12, %v7223_v11  ;;  %v7199_v43 = vld [vmem:[#allocation10] sm:$0xf]  ;;  %v7228_v18 = vor.u32 %v8204_v13, %v7225_v51  ;;  %v8199_v19 = vld [vmem:[#allocation10 + $0x4] sm:$0xf] }
 0x3db   : > { %v7200_v22 = vor.u32 %v8201_v17, %v7199_v43  ;;  %v7204_v23 = vor.u32 %v8199_v19, %v7201_v20  ;;  %v1577_v51 = vld [vmem:[#allocation2 + $0x24] ss:$8 sm:$0xf] }
 0x3dc   : > { %v7194_v42 = vmul.f32 -1.442695, %v2992_v27  ;;  %v7195_v26 = vmul.f32 -1.442695, %v2993_v30  ;;  %v8200_v27 = vld [vmem:[#allocation10 + $0xc] sm:$0xf]  ;;  %3295 = vmatpush.bf16.msra.mxu2 %v7224_v16  ;;  %3308 = vmatpush.bf16.msra.mxu3 %v7228_v18 }
 0x3dd   : > { %3270 = vmatpush.bf16.msra.mxu0 %v7200_v22  ;;  %3283 = vmatpush.bf16.msra.mxu1 %v7204_v23  ;;  %v1580_v25 = vperm.slane %v1577_v51, 0 }
 0x3de   : > { %8511 = vpow2.f32 %v7194_v42  ;;  %v2963_v52 = vpop.f32.mrf.mxu2  ;;  %v2976_v53 = vpop.f32.mrf.mxu3  ;;  %v7212_v42 = vor.u32 %v8200_v27, %v7209_v35  ;;  %v1581_v27 = vperm.slane %v1577_v51, 1 }
 0x3df   : > { %8513 = vpow2.f32 %v7195_v26  ;;  %v2986_v56 = vrot.slane %v2963_v52, 2  ;;  %v2987_v34 = vrot.slane %v2976_v53, 2  ;;  %v2939_v0 = vpop.f32.mrf.mxu0  ;;  %v2952_v59 = vpop.f32.mrf.mxu1  ;;  %v1233_v52 = vld [vmem:[#allocation2 + $0x4] ss:$8 sm:$0xf] }
 0x3e0   : > { %3296 = vmatpush.bf16.msra.mxu2 %v7208_v33  ;;  %3309 = vmatpush.bf16.msra.mxu3 %v7212_v42  ;;  %v1234_v53 = vld [vmem:[#allocation2 + $0x3] ss:$8 sm:$0xf]  ;;  %v1236_v55 = vperm.slane %v1233_v52, 0  ;;  %v1237_v57 = vperm.slane %v1233_v52, 1  ;;  %v1239_v2 = vperm.slane %v1233_v52, 3 }
 0x3e1   : > { %v2994_v9 = vadd.f32 %v2986_v56, %v2730_v29  ;;  %v2995_v26 = vadd.f32 %v2987_v34, %v2731_v14  ;;  %v3055_v29 = vrot.slane %v9533_v62, 6  ;;  %v1238_v56 = vperm.slane %v1233_v52, 2 }
 0x3e2   : > { %v1245_v34 = vperm.slane %v1234_v53, 0  ;;  %v1246_v0 = vperm.slane %v1234_v53, 1  ;;  %v1247_v59 = vperm.slane %v1234_v53, 2  ;;  %v1248_v10 = vperm.slane %v1234_v53, 3 }
 0x3e3   : > { %v7196_v60 = vmul.f32 -1.442695, %v2994_v9 }
 0x3e4   : > { %v8512_v21 = vpop.eup %8511  ;;  %v1253_v58 = vsel %vm1037_vm0, %v1236_v55, %v1245_v34  ;;  %v1254_v11 = vsel %vm9256_vm1, %v1237_v57, %v1246_v0  ;;  %v1255_v16 = vsel %vm9260_vm2, %v1238_v56, %v1247_v59  ;;  %v1256_v17 = vsel %vm9264_vm3, %v1239_v2, %v1248_v10 }
 0x3e5   : > { %v8514_v30 = vpop.eup %8513  ;;  %v9552_v31 = vadd.f32 1.0, %v8512_v21  ;;  %8515 = vpow2.f32 %v7196_v60  ;;  %v1257_v60 = vadd.f32 %v1253_v58, %v9274_v44  ;;  %v1258_v18 = vadd.f32 %v1254_v11, %v9278_v46 }
 0x3e6   : > { %v9554_v36 = vadd.f32 1.0, %v8514_v30  ;;  %v2965_v40 = vpop.f32.mrf.mxu2  ;;  %v2978_v41 = vpop.f32.mrf.mxu3  ;;  %v1259_v20 = vadd.f32 %v1255_v16, %v9280_v47  ;;  %v1260_v21 = vadd.f32 %v1256_v17, %v9282_v48 }
 0x3e7   : > { %8517 = vrcp.f32 %v9552_v31  ;;  %v3017_v49 = vand.u32 2147483647, %v9552_v31  ;;  %v3019_v28 = vand.u32 2147483648, %v9552_v31  ;;  %vm3013_vm12 = vweird.f32 %v9552_v31  ;;  %v1578_v40 = vld [vmem:[#allocation2 + $0x23] ss:$8 sm:$0xf] }
 0x3e8   : > { %8519 = vrcp.f32 %v9554_v36  ;;  %v3034_v45 = vand.u32 2147483648, %v9554_v36  ;;  %v3032_v54 = vand.u32 2147483647, %v9554_v36  ;;  %vm3028_vm13 = vweird.f32 %v9554_v36 }
 0x3e9   : > { %8521 = vtanh.f32 %v2995_v26  ;;  %vm9570_vm14 = vcmp.eq.f32.partialorder %v3017_v49, 8.507059e+37  ;;  %v3020_v8 = vor.u32 1.1754944e-38, %v3019_v28  ;;  %v1265_v24 = vrot.slane %v1258_v18, 7 }
 0x3ea   : > { %v3035_v5 = vor.u32 1.1754944e-38, %v3034_v45  ;;  %vm9578_vm8 = vcmp.eq.f32.partialorder %v3032_v54, 8.507059e+37  ;;  %v1266_v35 = vrot.slane %v1259_v20, 6  ;;  %v1582_v41 = vperm.slane %v1577_v51, 2  ;;  %v7442_v20 = vld [vmem:[#allocation10 + $0xe0] sm:$0xf] }
 0x3eb   : > { %v8516_v50 = vpop.eup %8515  ;;  %v1267_v26 = vrot.slane %v1260_v21, 5  ;;  %v1268_v45 = vsel %vm1088_vm4, %v1257_v60, %v1265_v24  ;;  %v1583_v49 = vperm.slane %v1577_v51, 3  ;;  %v1589_v53 = vperm.slane %v1578_v40, 0  ;;  %v8261_v21 = vld [vmem:[#allocation10 + $0xec] sm:$0xf0] }
 0x3ec   : > { %v9562_v32 = vadd.f32 1.0, %v8516_v50  ;;  %v1590_v57 = vperm.slane %v1578_v40, 1  ;;  %v1591_v34 = vperm.slane %v1578_v40, 2  ;;  %v1592_v0 = vperm.slane %v1578_v40, 3  ;;  %v7444_v24 = vld [vmem:[#allocation10 + $0xf0] sm:$0xf0] }
 0x3ed   : > { %v8518_v61 = vpop.eup %8517  ;;  %v1269_v55 = vsel %vm1090_vm5, %v1266_v35, %v1267_v26  ;;  %v1597_v59 = vsel %vm1037_vm0, %v1580_v25, %v1589_v53  ;;  %v7450_v25 = vld [vmem:[#allocation10 + $0xe8] sm:$0xf]  ;;  %v8260_v35 = vld [vmem:[#allocation10 + $0xec] sm:$0xf]  ;;  %v7452_v40 = vld [vmem:[#allocation10 + $0xf8] sm:$0xf0] }
 0x3ee   : > { %v8520_v63 = vpop.eup %8519  ;;  %v3009_v1 = vmul.f32 %v8518_v61, %v9552_v31  ;;  %8523 = vrcp.f32 %v9562_v32  ;;  %vm3014_vm15 = vweird.f32 %v8518_v61  ;;  %v1270_v56 = vsel %vm1092_vm6, %v1268_v45, %v1269_v55  ;;  %v8257_v26 = vld [vmem:[#allocation10 + $0xcc] sm:$0xf0]  ;;  %v8255_v45 = vld [vmem:[#allocation10 + $0xc4] sm:$0xf]  ;;  %v7436_v55 = vld [vmem:[#allocation10 + $0xd8] sm:$0xf0] }
 0x3ef   : > { %v3024_v4 = vmul.f32 %v8520_v63, %v9554_v36  ;;  %v8522_v12 = vpop.eup %8521  ;;  %vm3029_vm9 = vweird.f32 %v8520_v63  ;;  %vm3015_vm10 = vmor %vm3013_vm12, %vm3014_vm15  ;;  %1273 = vst.msk [vmem:[#allocation3 + $0x20] ss:$8 sm:$0xf] %vm9290_vm7, %v1270_v56  ;;  %v1599_v62 = vsel %vm9260_vm2, %v1582_v41, %v1591_v34  ;;  %v3047_v10 = vand.u32 2147483647, %v9562_v32 }
 0x3f0   : > { %v3010_v9 = vsub.f32 1.0, %v3009_v1  ;;  %vm3030_vm11 = vmor %vm3028_vm13, %vm3029_vm9  ;;  %v1603_v6 = vadd.f32 %v1599_v62, %v9280_v47  ;;  %vm3043_vm13 = vweird.f32 %v9562_v32  ;;  %v7455_v41 = vor.u32 %v8260_v35, %v7452_v40  ;;  %v8251_v56 = vld [vmem:[#allocation10 + $0xa4] sm:$0xf] }
 0x3f1   : > { %v3025_v13 = vsub.f32 1.0, %v3024_v4  ;;  %v1601_v4 = vadd.f32 %v1597_v59, %v9274_v44  ;;  %vm3048_vm15 = vcmp.eq.f32.partialorder %v3047_v10, 8.507059e+37  ;;  %v7418_v59 = vld [vmem:[#allocation10 + $0xa8] sm:$0xf] }
 0x3f2   : > { %v3011_v43 = vmul.f32 %v8518_v61, %v3010_v9  ;;  %v1610_v11 = vrot.slane %v1603_v6, 6  ;;  %3622 = vmatpush.bf16.msrb.mxu3 %v7455_v41  ;;  %v7394_v6 = vld [vmem:[#allocation10 + $0x80] sm:$0xf] }
 0x3f3   : > { %v3026_v19 = vmul.f32 %v8520_v63, %v3025_v13 }
 0x3f4   : > { %v8524_v22 = vpop.eup %8523  ;;  %v3012_v23 = vadd.f32 %v8518_v61, %v3011_v43 }
 0x3f5   : > { %v3039_v30 = vmul.f32 %v8524_v22, %v9562_v32  ;;  %v3027_v33 = vadd.f32 %v8520_v63, %v3026_v19  ;;  %vm3044_vm12 = vweird.f32 %v8524_v22 }
 0x3f6   : > { %v3016_v42 = vsel %vm3015_vm10, %v8518_v61, %v3012_v23  ;;  %v7443_v23 = vor.u32 %v8261_v21, %v7442_v20  ;;  %v7380_v21 = vld [vmem:[#allocation10 + $0x70] sm:$0xf0] }
 0x3f7   : > { %v3040_v28 = vsub.f32 1.0, %v3039_v30  ;;  %v3021_v50 = vsel %vm9570_vm14, %v3020_v8, %v3016_v42  ;;  %v3031_v52 = vsel %vm3030_vm11, %v8520_v63, %v3027_v33  ;;  %v1598_v63 = vsel %vm9256_vm1, %v1581_v27, %v1590_v57  ;;  %vm3045_vm14 = vmor %vm3043_vm13, %vm3044_vm12  ;;  %v8262_v27 = vld [vmem:[#allocation10 + $0xf4] sm:$0xf0]  ;;  %v7426_v42 = vld [vmem:[#allocation10 + $0xc0] sm:$0xf] }
 0x3f8   : > { %v3036_v31 = vsel %vm9578_vm8, %v3035_v5, %v3031_v52  ;;  %v3058_v54 = vmul.f32 %v8522_v12, %v3021_v50  ;;  %v1602_v5 = vadd.f32 %v1598_v63, %v9278_v46  ;;  %v3049_v8 = vand.u32 2147483648, %v9562_v32  ;;  %3583 = vmatpush.bf16.msrb.mxu0 %v7443_v23  ;;  %v7434_v50 = vld [vmem:[#allocation10 + $0xc8] sm:$0xf]  ;;  %v8258_v52 = vld [vmem:[#allocation10 + $0xd4] sm:$0xf0] }
 0x3f9   : > { %v3057_v36 = vmul.f32 %v3055_v29, %v3036_v31  ;;  %v3041_v61 = vmul.f32 %v8524_v22, %v3040_v28  ;;  %v1600_v29 = vsel %vm9264_vm3, %v1583_v49, %v1592_v0  ;;  %v7451_v33 = vor.u32 %v8262_v27, %v7450_v25  ;;  %v7428_v28 = vld [vmem:[#allocation10 + $0xd0] sm:$0xf0]  ;;  %v8254_v63 = vld [vmem:[#allocation10 + $0xb4] sm:$0xf0]  ;;  %v8244_v27 = vld [vmem:[#allocation10 + $0x6c] sm:$0xf] }
 0x3fa   : > { %v1604_v9 = vadd.f32 %v1600_v29, %v9282_v48  ;;  %v1609_v58 = vrot.slane %v1602_v5, 7  ;;  %v3050_v16 = vor.u32 1.1754944e-38, %v3049_v8  ;;  %v7427_v49 = vor.u32 %v8257_v26, %v7426_v42  ;;  %v7412_v0 = vld [vmem:[#allocation10 + $0xb0] sm:$0xf0]  ;;  %v8252_v29 = vld [vmem:[#allocation10 + $0xac] sm:$0xf] }
 0x3fb   : > { %v9611_v1 = vadd.f32 %v3058_v54, %v3057_v36  ;;  %v3042_v2 = vadd.f32 %v8524_v22, %v3041_v61  ;;  %3609 = vmatpush.bf16.msrb.mxu2 %v7451_v33  ;;  %v7431_v53 = vor.u32 %v8255_v45, %v7428_v28  ;;  %v7435_v31 = vor.u32 %v8258_v52, %v7434_v50  ;;  %v8256_v54 = vld [vmem:[#allocation10 + $0xcc] sm:$0xf]  ;;  %v7410_v36 = vld [vmem:[#allocation10 + $0xa0] sm:$0xf]  ;;  %v8253_v61 = vld [vmem:[#allocation10 + $0xac] sm:$0xf0] }
 0x3fc   : > { %v1611_v12 = vrot.slane %v1604_v9, 5  ;;  %v1612_v14 = vsel %vm1088_vm4, %v1601_v4, %v1609_v58  ;;  %3584 = vmatpush.bf16.msrb.mxu0 %v7427_v49  ;;  %v7439_v57 = vor.u32 %v8256_v54, %v7436_v55  ;;  %v7411_v34 = vor.u32 %v8253_v61, %v7410_v36  ;;  %v7420_v4 = vld [vmem:[#allocation10 + $0xb8] sm:$0xf0]  ;;  %v8249_v8 = vld [vmem:[#allocation10 + $0x8c] sm:$0xf0] }
 0x3fd   : > { %8525 = vtanh.f32 %v9611_v1  ;;  %v3046_v13 = vsel %vm3045_vm14, %v8524_v22, %v3042_v2  ;;  %v8259_v22 = vld [vmem:[#allocation10 + $0xe4] sm:$0xf]  ;;  %v7415_v2 = vor.u32 %v8251_v56, %v7412_v0  ;;  %v7419_v62 = vor.u32 %v8254_v63, %v7418_v59  ;;  %v7396_v58 = vld [vmem:[#allocation10 + $0x90] sm:$0xf0]  ;;  %v8246_v23 = vld [vmem:[#allocation10 + $0x74] sm:$0xf0] }
 0x3fe   : > { %v1613_v51 = vsel %vm1090_vm5, %v1610_v11, %v1611_v12  ;;  %v3051_v60 = vsel %vm3048_vm15, %v3050_v16, %v3046_v13  ;;  %v7447_v30 = vor.u32 %v8259_v22, %v7444_v24  ;;  %3623 = vmatpush.bf16.msrb.mxu3 %v7439_v57  ;;  %v7423_v5 = vor.u32 %v8252_v29, %v7420_v4  ;;  %v8247_v9 = vld [vmem:[#allocation10 + $0x84] sm:$0xf]  ;;  %v7402_v11 = vld [vmem:[#allocation10 + $0x88] sm:$0xf]  ;;  %v8250_v12 = vld [vmem:[#allocation10 + $0x94] sm:$0xf0] }
 0x3ff   : > { %v1614_v43 = vsel %vm1092_vm6, %v1612_v14, %v1613_v51  ;;  %3610 = vmatpush.bf16.msrb.mxu2 %v7435_v31  ;;  %v7395_v10 = vor.u32 %v8249_v8, %v7394_v6  ;;  %v7399_v13 = vor.u32 %v8247_v9, %v7396_v58  ;;  %v7403_v14 = vor.u32 %v8250_v12, %v7402_v11  ;;  %v8248_v16 = vld [vmem:[#allocation10 + $0x8c] sm:$0xf]  ;;  %v7404_v51 = vld [vmem:[#allocation10 + $0x98] sm:$0xf0]  ;;  %v7386_v22 = vld [vmem:[#allocation10 + $0x68] sm:$0xf] }
 0x400   : > { %1617 = vst.msk [vmem:[#allocation3 + $0x21] ss:$8 sm:$0xf] %vm9290_vm7, %v1614_v43  ;;  %3596 = vmatpush.bf16.msrb.mxu1 %v7447_v30  ;;  %3585 = vmatpush.bf16.msrb.mxu0 %v7411_v34  ;;  %v7387_v25 = vor.u32 %v8246_v23, %v7386_v22  ;;  %v7388_v30 = vld [vmem:[#allocation10 + $0x78] sm:$0xf0] }
 0x401   : > { %v7391_v40 = vor.u32 %v8244_v27, %v7388_v30  ;;  %v7362_v26 = vld [vmem:[#allocation10 + $0x40] sm:$0xf]  ;;  %v8241_v45 = vld [vmem:[#allocation10 + $0x4c] sm:$0xf0]  ;;  %v8239_v49 = vld [vmem:[#allocation10 + $0x44] sm:$0xf] }
 0x402   : > { %3624 = vmatpush.bf16.msrb.mxu3 %v7423_v5  ;;  %v7363_v28 = vor.u32 %v8241_v45, %v7362_v26  ;;  %v7364_v50 = vld [vmem:[#allocation10 + $0x50] sm:$0xf0]  ;;  %v7370_v52 = vld [vmem:[#allocation10 + $0x48] sm:$0xf]  ;;  %v8240_v61 = vld [vmem:[#allocation10 + $0x4c] sm:$0xf] }
 0x403   : > { %v8526_v17 = vpop.eup %8525  ;;  %3611 = vmatpush.bf16.msrb.mxu2 %v7419_v62  ;;  %v7367_v57 = vor.u32 %v8239_v49, %v7364_v50  ;;  %v7372_v56 = vld [vmem:[#allocation10 + $0x58] sm:$0xf0]  ;;  %v7346_v34 = vld [vmem:[#allocation10 + $0x20] sm:$0xf]  ;;  %v8237_v0 = vld [vmem:[#allocation10 + $0x2c] sm:$0xf0] }
 0x404   : > { %v3061_v18 = vmul.f32 %v8526_v17, %v3051_v60  ;;  %3597 = vmatpush.bf16.msrb.mxu1 %v7431_v53  ;;  %3586 = vmatpush.bf16.msrb.mxu0 %v7395_v10  ;;  %v7407_v60 = vor.u32 %v8248_v16, %v7404_v51  ;;  %v8242_v53 = vld [vmem:[#allocation10 + $0x54] sm:$0xf0]  ;;  %v7375_v59 = vor.u32 %v8240_v61, %v7372_v56  ;;  %v7348_v62 = vld [vmem:[#allocation10 + $0x30] sm:$0xf0]  ;;  %v7354_v29 = vld [vmem:[#allocation10 + $0x28] sm:$0xf] }
 0x405   : > { %v7371_v36 = vor.u32 %v8242_v53, %v7370_v52  ;;  %v7347_v63 = vor.u32 %v8237_v0, %v7346_v34  ;;  %v8238_v5 = vld [vmem:[#allocation10 + $0x34] sm:$0xf0]  ;;  %v8236_v6 = vld [vmem:[#allocation10 + $0x2c] sm:$0xf]  ;;  %v7356_v8 = vld [vmem:[#allocation10 + $0x38] sm:$0xf0] }
 0x406   : > { %3062 = vst [vmem:[#allocation4] sm:$0xc0] %v3061_v18  ;;  %v3067_v32 = vpack.c.bf16 %v3061_v18, %v3061_v18  ;;  %v7378_v18 = vld [vmem:[#allocation10 + $0x60] sm:$0xf]  ;;  %3625 = vmatpush.bf16.msrb.mxu3 %v7407_v60  ;;  %v7355_v58 = vor.u32 %v8238_v5, %v7354_v29  ;;  %v7359_v11 = vor.u32 %v8236_v6, %v7356_v8  ;;  %v7332_v60 = vld [vmem:[#allocation10 + $0x10] sm:$0xf0] }
 0x407   : > { %v3063_v43 = vld [vmem:[#allocation3 + $0x20] sm:$0x3]  ;;  %v3064_v17 = vld [vmem:[#allocation3 + $0x28] sm:$0x3]  ;;  %3612 = vmatpush.bf16.msrb.mxu2 %v7403_v14  ;;  %v3065_v55 = vld [vmem:[#allocation3 + $0x30] sm:$0x3] }
 0x408   : > { %v3101_v19 = vrot.slane %v3067_v32, 3  ;;  %3598 = vmatpush.bf16.msrb.mxu1 %v7415_v2  ;;  %v8245_v32 = vld [vmem:[#allocation10 + $0x6c] sm:$0xf0]  ;;  %v8235_v2 = vld [vmem:[#allocation10 + $0x24] sm:$0xf] }
 0x409   : > { %v7379_v20 = vor.u32 %v8245_v32, %v7378_v18  ;;  %v7351_v4 = vor.u32 %v8235_v2, %v7348_v62  ;;  %v7330_v12 = vld [vmem:[#allocation10] sm:$0xf]  ;;  %v8231_v14 = vld [vmem:[#allocation10 + $0x4] sm:$0xf]  ;;  %v7338_v18 = vld [vmem:[#allocation10 + $0x8] sm:$0xf] }
 0x40a   : > { %3271 = vmatmul.bf16.vlgmr.msra.gmra.mxu0 %v3101_v19  ;;  %3284 = vmatmul.bf16.vlgmr.msra.gmra.mxu1 %v3101_v19  ;;  %v8234_v32 = vld [vmem:[#allocation10 + $0x14] sm:$0xf0]  ;;  %v7340_v22 = vld [vmem:[#allocation10 + $0x18] sm:$0xf0] }
 0x40b   : > { %3297 = vmatmul.bf16.vlgmr.msra.gmra.mxu2 %v3101_v19  ;;  %3310 = vmatmul.bf16.vlgmr.msra.gmra.mxu3 %v3101_v19  ;;  %v8243_v19 = vld [vmem:[#allocation10 + $0x64] sm:$0xf]  ;;  %v1276_v50 = vld [vmem:[#allocation2 + $0x2] ss:$8 sm:$0xf] }
 0x40c   : > { %3599 = vmatpush.bf16.msrb.mxu1 %v7399_v13  ;;  %v7383_v24 = vor.u32 %v8243_v19, %v7380_v21  ;;  %3587 = vmatpush.bf16.msrb.mxu0 %v7379_v20  ;;  %v8233_v13 = vld [vmem:[#allocation10 + $0xc] sm:$0xf0]  ;;  %v7335_v19 = vor.u32 %v8231_v14, %v7332_v60  ;;  %v7339_v20 = vor.u32 %v8234_v32, %v7338_v18  ;;  %v8232_v21 = vld [vmem:[#allocation10 + $0xc] sm:$0xf]  ;;  %v1288_v61 = vperm.slane %v1276_v50, 1 }
 0x40d   : > { %3613 = vmatpush.bf16.msrb.mxu2 %v7387_v25  ;;  %3626 = vmatpush.bf16.msrb.mxu3 %v7391_v40  ;;  %v7343_v25 = vor.u32 %v8232_v21, %v7340_v22  ;;  %v1275_v45 = vld [vmem:[#allocation2 + $0x5] ss:$8 sm:$0xf]  ;;  %v1289_v56 = vperm.slane %v1276_v50, 2  ;;  %v1290_v34 = vperm.slane %v1276_v50, 3 }
 0x40e   : > { %v1278_v52 = vperm.slane %v1275_v45, 0 }
 0x410   : > { %3600 = vmatpush.bf16.msrb.mxu1 %v7383_v24  ;;  %3588 = vmatpush.bf16.msrb.mxu0 %v7363_v28 }
 0x411   : > { %3614 = vmatpush.bf16.msrb.mxu2 %v7371_v36  ;;  %3627 = vmatpush.bf16.msrb.mxu3 %v7375_v59 }
 0x414   : > { %3601 = vmatpush.bf16.msrb.mxu1 %v7367_v57  ;;  %3589 = vmatpush.bf16.msrb.mxu0 %v7347_v63  ;;  %v1287_v57 = vperm.slane %v1276_v50, 0  ;;  %v3378_v63 = vrot.slane %v9611_v1, 6 }
 0x415   : > { %3615 = vmatpush.bf16.msrb.mxu2 %v7355_v58  ;;  %3628 = vmatpush.bf16.msrb.mxu3 %v7359_v11  ;;  %v1619_v11 = vld [vmem:[#allocation2 + $0x25] ss:$8 sm:$0xf] }
 0x416   : > { %v1295_v29 = vsel %vm1037_vm0, %v1278_v52, %v1287_v57  ;;  %v1622_v32 = vperm.slane %v1619_v11, 0 }
 0x417   : > { %v1299_v14 = vadd.f32 %v1295_v29, %v9274_v44 }
 0x418   : > { %3602 = vmatpush.bf16.msrb.mxu1 %v7351_v4 }
 0x419   : > { %3616 = vmatpush.bf16.msrb.mxu2 %v7339_v20  ;;  %3629 = vmatpush.bf16.msrb.mxu3 %v7343_v25 }
 0x41c   : > { %3603 = vmatpush.bf16.msrb.mxu1 %v7335_v19  ;;  %v1623_v19 = vperm.slane %v1619_v11, 1 }
 0x487   : > { %v3272_v33 = vpop.f32.mrf.mxu0  ;;  %v3285_v35 = vpop.f32.mrf.mxu1 }
 0x488   : > { %v3315_v41 = vadd.f32 %v3272_v33, %v3063_v43  ;;  %v3316_v42 = vadd.f32 %v3285_v35, %v3064_v17  ;;  %v7331_v17 = vor.u32 %v8233_v13, %v7330_v12  ;;  %v3066_v35 = vld [vmem:[#allocation3 + $0x38] sm:$0x3] }
 0x48a   : > { %v7325_v31 = vmul.f32 -1.442695, %v3315_v41  ;;  %v7326_v54 = vmul.f32 -1.442695, %v3316_v42  ;;  %3590 = vmatpush.bf16.msrb.mxu0 %v7331_v17 }
 0x48c   : > { %8527 = vpow2.f32 %v7325_v31  ;;  %v1279_v31 = vperm.slane %v1275_v45, 1 }
 0x48d   : > { %8529 = vpow2.f32 %v7326_v54  ;;  %v1280_v54 = vperm.slane %v1275_v45, 2 }
 0x48e   : > { %v3298_v9 = vpop.f32.mrf.mxu2  ;;  %v3311_v10 = vpop.f32.mrf.mxu3  ;;  %v1296_v1 = vsel %vm9256_vm1, %v1279_v31, %v1288_v61 }
 0x48f   : > { %v3317_v16 = vadd.f32 %v3298_v9, %v3065_v55  ;;  %v3274_v51 = vpop.f32.mrf.mxu0  ;;  %v3287_v43 = vpop.f32.mrf.mxu1  ;;  %v3318_v42 = vadd.f32 %v3311_v10, %v3066_v35  ;;  %v1281_v55 = vperm.slane %v1275_v45, 3  ;;  %v1297_v10 = vsel %vm9260_vm2, %v1280_v54, %v1289_v56  ;;  %v1620_v35 = vld [vmem:[#allocation2 + $0x22] ss:$8 sm:$0xf] }
 0x490   : > { %v1300_v51 = vadd.f32 %v1296_v1, %v9278_v46  ;;  %v1301_v43 = vadd.f32 %v1297_v10, %v9280_v47  ;;  %v1633_v54 = vperm.slane %v1620_v35, 2  ;;  %v1634_v61 = vperm.slane %v1620_v35, 3 }
 0x491   : > { %v7327_v23 = vmul.f32 -1.442695, %v3317_v16  ;;  %v1298_v58 = vsel %vm9264_vm3, %v1281_v55, %v1290_v34 }
 0x492   : > { %v8528_v24 = vpop.eup %8527  ;;  %v1302_v17 = vadd.f32 %v1298_v58, %v9282_v48  ;;  %v1307_v22 = vrot.slane %v1300_v51, 7 }
 0x493   : > { %v8530_v27 = vpop.eup %8529  ;;  %v9630_v30 = vadd.f32 1.0, %v8528_v24  ;;  %8531 = vpow2.f32 %v7327_v23  ;;  %v1308_v23 = vrot.slane %v1301_v43, 6 }
 0x494   : > { %v9632_v33 = vadd.f32 1.0, %v8530_v27  ;;  %v1309_v24 = vrot.slane %v1302_v17, 5  ;;  %v4402_v17 = vld [vmem:[#allocation4 + $0x6] sm:$0x3] }
 0x495   : > { %8533 = vrcp.f32 %v9630_v30  ;;  %v3340_v26 = vand.u32 2147483647, %v9630_v30  ;;  %v3342_v28 = vand.u32 2147483648, %v9630_v30  ;;  %vm3336_vm8 = vweird.f32 %v9630_v30 }
 0x496   : > { %8535 = vrcp.f32 %v9632_v33  ;;  %v3300_v40 = vpop.f32.mrf.mxu2  ;;  %v3313_v41 = vpop.f32.mrf.mxu3  ;;  %v3357_v49 = vand.u32 2147483648, %v9632_v33  ;;  %v3355_v59 = vand.u32 2147483647, %v9632_v33  ;;  %vm3351_vm9 = vweird.f32 %v9632_v33 }
 0x497   : > { %8537 = vtanh.f32 %v3318_v42  ;;  %vm9650_vm10 = vcmp.eq.f32.partialorder %v3340_v26, 8.507059e+37  ;;  %v3343_v8 = vor.u32 1.1754944e-38, %v3342_v28  ;;  %v1624_v40 = vperm.slane %v1619_v11, 2 }
 0x498   : > { %v3358_v5 = vor.u32 1.1754944e-38, %v3357_v49  ;;  %vm9660_vm12 = vcmp.eq.f32.partialorder %v3355_v59, 8.507059e+37  ;;  %v1625_v41 = vperm.slane %v1619_v11, 3  ;;  %v1310_v26 = vsel %vm1088_vm4, %v1299_v14, %v1307_v22  ;;  %v8293_v22 = vld [vmem:[#allocation10 + $0xec] sm:$0xf0] }
 0x499   : > { %v8532_v53 = vpop.eup %8531  ;;  %v1311_v45 = vsel %vm1090_vm5, %v1308_v23, %v1309_v24  ;;  %v1631_v49 = vperm.slane %v1620_v35, 0  ;;  %v8291_v23 = vld [vmem:[#allocation10 + $0xe4] sm:$0xf] }
 0x49a   : > { %v9639_v36 = vadd.f32 1.0, %v8532_v53 }
 0x49b   : > { %v8534_v0 = vpop.eup %8533  ;;  %v1639_v56 = vsel %vm1037_vm0, %v1622_v32, %v1631_v49  ;;  %v4407_v32 = vld [vmem:[#allocation4 + $0x6] sm:$0x3]  ;;  %v7557_v49 = vld [vmem:[#allocation10 + $0xc0] sm:$0xf] }
 0x49c   : > { %v8536_v2 = vpop.eup %8535  ;;  %v3332_v62 = vmul.f32 %v8534_v0, %v9630_v30  ;;  %8539 = vrcp.f32 %v9639_v36  ;;  %vm3337_vm11 = vweird.f32 %v8534_v0  ;;  %v1312_v30 = vsel %vm1092_vm6, %v1310_v26, %v1311_v45  ;;  %v7583_v26 = vld [vmem:[#allocation10 + $0xf8] sm:$0xf0] }
 0x49d   : > { %v3347_v4 = vmul.f32 %v8536_v2, %v9632_v33  ;;  %v8538_v60 = vpop.eup %8537  ;;  %vm3352_vm13 = vweird.f32 %v8536_v2  ;;  %vm3338_vm14 = vmor %vm3336_vm8, %vm3337_vm11  ;;  %1315 = vst.msk [vmem:[#allocation3 + $0x22] ss:$8 sm:$0xf] %vm9290_vm7, %v1312_v30  ;;  %v1632_v33 = vperm.slane %v1620_v35, 1  ;;  %v3372_v6 = vand.u32 2147483648, %v9639_v36 }
 0x49e   : > { %v3333_v9 = vsub.f32 1.0, %v3332_v62  ;;  %vm3353_vm15 = vmor %vm3351_vm9, %vm3352_vm13  ;;  %v1643_v62 = vadd.f32 %v1639_v56, %v9274_v44  ;;  %vm3366_vm9 = vweird.f32 %v9639_v36  ;;  %v8294_v35 = vld [vmem:[#allocation10 + $0xf4] sm:$0xf0]  ;;  %v7559_v30 = vld [vmem:[#allocation10 + $0xd0] sm:$0xf0] }
 0x49f   : > { %v3348_v12 = vsub.f32 1.0, %v3347_v4  ;;  %v1640_v34 = vsel %vm9256_vm1, %v1623_v19, %v1632_v33  ;;  %v3373_v13 = vor.u32 1.1754944e-38, %v3372_v6  ;;  %v7541_v56 = vld [vmem:[#allocation10 + $0xa0] sm:$0xf]  ;;  %v8284_v6 = vld [vmem:[#allocation10 + $0xac] sm:$0xf] }
 0x4a0   : > { %v3334_v16 = vmul.f32 %v8534_v0, %v3333_v9  ;;  %v1644_v29 = vadd.f32 %v1640_v34, %v9278_v46  ;;  %v3370_v9 = vand.u32 2147483647, %v9639_v36  ;;  %v8285_v34 = vld [vmem:[#allocation10 + $0xac] sm:$0xf0] }
 0x4a1   : > { %v3349_v18 = vmul.f32 %v8536_v2, %v3348_v12 }
 0x4a2   : > { %v8540_v20 = vpop.eup %8539  ;;  %v3335_v21 = vadd.f32 %v8534_v0, %v3334_v16  ;;  %vm3371_vm11 = vcmp.eq.f32.partialorder %v3370_v9, 8.507059e+37 }
 0x4a3   : > { %v3362_v25 = vmul.f32 %v8540_v20, %v9639_v36  ;;  %v3350_v27 = vadd.f32 %v8536_v2, %v3349_v18  ;;  %vm3367_vm8 = vweird.f32 %v8540_v20 }
 0x4a4   : > { %v3339_v42 = vsel %vm3338_vm14, %v8534_v0, %v3335_v21  ;;  %v1641_v0 = vsel %vm9260_vm2, %v1624_v40, %v1633_v54  ;;  %v7573_v21 = vld [vmem:[#allocation10 + $0xe0] sm:$0xf] }
 0x4a5   : > { %v3363_v28 = vsub.f32 1.0, %v3362_v25  ;;  %v3344_v50 = vsel %vm9650_vm10, %v3343_v8, %v3339_v42  ;;  %v3354_v52 = vsel %vm3353_vm15, %v8536_v2, %v3350_v27  ;;  %v1642_v2 = vsel %vm9264_vm3, %v1625_v41, %v1634_v61  ;;  %vm3368_vm10 = vmor %vm3366_vm9, %vm3367_vm8  ;;  %v7575_v25 = vld [vmem:[#allocation10 + $0xf0] sm:$0xf0]  ;;  %v7581_v27 = vld [vmem:[#allocation10 + $0xe8] sm:$0xf] }
 0x4a6   : > { %v3359_v53 = vsel %vm9660_vm12, %v3358_v5, %v3354_v52  ;;  %v3381_v31 = vmul.f32 %v8538_v60, %v3344_v50  ;;  %v1645_v4 = vadd.f32 %v1641_v0, %v9280_v47  ;;  %v1646_v5 = vadd.f32 %v1642_v2, %v9282_v48  ;;  %v8292_v42 = vld [vmem:[#allocation10 + $0xec] sm:$0xf]  ;;  %v8287_v50 = vld [vmem:[#allocation10 + $0xc4] sm:$0xf] }
 0x4a7   : > { %v3364_v55 = vmul.f32 %v8540_v20, %v3363_v28  ;;  %v3380_v57 = vmul.f32 %v3378_v63, %v3359_v53  ;;  %v1651_v8 = vrot.slane %v1644_v29, 7  ;;  %v7574_v24 = vor.u32 %v8293_v22, %v7573_v21  ;;  %v8289_v28 = vld [vmem:[#allocation10 + $0xcc] sm:$0xf0]  ;;  %v7565_v53 = vld [vmem:[#allocation10 + $0xc8] sm:$0xf] }
 0x4a8   : > { %v1652_v1 = vrot.slane %v1645_v4, 6  ;;  %v1653_v10 = vrot.slane %v1646_v5, 5  ;;  %v7578_v40 = vor.u32 %v8291_v23, %v7575_v25  ;;  %v7582_v41 = vor.u32 %v8294_v35, %v7581_v27  ;;  %v8283_v0 = vld [vmem:[#allocation10 + $0xa4] sm:$0xf]  ;;  %v7549_v29 = vld [vmem:[#allocation10 + $0xa8] sm:$0xf] }
 0x4a9   : > { %v9689_v59 = vadd.f32 %v3381_v31, %v3380_v57  ;;  %v3365_v63 = vadd.f32 %v8540_v20, %v3364_v55  ;;  %v1654_v58 = vsel %vm1088_vm4, %v1643_v62, %v1651_v8  ;;  %3918 = vmatpush.bf16.msra.mxu0 %v7574_v24  ;;  %v7586_v45 = vor.u32 %v8292_v42, %v7583_v26  ;;  %v8290_v31 = vld [vmem:[#allocation10 + $0xd4] sm:$0xf0]  ;;  %v8288_v55 = vld [vmem:[#allocation10 + $0xcc] sm:$0xf]  ;;  %v7567_v57 = vld [vmem:[#allocation10 + $0xd8] sm:$0xf0] }
 0x4aa   : > { %v1655_v12 = vsel %vm1090_vm5, %v1652_v1, %v1653_v10  ;;  %3931 = vmatpush.bf16.msra.mxu1 %v7578_v40  ;;  %3944 = vmatpush.bf16.msra.mxu2 %v7582_v41  ;;  %v7558_v52 = vor.u32 %v8289_v28, %v7557_v49  ;;  %v7562_v33 = vor.u32 %v8287_v50, %v7559_v30  ;;  %v7543_v62 = vld [vmem:[#allocation10 + $0xb0] sm:$0xf0]  ;;  %v7551_v8 = vld [vmem:[#allocation10 + $0xb8] sm:$0xf0]  ;;  %v7525_v1 = vld [vmem:[#allocation10 + $0x80] sm:$0xf] }
 0x4ab   : > { %8541 = vtanh.f32 %v9689_v59  ;;  %v3369_v11 = vsel %vm3368_vm10, %v8540_v20, %v3365_v63  ;;  %v1656_v14 = vsel %vm1092_vm6, %v1654_v58, %v1655_v12  ;;  %3957 = vmatpush.bf16.msra.mxu3 %v7586_v45  ;;  %v7566_v54 = vor.u32 %v8290_v31, %v7565_v53  ;;  %v8286_v63 = vld [vmem:[#allocation10 + $0xb4] sm:$0xf0]  ;;  %v8281_v10 = vld [vmem:[#allocation10 + $0x8c] sm:$0xf0]  ;;  %v8279_v58 = vld [vmem:[#allocation10 + $0x84] sm:$0xf] }
 0x4ac   : > { %1659 = vst.msk [vmem:[#allocation3 + $0x23] ss:$8 sm:$0xf] %vm9290_vm7, %v1656_v14  ;;  %v3374_v51 = vsel %vm3371_vm11, %v3373_v13, %v3369_v11  ;;  %v7570_v61 = vor.u32 %v8288_v55, %v7567_v57  ;;  %v7542_v2 = vor.u32 %v8285_v34, %v7541_v56  ;;  %v7546_v4 = vor.u32 %v8283_v0, %v7543_v62  ;;  %v7527_v12 = vld [vmem:[#allocation10 + $0x90] sm:$0xf0] }
 0x4ad   : > { %3919 = vmatpush.bf16.msra.mxu0 %v7558_v52  ;;  %v7550_v5 = vor.u32 %v8286_v63, %v7549_v29  ;;  %v7554_v9 = vor.u32 %v8284_v6, %v7551_v8  ;;  %v7526_v11 = vor.u32 %v8281_v10, %v7525_v1  ;;  %v7533_v13 = vld [vmem:[#allocation10 + $0x88] sm:$0xf]  ;;  %v8282_v14 = vld [vmem:[#allocation10 + $0x94] sm:$0xf0]  ;;  %v7509_v22 = vld [vmem:[#allocation10 + $0x60] sm:$0xf] }
 0x4ae   : > { %3932 = vmatpush.bf16.msra.mxu1 %v7562_v33  ;;  %3945 = vmatpush.bf16.msra.mxu2 %v7566_v54  ;;  %v8277_v23 = vld [vmem:[#allocation10 + $0x6c] sm:$0xf0]  ;;  %v8275_v25 = vld [vmem:[#allocation10 + $0x64] sm:$0xf]  ;;  %v7511_v27 = vld [vmem:[#allocation10 + $0x70] sm:$0xf0] }
 0x4af   : > { %3958 = vmatpush.bf16.msra.mxu3 %v7570_v61  ;;  %v7510_v24 = vor.u32 %v8277_v23, %v7509_v22  ;;  %v7517_v35 = vld [vmem:[#allocation10 + $0x68] sm:$0xf]  ;;  %v7514_v42 = vor.u32 %v8275_v25, %v7511_v27  ;;  %v8278_v26 = vld [vmem:[#allocation10 + $0x74] sm:$0xf0]  ;;  %v8276_v45 = vld [vmem:[#allocation10 + $0x6c] sm:$0xf] }
 0x4b0   : > { %v7519_v49 = vld [vmem:[#allocation10 + $0x78] sm:$0xf0]  ;;  %v7518_v28 = vor.u32 %v8278_v26, %v7517_v35  ;;  %v7493_v31 = vld [vmem:[#allocation10 + $0x40] sm:$0xf]  ;;  %v8273_v33 = vld [vmem:[#allocation10 + $0x4c] sm:$0xf0] }
 0x4b1   : > { %v8542_v16 = vpop.eup %8541  ;;  %3920 = vmatpush.bf16.msra.mxu0 %v7542_v2  ;;  %v7522_v50 = vor.u32 %v8276_v45, %v7519_v49  ;;  %v8271_v54 = vld [vmem:[#allocation10 + $0x44] sm:$0xf]  ;;  %v7495_v55 = vld [vmem:[#allocation10 + $0x50] sm:$0xf0]  ;;  %v7494_v56 = vor.u32 %v8273_v33, %v7493_v31  ;;  %v7501_v0 = vld [vmem:[#allocation10 + $0x48] sm:$0xf] }
 0x4b2   : > { %v3384_v43 = vmul.f32 %v8542_v16, %v3374_v51  ;;  %3933 = vmatpush.bf16.msra.mxu1 %v7546_v4  ;;  %3946 = vmatpush.bf16.msra.mxu2 %v7550_v5  ;;  %v7530_v16 = vor.u32 %v8279_v58, %v7527_v12  ;;  %v7534_v51 = vor.u32 %v8282_v14, %v7533_v13  ;;  %v8274_v2 = vld [vmem:[#allocation10 + $0x54] sm:$0xf0]  ;;  %v8272_v62 = vld [vmem:[#allocation10 + $0x4c] sm:$0xf]  ;;  %v7503_v8 = vld [vmem:[#allocation10 + $0x58] sm:$0xf0] }
 0x4b3   : > { %3959 = vmatpush.bf16.msra.mxu3 %v7554_v9  ;;  %v3388_v53 = vld [vmem:[#allocation3 + $0x30] sm:$0xc]  ;;  %v7498_v34 = vor.u32 %v8271_v54, %v7495_v55  ;;  %v7502_v6 = vor.u32 %v8274_v2, %v7501_v0  ;;  %v7477_v9 = vld [vmem:[#allocation10 + $0x20] sm:$0xf]  ;;  %v7506_v1 = vor.u32 %v8272_v62, %v7503_v8  ;;  %v8267_v58 = vld [vmem:[#allocation10 + $0x24] sm:$0xf] }
 0x4b4   : > { %3385 = vst [vmem:[#allocation4 + $0x8] sm:$0x3] %v3384_v43  ;;  %v3390_v36 = vpack.c.bf16 %v3384_v43, %v3384_v43  ;;  %v8280_v43 = vld [vmem:[#allocation10 + $0x8c] sm:$0xf]  ;;  %v8269_v10 = vld [vmem:[#allocation10 + $0x2c] sm:$0xf0] }
 0x4b5   : > { %3921 = vmatpush.bf16.msra.mxu0 %v7526_v11  ;;  %v7479_v11 = vld [vmem:[#allocation10 + $0x30] sm:$0xf0]  ;;  %v7478_v13 = vor.u32 %v8269_v10, %v7477_v9  ;;  %v7469_v27 = vld [vmem:[#allocation10 + $0x8] sm:$0xf]  ;;  %v8266_v35 = vld [vmem:[#allocation10 + $0x14] sm:$0xf0] }
 0x4b6   : > { %3591 = vmatmul.bf16.vlgmr.msrb.gmra.mxu0 %v3390_v36  ;;  %3604 = vmatmul.bf16.vlgmr.msrb.gmra.mxu1 %v3390_v36  ;;  %v7482_v14 = vor.u32 %v8267_v58, %v7479_v11  ;;  %v7463_v22 = vld [vmem:[#allocation10 + $0x10] sm:$0xf0]  ;;  %v7470_v26 = vor.u32 %v8266_v35, %v7469_v27  ;;  %v7471_v45 = vld [vmem:[#allocation10 + $0x18] sm:$0xf0] }
 0x4b7   : > { %3617 = vmatmul.bf16.vlgmr.msrb.gmra.mxu2 %v3390_v36  ;;  %3630 = vmatmul.bf16.vlgmr.msrb.gmra.mxu3 %v3390_v36  ;;  %v7535_v36 = vld [vmem:[#allocation10 + $0x98] sm:$0xf0] }
 0x4b8   : > { %3934 = vmatpush.bf16.msra.mxu1 %v7530_v16  ;;  %3947 = vmatpush.bf16.msra.mxu2 %v7534_v51  ;;  %v7485_v16 = vld [vmem:[#allocation10 + $0x28] sm:$0xf]  ;;  %v8270_v51 = vld [vmem:[#allocation10 + $0x34] sm:$0xf0] }
 0x4b9   : > { %3922 = vmatpush.bf16.msra.mxu0 %v7510_v24 }
 0x4bb   : > { %v4403_v60 = vld [vmem:[#allocation4 + $0x8] sm:$0x3] }
 0x4bc   : > { %v4406_v18 = vld [vmem:[#allocation4 + $0x8] sm:$0x3]  ;;  %v4404_v19 = vsel %vm1037_vm0, %v4402_v17, %v4403_v60  ;;  %v3386_v17 = vld [vmem:[#allocation3 + $0x20] sm:$0xc]  ;;  %3935 = vmatpush.bf16.msra.mxu1 %v7514_v42  ;;  %3948 = vmatpush.bf16.msra.mxu2 %v7518_v28 }
 0x4bd   : > { %v4408_v20 = vsel %vm1037_vm0, %v4406_v18, %v4407_v32  ;;  %4405 = vst [vmem:[#allocation5 + $0x6] sm:$0x3] %v4404_v19  ;;  %v3387_v18 = vld [vmem:[#allocation3 + $0x28] sm:$0xc]  ;;  %v7538_v19 = vor.u32 %v8280_v43, %v7535_v36  ;;  %3923 = vmatpush.bf16.msra.mxu0 %v7494_v56  ;;  %v8268_v43 = vld [vmem:[#allocation10 + $0x2c] sm:$0xf] }
 0x4be   : > { %4409 = vst [vmem:[#allocation5 + $0x8] sm:$0x3] %v4408_v20  ;;  %v3389_v36 = vld [vmem:[#allocation3 + $0x38] sm:$0xc] }
 0x4bf   : > { %3960 = vmatpush.bf16.msra.mxu3 %v7538_v19 }
 0x4c0   : > { %3936 = vmatpush.bf16.msra.mxu1 %v7498_v34  ;;  %3949 = vmatpush.bf16.msra.mxu2 %v7502_v6 }
 0x4c1   : > { %3924 = vmatpush.bf16.msra.mxu0 %v7478_v13 }
 0x4c3   : > { %3961 = vmatpush.bf16.msra.mxu3 %v7522_v50 }
 0x4c4   : > { %3937 = vmatpush.bf16.msra.mxu1 %v7482_v14 }
 0x4c7   : > { %3962 = vmatpush.bf16.msra.mxu3 %v7506_v1 }
 0x533   : > { %v3592_v60 = vpop.f32.mrf.mxu0  ;;  %v3605_v32 = vpop.f32.mrf.mxu1 }
 0x534   : > { %v3639_v20 = vrot.slane %v3592_v60, 6  ;;  %v3640_v21 = vrot.slane %v3605_v32, 6  ;;  %v7487_v60 = vld [vmem:[#allocation10 + $0x38] sm:$0xf0]  ;;  %v8265_v32 = vld [vmem:[#allocation10 + $0xc] sm:$0xf0] }
 0x536   : > { %v3647_v40 = vadd.f32 %v3639_v20, %v3386_v17  ;;  %v3648_v41 = vadd.f32 %v3640_v21, %v3387_v18  ;;  %v7486_v17 = vor.u32 %v8270_v51, %v7485_v16  ;;  %v7461_v18 = vld [vmem:[#allocation10] sm:$0xf]  ;;  %v7490_v20 = vor.u32 %v8268_v43, %v7487_v60  ;;  %v8263_v21 = vld [vmem:[#allocation10 + $0x4] sm:$0xf] }
 0x537   : > { %v7462_v24 = vor.u32 %v8265_v32, %v7461_v18  ;;  %v7466_v25 = vor.u32 %v8263_v21, %v7463_v22  ;;  %v1661_v60 = vld [vmem:[#allocation2 + $0x26] ss:$8 sm:$0xf] }
 0x538   : > { %v7456_v52 = vmul.f32 -1.442695, %v3647_v40  ;;  %v7457_v30 = vmul.f32 -1.442695, %v3648_v41  ;;  %v8264_v40 = vld [vmem:[#allocation10 + $0xc] sm:$0xf]  ;;  %3950 = vmatpush.bf16.msra.mxu2 %v7486_v17  ;;  %3963 = vmatpush.bf16.msra.mxu3 %v7490_v20 }
 0x539   : > { %3925 = vmatpush.bf16.msra.mxu0 %v7462_v24  ;;  %3938 = vmatpush.bf16.msra.mxu1 %v7466_v25  ;;  %v1664_v35 = vperm.slane %v1661_v60, 0 }
 0x53a   : > { %8543 = vpow2.f32 %v7456_v52  ;;  %v3618_v57 = vpop.f32.mrf.mxu2  ;;  %v3631_v61 = vpop.f32.mrf.mxu3  ;;  %v7474_v52 = vor.u32 %v8264_v40, %v7471_v45  ;;  %v1665_v40 = vperm.slane %v1661_v60, 1 }
 0x53b   : > { %8545 = vpow2.f32 %v7457_v30  ;;  %v3641_v29 = vrot.slane %v3618_v57, 6  ;;  %v3642_v63 = vrot.slane %v3631_v61, 6  ;;  %v3594_v4 = vpop.f32.mrf.mxu0  ;;  %v3607_v5 = vpop.f32.mrf.mxu1  ;;  %v1317_v57 = vld [vmem:[#allocation2 + $0x6] ss:$8 sm:$0xf] }
 0x53c   : > { %3951 = vmatpush.bf16.msra.mxu2 %v7470_v26  ;;  %3964 = vmatpush.bf16.msra.mxu3 %v7474_v52  ;;  %v1318_v61 = vld [vmem:[#allocation2 + $0x1] ss:$8 sm:$0xf]  ;;  %v1320_v0 = vperm.slane %v1317_v57, 0  ;;  %v1321_v2 = vperm.slane %v1317_v57, 1  ;;  %v1323_v9 = vperm.slane %v1317_v57, 3 }
 0x53d   : > { %v3649_v12 = vadd.f32 %v3641_v29, %v3388_v53  ;;  %v3650_v30 = vadd.f32 %v3642_v63, %v3389_v36  ;;  %v3710_v53 = vrot.slane %v9689_v59, 6  ;;  %v1322_v29 = vperm.slane %v1317_v57, 2 }
 0x53e   : > { %v1329_v63 = vperm.slane %v1318_v61, 0  ;;  %v1330_v4 = vperm.slane %v1318_v61, 1  ;;  %v1331_v5 = vperm.slane %v1318_v61, 2  ;;  %v1332_v13 = vperm.slane %v1318_v61, 3 }
 0x53f   : > { %v7458_v19 = vmul.f32 -1.442695, %v3649_v12 }
 0x540   : > { %v8544_v23 = vpop.eup %8543  ;;  %v1337_v14 = vsel %vm1037_vm0, %v1320_v0, %v1329_v63  ;;  %v1338_v16 = vsel %vm9256_vm1, %v1321_v2, %v1330_v4  ;;  %v1339_v17 = vsel %vm9260_vm2, %v1322_v29, %v1331_v5  ;;  %v1340_v32 = vsel %vm9264_vm3, %v1323_v9, %v1332_v13 }
 0x541   : > { %v8546_v41 = vpop.eup %8545  ;;  %v9710_v42 = vadd.f32 1.0, %v8544_v23  ;;  %8547 = vpow2.f32 %v7458_v19  ;;  %v1341_v19 = vadd.f32 %v1337_v14, %v9274_v44  ;;  %v1342_v20 = vadd.f32 %v1338_v16, %v9278_v46 }
 0x542   : > { %v9712_v49 = vadd.f32 1.0, %v8546_v41  ;;  %v3620_v28 = vpop.f32.mrf.mxu2  ;;  %v3633_v50 = vpop.f32.mrf.mxu3  ;;  %v1343_v22 = vadd.f32 %v1339_v17, %v9280_v47  ;;  %v1344_v23 = vadd.f32 %v1340_v32, %v9282_v48 }
 0x543   : > { %8549 = vrcp.f32 %v9710_v42  ;;  %v3672_v33 = vand.u32 2147483647, %v9710_v42  ;;  %v3674_v54 = vand.u32 2147483648, %v9710_v42  ;;  %vm3668_vm12 = vweird.f32 %v9710_v42  ;;  %v1662_v28 = vld [vmem:[#allocation2 + $0x21] ss:$8 sm:$0xf] }
 0x544   : > { %8551 = vrcp.f32 %v9712_v49  ;;  %v3689_v31 = vand.u32 2147483648, %v9712_v49  ;;  %v3687_v34 = vand.u32 2147483647, %v9712_v49  ;;  %vm3683_vm13 = vweird.f32 %v9712_v49 }
 0x545   : > { %8553 = vtanh.f32 %v3650_v30  ;;  %vm9728_vm14 = vcmp.eq.f32.partialorder %v3672_v33, 8.507059e+37  ;;  %v3675_v11 = vor.u32 1.1754944e-38, %v3674_v54  ;;  %v1349_v27 = vrot.slane %v1342_v20, 7 }
 0x546   : > { %v3690_v10 = vor.u32 1.1754944e-38, %v3689_v31  ;;  %vm9736_vm8 = vcmp.eq.f32.partialorder %v3687_v34, 8.507059e+37  ;;  %v1350_v45 = vrot.slane %v1343_v22, 6  ;;  %v1666_v50 = vperm.slane %v1661_v60, 2  ;;  %v4398_v22 = vld [vmem:[#allocation4 + $0x4] sm:$0x3] }
 0x547   : > { %v8548_v55 = vpop.eup %8547  ;;  %v1351_v30 = vrot.slane %v1344_v23, 5  ;;  %v1352_v31 = vsel %vm1088_vm4, %v1341_v19, %v1349_v27  ;;  %v1667_v33 = vperm.slane %v1661_v60, 3  ;;  %v1673_v61 = vperm.slane %v1662_v28, 0 }
 0x548   : > { %v9720_v56 = vadd.f32 1.0, %v8548_v55  ;;  %v1674_v2 = vperm.slane %v1662_v28, 1  ;;  %v1675_v63 = vperm.slane %v1662_v28, 2  ;;  %v1676_v4 = vperm.slane %v1662_v28, 3  ;;  %v7706_v28 = vld [vmem:[#allocation10 + $0xf0] sm:$0xf0] }
 0x549   : > { %v8550_v62 = vpop.eup %8549  ;;  %v1353_v0 = vsel %vm1090_vm5, %v1350_v45, %v1351_v30  ;;  %v1681_v5 = vsel %vm1037_vm0, %v1664_v35, %v1673_v61  ;;  %v8321_v61 = vld [vmem:[#allocation10 + $0xcc] sm:$0xf0] }
 0x54a   : > { %v8552_v6 = vpop.eup %8551  ;;  %v3664_v8 = vmul.f32 %v8550_v62, %v9710_v42  ;;  %8555 = vrcp.f32 %v9720_v56  ;;  %vm3669_vm15 = vweird.f32 %v8550_v62  ;;  %v1354_v29 = vsel %vm1092_vm6, %v1352_v31, %v1353_v0  ;;  %v7690_v0 = vld [vmem:[#allocation10 + $0xd0] sm:$0xf0] }
 0x54b   : > { %v3679_v1 = vmul.f32 %v8552_v6, %v9712_v49  ;;  %v8554_v51 = vpop.eup %8553  ;;  %vm3684_vm9 = vweird.f32 %v8552_v6  ;;  %vm3670_vm10 = vmor %vm3668_vm12, %vm3669_vm15  ;;  %1357 = vst.msk [vmem:[#allocation3 + $0x24] ss:$8 sm:$0xf] %vm9290_vm7, %v1354_v29  ;;  %v1683_v59 = vsel %vm9260_vm2, %v1666_v50, %v1675_v63  ;;  %v3702_v13 = vand.u32 2147483647, %v9720_v56 }
 0x54c   : > { %v3665_v12 = vsub.f32 1.0, %v3664_v8  ;;  %vm3685_vm11 = vmor %vm3683_vm13, %vm3684_vm9  ;;  %v1687_v58 = vadd.f32 %v1683_v59, %v9280_v47  ;;  %vm3698_vm13 = vweird.f32 %v9720_v56  ;;  %v7712_v50 = vld [vmem:[#allocation10 + $0xe8] sm:$0xf]  ;;  %v8320_v63 = vld [vmem:[#allocation10 + $0xcc] sm:$0xf] }
 0x54d   : > { %v3680_v43 = vsub.f32 1.0, %v3679_v1  ;;  %v1685_v1 = vadd.f32 %v1681_v5, %v9274_v44  ;;  %vm3703_vm15 = vcmp.eq.f32.partialorder %v3702_v13, 8.507059e+37  ;;  %v8315_v59 = vld [vmem:[#allocation10 + $0xa4] sm:$0xf]  ;;  %v8316_v13 = vld [vmem:[#allocation10 + $0xac] sm:$0xf] }
 0x54e   : > { %v3666_v18 = vmul.f32 %v8550_v62, %v3665_v12  ;;  %v1694_v16 = vrot.slane %v1687_v58, 6  ;;  %v8318_v58 = vld [vmem:[#allocation10 + $0xb4] sm:$0xf0] }
 0x54f   : > { %v3681_v21 = vmul.f32 %v8552_v6, %v3680_v43 }
 0x550   : > { %v8556_v24 = vpop.eup %8555  ;;  %v3667_v25 = vadd.f32 %v8550_v62, %v3666_v18 }
 0x551   : > { %v3694_v41 = vmul.f32 %v8556_v24, %v9720_v56  ;;  %v3682_v26 = vadd.f32 %v8552_v6, %v3681_v21  ;;  %vm3699_vm12 = vweird.f32 %v8556_v24 }
 0x552   : > { %v3671_v52 = vsel %vm3670_vm10, %v8550_v62, %v3667_v25  ;;  %v4411_v25 = vld [vmem:[#allocation4 + $0x4] sm:$0x3] }
 0x553   : > { %v3695_v54 = vsub.f32 1.0, %v3694_v41  ;;  %v3676_v55 = vsel %vm9728_vm14, %v3675_v11, %v3671_v52  ;;  %v3686_v57 = vsel %vm3685_vm11, %v8552_v6, %v3682_v26  ;;  %v1682_v6 = vsel %vm9256_vm1, %v1665_v40, %v1674_v2  ;;  %vm3700_vm14 = vmor %vm3698_vm13, %vm3699_vm12  ;;  %v7704_v40 = vld [vmem:[#allocation10 + $0xe0] sm:$0xf]  ;;  %v8325_v41 = vld [vmem:[#allocation10 + $0xec] sm:$0xf0] }
 0x554   : > { %v3691_v42 = vsel %vm9736_vm8, %v3690_v10, %v3686_v57  ;;  %v3713_v34 = vmul.f32 %v8554_v51, %v3676_v55  ;;  %v1686_v10 = vadd.f32 %v1682_v6, %v9278_v46  ;;  %v3704_v11 = vand.u32 2147483648, %v9720_v56  ;;  %v8323_v26 = vld [vmem:[#allocation10 + $0xe4] sm:$0xf]  ;;  %v8326_v52 = vld [vmem:[#allocation10 + $0xf4] sm:$0xf0] }
 0x555   : > { %v3712_v49 = vmul.f32 %v3710_v53, %v3691_v42  ;;  %v3696_v62 = vmul.f32 %v8556_v24, %v3695_v54  ;;  %v1684_v53 = vsel %vm9264_vm3, %v1667_v33, %v1676_v4  ;;  %v7705_v45 = vor.u32 %v8325_v41, %v7704_v40  ;;  %v8324_v33 = vld [vmem:[#allocation10 + $0xec] sm:$0xf]  ;;  %v7714_v54 = vld [vmem:[#allocation10 + $0xf8] sm:$0xf0]  ;;  %v7688_v57 = vld [vmem:[#allocation10 + $0xc0] sm:$0xf] }
 0x556   : > { %v1688_v12 = vadd.f32 %v1684_v53, %v9282_v48  ;;  %v1693_v14 = vrot.slane %v1686_v10, 7  ;;  %v3705_v17 = vor.u32 1.1754944e-38, %v3704_v11  ;;  %v7709_v30 = vor.u32 %v8323_v26, %v7706_v28  ;;  %v8319_v42 = vld [vmem:[#allocation10 + $0xc4] sm:$0xf]  ;;  %v7696_v2 = vld [vmem:[#allocation10 + $0xc8] sm:$0xf] }
 0x557   : > { %v9769_v8 = vadd.f32 %v3713_v34, %v3712_v49  ;;  %v3697_v9 = vadd.f32 %v8556_v24, %v3696_v62  ;;  %v7713_v31 = vor.u32 %v8326_v52, %v7712_v50  ;;  %4253 = vmatpush.bf16.msrb.mxu0 %v7705_v45  ;;  %v7717_v55 = vor.u32 %v8324_v33, %v7714_v54  ;;  %v8322_v49 = vld [vmem:[#allocation10 + $0xd4] sm:$0xf0]  ;;  %v7698_v4 = vld [vmem:[#allocation10 + $0xd8] sm:$0xf0]  ;;  %v7672_v6 = vld [vmem:[#allocation10 + $0xa0] sm:$0xf] }
 0x558   : > { %v1695_v51 = vrot.slane %v1688_v12, 5  ;;  %v1696_v36 = vsel %vm1088_vm4, %v1685_v1, %v1693_v14  ;;  %4266 = vmatpush.bf16.msrb.mxu1 %v7709_v30  ;;  %v7689_v34 = vor.u32 %v8321_v61, %v7688_v57  ;;  %v7693_v62 = vor.u32 %v8319_v42, %v7690_v0  ;;  %v7674_v1 = vld [vmem:[#allocation10 + $0xb0] sm:$0xf0]  ;;  %v7680_v10 = vld [vmem:[#allocation10 + $0xa8] sm:$0xf] }
 0x559   : > { %8557 = vtanh.f32 %v9769_v8  ;;  %v3701_v43 = vsel %vm3700_vm14, %v8556_v24, %v3697_v9  ;;  %4279 = vmatpush.bf16.msrb.mxu2 %v7713_v31  ;;  %4292 = vmatpush.bf16.msrb.mxu3 %v7717_v55  ;;  %v7697_v29 = vor.u32 %v8322_v49, %v7696_v2  ;;  %v7701_v5 = vor.u32 %v8320_v63, %v7698_v4  ;;  %v8317_v9 = vld [vmem:[#allocation10 + $0xac] sm:$0xf0]  ;;  %v7682_v14 = vld [vmem:[#allocation10 + $0xb8] sm:$0xf0]  ;;  %v7640_v41 = vld [vmem:[#allocation10 + $0x60] sm:$0xf] }
 0x55a   : > { %v1697_v60 = vsel %vm1090_vm5, %v1694_v16, %v1695_v51  ;;  %v3706_v19 = vsel %vm3703_vm15, %v3705_v17, %v3701_v43  ;;  %v7673_v53 = vor.u32 %v8317_v9, %v7672_v6  ;;  %v7677_v11 = vor.u32 %v8315_v59, %v7674_v1  ;;  %v7656_v51 = vld [vmem:[#allocation10 + $0x80] sm:$0xf]  ;;  %v8313_v43 = vld [vmem:[#allocation10 + $0x8c] sm:$0xf0]  ;;  %v8307_v28 = vld [vmem:[#allocation10 + $0x64] sm:$0xf] }
 0x55b   : > { %v1698_v18 = vsel %vm1092_vm6, %v1696_v36, %v1697_v60  ;;  %4254 = vmatpush.bf16.msrb.mxu0 %v7689_v34  ;;  %v7681_v12 = vor.u32 %v8318_v58, %v7680_v10  ;;  %v7685_v16 = vor.u32 %v8316_v13, %v7682_v14  ;;  %v8311_v36 = vld [vmem:[#allocation10 + $0x84] sm:$0xf]  ;;  %v7657_v17 = vor.u32 %v8313_v43, %v7656_v51  ;;  %v7658_v60 = vld [vmem:[#allocation10 + $0x90] sm:$0xf0]  ;;  %v8309_v26 = vld [vmem:[#allocation10 + $0x6c] sm:$0xf0] }
 0x55c   : > { %1701 = vst.msk [vmem:[#allocation3 + $0x25] ss:$8 sm:$0xf] %vm9290_vm7, %v1698_v18  ;;  %4267 = vmatpush.bf16.msrb.mxu1 %v7693_v62  ;;  %v7664_v18 = vld [vmem:[#allocation10 + $0x88] sm:$0xf]  ;;  %v7641_v45 = vor.u32 %v8309_v26, %v7640_v41 }
 0x55d   : > { %4280 = vmatpush.bf16.msrb.mxu2 %v7697_v29  ;;  %4293 = vmatpush.bf16.msrb.mxu3 %v7701_v5  ;;  %v7642_v50 = vld [vmem:[#allocation10 + $0x70] sm:$0xf0]  ;;  %v7648_v52 = vld [vmem:[#allocation10 + $0x68] sm:$0xf]  ;;  %v8310_v54 = vld [vmem:[#allocation10 + $0x74] sm:$0xf0] }
 0x55e   : > { %v7645_v33 = vor.u32 %v8307_v28, %v7642_v50  ;;  %v8308_v55 = vld [vmem:[#allocation10 + $0x6c] sm:$0xf]  ;;  %v7650_v57 = vld [vmem:[#allocation10 + $0x78] sm:$0xf0]  ;;  %v7649_v61 = vor.u32 %v8310_v54, %v7648_v52  ;;  %v7624_v49 = vld [vmem:[#allocation10 + $0x40] sm:$0xf] }
 0x55f   : > { %v8558_v32 = vpop.eup %8557  ;;  %4255 = vmatpush.bf16.msrb.mxu0 %v7673_v53  ;;  %v7653_v42 = vor.u32 %v8308_v55, %v7650_v57  ;;  %v8305_v62 = vld [vmem:[#allocation10 + $0x4c] sm:$0xf0]  ;;  %v8303_v29 = vld [vmem:[#allocation10 + $0x44] sm:$0xf]  ;;  %v7626_v63 = vld [vmem:[#allocation10 + $0x50] sm:$0xf0] }
 0x560   : > { %v3716_v20 = vmul.f32 %v8558_v32, %v3706_v19  ;;  %4268 = vmatpush.bf16.msrb.mxu1 %v7677_v11  ;;  %v8314_v32 = vld [vmem:[#allocation10 + $0x94] sm:$0xf0]  ;;  %v7661_v19 = vor.u32 %v8311_v36, %v7658_v60  ;;  %v7625_v6 = vor.u32 %v8305_v62, %v7624_v49  ;;  %v7629_v9 = vor.u32 %v8303_v29, %v7626_v63  ;;  %v7632_v59 = vld [vmem:[#allocation10 + $0x48] sm:$0xf]  ;;  %v8304_v1 = vld [vmem:[#allocation10 + $0x4c] sm:$0xf] }
 0x561   : > { %4281 = vmatpush.bf16.msrb.mxu2 %v7681_v12  ;;  %4294 = vmatpush.bf16.msrb.mxu3 %v7685_v16  ;;  %v8306_v53 = vld [vmem:[#allocation10 + $0x54] sm:$0xf0]  ;;  %v7634_v14 = vld [vmem:[#allocation10 + $0x58] sm:$0xf0]  ;;  %v7608_v16 = vld [vmem:[#allocation10 + $0x20] sm:$0xf] }
 0x562   : > { %3717 = vst [vmem:[#allocation4 + $0x8] sm:$0xc] %v3716_v20  ;;  %v3722_v56 = vpack.c.bf16 %v3716_v20, %v3716_v20  ;;  %v7665_v20 = vor.u32 %v8314_v32, %v7664_v18  ;;  %v7633_v13 = vor.u32 %v8306_v53, %v7632_v59  ;;  %v7637_v51 = vor.u32 %v8304_v1, %v7634_v14  ;;  %v8301_v43 = vld [vmem:[#allocation10 + $0x2c] sm:$0xf0]  ;;  %v8299_v36 = vld [vmem:[#allocation10 + $0x24] sm:$0xf] }
 0x563   : > { %4256 = vmatpush.bf16.msrb.mxu0 %v7657_v17  ;;  %v3720_v2 = vld [vmem:[#allocation3 + $0x30] sm:$0x30]  ;;  %v7609_v18 = vor.u32 %v8301_v43, %v7608_v16  ;;  %v7600_v50 = vld [vmem:[#allocation10 + $0x8] sm:$0xf]  ;;  %v8298_v52 = vld [vmem:[#allocation10 + $0x14] sm:$0xf0] }
 0x564   : > { %v3756_v21 = vrot.slane %v3722_v56, 1  ;;  %v8312_v56 = vld [vmem:[#allocation10 + $0x8c] sm:$0xf]  ;;  %4269 = vmatpush.bf16.msrb.mxu1 %v7661_v19  ;;  %v7610_v17 = vld [vmem:[#allocation10 + $0x30] sm:$0xf0]  ;;  %v7601_v54 = vor.u32 %v8298_v52, %v7600_v50 }
 0x565   : > { %4282 = vmatpush.bf16.msrb.mxu2 %v7665_v20  ;;  %v7613_v32 = vor.u32 %v8299_v36, %v7610_v17  ;;  %v7616_v19 = vld [vmem:[#allocation10 + $0x28] sm:$0xf]  ;;  %v8302_v20 = vld [vmem:[#allocation10 + $0x34] sm:$0xf0]  ;;  %v7594_v41 = vld [vmem:[#allocation10 + $0x10] sm:$0xf0] }
 0x566   : > { %3926 = vmatmul.bf16.vlgmr.msra.gmra.mxu0 %v3756_v21  ;;  %3939 = vmatmul.bf16.vlgmr.msra.gmra.mxu1 %v3756_v21  ;;  %v7602_v55 = vld [vmem:[#allocation10 + $0x18] sm:$0xf0] }
 0x567   : > { %3952 = vmatmul.bf16.vlgmr.msra.gmra.mxu2 %v3756_v21  ;;  %3965 = vmatmul.bf16.vlgmr.msra.gmra.mxu3 %v3756_v21  ;;  %v7666_v21 = vld [vmem:[#allocation10 + $0x98] sm:$0xf0] }
 0x568   : > { %4257 = vmatpush.bf16.msrb.mxu0 %v7641_v45  ;;  %4270 = vmatpush.bf16.msrb.mxu1 %v7645_v33 }
 0x569   : > { %v4399_v23 = vld [vmem:[#allocation4 + $0xa] sm:$0x3]  ;;  %4283 = vmatpush.bf16.msrb.mxu2 %v7649_v61 }
 0x56a   : > { %v4410_v24 = vld [vmem:[#allocation4 + $0xa] sm:$0x3]  ;;  %v4400_v27 = vsel %vm1037_vm0, %v4398_v22, %v4399_v23  ;;  %v3718_v22 = vld [vmem:[#allocation3 + $0x20] sm:$0x30] }
 0x56b   : > { %v4412_v35 = vsel %vm1037_vm0, %v4410_v24, %v4411_v25  ;;  %4401 = vst [vmem:[#allocation5 + $0x4] sm:$0x3] %v4400_v27  ;;  %v3719_v24 = vld [vmem:[#allocation3 + $0x28] sm:$0x30]  ;;  %v7669_v27 = vor.u32 %v8312_v56, %v7666_v21  ;;  %v3721_v21 = vld [vmem:[#allocation3 + $0x38] sm:$0x30] }
 0x56c   : > { %4413 = vst [vmem:[#allocation5 + $0xa] sm:$0x3] %v4412_v35  ;;  %4258 = vmatpush.bf16.msrb.mxu0 %v7625_v6  ;;  %4271 = vmatpush.bf16.msrb.mxu1 %v7629_v9  ;;  %v8300_v56 = vld [vmem:[#allocation10 + $0x2c] sm:$0xf] }
 0x56d   : > { %4295 = vmatpush.bf16.msrb.mxu3 %v7669_v27  ;;  %4284 = vmatpush.bf16.msrb.mxu2 %v7633_v13 }
 0x570   : > { %4259 = vmatpush.bf16.msrb.mxu0 %v7609_v18  ;;  %4272 = vmatpush.bf16.msrb.mxu1 %v7613_v32 }
 0x571   : > { %4296 = vmatpush.bf16.msrb.mxu3 %v7653_v42 }
 0x575   : > { %4297 = vmatpush.bf16.msrb.mxu3 %v7637_v51 }
 0x5e3   : > { %v3927_v23 = vpop.f32.mrf.mxu0  ;;  %v3940_v25 = vpop.f32.mrf.mxu1 }
 0x5e4   : > { %v3974_v35 = vrot.slane %v3927_v23, 4  ;;  %v3975_v40 = vrot.slane %v3940_v25, 4  ;;  %v7618_v23 = vld [vmem:[#allocation10 + $0x38] sm:$0xf0]  ;;  %v8297_v25 = vld [vmem:[#allocation10 + $0xc] sm:$0xf0] }
 0x5e6   : > { %v3982_v30 = vadd.f32 %v3974_v35, %v3718_v22  ;;  %v3983_v31 = vadd.f32 %v3975_v40, %v3719_v24  ;;  %v7617_v22 = vor.u32 %v8302_v20, %v7616_v19  ;;  %v7592_v24 = vld [vmem:[#allocation10] sm:$0xf]  ;;  %v7621_v35 = vor.u32 %v8300_v56, %v7618_v23  ;;  %v8295_v40 = vld [vmem:[#allocation10 + $0x4] sm:$0xf] }
 0x5e7   : > { %v7593_v45 = vor.u32 %v8297_v25, %v7592_v24  ;;  %v7597_v28 = vor.u32 %v8295_v40, %v7594_v41  ;;  %v1703_v23 = vld [vmem:[#allocation2 + $0x27] ss:$8 sm:$0xf] }
 0x5e8   : > { %v7587_v34 = vmul.f32 -1.442695, %v3982_v30  ;;  %v7588_v0 = vmul.f32 -1.442695, %v3983_v31  ;;  %v8296_v30 = vld [vmem:[#allocation10 + $0xc] sm:$0xf]  ;;  %4285 = vmatpush.bf16.msrb.mxu2 %v7617_v22  ;;  %4298 = vmatpush.bf16.msrb.mxu3 %v7621_v35 }
 0x5e9   : > { %4260 = vmatpush.bf16.msrb.mxu0 %v7593_v45  ;;  %4273 = vmatpush.bf16.msrb.mxu1 %v7597_v28  ;;  %v1706_v52 = vperm.slane %v1703_v23, 0 }
 0x5ea   : > { %8559 = vpow2.f32 %v7587_v34  ;;  %v3953_v4 = vpop.f32.mrf.mxu2  ;;  %v3966_v5 = vpop.f32.mrf.mxu3  ;;  %v7605_v34 = vor.u32 %v8296_v30, %v7602_v55  ;;  %v1707_v30 = vperm.slane %v1703_v23, 1 }
 0x5eb   : > { %8561 = vpow2.f32 %v7588_v0  ;;  %v3976_v10 = vrot.slane %v3953_v4, 4  ;;  %v3977_v58 = vrot.slane %v3966_v5, 4  ;;  %v3929_v11 = vpop.f32.mrf.mxu0  ;;  %v3942_v12 = vpop.f32.mrf.mxu1  ;;  %v1359_v4 = vld [vmem:[#allocation2 + $0x7] ss:$8 sm:$0xf] }
 0x5ec   : > { %4286 = vmatpush.bf16.msrb.mxu2 %v7601_v54  ;;  %4299 = vmatpush.bf16.msrb.mxu3 %v7605_v34  ;;  %v1360_v5 = vld [vmem:[#allocation2] ss:$8 sm:$0xf]  ;;  %v1362_v59 = vperm.slane %v1359_v4, 0  ;;  %v1363_v53 = vperm.slane %v1359_v4, 1  ;;  %v1365_v16 = vperm.slane %v1359_v4, 3 }
 0x5ed   : > { %v3984_v60 = vadd.f32 %v3976_v10, %v3720_v2  ;;  %v3985_v0 = vadd.f32 %v3977_v58, %v3721_v21  ;;  %v4045_v2 = vrot.slane %v9769_v8, 6  ;;  %v1364_v10 = vperm.slane %v1359_v4, 2 }
 0x5ee   : > { %v1371_v58 = vperm.slane %v1360_v5, 0  ;;  %v1372_v11 = vperm.slane %v1360_v5, 1  ;;  %v1373_v12 = vperm.slane %v1360_v5, 2  ;;  %v1374_v18 = vperm.slane %v1360_v5, 3 }
 0x5ef   : > { %v7589_v27 = vmul.f32 -1.442695, %v3984_v60 }
 0x5f0   : > { %v8560_v26 = vpop.eup %8559  ;;  %v1379_v32 = vsel %vm1037_vm0, %v1362_v59, %v1371_v58  ;;  %v1380_v19 = vsel %vm9256_vm1, %v1363_v53, %v1372_v11  ;;  %v1381_v22 = vsel %vm9260_vm2, %v1364_v10, %v1373_v12  ;;  %v1382_v25 = vsel %vm9264_vm3, %v1365_v16, %v1374_v18 }
 0x5f1   : > { %v8562_v31 = vpop.eup %8561  ;;  %v9792_v33 = vadd.f32 1.0, %v8560_v26  ;;  %8563 = vpow2.f32 %v7589_v27  ;;  %v1383_v27 = vadd.f32 %v1379_v32, %v9274_v44  ;;  %v1384_v35 = vadd.f32 %v1380_v19, %v9278_v46 }
 0x5f2   : > { %v9794_v57 = vadd.f32 1.0, %v8562_v31  ;;  %v3955_v61 = vpop.f32.mrf.mxu2  ;;  %v3968_v42 = vpop.f32.mrf.mxu3  ;;  %v1385_v41 = vadd.f32 %v1381_v22, %v9280_v47  ;;  %v1386_v26 = vadd.f32 %v1382_v25, %v9282_v48  ;;  %v4394_v25 = vld [vmem:[#allocation4 + $0x2] sm:$0x3] }
 0x5f3   : > { %8565 = vrcp.f32 %v9792_v33  ;;  %v4007_v62 = vand.u32 2147483647, %v9792_v33  ;;  %v4009_v29 = vand.u32 2147483648, %v9792_v33  ;;  %vm4003_vm8 = vweird.f32 %v9792_v33  ;;  %v1704_v61 = vld [vmem:[#allocation2 + $0x20] ss:$8 sm:$0xf] }
 0x5f4   : > { %8567 = vrcp.f32 %v9794_v57  ;;  %v4024_v49 = vand.u32 2147483648, %v9794_v57  ;;  %v4022_v9 = vand.u32 2147483647, %v9794_v57  ;;  %vm4018_vm9 = vweird.f32 %v9794_v57 }
 0x5f5   : > { %8569 = vtanh.f32 %v3985_v0  ;;  %vm9810_vm10 = vcmp.eq.f32.partialorder %v4007_v62, 8.507059e+37  ;;  %v4010_v17 = vor.u32 1.1754944e-38, %v4009_v29  ;;  %v1391_v50 = vrot.slane %v1384_v35, 7 }
 0x5f6   : > { %v4025_v43 = vor.u32 1.1754944e-38, %v4024_v49  ;;  %vm9818_vm12 = vcmp.eq.f32.partialorder %v4022_v9, 8.507059e+37  ;;  %v1392_v55 = vrot.slane %v1385_v41, 6  ;;  %v1708_v42 = vperm.slane %v1703_v23, 2 }
 0x5f7   : > { %v8564_v63 = vpop.eup %8563  ;;  %v1393_v0 = vrot.slane %v1386_v26, 5  ;;  %v1394_v49 = vsel %vm1088_vm4, %v1383_v27, %v1391_v50  ;;  %v1709_v62 = vperm.slane %v1703_v23, 3  ;;  %v1715_v5 = vperm.slane %v1704_v61, 0 }
 0x5f8   : > { %v9802_v6 = vadd.f32 1.0, %v8564_v63  ;;  %v1716_v53 = vperm.slane %v1704_v61, 1  ;;  %v1717_v58 = vperm.slane %v1704_v61, 2  ;;  %v1718_v11 = vperm.slane %v1704_v61, 3 }
 0x5f9   : > { %v8566_v1 = vpop.eup %8565  ;;  %v1395_v59 = vsel %vm1090_vm5, %v1392_v55, %v1393_v0  ;;  %v1723_v12 = vsel %vm1037_vm0, %v1706_v52, %v1715_v5  ;;  %v7837_v52 = vld [vmem:[#allocation12 + $0xf0] sm:$0xf0]  ;;  %v8351_v55 = vld [vmem:[#allocation12 + $0xc4] sm:$0xf]  ;;  %v8358_v0 = vld [vmem:[#allocation12 + $0xf4] sm:$0xf0] }
 0x5fa   : > { %v8568_v13 = vpop.eup %8567  ;;  %v3999_v14 = vmul.f32 %v8566_v1, %v9792_v33  ;;  %8571 = vrcp.f32 %v9802_v6  ;;  %vm4004_vm11 = vweird.f32 %v8566_v1  ;;  %v1396_v10 = vsel %vm1092_vm6, %v1394_v49, %v1395_v59  ;;  %v7803_v59 = vld [vmem:[#allocation12 + $0xa0] sm:$0xf] }
 0x5fb   : > { %v4014_v51 = vmul.f32 %v8568_v13, %v9794_v57  ;;  %v8570_v20 = vpop.eup %8569  ;;  %vm4019_vm13 = vweird.f32 %v8568_v13  ;;  %vm4005_vm14 = vmor %vm4003_vm8, %vm4004_vm11  ;;  %1399 = vst.msk [vmem:[#allocation3 + $0x26] ss:$8 sm:$0xf] %vm9290_vm7, %v1396_v10  ;;  %v1725_v8 = vsel %vm9260_vm2, %v1708_v42, %v1717_v58  ;;  %v4037_v18 = vand.u32 2147483647, %v9802_v6 }
 0x5fc   : > { %v4000_v60 = vsub.f32 1.0, %v3999_v14  ;;  %vm4020_vm15 = vmor %vm4018_vm9, %vm4019_vm13  ;;  %v1729_v36 = vadd.f32 %v1725_v8, %v9280_v47  ;;  %vm4033_vm9 = vweird.f32 %v9802_v6  ;;  %v7821_v42 = vld [vmem:[#allocation12 + $0xd0] sm:$0xf0]  ;;  %v8356_v58 = vld [vmem:[#allocation12 + $0xec] sm:$0xf] }
 0x5fd   : > { %v4015_v56 = vsub.f32 1.0, %v4014_v51  ;;  %v1727_v51 = vadd.f32 %v1723_v12, %v9274_v44  ;;  %vm4038_vm11 = vcmp.eq.f32.partialorder %v4037_v18, 8.507059e+37  ;;  %v7824_v49 = vor.u32 %v8351_v55, %v7821_v42  ;;  %v7805_v10 = vld [vmem:[#allocation12 + $0xb0] sm:$0xf0]  ;;  %v7827_v8 = vld [vmem:[#allocation12 + $0xc8] sm:$0xf] }
 0x5fe   : > { %v4001_v24 = vmul.f32 %v8566_v1, %v4000_v60  ;;  %v1736_v19 = vrot.slane %v1729_v36, 6  ;;  %v7787_v18 = vld [vmem:[#allocation12 + $0x80] sm:$0xf]  ;;  %v8346_v55 = vld [vmem:[#allocation12 + $0x94] sm:$0xf0] }
 0x5ff   : > { %v4016_v40 = vmul.f32 %v8568_v13, %v4015_v56 }
 0x600   : > { %v8572_v45 = vpop.eup %8571  ;;  %v4002_v28 = vadd.f32 %v8566_v1, %v4001_v24 }
 0x601   : > { %v4029_v31 = vmul.f32 %v8572_v45, %v9802_v6  ;;  %v4017_v54 = vadd.f32 %v8568_v13, %v4016_v40  ;;  %vm4034_vm8 = vweird.f32 %v8572_v45  ;;  %v4415_v40 = vld [vmem:[#allocation4 + $0x2] sm:$0x3] }
 0x602   : > { %v4006_v34 = vsel %vm4005_vm14, %v8566_v1, %v4002_v28  ;;  %v8355_v28 = vld [vmem:[#allocation12 + $0xe4] sm:$0xf] }
 0x603   : > { %v4030_v29 = vsub.f32 1.0, %v4029_v31  ;;  %v4011_v63 = vsel %vm9810_vm10, %v4010_v17, %v4006_v34  ;;  %v4021_v4 = vsel %vm4020_vm15, %v8568_v13, %v4017_v54  ;;  %v1724_v13 = vsel %vm9256_vm1, %v1707_v30, %v1716_v53  ;;  %vm4035_vm10 = vmor %vm4033_vm9, %vm4034_vm8  ;;  %v7819_v31 = vld [vmem:[#allocation12 + $0xc0] sm:$0xf]  ;;  %v8353_v54 = vld [vmem:[#allocation12 + $0xcc] sm:$0xf0] }
 0x604   : > { %v4026_v33 = vsel %vm9818_vm12, %v4025_v43, %v4021_v4  ;;  %v4048_v9 = vmul.f32 %v8570_v20, %v4011_v63  ;;  %v1728_v43 = vadd.f32 %v1724_v13, %v9278_v46  ;;  %v4039_v17 = vand.u32 2147483648, %v9802_v6  ;;  %v7843_v34 = vld [vmem:[#allocation12 + $0xe8] sm:$0xf]  ;;  %v8349_v53 = vld [vmem:[#allocation12 + $0xac] sm:$0xf0] }
 0x605   : > { %v4047_v57 = vmul.f32 %v4045_v2, %v4026_v33  ;;  %v4031_v1 = vmul.f32 %v8572_v45, %v4030_v29  ;;  %v1726_v2 = vsel %vm9264_vm3, %v1709_v62, %v1718_v11  ;;  %v7840_v30 = vor.u32 %v8355_v28, %v7837_v52  ;;  %v7773_v28 = vld [vmem:[#allocation12 + $0x70] sm:$0xf0]  ;;  %v7813_v52 = vld [vmem:[#allocation12 + $0xb8] sm:$0xf0] }
 0x606   : > { %v1730_v60 = vadd.f32 %v1726_v2, %v9282_v48  ;;  %v1735_v32 = vrot.slane %v1728_v43, 7  ;;  %v4040_v46 = vor.u32 1.1754944e-38, %v4039_v17  ;;  %v7820_v61 = vor.u32 %v8353_v54, %v7819_v31  ;;  %v8354_v2 = vld [vmem:[#allocation12 + $0xd4] sm:$0xf0]  ;;  %v7795_v54 = vld [vmem:[#allocation12 + $0x88] sm:$0xf] }
 0x607   : > { %v9851_v14 = vadd.f32 %v4048_v9, %v4047_v57  ;;  %v4032_v16 = vadd.f32 %v8572_v45, %v4031_v1  ;;  %4631 = vmatpush.bf16.msra.mxu1 %v7840_v30  ;;  %v7844_v62 = vor.u32 %v8358_v0, %v7843_v34  ;;  %v7804_v57 = vor.u32 %v8349_v53, %v7803_v59  ;;  %v8347_v1 = vld [vmem:[#allocation12 + $0xa4] sm:$0xf]  ;;  %v8344_v59 = vld [vmem:[#allocation12 + $0x8c] sm:$0xf] }
 0x608   : > { %v1737_v20 = vrot.slane %v1730_v60, 5  ;;  %v1738_v44 = vsel %vm1088_vm4, %v1727_v51, %v1735_v32  ;;  %v7808_v13 = vor.u32 %v8347_v1, %v7805_v10  ;;  %v7828_v43 = vor.u32 %v8354_v2, %v7827_v8  ;;  %v8345_v32 = vld [vmem:[#allocation12 + $0x8c] sm:$0xf0]  ;;  %v7739_v8 = vld [vmem:[#allocation12 + $0x20] sm:$0xf] }
 0x609   : > { %8573 = vtanh.f32 %v9851_v14  ;;  %v4036_v56 = vsel %vm4035_vm10, %v8572_v45, %v4032_v16  ;;  %v8357_v45 = vld [vmem:[#allocation12 + $0xec] sm:$0xf0]  ;;  %4645 = vmatpush.bf16.msra.mxu2 %v7844_v62  ;;  %v7845_v16 = vld [vmem:[#allocation12 + $0xf8] sm:$0xf0]  ;;  %v7796_v42 = vor.u32 %v8346_v55, %v7795_v54  ;;  %v8334_v55 = vld [vmem:[#allocation12 + $0x34] sm:$0xf0] }
 0x60a   : > { %v1739_v47 = vsel %vm1090_vm5, %v1736_v19, %v1737_v20  ;;  %v4041_v23 = vsel %vm4038_vm11, %v4040_v46, %v4036_v56  ;;  %v7836_v50 = vor.u32 %v8357_v45, %v7835_v3  ;;  %v7848_v51 = vor.u32 %v8356_v58, %v7845_v16  ;;  %v8343_v19 = vld [vmem:[#allocation12 + $0x84] sm:$0xf]  ;;  %v7789_v20 = vld [vmem:[#allocation12 + $0x90] sm:$0xf0]  ;;  %v8337_v62 = vld [vmem:[#allocation12 + $0x4c] sm:$0xf0] }
 0x60b   : > { %v1740_v21 = vsel %vm1092_vm6, %v1738_v44, %v1739_v47  ;;  %4632 = vmatpush.bf16.msra.mxu1 %v7824_v49  ;;  %v7788_v46 = vor.u32 %v8345_v32, %v7787_v18  ;;  %v7792_v47 = vor.u32 %v8343_v19, %v7789_v20  ;;  %v7755_v49 = vld [vmem:[#allocation12 + $0x40] sm:$0xf]  ;;  %v7797_v58 = vld [vmem:[#allocation12 + $0x98] sm:$0xf0]  ;;  %v7741_v19 = vld [vmem:[#allocation12 + $0x30] sm:$0xf0] }
 0x60c   : > { %1743 = vst.msk [vmem:[#allocation3 + $0x27] ss:$8 sm:$0xf] %vm9290_vm7, %v1740_v21  ;;  %4617 = vmatpush.bf16.msra.mxu0 %v7836_v50  ;;  %4659 = vmatpush.bf16.msra.mxu3 %v7848_v51  ;;  %v8352_v21 = vld [vmem:[#allocation12 + $0xcc] sm:$0xf] }
 0x60d   : > { %4646 = vmatpush.bf16.msra.mxu2 %v7828_v43  ;;  %v8348_v50 = vld [vmem:[#allocation12 + $0xac] sm:$0xf]  ;;  %v7800_v43 = vor.u32 %v8344_v59, %v7797_v58  ;;  %v7965_v59 = vld [vmem:[#allocation13 + $0xf0] sm:$0xf0]  ;;  %v7749_v58 = vld [vmem:[#allocation12 + $0x38] sm:$0xf0] }
 0x60e   : > { %v7816_v31 = vor.u32 %v8348_v50, %v7813_v52  ;;  %v8340_v20 = vld [vmem:[#allocation12 + $0x6c] sm:$0xf]  ;;  %v7765_v52 = vld [vmem:[#allocation12 + $0x58] sm:$0xf0] }
 0x60f   : > { %v8574_v22 = vpop.eup %8573  ;;  %4633 = vmatpush.bf16.msra.mxu1 %v7808_v13  ;;  %v4380_v13 = vrot.slane %v9851_v14, 6 }
 0x610   : > { %v4051_v48 = vmul.f32 %v8574_v22, %v4041_v23  ;;  %4618 = vmatpush.bf16.msra.mxu0 %v7820_v61  ;;  %v7829_v22 = vld [vmem:[#allocation12 + $0xd8] sm:$0xf0]  ;;  %v7811_v23 = vld [vmem:[#allocation12 + $0xa8] sm:$0xf] }
 0x612   : > { %4052 = vst [vmem:[#allocation4 + $0x8] sm:$0x30] %v4051_v48  ;;  %v4057_v6 = vpack.c.bf16 %v4051_v48, %v4051_v48 }
 0x613   : > { %v4053_v29 = vld [vmem:[#allocation3 + $0x20] sm:$0xc0]  ;;  %v4054_v4 = vld [vmem:[#allocation3 + $0x28] sm:$0xc0]  ;;  %v4055_v60 = vld [vmem:[#allocation3 + $0x30] sm:$0xc0]  ;;  %4634 = vmatpush.bf16.msra.mxu1 %v7792_v47 }
 0x614   : > { %v4091_v24 = vrot.slane %v4057_v6, 2  ;;  %4619 = vmatpush.bf16.msra.mxu0 %v7804_v57  ;;  %v4056_v0 = vld [vmem:[#allocation3 + $0x38] sm:$0xc0]  ;;  %v7763_v47 = vld [vmem:[#allocation12 + $0x48] sm:$0xf] }
 0x616   : > { %4261 = vmatmul.bf16.vlgmr.msrb.gmra.mxu0 %v4091_v24  ;;  %4274 = vmatmul.bf16.vlgmr.msrb.gmra.mxu1 %v4091_v24 }
 0x617   : > { %4287 = vmatmul.bf16.vlgmr.msrb.gmra.mxu2 %v4091_v24  ;;  %4300 = vmatmul.bf16.vlgmr.msrb.gmra.mxu3 %v4091_v24 }
 0x618   : > { %4620 = vmatpush.bf16.msra.mxu0 %v7788_v46  ;;  %v7781_v46 = vld [vmem:[#allocation12 + $0x78] sm:$0xf0] }
 0x619   : > { %v4395_v27 = vld [vmem:[#allocation4 + $0xc] sm:$0x3] }
 0x61a   : > { %v4414_v35 = vld [vmem:[#allocation4 + $0xc] sm:$0x3]  ;;  %v4396_v41 = vsel %vm1037_vm0, %v4394_v25, %v4395_v27  ;;  %v7832_v25 = vor.u32 %v8352_v21, %v7829_v22  ;;  %v8350_v27 = vld [vmem:[#allocation12 + $0xb4] sm:$0xf0] }
 0x61b   : > { %v4416_v26 = vsel %vm1037_vm0, %v4414_v35, %v4415_v40  ;;  %4397 = vst [vmem:[#allocation5 + $0x2] sm:$0x3] %v4396_v41  ;;  %v7812_v35 = vor.u32 %v8350_v27, %v7811_v23  ;;  %v7771_v40 = vld [vmem:[#allocation12 + $0x60] sm:$0xf]  ;;  %v8341_v41 = vld [vmem:[#allocation12 + $0x6c] sm:$0xf0] }
 0x61c   : > { %4417 = vst [vmem:[#allocation5 + $0xc] sm:$0x3] %v4416_v26  ;;  %v8339_v26 = vld [vmem:[#allocation12 + $0x64] sm:$0xf]  ;;  %4660 = vmatpush.bf16.msra.mxu3 %v7832_v25  ;;  %v7772_v45 = vor.u32 %v8341_v41, %v7771_v40  ;;  %v8338_v21 = vld [vmem:[#allocation12 + $0x54] sm:$0xf0] }
 0x61d   : > { %4647 = vmatpush.bf16.msra.mxu2 %v7812_v35  ;;  %v7776_v30 = vor.u32 %v8339_v26, %v7773_v28  ;;  %v8329_v25 = vld [vmem:[#allocation12 + $0xc] sm:$0xf0]  ;;  %v8327_v40 = vld [vmem:[#allocation12 + $0x4] sm:$0xf]  ;;  %v7725_v41 = vld [vmem:[#allocation12 + $0x10] sm:$0xf0] }
 0x61e   : > { %4621 = vmatpush.bf16.msra.mxu0 %v7772_v45  ;;  %v8336_v26 = vld [vmem:[#allocation12 + $0x4c] sm:$0xf] }
 0x61f   : > { %4635 = vmatpush.bf16.msra.mxu1 %v7776_v30  ;;  %v7747_v30 = vld [vmem:[#allocation12 + $0x28] sm:$0xf] }
 0x620   : > { %4661 = vmatpush.bf16.msra.mxu3 %v7816_v31 }
 0x621   : > { %4648 = vmatpush.bf16.msra.mxu2 %v7796_v42 }
 0x624   : > { %4662 = vmatpush.bf16.msra.mxu3 %v7800_v43  ;;  %v7947_v43 = vld [vmem:[#allocation13 + $0xc0] sm:$0xf] }
 0x693   : > { %v4262_v63 = vpop.f32.mrf.mxu0  ;;  %v4275_v5 = vpop.f32.mrf.mxu1 }
 0x694   : > { %v4309_v33 = vrot.slane %v4262_v63, 2  ;;  %v4310_v9 = vrot.slane %v4275_v5, 2 }
 0x696   : > { %v4317_v11 = vadd.f32 %v4309_v33, %v4053_v29  ;;  %v4318_v12 = vadd.f32 %v4310_v9, %v4054_v4  ;;  %v8335_v29 = vld [vmem:[#allocation12 + $0x44] sm:$0xf]  ;;  %v7756_v33 = vor.u32 %v8337_v62, %v7755_v49  ;;  %v7757_v9 = vld [vmem:[#allocation12 + $0x50] sm:$0xf0]  ;;  %v7768_v49 = vor.u32 %v8336_v26, %v7765_v52  ;;  %v8389_v62 = vld [vmem:[#allocation13 + $0xec] sm:$0xf0] }
 0x697   : > { %v7760_v10 = vor.u32 %v8335_v29, %v7757_v9  ;;  %v8387_v29 = vld [vmem:[#allocation13 + $0xe4] sm:$0xf] }
 0x698   : > { %v7718_v36 = vmul.f32 -1.442695, %v4317_v11  ;;  %v7719_v17 = vmul.f32 -1.442695, %v4318_v12  ;;  %v7779_v11 = vld [vmem:[#allocation12 + $0x68] sm:$0xf]  ;;  %4622 = vmatpush.bf16.msra.mxu0 %v7756_v33  ;;  %v7748_v33 = vor.u32 %v8334_v55, %v7747_v30 }
 0x699   : > { %v8342_v12 = vld [vmem:[#allocation12 + $0x74] sm:$0xf0]  ;;  %4636 = vmatpush.bf16.msra.mxu1 %v7760_v10  ;;  %v9916_v10 = vor.u32 %v8387_v29, %v7965_v59  ;;  %v7915_v29 = vld [vmem:[#allocation13 + $0x80] sm:$0xf]  ;;  %v8384_v59 = vld [vmem:[#allocation13 + $0xcc] sm:$0xf] }
 0x69a   : > { %8575 = vpow2.f32 %v7718_v36  ;;  %v4288_v56 = vpop.f32.mrf.mxu2  ;;  %v4301_v44 = vpop.f32.mrf.mxu3  ;;  %v7780_v36 = vor.u32 %v8342_v12, %v7779_v11  ;;  %v7731_v11 = vld [vmem:[#allocation12 + $0x8] sm:$0xf]  ;;  %v8330_v12 = vld [vmem:[#allocation12 + $0x14] sm:$0xf0] }
 0x69b   : > { %8577 = vpow2.f32 %v7719_v17  ;;  %v4311_v48 = vrot.slane %v4288_v56, 2  ;;  %v4264_v6 = vpop.f32.mrf.mxu0  ;;  %v4277_v24 = vpop.f32.mrf.mxu1  ;;  %v4312_v5 = vrot.slane %v4301_v44, 2  ;;  %v8333_v17 = vld [vmem:[#allocation12 + $0x2c] sm:$0xf0] }
 0x69c   : > { %v7740_v32 = vor.u32 %v8333_v17, %v7739_v8  ;;  %4649 = vmatpush.bf16.msra.mxu2 %v7780_v36  ;;  %v7764_v6 = vor.u32 %v8338_v21, %v7763_v47  ;;  %v7723_v24 = vld [vmem:[#allocation12] sm:$0xf]  ;;  %v8385_v36 = vld [vmem:[#allocation13 + $0xcc] sm:$0xf0]  ;;  %v8383_v17 = vld [vmem:[#allocation13 + $0xc4] sm:$0xf] }
 0x69d   : > { %v4319_v3 = vadd.f32 %v4311_v48, %v4055_v60  ;;  %v4320_v2 = vadd.f32 %v4312_v5, %v4056_v0  ;;  %v8331_v60 = vld [vmem:[#allocation12 + $0x24] sm:$0xf]  ;;  %v7784_v48 = vor.u32 %v8340_v20, %v7781_v46  ;;  %v7724_v35 = vor.u32 %v8329_v25, %v7723_v24  ;;  %v7971_v20 = vld [vmem:[#allocation13 + $0xe8] sm:$0xf]  ;;  %v8328_v21 = vld [vmem:[#allocation12 + $0xc] sm:$0xf] }
 0x69e   : > { %v7744_v44 = vor.u32 %v8331_v60, %v7741_v19  ;;  %4623 = vmatpush.bf16.msra.mxu0 %v7740_v32  ;;  %v7728_v0 = vor.u32 %v8327_v40, %v7725_v41  ;;  %v9925_v32 = vor.u32 %v8385_v36, %v7947_v43  ;;  %v7949_v19 = vld [vmem:[#allocation13 + $0xd0] sm:$0xf0]  ;;  %v8381_v40 = vld [vmem:[#allocation13 + $0xac] sm:$0xf0]  ;;  %v8379_v41 = vld [vmem:[#allocation13 + $0xa4] sm:$0xf] }
 0x69f   : > { %v7720_v61 = vmul.f32 -1.442695, %v4319_v3  ;;  %4663 = vmatpush.bf16.msra.mxu3 %v7784_v48  ;;  %v9931_v47 = vor.u32 %v8383_v17, %v7949_v19  ;;  %v7931_v48 = vld [vmem:[#allocation13 + $0xa0] sm:$0xf]  ;;  %v8375_v5 = vld [vmem:[#allocation13 + $0x84] sm:$0xf] }
 0x6a0   : > { %v8576_v34 = vpop.eup %8575  ;;  %4637 = vmatpush.bf16.msra.mxu1 %v7744_v44  ;;  %4650 = vmatpush.bf16.msra.mxu2 %v7764_v6  ;;  %v9951_v30 = vor.u32 %v8381_v40, %v7931_v48  ;;  %v7901_v43 = vld [vmem:[#allocation13 + $0x70] sm:$0xf0]  ;;  %v8380_v36 = vld [vmem:[#allocation13 + $0xac] sm:$0xf]  ;;  %v7941_v17 = vld [vmem:[#allocation13 + $0xb8] sm:$0xf0] }
 0x6a1   : > { %v8578_v63 = vpop.eup %8577  ;;  %v9874_v4 = vadd.f32 1.0, %v8576_v34  ;;  %8579 = vpow2.f32 %v7720_v61  ;;  %v7963_v61 = vld [vmem:[#allocation13 + $0xe0] sm:$0xf]  ;;  %v7907_v40 = vld [vmem:[#allocation13 + $0x68] sm:$0xf] }
 0x6a2   : > { %v9876_v53 = vadd.f32 1.0, %v8578_v63  ;;  %v4290_v57 = vpop.f32.mrf.mxu2  ;;  %v4303_v1 = vpop.f32.mrf.mxu3  ;;  %4624 = vmatpush.bf16.msra.mxu0 %v7724_v35  ;;  %v9913_v9 = vor.u32 %v8389_v62, %v7963_v61  ;;  %v7883_v48 = vld [vmem:[#allocation13 + $0x40] sm:$0xf] }
 0x6a3   : > { %8581 = vrcp.f32 %v9874_v4  ;;  %v4342_v16 = vand.u32 2147483647, %v9874_v4  ;;  %v4344_v51 = vand.u32 2147483648, %v9874_v4  ;;  %vm4338_vm5 = vweird.f32 %v9874_v4  ;;  %v8332_v57 = vld [vmem:[#allocation12 + $0x2c] sm:$0xf]  ;;  %4664 = vmatpush.bf16.msra.mxu3 %v7768_v49 }
 0x6a4   : > { %8583 = vrcp.f32 %v9876_v53  ;;  %v4357_v18 = vand.u32 2147483647, %v9876_v53  ;;  %v4359_v22 = vand.u32 2147483648, %v9876_v53  ;;  %4638 = vmatpush.bf16.msra.mxu1 %v7728_v0  ;;  %4651 = vmatpush.bf16.msra.mxu2 %v7748_v33  ;;  %vm4353_vm14 = vweird.f32 %v9876_v53  ;;  %v8386_v0 = vld [vmem:[#allocation13 + $0xd4] sm:$0xf0] }
 0x6a5   : > { %8585 = vtanh.f32 %v4320_v2  ;;  %vm9894_vm4 = vcmp.eq.f32.partialorder %v4342_v16, 8.507059e+37  ;;  %v9898_v50 = vor.u32 1.1754944e-38, %v4344_v51  ;;  %v7752_v2 = vor.u32 %v8332_v57, %v7749_v58  ;;  %v7917_v33 = vld [vmem:[#allocation13 + $0x90] sm:$0xf0]  ;;  %v7957_v57 = vld [vmem:[#allocation13 + $0xd8] sm:$0xf0] }
 0x6a6   : > { %v4360_v34 = vor.u32 1.1754944e-38, %v4359_v22  ;;  %vm9909_vm12 = vcmp.eq.f32.partialorder %v4357_v18, 8.507059e+37  ;;  %v7732_v51 = vor.u32 %v8330_v12, %v7731_v11  ;;  %5151 = vmatpush.bf16.msrb.mxu0 %v9913_v9  ;;  %v7733_v22 = vld [vmem:[#allocation12 + $0x18] sm:$0xf0]  ;;  %v7939_v58 = vld [vmem:[#allocation13 + $0xa8] sm:$0xf] }
 0x6a7   : > { %v8580_v56 = vpop.eup %8579  ;;  %v7736_v35 = vor.u32 %v8328_v21, %v7733_v22  ;;  %4665 = vmatpush.bf16.msra.mxu3 %v7752_v2  ;;  %v8382_v11 = vld [vmem:[#allocation13 + $0xb4] sm:$0xf0]  ;;  %v7899_v12 = vld [vmem:[#allocation13 + $0x60] sm:$0xf]  ;;  %v8373_v2 = vld [vmem:[#allocation13 + $0x6c] sm:$0xf0] }
 0x6a8   : > { %v9885_v23 = vadd.f32 1.0, %v8580_v56  ;;  %5164 = vmatpush.bf16.msrb.mxu1 %v9916_v10  ;;  %v8390_v56 = vld [vmem:[#allocation13 + $0xf4] sm:$0xf0]  ;;  %4652 = vmatpush.bf16.msra.mxu2 %v7732_v51  ;;  %v8371_v51 = vld [vmem:[#allocation13 + $0x64] sm:$0xf]  ;;  %v9999_v21 = vor.u32 %v8373_v2, %v7899_v12 }
 0x6a9   : > { %v9887_v27 = vpop.eup %8581  ;;  %v9943_v25 = vor.u32 %v8390_v56, %v7971_v20  ;;  %v8378_v56 = vld [vmem:[#allocation13 + $0x94] sm:$0xf0]  ;;  %v10001_v22 = vor.u32 %v8371_v51, %v7901_v43  ;;  %v7853_v12 = vld [vmem:[#allocation13 + $0x10] sm:$0xf0]  ;;  %v8368_v2 = vld [vmem:[#allocation13 + $0x4c] sm:$0xf] }
 0x6aa   : > { %v9889_v3 = vpop.eup %8583  ;;  %v4334_v45 = vmul.f32 %v9887_v27, %v9874_v4  ;;  %8587 = vrcp.f32 %v9885_v23  ;;  %v4372_v54 = vand.u32 2147483647, %v9885_v23  ;;  %vm4339_vm6 = vweird.f32 %v9887_v27  ;;  %5152 = vmatpush.bf16.msrb.mxu0 %v9925_v32  ;;  %v7893_v51 = vld [vmem:[#allocation13 + $0x58] sm:$0xf0]  ;;  %v7875_v43 = vld [vmem:[#allocation13 + $0x28] sm:$0xf] }
 0x6ab   : > { %v4349_v31 = vmul.f32 %v9889_v3, %v9876_v53  ;;  %vm9905_vm7 = vmor %vm4338_vm5, %vm4339_vm6  ;;  %v8586_v16 = vpop.eup %8585  ;;  %vm4354_vm13 = vweird.f32 %v9889_v3  ;;  %v4374_v24 = vand.u32 2147483648, %v9885_v23  ;;  %4666 = vmatpush.bf16.msra.mxu3 %v7736_v35  ;;  %vm4368_vm9 = vweird.f32 %v9885_v23  ;;  %v7925_v35 = vld [vmem:[#allocation13 + $0x98] sm:$0xf0] }
 0x6ac   : > { %v4335_v42 = vsub.f32 1.0, %v4334_v45  ;;  %vm9935_vm15 = vmor %vm4353_vm14, %vm4354_vm13  ;;  %5165 = vmatpush.bf16.msrb.mxu1 %v9931_v47  ;;  %5177 = vmatpush.bf16.msrb.mxu2 %v9943_v25  ;;  %vm9990_vm11 = vcmp.eq.f32.partialorder %v4372_v54, 8.507059e+37  ;;  %v10005_v54 = vor.u32 %v8380_v36, %v7941_v17  ;;  %v8366_v36 = vld [vmem:[#allocation13 + $0x34] sm:$0xf0]  ;;  %v4388_v17 = vld [vmem:[#allocation4] sm:$0x3] }
 0x6ad   : > { %v4350_v63 = vsub.f32 1.0, %v4349_v31  ;;  %v7933_v31 = vld [vmem:[#allocation13 + $0xb0] sm:$0xf0] }
 0x6ae   : > { %v4336_v1 = vmul.f32 %v9887_v27, %v4335_v42  ;;  %v9957_v28 = vor.u32 %v8379_v41, %v7933_v31  ;;  %v7955_v42 = vld [vmem:[#allocation13 + $0xc8] sm:$0xf]  ;;  %5153 = vmatpush.bf16.msrb.mxu0 %v9951_v30  ;;  %v8374_v41 = vld [vmem:[#allocation13 + $0x74] sm:$0xf0] }
 0x6af   : > { %v4351_v8 = vmul.f32 %v9889_v3, %v4350_v63  ;;  %v8377_v63 = vld [vmem:[#allocation13 + $0x8c] sm:$0xf0] }
 0x6b0   : > { %v9920_v60 = vpop.eup %8587  ;;  %v4337_v18 = vadd.f32 %v9887_v27, %v4336_v1  ;;  %5166 = vmatpush.bf16.msrb.mxu1 %v9957_v28  ;;  %v9971_v14 = vor.u32 %v8377_v63, %v7915_v29  ;;  %v7909_v29 = vld [vmem:[#allocation13 + $0x78] sm:$0xf0]  ;;  %v7891_v63 = vld [vmem:[#allocation13 + $0x48] sm:$0xf] }
 0x6b1   : > { %v4364_v44 = vmul.f32 %v9920_v60, %v9885_v23  ;;  %v4352_v46 = vadd.f32 %v9889_v3, %v4351_v8  ;;  %vm4369_vm8 = vweird.f32 %v9920_v60  ;;  %v9979_v8 = vor.u32 %v8382_v11, %v7939_v58  ;;  %v8369_v23 = vld [vmem:[#allocation13 + $0x4c] sm:$0xf0]  ;;  %v8359_v11 = vld [vmem:[#allocation13 + $0x4] sm:$0xf] }
 0x6b2   : > { %v4341_v53 = vsel %vm9905_vm7, %v9887_v27, %v4337_v18  ;;  %v8388_v27 = vld [vmem:[#allocation13 + $0xec] sm:$0xf]  ;;  %v7923_v18 = vld [vmem:[#allocation13 + $0x88] sm:$0xf]  ;;  %vm9984_vm10 = vmor %vm4368_vm9, %vm4369_vm8  ;;  %5154 = vmatpush.bf16.msrb.mxu0 %v9971_v14  ;;  %v10013_v31 = vor.u32 %v8369_v23, %v7883_v48  ;;  %v10039_v20 = vor.u32 %v8359_v11, %v7853_v12  ;;  %v10045_v48 = vor.u32 %v8366_v36, %v7875_v43 }
 0x6b3   : > { %v4365_v26 = vsub.f32 1.0, %v4364_v44  ;;  %v4346_v45 = vsel %vm9894_vm4, %v9898_v50, %v4341_v53  ;;  %v4356_v52 = vsel %vm9935_vm15, %v9889_v3, %v4352_v46  ;;  %v7973_v50 = vld [vmem:[#allocation13 + $0xf8] sm:$0xf0]  ;;  %v4375_v46 = vor.u32 1.1754944e-38, %v4374_v24  ;;  %v7885_v24 = vld [vmem:[#allocation13 + $0x50] sm:$0xf0] }
 0x6b4   : > { %v4361_v55 = vsel %vm9909_vm12, %v4360_v34, %v4356_v52  ;;  %v4383_v61 = vmul.f32 %v8586_v16, %v4346_v45  ;;  %v9963_v62 = vor.u32 %v8388_v27, %v7973_v50  ;;  %v9965_v34 = vor.u32 %v8386_v0, %v7955_v42  ;;  %v8376_v53 = vld [vmem:[#allocation13 + $0x8c] sm:$0xf]  ;;  %v8363_v50 = vld [vmem:[#allocation13 + $0x24] sm:$0xf]  ;;  %10662 = vst [vmem:[#allocation21_spill] sm:$0xff] %v10039_v20 }
 0x6b5   : > { %v4366_v3 = vmul.f32 %v9920_v60, %v4365_v26  ;;  %v4382_v49 = vmul.f32 %v4380_v13, %v4361_v55  ;;  %v9973_v13 = vor.u32 %v8375_v5, %v7917_v33  ;;  %v9977_v16 = vor.u32 %v8384_v59, %v7957_v57  ;;  %v7867_v55 = vld [vmem:[#allocation13 + $0x20] sm:$0xf]  ;;  %v8370_v5 = vld [vmem:[#allocation13 + $0x54] sm:$0xf0]  ;;  %v8361_v57 = vld [vmem:[#allocation13 + $0xc] sm:$0xf0] }
 0x6b6   : > { %5190 = vmatpush.bf16.msrb.mxu3 %v9963_v62  ;;  %5178 = vmatpush.bf16.msrb.mxu2 %v9965_v34  ;;  %v10007_v6 = vor.u32 %v8378_v56, %v7923_v18  ;;  %v10019_v42 = vor.u32 %v8376_v53, %v7925_v35  ;;  %v10021_v0 = vor.u32 %v8374_v41, %v7907_v40  ;;  %v7851_v59 = vld [vmem:[#allocation13] sm:$0xf]  ;;  %v8364_v23 = vld [vmem:[#allocation13 + $0x2c] sm:$0xf]  ;;  %v7877_v53 = vld [vmem:[#allocation13 + $0x38] sm:$0xf0] }
 0x6b7   : > { %v4384_v4 = vadd.f32 %v4383_v61, %v4382_v49  ;;  %v4367_v1 = vadd.f32 %v9920_v60, %v4366_v3  ;;  %5167 = vmatpush.bf16.msrb.mxu1 %v9973_v13  ;;  %5155 = vmatpush.bf16.msrb.mxu0 %v9999_v21  ;;  %v8365_v61 = vld [vmem:[#allocation13 + $0x2c] sm:$0xf0]  ;;  %v7869_v3 = vld [vmem:[#allocation13 + $0x30] sm:$0xf0]  ;;  %v8372_v49 = vld [vmem:[#allocation13 + $0x6c] sm:$0xf]  ;;  %v10033_v58 = vor.u32 %v8370_v5, %v7891_v63 }
 0x6b8   : > { %v10027_v33 = vor.u32 %v8363_v50, %v7869_v3  ;;  %v4419_v18 = vld [vmem:[#allocation4] sm:$0x3]  ;;  %v10037_v19 = vor.u32 %v8361_v57, %v7851_v59  ;;  %10664 = vst [vmem:[#allocation23_spill] sm:$0xff] %v10045_v48  ;;  %v7859_v35 = vld [vmem:[#allocation13 + $0x8] sm:$0xf]  ;;  %v10055_v41 = vor.u32 %v8364_v23, %v7877_v53 }
 0x6b9   : > { %8589 = vtanh.f32 %v4384_v4  ;;  %v4371_v44 = vsel %vm9984_vm10, %v9920_v60, %v4367_v1  ;;  %v8367_v60 = vld [vmem:[#allocation13 + $0x44] sm:$0xf]  ;;  %v10025_v4 = vor.u32 %v8365_v61, %v7867_v55  ;;  %v10031_v1 = vor.u32 %v8372_v49, %v7909_v29  ;;  %v8362_v40 = vld [vmem:[#allocation13 + $0x14] sm:$0xf0]  ;;  %v4681_v57 = vld [vmem:[%s10581_s6] sm:$0xf] }
 0x6ba   : > { %5191 = vmatpush.bf16.msrb.mxu3 %v9977_v16  ;;  %5179 = vmatpush.bf16.msrb.mxu2 %v9979_v8  ;;  %v4376_v45 = vsel %vm9990_vm11, %v4375_v46, %v4371_v44  ;;  %v10015_v27 = vor.u32 %v8367_v60, %v7885_v24  ;;  %10660 = vst [vmem:[#allocation19_spill] sm:$0xff] %v10027_v33  ;;  %v10139_v43 = vperm.slane %v4681_v57, 0 }
 0x6bb   : > { %5168 = vmatpush.bf16.msrb.mxu1 %v10001_v22  ;;  %5156 = vmatpush.bf16.msrb.mxu0 %v10013_v31  ;;  %10659 = vst [vmem:[#allocation18_spill] sm:$0xff] %v10025_v4  ;;  %v10043_v46 = vor.u32 %v8368_v2, %v7893_v51 }
 0x6bc   : > { %10661 = vst [vmem:[#allocation20_spill] sm:$0xff] %v10037_v19 }
 0x6bd   : > { %10663 = vst [vmem:[#allocation22_spill] sm:$0xff] %v10043_v46 }
 0x6be   : > { %5192 = vmatpush.bf16.msrb.mxu3 %v10005_v54  ;;  %5180 = vmatpush.bf16.msrb.mxu2 %v10007_v6  ;;  %10665 = vst [vmem:[#allocation24_spill] sm:$0xff] %v10055_v41 }
 0x6bf   : > { %v8590_v26 = vpop.eup %8589  ;;  %5169 = vmatpush.bf16.msrb.mxu1 %v10015_v27  ;;  %5157 = vmatpush.bf16.msrb.mxu0 %v10025_v4 }
 0x6c0   : > { %v4386_v52 = vmul.f32 %v8590_v26, %v4376_v45  ;;  %v10057_v26 = vor.u32 %v8362_v40, %v7859_v35  ;;  %v8360_v45 = vld [vmem:[#allocation13 + $0xc] sm:$0xf] }
 0x6c2   : > { %4387 = vst [vmem:[#allocation4 + $0x8] sm:$0xc0] %v4386_v52  ;;  %5193 = vmatpush.bf16.msrb.mxu3 %v10019_v42  ;;  %5181 = vmatpush.bf16.msrb.mxu2 %v10021_v0  ;;  %v7861_v52 = vld [vmem:[#allocation13 + $0x18] sm:$0xf0] }
 0x6c3   : > { %5170 = vmatpush.bf16.msrb.mxu1 %v10027_v33  ;;  %5158 = vmatpush.bf16.msrb.mxu0 %v10037_v19  ;;  %10666 = vst [vmem:[#allocation25_spill] sm:$0xff] %v10057_v26  ;;  %v10061_v55 = vor.u32 %v8360_v45, %v7861_v52 }
 0x6c5   : > { %10667 = vst [vmem:[#allocation26_spill] sm:$0xff] %v10061_v55 }
 0x6c6   : > { %5194 = vmatpush.bf16.msrb.mxu3 %v10031_v1  ;;  %5182 = vmatpush.bf16.msrb.mxu2 %v10033_v58 }
 0x6c7   : > { %5171 = vmatpush.bf16.msrb.mxu1 %v10039_v20 }
 0x6c9   : > { %v4389_v56 = vld [vmem:[#allocation4 + $0xe] sm:$0x3] }
 0x6ca   : > { %v4418_v44 = vld [vmem:[#allocation4 + $0xe] sm:$0x3]  ;;  %v4392_v60 = vsel %vm1037_vm0, %v4388_v17, %v4389_v56  ;;  %5195 = vmatpush.bf16.msrb.mxu3 %v10043_v46  ;;  %5183 = vmatpush.bf16.msrb.mxu2 %v10045_v48  ;;  %v10143_v17 = vperm.slane %v4681_v57, 1  ;;  %v10147_v56 = vperm.slane %v4681_v57, 2 }
 0x6cb   : > { %v4420_v24 = vsel %vm1037_vm0, %v4418_v44, %v4419_v18  ;;  %4393 = vst [vmem:[#allocation5] sm:$0x3] %v4392_v60  ;;  %v10149_v44 = vperm.slane %v4681_v57, 3 }
 0x6cc   : > { %4421 = vst [vmem:[#allocation5 + $0xe] sm:$0x3] %v4420_v24 }
 0x6ce   : > { %5196 = vmatpush.bf16.msrb.mxu3 %v10055_v41  ;;  %5184 = vmatpush.bf16.msrb.mxu2 %v10057_v26 }
 0x6d2   : > { %v4422_v61 = vld [vmem:[#allocation5] sm:$0xff]  ;;  %5197 = vmatpush.bf16.msrb.mxu3 %v10061_v55 }
 0x6d3   : > { %v4423_v50 = vld [vmem:[#allocation5 + $0x8] sm:$0xff] }
 0x6d4   : > { %v4424_v3 = vpack.c.bf16 %v4423_v50, %v4422_v61 }
 0x6d6   : > { %4625 = vmatmul.bf16.vlgmr.msra.gmra.mxu0 %v4424_v3  ;;  %4639 = vmatmul.bf16.vlgmr.msra.gmra.mxu1 %v4424_v3 }
 0x6d7   : > { %4653 = vmatmul.bf16.vlgmr.msra.gmra.mxu2 %v4424_v3  ;;  %4667 = vmatmul.bf16.vlgmr.msra.gmra.mxu3 %v4424_v3 }
 0x6d8   : > { %5275 = vmatpush.bf16.msra.mxu0 %v9913_v9  ;;  %5288 = vmatpush.bf16.msra.mxu1 %v9916_v10 }
 0x6d9   : > { %5301 = vmatpush.bf16.msra.mxu2 %v9943_v25  ;;  %5314 = vmatpush.bf16.msra.mxu3 %v9963_v62 }
 0x6dc   : > { %5276 = vmatpush.bf16.msra.mxu0 %v9925_v32  ;;  %5289 = vmatpush.bf16.msra.mxu1 %v9931_v47 }
 0x6dd   : > { %5302 = vmatpush.bf16.msra.mxu2 %v9965_v34  ;;  %5315 = vmatpush.bf16.msra.mxu3 %v9977_v16 }
 0x6e0   : > { %5277 = vmatpush.bf16.msra.mxu0 %v9951_v30  ;;  %5290 = vmatpush.bf16.msra.mxu1 %v9957_v28 }
 0x6e1   : > { %5303 = vmatpush.bf16.msra.mxu2 %v9979_v8  ;;  %5316 = vmatpush.bf16.msra.mxu3 %v10005_v54 }
 0x6e4   : > { %5278 = vmatpush.bf16.msra.mxu0 %v9971_v14  ;;  %5291 = vmatpush.bf16.msra.mxu1 %v9973_v13 }
 0x6e5   : > { %5304 = vmatpush.bf16.msra.mxu2 %v10007_v6  ;;  %5317 = vmatpush.bf16.msra.mxu3 %v10019_v42 }
 0x6e6   : > { %5159 = vmatmul.bf16.vlgmr.msrb.gmra.mxu0 %v8893_v7  ;;  %5172 = vmatmul.bf16.vlgmr.msrb.gmra.mxu1 %v8893_v7 }
 0x6e7   : > { %5185 = vmatmul.bf16.vlgmr.msrb.gmra.mxu2 %v8893_v7  ;;  %5198 = vmatmul.bf16.vlgmr.msrb.gmra.mxu3 %v8893_v7 }
 0x6e8   : > { %5279 = vmatpush.bf16.msra.mxu0 %v9999_v21  ;;  %5292 = vmatpush.bf16.msra.mxu1 %v10001_v22 }
 0x6e9   : > { %5305 = vmatpush.bf16.msra.mxu2 %v10021_v0  ;;  %5318 = vmatpush.bf16.msra.mxu3 %v10031_v1 }
 0x6ec   : > { %5280 = vmatpush.bf16.msra.mxu0 %v10013_v31  ;;  %5293 = vmatpush.bf16.msra.mxu1 %v10015_v27 }
 0x6ed   : > { %5306 = vmatpush.bf16.msra.mxu2 %v10033_v58  ;;  %5319 = vmatpush.bf16.msra.mxu3 %v10043_v46 }
 0x6f0   : > { %5281 = vmatpush.bf16.msra.mxu0 %v10025_v4  ;;  %5294 = vmatpush.bf16.msra.mxu1 %v10027_v33 }
 0x6f1   : > { %5307 = vmatpush.bf16.msra.mxu2 %v10045_v48  ;;  %5320 = vmatpush.bf16.msra.mxu3 %v10055_v41 }
 0x6f4   : > { %5282 = vmatpush.bf16.msra.mxu0 %v10037_v19  ;;  %5295 = vmatpush.bf16.msra.mxu1 %v10039_v20 }
 0x6f5   : > { %5308 = vmatpush.bf16.msra.mxu2 %v10057_v26  ;;  %5321 = vmatpush.bf16.msra.mxu3 %v10061_v55 }
 0x6f8   : > { %5417 = vmatpush.bf16.msrb.mxu0 %v9913_v9  ;;  %5430 = vmatpush.bf16.msrb.mxu1 %v9916_v10 }
 0x6f9   : > { %5443 = vmatpush.bf16.msrb.mxu2 %v9943_v25  ;;  %5456 = vmatpush.bf16.msrb.mxu3 %v9963_v62 }
 0x6fc   : > { %5418 = vmatpush.bf16.msrb.mxu0 %v9925_v32  ;;  %5431 = vmatpush.bf16.msrb.mxu1 %v9931_v47 }
 0x6fd   : > { %5444 = vmatpush.bf16.msrb.mxu2 %v9965_v34  ;;  %5457 = vmatpush.bf16.msrb.mxu3 %v9977_v16 }
 0x700   : > { %5419 = vmatpush.bf16.msrb.mxu0 %v9951_v30  ;;  %5432 = vmatpush.bf16.msrb.mxu1 %v9957_v28 }
 0x701   : > { %5445 = vmatpush.bf16.msrb.mxu2 %v9979_v8  ;;  %5458 = vmatpush.bf16.msrb.mxu3 %v10005_v54 }
 0x704   : > { %5420 = vmatpush.bf16.msrb.mxu0 %v9971_v14  ;;  %5433 = vmatpush.bf16.msrb.mxu1 %v9973_v13 }
 0x705   : > { %5446 = vmatpush.bf16.msrb.mxu2 %v10007_v6  ;;  %5459 = vmatpush.bf16.msrb.mxu3 %v10019_v42 }
 0x708   : > { %5421 = vmatpush.bf16.msrb.mxu0 %v9999_v21  ;;  %5434 = vmatpush.bf16.msrb.mxu1 %v10001_v22 }
 0x709   : > { %5447 = vmatpush.bf16.msrb.mxu2 %v10021_v0  ;;  %5460 = vmatpush.bf16.msrb.mxu3 %v10031_v1 }
 0x70c   : > { %5422 = vmatpush.bf16.msrb.mxu0 %v10013_v31  ;;  %5435 = vmatpush.bf16.msrb.mxu1 %v10015_v27 }
 0x70d   : > { %5448 = vmatpush.bf16.msrb.mxu2 %v10033_v58  ;;  %5461 = vmatpush.bf16.msrb.mxu3 %v10043_v46 }
 0x710   : > { %5423 = vmatpush.bf16.msrb.mxu0 %v10025_v4  ;;  %5436 = vmatpush.bf16.msrb.mxu1 %v10027_v33 }
 0x711   : > { %5449 = vmatpush.bf16.msrb.mxu2 %v10045_v48  ;;  %5462 = vmatpush.bf16.msrb.mxu3 %v10055_v41 }
 0x714   : > { %5424 = vmatpush.bf16.msrb.mxu0 %v10037_v19  ;;  %5437 = vmatpush.bf16.msrb.mxu1 %v10039_v20 }
 0x715   : > { %5450 = vmatpush.bf16.msrb.mxu2 %v10057_v26  ;;  %5463 = vmatpush.bf16.msrb.mxu3 %v10061_v55 }
 0x753   : > { %v4626_v7 = vpop.f32.mrf.mxu0  ;;  %v4640_v49 = vpop.f32.mrf.mxu1 }
 0x754   : > { %4673 = vst [vmem:[#allocation2] sm:$0xff] %v4626_v7 }
 0x755   : > { %4674 = vst [vmem:[#allocation2 + $0x8] sm:$0xff] %v4640_v49 }
 0x75a   : > { %v4654_v29 = vpop.f32.mrf.mxu2  ;;  %v4668_v63 = vpop.f32.mrf.mxu3 }
 0x75b   : > { %4675 = vst [vmem:[#allocation2 + $0x10] sm:$0xff] %v4654_v29  ;;  %v4628_v5 = vpop.f32.mrf.mxu0  ;;  %v4642_v59 = vpop.f32.mrf.mxu1  ;;  %v10135_v11 = vld [vmem:[#allocation2] sm:$0xc0]  ;;  %v4682_v60 = vld [vmem:[#allocation2] sm:$0x3] }
 0x75c   : > { %4676 = vst [vmem:[#allocation2 + $0x18] sm:$0xff] %v4668_v63  ;;  %v10137_v12 = vld [vmem:[#allocation2 + $0x8] sm:$0xc0]  ;;  %v4731_v53 = vld [vmem:[#allocation2] sm:$0xc] }
 0x75d   : > { %4677 = vst [vmem:[#allocation2 + $0x20] sm:$0xff] %v4628_v5  ;;  %v4683_v5 = vld [vmem:[#allocation2 + $0x8] sm:$0x3]  ;;  %v4732_v57 = vld [vmem:[#allocation2 + $0x8] sm:$0xc] }
 0x75e   : > { %4678 = vst [vmem:[#allocation2 + $0x28] sm:$0xff] %v4642_v59  ;;  %v4764_v23 = vld [vmem:[#allocation2 + $0x8] sm:$0x30]  ;;  %v4795_v41 = vld [vmem:[#allocation2] sm:$0xc0] }
 0x762   : > { %v4656_v2 = vpop.f32.mrf.mxu2  ;;  %v4670_v51 = vpop.f32.mrf.mxu3 }
 0x763   : > { %4679 = vst [vmem:[#allocation2 + $0x30] sm:$0xff] %v4656_v2  ;;  %v10141_v36 = vpop.f32.mrf.mxu0  ;;  %v10145_v18 = vpop.f32.mrf.mxu1  ;;  %v4734_v20 = vld [vmem:[#allocation2 + $0x18] sm:$0xc]  ;;  %v4766_v46 = vld [vmem:[#allocation2 + $0x18] sm:$0x30] }
 0x764   : > { %4680 = vst [vmem:[#allocation2 + $0x38] sm:$0xff] %v4670_v51  ;;  %v4686_v24 = vld [vmem:[#allocation2 + $0x20] sm:$0xc0]  ;;  %v4735_v35 = vld [vmem:[#allocation2 + $0x20] sm:$0x30] }
 0x765   : > { %v4702_v45 = vrot.slane %v4686_v24, 6  ;;  %v4687_v52 = vld [vmem:[#allocation2 + $0x28] sm:$0xc0]  ;;  %v4743_v61 = vrot.slane %v4735_v35, 2  ;;  %v4736_v50 = vld [vmem:[#allocation2 + $0x28] sm:$0x30] }
 0x766   : > { %v4703_v3 = vrot.slane %v4687_v52, 6  ;;  %v4744_v7 = vrot.slane %v4736_v50, 2  ;;  %v4767_v49 = vld [vmem:[#allocation2 + $0x20] sm:$0xc]  ;;  %v4768_v29 = vld [vmem:[#allocation2 + $0x28] sm:$0xc] }
 0x767   : > { %v4710_v63 = vsel %vm1037_vm0, %v4682_v60, %v4702_v45  ;;  %v4751_v59 = vsel %vm1037_vm0, %v4731_v53, %v4743_v61  ;;  %v4775_v2 = vrot.slane %v4767_v49, 6  ;;  %v4776_v51 = vrot.slane %v4768_v29, 6  ;;  %v4763_v50 = vld [vmem:[#allocation2] sm:$0x30]  ;;  %v4799_v49 = vld [vmem:[#allocation2 + $0x20] sm:$0x3] }
 0x768   : > { %v4723_v40 = vadd.f32 %v10139_v43, %v4710_v63  ;;  %v4711_v24 = vsel %vm9256_vm1, %v4683_v5, %v4703_v3  ;;  %v4755_v35 = vadd.f32 %v4751_v59, %v10139_v43  ;;  %v4752_v52 = vsel %vm9256_vm1, %v4732_v57, %v4744_v7  ;;  %v4800_v29 = vld [vmem:[#allocation2 + $0x28] sm:$0x3]  ;;  %v4684_v3 = vld [vmem:[#allocation2 + $0x10] sm:$0x3]  ;;  %v4733_v59 = vld [vmem:[#allocation2 + $0x10] sm:$0xc] }
 0x769   : > { %v4724_v60 = vadd.f32 %v10143_v17, %v4711_v24  ;;  %v4756_v45 = vadd.f32 %v4752_v52, %v10143_v17  ;;  %v4783_v53 = vsel %vm1037_vm0, %v4763_v50, %v4775_v2  ;;  %v4784_v61 = vsel %vm9256_vm1, %v4764_v23, %v4776_v51  ;;  %v4685_v50 = vld [vmem:[#allocation2 + $0x18] sm:$0x3]  ;;  %v4827_v33 = vld [vmem:[#allocation2 + $0x20] sm:$0x3] }
 0x76a   : > { %4727 = vst [vmem:[#allocation3] sm:$0x3] %v4723_v40  ;;  %v4688_v63 = vld [vmem:[#allocation2 + $0x30] sm:$0xc0]  ;;  %v10169_v5 = vpop.f32.mrf.mxu2  ;;  %v10171_v7 = vpop.f32.mrf.mxu3  ;;  %v4737_v57 = vld [vmem:[#allocation2 + $0x30] sm:$0x30]  ;;  %v4787_v24 = vadd.f32 %v4783_v53, %v10139_v43  ;;  %v4788_v51 = vadd.f32 %v4784_v61, %v10143_v17 }
 0x76b   : > { %4728 = vst [vmem:[#allocation3 + $0x8] sm:$0x3] %v4724_v60  ;;  %v5162_v52 = vpop.f32.mrf.mxu0  ;;  %v5175_v55 = vpop.f32.mrf.mxu1  ;;  %v4704_v2 = vrot.slane %v4688_v63, 6  ;;  %v4689_v26 = vld [vmem:[#allocation2 + $0x38] sm:$0xc0]  ;;  %v4745_v23 = vrot.slane %v4737_v57, 2 }
 0x76c   : > { %v4705_v40 = vrot.slane %v4689_v26, 6  ;;  %4759 = vst [vmem:[#allocation3] sm:$0xc] %v4755_v35  ;;  %v4738_v19 = vld [vmem:[#allocation2 + $0x38] sm:$0x30]  ;;  %v4807_v48 = vrot.slane %v4799_v49, 2 }
 0x76d   : > { %v4712_v4 = vsel %vm9260_vm2, %v4684_v3, %v4704_v2  ;;  %4760 = vst [vmem:[#allocation3 + $0x8] sm:$0xc] %v4756_v45  ;;  %v4753_v55 = vsel %vm9260_vm2, %v4733_v59, %v4745_v23  ;;  %v4746_v60 = vrot.slane %v4738_v19, 2  ;;  %v4765_v53 = vld [vmem:[#allocation2 + $0x10] sm:$0x30]  ;;  %v4808_v52 = vrot.slane %v4800_v29, 2 }
 0x76e   : > { %v4769_v63 = vld [vmem:[#allocation2 + $0x30] sm:$0xc]  ;;  %v4796_v57 = vld [vmem:[#allocation2 + $0x8] sm:$0xc0]  ;;  %v4725_v26 = vadd.f32 %v10147_v56, %v4712_v4  ;;  %v4713_v35 = vsel %vm9264_vm3, %v4685_v50, %v4705_v40  ;;  %v4757_v61 = vadd.f32 %v4753_v55, %v10147_v56  ;;  %4791 = vst [vmem:[#allocation3] sm:$0x30] %v4787_v24  ;;  %v4815_v4 = vsel %vm1037_vm0, %v4795_v41, %v4807_v48 }
 0x76f   : > { %v4777_v49 = vrot.slane %v4769_v63, 6  ;;  %v4770_v3 = vld [vmem:[#allocation2 + $0x38] sm:$0xc]  ;;  %v4833_v45 = vld [vmem:[#allocation2 + $0x10] sm:$0xc0]  ;;  %v4726_v2 = vadd.f32 %v10149_v44, %v4713_v35  ;;  %v4754_v19 = vsel %vm9264_vm3, %v4734_v20, %v4746_v60  ;;  %v4816_v40 = vsel %vm9256_vm1, %v4796_v57, %v4808_v52 }
 0x770   : > { %4792 = vst [vmem:[#allocation3 + $0x8] sm:$0x30] %v4788_v51  ;;  %v4778_v59 = vrot.slane %v4770_v3, 6  ;;  %v4801_v29 = vld [vmem:[#allocation2 + $0x30] sm:$0x3]  ;;  %v4758_v50 = vadd.f32 %v4754_v19, %v10149_v44  ;;  %v10668_v60 = vrot.slane %v10135_v11, 6 }
 0x771   : > { %v4828_v23 = vld [vmem:[#allocation2 + $0x28] sm:$0x3]  ;;  %4729 = vst [vmem:[#allocation3 + $0x10] sm:$0x3] %v4725_v26  ;;  %v4785_v24 = vsel %vm9260_vm2, %v4765_v53, %v4777_v49  ;;  %v4797_v55 = vld [vmem:[#allocation2 + $0x10] sm:$0xc0] }
 0x772   : > { %v4802_v63 = vld [vmem:[#allocation2 + $0x38] sm:$0x3]  ;;  %v4829_v35 = vld [vmem:[#allocation2 + $0x30] sm:$0x3]  ;;  %v4955_v20 = vld [vmem:[#allocation3] sm:$0x3]  ;;  %v4789_v51 = vadd.f32 %v4785_v24, %v10147_v56  ;;  %v4786_v48 = vsel %vm9264_vm3, %v4766_v46, %v4778_v59  ;;  %v4847_v26 = vsel %vm1037_vm0, %v4827_v33, %v10668_v60  ;;  %v5188_v57 = vpop.f32.mrf.mxu2  ;;  %v5201_v52 = vpop.f32.mrf.mxu3  ;;  %v4820_v46 = vadd.f32 %v4816_v40, %v10143_v17 }
 0x773   : > { %4730 = vst [vmem:[#allocation3 + $0x18] sm:$0x3] %v4726_v2  ;;  %v4809_v41 = vrot.slane %v4801_v29, 2  ;;  %v5203_v53 = vadd.f32 %v10141_v36, %v4955_v20  ;;  %v4956_v49 = vld [vmem:[#allocation3 + $0x8] sm:$0x3]  ;;  %v4790_v3 = vadd.f32 %v4786_v48, %v10149_v44  ;;  %v4819_v2 = vadd.f32 %v4815_v4, %v10139_v43 }
 0x774   : > { %4761 = vst [vmem:[#allocation3 + $0x10] sm:$0xc] %v4757_v61  ;;  %v4810_v19 = vrot.slane %v4802_v63, 2  ;;  %v5204_v24 = vadd.f32 %v10145_v18, %v4956_v49  ;;  %v4798_v33 = vld [vmem:[#allocation2 + $0x18] sm:$0xc0]  ;;  %v4841_v59 = vrot.slane %v4833_v45, 6  ;;  %v4851_v20 = vadd.f32 %v4847_v26, %v10139_v43 }
 0x775   : > { %4762 = vst [vmem:[#allocation3 + $0x18] sm:$0xc] %v4758_v50  ;;  %v4817_v11 = vsel %vm9260_vm2, %v4797_v55, %v4809_v41  ;;  %v7977_v36 = vmul.f32 -1.442695, %v5203_v53  ;;  %v10669_v4 = vrot.slane %v10137_v12, 6 }
 0x776   : > { %4793 = vst [vmem:[#allocation3 + $0x10] sm:$0x30] %v4789_v51  ;;  %v4821_v29 = vadd.f32 %v4817_v11, %v10147_v56  ;;  %v4818_v61 = vsel %vm9264_vm3, %v4798_v33, %v4810_v19  ;;  %v4863_v50 = vld [vmem:[#allocation2] sm:$0x30]  ;;  %v7978_v63 = vmul.f32 -1.442695, %v5204_v24  ;;  %v4849_v45 = vsel %vm9260_vm2, %v4829_v35, %v4841_v59 }
 0x777   : > { %v4848_v18 = vsel %vm9256_vm1, %v4828_v23, %v10669_v4  ;;  %4794 = vst [vmem:[#allocation3 + $0x18] sm:$0x30] %v4790_v3  ;;  %v4822_v40 = vadd.f32 %v4818_v61, %v10149_v44  ;;  %v4864_v55 = vld [vmem:[#allocation2 + $0x8] sm:$0x30]  ;;  %8591 = vpow2.f32 %v7977_v36  ;;  %v4830_v51 = vld [vmem:[#allocation2 + $0x38] sm:$0x3]  ;;  %v4853_v49 = vadd.f32 %v4849_v45, %v10147_v56 }
 0x778   : > { %4823 = vst [vmem:[#allocation3] sm:$0xc0] %v4819_v2  ;;  %v4834_v48 = vld [vmem:[#allocation2 + $0x18] sm:$0xc0]  ;;  %8593 = vpow2.f32 %v7978_v63  ;;  %v4957_v12 = vld [vmem:[#allocation3 + $0x10] sm:$0x3]  ;;  %v4852_v23 = vadd.f32 %v4848_v18, %v10143_v17 }
 0x779   : > { %4824 = vst [vmem:[#allocation3 + $0x8] sm:$0xc0] %v4820_v46  ;;  %v4842_v41 = vrot.slane %v4834_v48, 6  ;;  %v4871_v60 = vrot.slane %v4863_v50, 2  ;;  %v5205_v53 = vadd.f32 %v10169_v5, %v4957_v12  ;;  %v4859_v35 = vld [vmem:[#allocation2 + $0x20] sm:$0xc] }
 0x77a   : > { %4825 = vst [vmem:[#allocation3 + $0x10] sm:$0xc0] %v4821_v29  ;;  %v4872_v57 = vrot.slane %v4864_v55, 2  ;;  %v4860_v3 = vld [vmem:[#allocation2 + $0x28] sm:$0xc] }
 0x77b   : > { %4826 = vst [vmem:[#allocation3 + $0x18] sm:$0xc0] %v4822_v40  ;;  %v4850_v26 = vsel %vm9264_vm3, %v4830_v51, %v4842_v41  ;;  %v4879_v52 = vsel %vm1037_vm0, %v4859_v35, %v4871_v60  ;;  %v7979_v2 = vmul.f32 -1.442695, %v5205_v53  ;;  %v4865_v11 = vld [vmem:[#allocation2 + $0x10] sm:$0x30] }
 0x77c   : > { %4855 = vst [vmem:[#allocation3 + $0x20] sm:$0x3] %v4851_v20  ;;  %v4854_v19 = vadd.f32 %v4850_v26, %v10149_v44  ;;  %v4883_v24 = vadd.f32 %v4879_v52, %v10139_v43  ;;  %v4880_v5 = vsel %vm9256_vm1, %v4860_v3, %v4872_v57  ;;  %v4958_v36 = vld [vmem:[#allocation3 + $0x18] sm:$0x3]  ;;  %v4861_v4 = vld [vmem:[#allocation2 + $0x30] sm:$0xc] }
 0x77d   : > { %4856 = vst [vmem:[#allocation3 + $0x28] sm:$0x3] %v4852_v23  ;;  %v8592_v46 = vpop.eup %8591  ;;  %8595 = vpow2.f32 %v7979_v2  ;;  %v4884_v29 = vadd.f32 %v4880_v5, %v10143_v17  ;;  %v4873_v18 = vrot.slane %v4865_v11, 2  ;;  %v5206_v50 = vadd.f32 %v10171_v7, %v4958_v36  ;;  %v4895_v40 = vld [vmem:[#allocation2] sm:$0xc] }
 0x77e   : > { %4857 = vst [vmem:[#allocation3 + $0x30] sm:$0x3] %v4853_v49  ;;  %v8594_v33 = vpop.eup %8593  ;;  %v10229_v59 = vadd.f32 1.0, %v8592_v46  ;;  %v4896_v45 = vld [vmem:[#allocation2 + $0x8] sm:$0xc]  ;;  %v4903_v35 = vrot.slane %v4895_v40, 6 }
 0x77f   : > { %4858 = vst [vmem:[#allocation3 + $0x38] sm:$0x3] %v4854_v19  ;;  %v10232_v61 = vadd.f32 1.0, %v8594_v33  ;;  %v4881_v63 = vsel %vm9260_vm2, %v4861_v4, %v4873_v18  ;;  %v4862_v7 = vld [vmem:[#allocation2 + $0x38] sm:$0xc]  ;;  %v4904_v57 = vrot.slane %v4896_v45, 6 }
 0x780   : > { %4887 = vst [vmem:[#allocation3 + $0x20] sm:$0xc] %v4883_v24  ;;  %8597 = vrcp.f32 %v10229_v59  ;;  %v5228_v20 = vand.u32 2147483647, %v10229_v59  ;;  %v5230_v51 = vand.u32 2147483648, %v10229_v59  ;;  %v4885_v12 = vadd.f32 %v4881_v63, %v10147_v56 }
 0x781   : > { %8599 = vrcp.f32 %v10232_v61  ;;  %4888 = vst [vmem:[#allocation3 + $0x28] sm:$0xc] %v4884_v29  ;;  %v5243_v48 = vand.u32 2147483647, %v10232_v61  ;;  %v5245_v23 = vand.u32 2147483648, %v10232_v61  ;;  %vm5224_vm6 = vweird.f32 %v10229_v59 }
 0x782   : > { %v4866_v60 = vld [vmem:[#allocation2 + $0x18] sm:$0x30]  ;;  %4889 = vst [vmem:[#allocation3 + $0x30] sm:$0xc] %v4885_v12  ;;  %vm10253_vm4 = vcmp.eq.f32.partialorder %v5228_v20, 8.507059e+37  ;;  %v5231_v11 = vor.u32 1.1754944e-38, %v5230_v51  ;;  %vm5239_vm13 = vweird.f32 %v10232_v61 }
 0x783   : > { %v8596_v55 = vpop.eup %8595  ;;  %v4874_v53 = vrot.slane %v4866_v60, 2  ;;  %v4891_v19 = vld [vmem:[#allocation2 + $0x20] sm:$0x30]  ;;  %v4892_v24 = vld [vmem:[#allocation2 + $0x28] sm:$0x30]  ;;  %v5246_v46 = vor.u32 1.1754944e-38, %v5245_v23 }
 0x784   : > { %v10244_v41 = vadd.f32 1.0, %v8596_v55  ;;  %vm10261_vm5 = vcmp.eq.f32.partialorder %v5243_v48, 8.507059e+37  ;;  %v4897_v36 = vld [vmem:[#allocation2 + $0x10] sm:$0xc]  ;;  %v4911_v18 = vsel %vm1037_vm0, %v4891_v19, %v4903_v35  ;;  %v4893_v63 = vld [vmem:[#allocation2 + $0x30] sm:$0x30] }
 0x785   : > { %v4882_v2 = vsel %vm9264_vm3, %v4862_v7, %v4874_v53  ;;  %v4898_v40 = vld [vmem:[#allocation2 + $0x18] sm:$0xc]  ;;  %v4915_v55 = vadd.f32 %v4911_v18, %v10139_v43  ;;  %v4905_v51 = vrot.slane %v4897_v36, 6  ;;  %v4927_v48 = vld [vmem:[#allocation2] sm:$0x3] }
 0x786   : > { %v10246_v49 = vpop.eup %8597  ;;  %8601 = vrcp.f32 %v10244_v41  ;;  %v4886_v4 = vadd.f32 %v4882_v2, %v10149_v44  ;;  %v4894_v23 = vld [vmem:[#allocation2 + $0x38] sm:$0x30]  ;;  %v4923_v7 = vld [vmem:[#allocation2 + $0x20] sm:$0xc0]  ;;  %v4928_v2 = vld [vmem:[#allocation2 + $0x8] sm:$0x3] }
 0x787   : > { %v10249_v26 = vpop.eup %8599  ;;  %v5220_v52 = vmul.f32 %v10246_v49, %v10229_v59  ;;  %8603 = vtanh.f32 %v5206_v50  ;;  %v4912_v50 = vsel %vm9256_vm1, %v4892_v24, %v4904_v57  ;;  %vm5225_vm7 = vweird.f32 %v10246_v49  ;;  %4919 = vst [vmem:[#allocation3 + $0x20] sm:$0x30] %v4915_v55 }
 0x788   : > { %v5235_v5 = vmul.f32 %v10249_v26, %v10232_v61  ;;  %v4916_v20 = vadd.f32 %v4912_v50, %v10143_v17  ;;  %vm5240_vm12 = vweird.f32 %v10249_v26  ;;  %4890 = vst [vmem:[#allocation3 + $0x38] sm:$0xc] %v4886_v4  ;;  %v4913_v35 = vsel %vm9260_vm2, %v4893_v63, %v4905_v51  ;;  %v4929_v4 = vld [vmem:[#allocation2 + $0x10] sm:$0x3]  ;;  %vm5226_vm14 = vmor %vm5224_vm6, %vm5225_vm7 }
 0x789   : > { %v5221_v29 = vsub.f32 1.0, %v5220_v52  ;;  %v4906_v57 = vrot.slane %v4898_v40, 6  ;;  %v4935_v52 = vrot.slane %v4927_v48, 2  ;;  %v4917_v36 = vadd.f32 %v4913_v35, %v10147_v56  ;;  %vm5241_vm15 = vmor %vm5239_vm13, %vm5240_vm12  ;;  %v4930_v48 = vld [vmem:[#allocation2 + $0x18] sm:$0x3] }
 0x78a   : > { %v5236_v45 = vsub.f32 1.0, %v5235_v5  ;;  %4920 = vst [vmem:[#allocation3 + $0x28] sm:$0x30] %v4916_v20  ;;  %v4936_v40 = vrot.slane %v4928_v2, 2  ;;  %v5258_v38 = vand.u32 2147483647, %v10244_v41 }
 0x78b   : > { %v5222_v12 = vmul.f32 %v10246_v49, %v5221_v29  ;;  %v4924_v29 = vld [vmem:[#allocation2 + $0x28] sm:$0xc0]  ;;  %v4914_v50 = vsel %vm9264_vm3, %v4894_v23, %v4906_v57  ;;  %v4943_v63 = vsel %vm1037_vm0, %v4923_v7, %v4935_v52  ;;  %4921 = vst [vmem:[#allocation3 + $0x30] sm:$0x30] %v4917_v36  ;;  %v4926_v57 = vld [vmem:[#allocation2 + $0x38] sm:$0xc0] }
 0x78c   : > { %v8602_v60 = vpop.eup %8601  ;;  %v5237_v53 = vmul.f32 %v10249_v26, %v5236_v45  ;;  %v4925_v45 = vld [vmem:[#allocation2 + $0x30] sm:$0xc0]  ;;  %v4918_v59 = vadd.f32 %v4914_v50, %v10149_v44  ;;  %v4947_v51 = vadd.f32 %v4943_v63, %v10139_v43  ;;  %v4944_v23 = vsel %vm9256_vm1, %v4924_v29, %v4936_v40  ;;  %v10677_v36 = vld [vmem:[#allocation23_spill] sm:$0xff]  ;;  %v10681_v50 = vld [vmem:[#allocation25_spill] sm:$0xff] }
 0x78d   : > { %v8604_v19 = vpop.eup %8603  ;;  %v5250_v24 = vmul.f32 %v8602_v60, %v10244_v41  ;;  %v5223_v5 = vadd.f32 %v10246_v49, %v5222_v12  ;;  %v4948_v35 = vadd.f32 %v4944_v23, %v10143_v17  ;;  %vm5255_vm0 = vweird.f32 %v8602_v60  ;;  %v10678_v29 = vld [vmem:[#allocation24_spill] sm:$0xff]  ;;  %v10682_v63 = vld [vmem:[#allocation26_spill] sm:$0xff] }
 0x78e   : > { %v5238_v18 = vadd.f32 %v10249_v26, %v5237_v53  ;;  %4922 = vst [vmem:[#allocation3 + $0x38] sm:$0x30] %v4918_v59  ;;  %v5260_v52 = vand.u32 2147483648, %v10244_v41  ;;  %vm5254_vm1 = vweird.f32 %v10244_v41  ;;  %vm5259_vm8 = vcmp.eq.f32.partialorder %v5258_v38, 8.507059e+37  ;;  %v10675_v41 = vld [vmem:[#allocation18_spill] sm:$0xff] }
 0x78f   : > { %v5251_v55 = vsub.f32 1.0, %v5250_v24  ;;  %v5227_v20 = vsel %vm5226_vm14, %v10246_v49, %v5223_v5  ;;  %v4937_v49 = vrot.slane %v4929_v4, 2  ;;  %4951 = vst [vmem:[#allocation3 + $0x20] sm:$0xc0] %v4947_v51  ;;  %v10679_v4 = vld [vmem:[#allocation20_spill] sm:$0xff] }
 0x790   : > { %v5232_v15 = vsel %vm10253_vm4, %v5231_v11, %v5227_v20  ;;  %v5242_v12 = vsel %vm5241_vm15, %v10249_v26, %v5238_v18  ;;  %v4938_v11 = vrot.slane %v4930_v48, 2  ;;  %4952 = vst [vmem:[#allocation3 + $0x28] sm:$0xc0] %v4948_v35  ;;  %v5261_v2 = vor.u32 1.1754944e-38, %v5260_v52  ;;  %v10680_v18 = vld [vmem:[#allocation21_spill] sm:$0xff] }
 0x791   : > { %v5247_v7 = vsel %vm10261_vm5, %v5246_v46, %v5242_v12  ;;  %v5266_v61 = vmul.f32 %v8604_v19, %v5232_v15  ;;  %v5252_v53 = vmul.f32 %v8602_v60, %v5251_v55  ;;  %v4945_v3 = vsel %vm9260_vm2, %v4925_v45, %v4937_v49  ;;  %vm5256_vm2 = vmor %vm5254_vm1, %vm5255_vm0  ;;  %v5270_v59 = vld [vmem:[#allocation3] sm:$0xc]  ;;  %v5271_v51 = vld [vmem:[#allocation3 + $0x8] sm:$0xc] }
 0x792   : > { %v5265_v43 = vmul.f32 0.0, %v5247_v7  ;;  %v4949_v37 = vadd.f32 %v4945_v3, %v10147_v56  ;;  %v4946_v46 = vsel %vm9264_vm3, %v4926_v57, %v4938_v11  ;;  %v5272_v57 = vld [vmem:[#allocation3 + $0x10] sm:$0xc] }
 0x793   : > { %v5253_v33 = vadd.f32 %v8602_v60, %v5252_v53  ;;  %v4950_v17 = vadd.f32 %v4946_v46, %v10149_v44  ;;  %v10674_v44 = vld [vmem:[#allocation22_spill] sm:$0xff] }
 0x794   : > { %v10310_v26 = vadd.f32 %v5266_v61, %v5265_v43  ;;  %4953 = vst [vmem:[#allocation3 + $0x30] sm:$0xc0] %v4949_v37 }
 0x795   : > { %4954 = vst [vmem:[#allocation3 + $0x38] sm:$0xc0] %v4950_v17  ;;  %v5257_v56 = vsel %vm5256_vm2, %v8602_v60, %v5253_v33  ;;  %v10676_v60 = vld [vmem:[#allocation19_spill] sm:$0xff] }
 0x796   : > { %8605 = vtanh.f32 %v10310_v26  ;;  %v5262_v19 = vsel %vm5259_vm8, %v5261_v2, %v5257_v56 }
 0x79c   : > { %v8606_v39 = vpop.eup %8605 }
 0x79d   : > { %v5269_v24 = vmul.f32 %v8606_v39, %v5262_v19  ;;  %v5273_v39 = vld [vmem:[#allocation3 + $0x18] sm:$0xc] }
 0x79f   : > { %v5274_v5 = vpack.c.bf16 %v5269_v24, %v5269_v24 }
 0x7a1   : > { %5283 = vmatmul.bf16.vlgmr.msra.gmra.mxu0 %v5274_v5  ;;  %5296 = vmatmul.bf16.vlgmr.msra.gmra.mxu1 %v5274_v5 }
 0x7a2   : > { %5309 = vmatmul.bf16.vlgmr.msra.gmra.mxu2 %v5274_v5  ;;  %5322 = vmatmul.bf16.vlgmr.msra.gmra.mxu3 %v5274_v5 }
 0x7a3   : > { %5559 = vmatpush.bf16.msra.mxu0 %v9913_v9  ;;  %5572 = vmatpush.bf16.msra.mxu1 %v9916_v10 }
 0x7a4   : > { %5585 = vmatpush.bf16.msra.mxu2 %v9943_v25  ;;  %5598 = vmatpush.bf16.msra.mxu3 %v9963_v62 }
 0x7a7   : > { %5560 = vmatpush.bf16.msra.mxu0 %v9925_v32  ;;  %5573 = vmatpush.bf16.msra.mxu1 %v9931_v47 }
 0x7a8   : > { %5586 = vmatpush.bf16.msra.mxu2 %v9965_v34  ;;  %5599 = vmatpush.bf16.msra.mxu3 %v9977_v16 }
 0x7ab   : > { %5561 = vmatpush.bf16.msra.mxu0 %v9951_v30  ;;  %5574 = vmatpush.bf16.msra.mxu1 %v9957_v28 }
 0x7ac   : > { %5587 = vmatpush.bf16.msra.mxu2 %v9979_v8  ;;  %5600 = vmatpush.bf16.msra.mxu3 %v10005_v54 }
 0x7af   : > { %5562 = vmatpush.bf16.msra.mxu0 %v9971_v14  ;;  %5575 = vmatpush.bf16.msra.mxu1 %v9973_v13 }
 0x7b0   : > { %5588 = vmatpush.bf16.msra.mxu2 %v10007_v6  ;;  %5601 = vmatpush.bf16.msra.mxu3 %v10019_v42 }
 0x7b3   : > { %5563 = vmatpush.bf16.msra.mxu0 %v9999_v21  ;;  %5576 = vmatpush.bf16.msra.mxu1 %v10001_v22 }
 0x7b4   : > { %5589 = vmatpush.bf16.msra.mxu2 %v10021_v0  ;;  %5602 = vmatpush.bf16.msra.mxu3 %v10031_v1 }
 0x7b7   : > { %5564 = vmatpush.bf16.msra.mxu0 %v10013_v31  ;;  %5577 = vmatpush.bf16.msra.mxu1 %v10015_v27 }
 0x7b8   : > { %5590 = vmatpush.bf16.msra.mxu2 %v10033_v58  ;;  %5603 = vmatpush.bf16.msra.mxu3 %v10674_v44 }
 0x7bb   : > { %5565 = vmatpush.bf16.msra.mxu0 %v10675_v41  ;;  %5578 = vmatpush.bf16.msra.mxu1 %v10676_v60 }
 0x7bc   : > { %5591 = vmatpush.bf16.msra.mxu2 %v10677_v36  ;;  %5604 = vmatpush.bf16.msra.mxu3 %v10678_v29 }
 0x7bf   : > { %5566 = vmatpush.bf16.msra.mxu0 %v10679_v4  ;;  %5579 = vmatpush.bf16.msra.mxu1 %v10680_v18 }
 0x7c0   : > { %5592 = vmatpush.bf16.msra.mxu2 %v10681_v50  ;;  %5605 = vmatpush.bf16.msra.mxu3 %v10682_v63 }
 0x81e   : > { %v5284_v40 = vpop.f32.mrf.mxu0  ;;  %v5297_v45 = vpop.f32.mrf.mxu1 }
 0x81f   : > { %v5331_v55 = vrot.slane %v5284_v40, 6  ;;  %v5332_v20 = vrot.slane %v5297_v45, 6 }
 0x821   : > { %v5339_v48 = vadd.f32 %v5331_v55, %v5270_v59  ;;  %v5340_v15 = vadd.f32 %v5332_v20, %v5271_v51 }
 0x823   : > { %v7980_v12 = vmul.f32 -1.442695, %v5339_v48  ;;  %v7981_v23 = vmul.f32 -1.442695, %v5340_v15 }
 0x825   : > { %8607 = vpow2.f32 %v7980_v12  ;;  %v5310_v49 = vpop.f32.mrf.mxu2  ;;  %v5323_v7 = vpop.f32.mrf.mxu3 }
 0x826   : > { %8609 = vpow2.f32 %v7981_v23  ;;  %v5333_v61 = vrot.slane %v5310_v49, 6  ;;  %v5286_v53 = vpop.f32.mrf.mxu0  ;;  %v5299_v35 = vpop.f32.mrf.mxu1  ;;  %v5334_v38 = vrot.slane %v5323_v7, 6 }
 0x828   : > { %v5341_v43 = vadd.f32 %v5333_v61, %v5272_v57  ;;  %v5342_v24 = vadd.f32 %v5334_v38, %v5273_v39  ;;  %v5402_v57 = vrot.slane %v10310_v26, 6 }
 0x82a   : > { %v7982_v3 = vmul.f32 -1.442695, %v5341_v43 }
 0x82b   : > { %v8608_v11 = vpop.eup %8607 }
 0x82c   : > { %v8610_v37 = vpop.eup %8609  ;;  %v5352_v46 = vadd.f32 1.0, %v8608_v11  ;;  %8611 = vpow2.f32 %v7982_v3 }
 0x82d   : > { %v5353_v33 = vadd.f32 1.0, %v8610_v37  ;;  %v5312_v17 = vpop.f32.mrf.mxu2  ;;  %v5325_v52 = vpop.f32.mrf.mxu3 }
 0x82e   : > { %8613 = vrcp.f32 %v5352_v46  ;;  %v5366_v59 = vand.u32 2147483648, %v5352_v46  ;;  %v5364_v15 = vand.u32 2147483647, %v5352_v46  ;;  %vm5360_vm10 = vweird.f32 %v5352_v46 }
 0x82f   : > { %8615 = vrcp.f32 %v5353_v33  ;;  %v5381_v51 = vand.u32 2147483648, %v5353_v33  ;;  %v5379_v23 = vand.u32 2147483647, %v5353_v33  ;;  %vm5375_vm11 = vweird.f32 %v5353_v33 }
 0x830   : > { %v5367_v53 = vor.u32 1.1754944e-38, %v5366_v59  ;;  %vm5365_vm6 = vcmp.eq.f32.partialorder %v5364_v15, 8.507059e+37 }
 0x831   : > { %v5382_v43 = vor.u32 1.1754944e-38, %v5381_v51  ;;  %vm5380_vm7 = vcmp.eq.f32.partialorder %v5379_v23, 8.507059e+37  ;;  %v5409_v23 = vld [vmem:[#allocation3] sm:$0x30] }
 0x832   : > { %v8612_v56 = vpop.eup %8611 }
 0x833   : > { %v5354_v2 = vadd.f32 1.0, %v8612_v56 }
 0x834   : > { %v8614_v19 = vpop.eup %8613 }
 0x835   : > { %v8616_v5 = vpop.eup %8615  ;;  %v5356_v40 = vmul.f32 %v8614_v19, %v5352_v46  ;;  %8617 = vrcp.f32 %v5354_v2  ;;  %vm5361_vm3 = vweird.f32 %v8614_v19  ;;  %v5396_v26 = vand.u32 2147483648, %v5354_v2 }
 0x836   : > { %v5371_v45 = vmul.f32 %v8616_v5, %v5353_v33  ;;  %8619 = vtanh.f32 %v5342_v24  ;;  %vm5376_vm9 = vweird.f32 %v8616_v5  ;;  %vm5362_vm4 = vmor %vm5360_vm10, %vm5361_vm3  ;;  %vm5390_vm13 = vweird.f32 %v5354_v2 }
 0x837   : > { %v5357_v55 = vsub.f32 1.0, %v5356_v40  ;;  %vm5377_vm5 = vmor %vm5375_vm11, %vm5376_vm9  ;;  %v5394_v40 = vand.u32 2147483647, %v5354_v2 }
 0x838   : > { %v5372_v20 = vsub.f32 1.0, %v5371_v45  ;;  %v5397_v45 = vor.u32 1.1754944e-38, %v5396_v26 }
 0x839   : > { %v5358_v48 = vmul.f32 %v8614_v19, %v5357_v55  ;;  %vm5395_vm15 = vcmp.eq.f32.partialorder %v5394_v40, 8.507059e+37 }
 0x83a   : > { %v5373_v12 = vmul.f32 %v8616_v5, %v5372_v20 }
 0x83b   : > { %v8618_v49 = vpop.eup %8617  ;;  %v5359_v7 = vadd.f32 %v8614_v19, %v5358_v48 }
 0x83c   : > { %v5386_v61 = vmul.f32 %v8618_v49, %v5354_v2  ;;  %v5374_v35 = vadd.f32 %v8616_v5, %v5373_v12  ;;  %v8620_v11 = vpop.eup %8619  ;;  %vm5391_vm12 = vweird.f32 %v8618_v49 }
 0x83d   : > { %v5363_v3 = vsel %vm5362_vm4, %v8614_v19, %v5359_v7  ;;  %vm5392_vm14 = vmor %vm5390_vm13, %vm5391_vm12 }
 0x83e   : > { %v5387_v37 = vsub.f32 1.0, %v5386_v61  ;;  %v5368_v17 = vsel %vm5365_vm6, %v5367_v53, %v5363_v3  ;;  %v5378_v52 = vsel %vm5377_vm5, %v8616_v5, %v5374_v35 }
 0x83f   : > { %v5383_v38 = vsel %vm5380_vm7, %v5382_v43, %v5378_v52  ;;  %v5405_v56 = vmul.f32 %v8620_v11, %v5368_v17  ;;  %v5411_v17 = vld [vmem:[#allocation3 + $0x10] sm:$0x30] }
 0x840   : > { %v5404_v39 = vmul.f32 %v5402_v57, %v5383_v38  ;;  %v5388_v46 = vmul.f32 %v8618_v49, %v5387_v37 }
 0x842   : > { %v10352_v33 = vadd.f32 %v5405_v56, %v5404_v39  ;;  %v5389_v24 = vadd.f32 %v8618_v49, %v5388_v46 }
 0x844   : > { %8621 = vtanh.f32 %v10352_v33  ;;  %v5393_v19 = vsel %vm5392_vm14, %v8618_v49, %v5389_v24  ;;  %v5410_v49 = vld [vmem:[#allocation3 + $0x8] sm:$0x30] }
 0x845   : > { %v5398_v5 = vsel %vm5395_vm15, %v5397_v45, %v5393_v19 }
 0x84a   : > { %v8622_v55 = vpop.eup %8621 }
 0x84b   : > { %v5408_v20 = vmul.f32 %v8622_v55, %v5398_v5  ;;  %v5412_v5 = vld [vmem:[#allocation3 + $0x18] sm:$0x30] }
 0x84d   : > { %v5413_v59 = vpack.c.bf16 %v5408_v20, %v5408_v20 }
 0x84f   : > { %v5415_v51 = vrot.slane %v5413_v59, 1 }
 0x851   : > { %5425 = vmatmul.bf16.vlgmr.msrb.gmra.mxu0 %v5415_v51  ;;  %5438 = vmatmul.bf16.vlgmr.msrb.gmra.mxu1 %v5415_v51 }
 0x852   : > { %5451 = vmatmul.bf16.vlgmr.msrb.gmra.mxu2 %v5415_v51  ;;  %5464 = vmatmul.bf16.vlgmr.msrb.gmra.mxu3 %v5415_v51 }
 0x853   : > { %5701 = vmatpush.bf16.msrb.mxu0 %v9913_v9  ;;  %5714 = vmatpush.bf16.msrb.mxu1 %v9916_v10 }
 0x854   : > { %5727 = vmatpush.bf16.msrb.mxu2 %v9943_v25  ;;  %5740 = vmatpush.bf16.msrb.mxu3 %v9963_v62 }
 0x857   : > { %5702 = vmatpush.bf16.msrb.mxu0 %v9925_v32  ;;  %5715 = vmatpush.bf16.msrb.mxu1 %v9931_v47 }
 0x858   : > { %5728 = vmatpush.bf16.msrb.mxu2 %v9965_v34  ;;  %5741 = vmatpush.bf16.msrb.mxu3 %v9977_v16 }
 0x85b   : > { %5703 = vmatpush.bf16.msrb.mxu0 %v9951_v30  ;;  %5716 = vmatpush.bf16.msrb.mxu1 %v9957_v28 }
 0x85c   : > { %5729 = vmatpush.bf16.msrb.mxu2 %v9979_v8  ;;  %5742 = vmatpush.bf16.msrb.mxu3 %v10005_v54 }
 0x85f   : > { %5704 = vmatpush.bf16.msrb.mxu0 %v9971_v14  ;;  %5717 = vmatpush.bf16.msrb.mxu1 %v9973_v13 }
 0x860   : > { %5730 = vmatpush.bf16.msrb.mxu2 %v10007_v6  ;;  %5743 = vmatpush.bf16.msrb.mxu3 %v10019_v42 }
 0x863   : > { %5705 = vmatpush.bf16.msrb.mxu0 %v9999_v21  ;;  %5718 = vmatpush.bf16.msrb.mxu1 %v10001_v22 }
 0x864   : > { %5731 = vmatpush.bf16.msrb.mxu2 %v10021_v0  ;;  %5744 = vmatpush.bf16.msrb.mxu3 %v10031_v1 }
 0x867   : > { %5706 = vmatpush.bf16.msrb.mxu0 %v10013_v31  ;;  %5719 = vmatpush.bf16.msrb.mxu1 %v10015_v27 }
 0x868   : > { %5732 = vmatpush.bf16.msrb.mxu2 %v10033_v58  ;;  %5745 = vmatpush.bf16.msrb.mxu3 %v10674_v44 }
 0x86b   : > { %5707 = vmatpush.bf16.msrb.mxu0 %v10675_v41  ;;  %5720 = vmatpush.bf16.msrb.mxu1 %v10676_v60 }
 0x86c   : > { %5733 = vmatpush.bf16.msrb.mxu2 %v10677_v36  ;;  %5746 = vmatpush.bf16.msrb.mxu3 %v10678_v29 }
 0x86f   : > { %5708 = vmatpush.bf16.msrb.mxu0 %v10679_v4  ;;  %5721 = vmatpush.bf16.msrb.mxu1 %v10680_v18 }
 0x870   : > { %5734 = vmatpush.bf16.msrb.mxu2 %v10681_v50  ;;  %5747 = vmatpush.bf16.msrb.mxu3 %v10682_v63 }
 0x8ce   : > { %v5426_v2 = vpop.f32.mrf.mxu0  ;;  %v5439_v48 = vpop.f32.mrf.mxu1 }
 0x8cf   : > { %v5473_v15 = vrot.slane %v5426_v2, 4  ;;  %v5474_v12 = vrot.slane %v5439_v48, 4 }
 0x8d1   : > { %v5481_v7 = vadd.f32 %v5473_v15, %v5409_v23  ;;  %v5482_v61 = vadd.f32 %v5474_v12, %v5410_v49 }
 0x8d3   : > { %v7983_v53 = vmul.f32 -1.442695, %v5481_v7  ;;  %v7984_v35 = vmul.f32 -1.442695, %v5482_v61 }
 0x8d5   : > { %8623 = vpow2.f32 %v7983_v53  ;;  %v5452_v57 = vpop.f32.mrf.mxu2  ;;  %v5465_v43 = vpop.f32.mrf.mxu3 }
 0x8d6   : > { %8625 = vpow2.f32 %v7984_v35  ;;  %v5475_v3 = vrot.slane %v5452_v57, 4  ;;  %v5428_v11 = vpop.f32.mrf.mxu0  ;;  %v5441_v37 = vpop.f32.mrf.mxu1  ;;  %v5476_v19 = vrot.slane %v5465_v43, 4 }
 0x8d8   : > { %v5483_v52 = vadd.f32 %v5475_v3, %v5411_v17  ;;  %v5484_v59 = vadd.f32 %v5476_v19, %v5412_v5  ;;  %v5544_v17 = vrot.slane %v10352_v33, 6 }
 0x8da   : > { %v7985_v38 = vmul.f32 -1.442695, %v5483_v52 }
 0x8db   : > { %v8624_v56 = vpop.eup %8623 }
 0x8dc   : > { %v8626_v39 = vpop.eup %8625  ;;  %v5494_v46 = vadd.f32 1.0, %v8624_v56  ;;  %8627 = vpow2.f32 %v7985_v38 }
 0x8dd   : > { %v5495_v24 = vadd.f32 1.0, %v8626_v39  ;;  %v5454_v26 = vpop.f32.mrf.mxu2  ;;  %v5467_v40 = vpop.f32.mrf.mxu3 }
 0x8de   : > { %8629 = vrcp.f32 %v5494_v46  ;;  %v5508_v23 = vand.u32 2147483648, %v5494_v46  ;;  %v5506_v61 = vand.u32 2147483647, %v5494_v46  ;;  %vm5502_vm2 = vweird.f32 %v5494_v46 }
 0x8df   : > { %8631 = vrcp.f32 %v5495_v24  ;;  %v5523_v49 = vand.u32 2147483648, %v5495_v24  ;;  %v5521_v35 = vand.u32 2147483647, %v5495_v24  ;;  %vm5517_vm8 = vweird.f32 %v5495_v24 }
 0x8e0   : > { %v5509_v11 = vor.u32 1.1754944e-38, %v5508_v23  ;;  %vm5507_vm10 = vcmp.eq.f32.partialorder %v5506_v61, 8.507059e+37 }
 0x8e1   : > { %v5524_v52 = vor.u32 1.1754944e-38, %v5523_v49  ;;  %vm5522_vm11 = vcmp.eq.f32.partialorder %v5521_v35, 8.507059e+37  ;;  %v5551_v35 = vld [vmem:[#allocation3] sm:$0xc0] }
 0x8e2   : > { %v8628_v45 = vpop.eup %8627 }
 0x8e3   : > { %v5496_v55 = vadd.f32 1.0, %v8628_v45 }
 0x8e4   : > { %v8630_v20 = vpop.eup %8629 }
 0x8e5   : > { %v8632_v51 = vpop.eup %8631  ;;  %v5498_v2 = vmul.f32 %v8630_v20, %v5494_v46  ;;  %8633 = vrcp.f32 %v5496_v55  ;;  %vm5503_vm0 = vweird.f32 %v8630_v20  ;;  %vm5532_vm5 = vweird.f32 %v5496_v55 }
 0x8e6   : > { %v5513_v48 = vmul.f32 %v8632_v51, %v5495_v24  ;;  %8635 = vtanh.f32 %v5484_v59  ;;  %vm5518_vm1 = vweird.f32 %v8632_v51  ;;  %vm5504_vm3 = vmor %vm5502_vm2, %vm5503_vm0  ;;  %v5536_v33 = vand.u32 2147483647, %v5496_v55 }
 0x8e7   : > { %v5499_v15 = vsub.f32 1.0, %v5498_v2  ;;  %vm5519_vm9 = vmor %vm5517_vm8, %vm5518_vm1  ;;  %v5538_v2 = vand.u32 2147483648, %v5496_v55 }
 0x8e8   : > { %v5514_v12 = vsub.f32 1.0, %v5513_v48  ;;  %vm5537_vm7 = vcmp.eq.f32.partialorder %v5536_v33, 8.507059e+37 }
 0x8e9   : > { %v5500_v7 = vmul.f32 %v8630_v20, %v5499_v15  ;;  %v5539_v48 = vor.u32 1.1754944e-38, %v5538_v2 }
 0x8ea   : > { %v5515_v53 = vmul.f32 %v8632_v51, %v5514_v12 }
 0x8eb   : > { %v8634_v57 = vpop.eup %8633  ;;  %v5501_v43 = vadd.f32 %v8630_v20, %v5500_v7 }
 0x8ec   : > { %v5528_v3 = vmul.f32 %v8634_v57, %v5496_v55  ;;  %v5516_v37 = vadd.f32 %v8632_v51, %v5515_v53  ;;  %v8636_v56 = vpop.eup %8635  ;;  %vm5533_vm4 = vweird.f32 %v8634_v57 }
 0x8ed   : > { %v5505_v38 = vsel %vm5504_vm3, %v8630_v20, %v5501_v43  ;;  %vm5534_vm6 = vmor %vm5532_vm5, %vm5533_vm4 }
 0x8ee   : > { %v5529_v39 = vsub.f32 1.0, %v5528_v3  ;;  %v5510_v26 = vsel %vm5507_vm10, %v5509_v11, %v5505_v38  ;;  %v5520_v40 = vsel %vm5519_vm9, %v8632_v51, %v5516_v37 }
 0x8ef   : > { %v5525_v19 = vsel %vm5522_vm11, %v5524_v52, %v5520_v40  ;;  %v5547_v45 = vmul.f32 %v8636_v56, %v5510_v26  ;;  %v5553_v26 = vld [vmem:[#allocation3 + $0x10] sm:$0xc0] }
 0x8f0   : > { %v5530_v5 = vmul.f32 %v8634_v57, %v5529_v39  ;;  %v5546_v46 = vmul.f32 %v5544_v17, %v5525_v19 }
 0x8f2   : > { %v10388_v24 = vadd.f32 %v5547_v45, %v5546_v46  ;;  %v5531_v59 = vadd.f32 %v8634_v57, %v5530_v5 }
 0x8f4   : > { %8637 = vtanh.f32 %v10388_v24  ;;  %v5535_v20 = vsel %vm5534_vm6, %v8634_v57, %v5531_v59  ;;  %v5552_v57 = vld [vmem:[#allocation3 + $0x8] sm:$0xc0] }
 0x8f5   : > { %v5540_v51 = vsel %vm5537_vm7, %v5539_v48, %v5535_v20 }
 0x8fa   : > { %v8638_v15 = vpop.eup %8637 }
 0x8fb   : > { %v5550_v12 = vmul.f32 %v8638_v15, %v5540_v51  ;;  %v5554_v51 = vld [vmem:[#allocation3 + $0x18] sm:$0xc0] }
 0x8fd   : > { %v5555_v23 = vpack.c.bf16 %v5550_v12, %v5550_v12 }
 0x8ff   : > { %v5557_v49 = vrot.slane %v5555_v23, 2 }
 0x901   : > { %5567 = vmatmul.bf16.vlgmr.msra.gmra.mxu0 %v5557_v49  ;;  %5580 = vmatmul.bf16.vlgmr.msra.gmra.mxu1 %v5557_v49 }
 0x902   : > { %5593 = vmatmul.bf16.vlgmr.msra.gmra.mxu2 %v5557_v49  ;;  %5606 = vmatmul.bf16.vlgmr.msra.gmra.mxu3 %v5557_v49 }
 0x903   : > { %5828 = vmatpush.bf16.msra.mxu0 %v9913_v9  ;;  %5841 = vmatpush.bf16.msra.mxu1 %v9916_v10 }
 0x904   : > { %5854 = vmatpush.bf16.msra.mxu2 %v9943_v25  ;;  %5867 = vmatpush.bf16.msra.mxu3 %v9963_v62 }
 0x907   : > { %5829 = vmatpush.bf16.msra.mxu0 %v9925_v32  ;;  %5842 = vmatpush.bf16.msra.mxu1 %v9931_v47 }
 0x908   : > { %5855 = vmatpush.bf16.msra.mxu2 %v9965_v34  ;;  %5868 = vmatpush.bf16.msra.mxu3 %v9977_v16 }
 0x90b   : > { %5830 = vmatpush.bf16.msra.mxu0 %v9951_v30  ;;  %5843 = vmatpush.bf16.msra.mxu1 %v9957_v28 }
 0x90c   : > { %5856 = vmatpush.bf16.msra.mxu2 %v9979_v8  ;;  %5869 = vmatpush.bf16.msra.mxu3 %v10005_v54 }
 0x90f   : > { %5831 = vmatpush.bf16.msra.mxu0 %v9971_v14  ;;  %5844 = vmatpush.bf16.msra.mxu1 %v9973_v13 }
 0x910   : > { %5857 = vmatpush.bf16.msra.mxu2 %v10007_v6  ;;  %5870 = vmatpush.bf16.msra.mxu3 %v10019_v42 }
 0x913   : > { %5832 = vmatpush.bf16.msra.mxu0 %v9999_v21  ;;  %5845 = vmatpush.bf16.msra.mxu1 %v10001_v22 }
 0x914   : > { %5858 = vmatpush.bf16.msra.mxu2 %v10021_v0  ;;  %5871 = vmatpush.bf16.msra.mxu3 %v10031_v1 }
 0x917   : > { %5833 = vmatpush.bf16.msra.mxu0 %v10013_v31  ;;  %5846 = vmatpush.bf16.msra.mxu1 %v10015_v27 }
 0x918   : > { %5859 = vmatpush.bf16.msra.mxu2 %v10033_v58  ;;  %5872 = vmatpush.bf16.msra.mxu3 %v10674_v44 }
 0x91b   : > { %5834 = vmatpush.bf16.msra.mxu0 %v10675_v41  ;;  %5847 = vmatpush.bf16.msra.mxu1 %v10676_v60 }
 0x91c   : > { %5860 = vmatpush.bf16.msra.mxu2 %v10677_v36  ;;  %5873 = vmatpush.bf16.msra.mxu3 %v10678_v29 }
 0x91f   : > { %5835 = vmatpush.bf16.msra.mxu0 %v10679_v4  ;;  %5848 = vmatpush.bf16.msra.mxu1 %v10680_v18 }
 0x920   : > { %5861 = vmatpush.bf16.msra.mxu2 %v10681_v50  ;;  %5874 = vmatpush.bf16.msra.mxu3 %v10682_v63 }
 0x97e   : > { %v5568_v55 = vpop.f32.mrf.mxu0  ;;  %v5581_v7 = vpop.f32.mrf.mxu1 }
 0x97f   : > { %v5615_v61 = vrot.slane %v5568_v55, 2  ;;  %v5616_v53 = vrot.slane %v5581_v7, 2 }
 0x981   : > { %v5623_v43 = vadd.f32 %v5615_v61, %v5551_v35  ;;  %v5624_v3 = vadd.f32 %v5616_v53, %v5552_v57 }
 0x983   : > { %v7986_v11 = vmul.f32 -1.442695, %v5623_v43  ;;  %v7987_v37 = vmul.f32 -1.442695, %v5624_v3 }
 0x985   : > { %8639 = vpow2.f32 %v7986_v11  ;;  %v5594_v17 = vpop.f32.mrf.mxu2  ;;  %v5607_v52 = vpop.f32.mrf.mxu3 }
 0x986   : > { %8641 = vpow2.f32 %v7987_v37  ;;  %v5617_v38 = vrot.slane %v5594_v17, 2  ;;  %v5570_v56 = vpop.f32.mrf.mxu0  ;;  %v5583_v39 = vpop.f32.mrf.mxu1  ;;  %v5618_v20 = vrot.slane %v5607_v52, 2 }
 0x988   : > { %v5625_v40 = vadd.f32 %v5617_v38, %v5553_v26  ;;  %v5626_v23 = vadd.f32 %v5618_v20, %v5554_v51  ;;  %v5686_v26 = vrot.slane %v10388_v24, 6 }
 0x98a   : > { %v7988_v19 = vmul.f32 -1.442695, %v5625_v40 }
 0x98b   : > { %v8640_v45 = vpop.eup %8639 }
 0x98c   : > { %v8642_v5 = vpop.eup %8641  ;;  %v5636_v46 = vadd.f32 1.0, %v8640_v45  ;;  %8643 = vpow2.f32 %v7988_v19 }
 0x98d   : > { %v5637_v59 = vadd.f32 1.0, %v8642_v5  ;;  %v5596_v2 = vpop.f32.mrf.mxu2  ;;  %v5609_v33 = vpop.f32.mrf.mxu3 }
 0x98e   : > { %8645 = vrcp.f32 %v5636_v46  ;;  %v5650_v35 = vand.u32 2147483648, %v5636_v46  ;;  %v5648_v3 = vand.u32 2147483647, %v5636_v46  ;;  %vm5644_vm14 = vweird.f32 %v5636_v46 }
 0x98f   : > { %8647 = vrcp.f32 %v5637_v59  ;;  %v5665_v57 = vand.u32 2147483648, %v5637_v59  ;;  %v5663_v37 = vand.u32 2147483647, %v5637_v59  ;;  %vm5659_vm15 = vweird.f32 %v5637_v59 }
 0x990   : > { %v5651_v56 = vor.u32 1.1754944e-38, %v5650_v35  ;;  %vm5649_vm2 = vcmp.eq.f32.partialorder %v5648_v3, 8.507059e+37  ;;  %v5694_v3 = vld [vmem:[#allocation3 + $0x28] sm:$0x3] }
 0x991   : > { %v5666_v40 = vor.u32 1.1754944e-38, %v5665_v57  ;;  %vm5664_vm8 = vcmp.eq.f32.partialorder %v5663_v37, 8.507059e+37 }
 0x992   : > { %v8644_v48 = vpop.eup %8643 }
 0x993   : > { %v5638_v15 = vadd.f32 1.0, %v8644_v48 }
 0x994   : > { %v8646_v12 = vpop.eup %8645 }
 0x995   : > { %v8648_v49 = vpop.eup %8647  ;;  %v5640_v55 = vmul.f32 %v8646_v12, %v5636_v46  ;;  %8649 = vrcp.f32 %v5638_v15  ;;  %vm5645_vm12 = vweird.f32 %v8646_v12  ;;  %vm5674_vm9 = vweird.f32 %v5638_v15 }
 0x996   : > { %v5655_v7 = vmul.f32 %v8648_v49, %v5637_v59  ;;  %8651 = vtanh.f32 %v5626_v23  ;;  %vm5660_vm13 = vweird.f32 %v8648_v49  ;;  %vm5646_vm0 = vmor %vm5644_vm14, %vm5645_vm12  ;;  %v5678_v24 = vand.u32 2147483647, %v5638_v15 }
 0x997   : > { %v5641_v61 = vsub.f32 1.0, %v5640_v55  ;;  %vm5661_vm1 = vmor %vm5659_vm15, %vm5660_vm13  ;;  %v5680_v55 = vand.u32 2147483648, %v5638_v15 }
 0x998   : > { %v5656_v53 = vsub.f32 1.0, %v5655_v7  ;;  %vm5679_vm11 = vcmp.eq.f32.partialorder %v5678_v24, 8.507059e+37  ;;  %v5696_v24 = vld [vmem:[#allocation3 + $0x38] sm:$0x3] }
 0x999   : > { %v5642_v43 = vmul.f32 %v8646_v12, %v5641_v61  ;;  %v5681_v7 = vor.u32 1.1754944e-38, %v5680_v55 }
 0x99a   : > { %v5657_v11 = vmul.f32 %v8648_v49, %v5656_v53 }
 0x99b   : > { %v8650_v17 = vpop.eup %8649  ;;  %v5643_v52 = vadd.f32 %v8646_v12, %v5642_v43 }
 0x99c   : > { %v5670_v38 = vmul.f32 %v8650_v17, %v5638_v15  ;;  %v5658_v39 = vadd.f32 %v8648_v49, %v5657_v11  ;;  %v8652_v45 = vpop.eup %8651  ;;  %vm5675_vm3 = vweird.f32 %v8650_v17  ;;  %v5693_v15 = vld [vmem:[#allocation3 + $0x20] sm:$0x3] }
 0x99d   : > { %v5647_v19 = vsel %vm5646_vm0, %v8646_v12, %v5643_v52  ;;  %vm5676_vm10 = vmor %vm5674_vm9, %vm5675_vm3 }
 0x99e   : > { %v5671_v5 = vsub.f32 1.0, %v5670_v38  ;;  %v5652_v2 = vsel %vm5649_vm2, %v5651_v56, %v5647_v19  ;;  %v5662_v33 = vsel %vm5661_vm1, %v8648_v49, %v5658_v39  ;;  %v5695_v56 = vld [vmem:[#allocation3 + $0x30] sm:$0x3] }
 0x99f   : > { %v5667_v20 = vsel %vm5664_vm8, %v5666_v40, %v5662_v33  ;;  %v5689_v48 = vmul.f32 %v8652_v45, %v5652_v2 }
 0x9a0   : > { %v5672_v51 = vmul.f32 %v8650_v17, %v5671_v5  ;;  %v5688_v46 = vmul.f32 %v5686_v26, %v5667_v20 }
 0x9a2   : > { %v10424_v59 = vadd.f32 %v5689_v48, %v5688_v46  ;;  %v5673_v23 = vadd.f32 %v8650_v17, %v5672_v51 }
 0x9a4   : > { %8653 = vtanh.f32 %v10424_v59  ;;  %v5677_v12 = vsel %vm5676_vm10, %v8650_v17, %v5673_v23 }
 0x9a5   : > { %v5682_v49 = vsel %vm5679_vm11, %v5681_v7, %v5677_v12 }
 0x9aa   : > { %v8654_v61 = vpop.eup %8653 }
 0x9ab   : > { %v5692_v53 = vmul.f32 %v8654_v61, %v5682_v49 }
 0x9ad   : > { %v5697_v35 = vpack.c.bf16 %v5692_v53, %v5692_v53 }
 0x9af   : > { %v5699_v57 = vrot.slane %v5697_v35, 3 }
 0x9b1   : > { %5709 = vmatmul.bf16.vlgmr.msrb.gmra.mxu0 %v5699_v57  ;;  %5722 = vmatmul.bf16.vlgmr.msrb.gmra.mxu1 %v5699_v57 }
 0x9b2   : > { %5735 = vmatmul.bf16.vlgmr.msrb.gmra.mxu2 %v5699_v57  ;;  %5748 = vmatmul.bf16.vlgmr.msrb.gmra.mxu3 %v5699_v57 }
 0x9b3   : > { %5970 = vmatpush.bf16.msrb.mxu0 %v9913_v9  ;;  %5983 = vmatpush.bf16.msrb.mxu1 %v9916_v10 }
 0x9b4   : > { %5996 = vmatpush.bf16.msrb.mxu2 %v9943_v25  ;;  %6009 = vmatpush.bf16.msrb.mxu3 %v9963_v62 }
 0x9b7   : > { %5971 = vmatpush.bf16.msrb.mxu0 %v9925_v32  ;;  %5984 = vmatpush.bf16.msrb.mxu1 %v9931_v47 }
 0x9b8   : > { %5997 = vmatpush.bf16.msrb.mxu2 %v9965_v34  ;;  %6010 = vmatpush.bf16.msrb.mxu3 %v9977_v16 }
 0x9bb   : > { %5972 = vmatpush.bf16.msrb.mxu0 %v9951_v30  ;;  %5985 = vmatpush.bf16.msrb.mxu1 %v9957_v28 }
 0x9bc   : > { %5998 = vmatpush.bf16.msrb.mxu2 %v9979_v8  ;;  %6011 = vmatpush.bf16.msrb.mxu3 %v10005_v54 }
 0x9bf   : > { %5973 = vmatpush.bf16.msrb.mxu0 %v9971_v14  ;;  %5986 = vmatpush.bf16.msrb.mxu1 %v9973_v13 }
 0x9c0   : > { %5999 = vmatpush.bf16.msrb.mxu2 %v10007_v6  ;;  %6012 = vmatpush.bf16.msrb.mxu3 %v10019_v42 }
 0x9c3   : > { %5974 = vmatpush.bf16.msrb.mxu0 %v9999_v21  ;;  %5987 = vmatpush.bf16.msrb.mxu1 %v10001_v22 }
 0x9c4   : > { %6000 = vmatpush.bf16.msrb.mxu2 %v10021_v0  ;;  %6013 = vmatpush.bf16.msrb.mxu3 %v10031_v1 }
 0x9c7   : > { %5975 = vmatpush.bf16.msrb.mxu0 %v10013_v31  ;;  %5988 = vmatpush.bf16.msrb.mxu1 %v10015_v27 }
 0x9c8   : > { %6001 = vmatpush.bf16.msrb.mxu2 %v10033_v58  ;;  %6014 = vmatpush.bf16.msrb.mxu3 %v10674_v44 }
 0x9cb   : > { %5976 = vmatpush.bf16.msrb.mxu0 %v10675_v41  ;;  %5989 = vmatpush.bf16.msrb.mxu1 %v10676_v60 }
 0x9cc   : > { %6002 = vmatpush.bf16.msrb.mxu2 %v10677_v36  ;;  %6015 = vmatpush.bf16.msrb.mxu3 %v10678_v29 }
 0x9cf   : > { %5977 = vmatpush.bf16.msrb.mxu0 %v10679_v4  ;;  %5990 = vmatpush.bf16.msrb.mxu1 %v10680_v18 }
 0x9d0   : > { %6003 = vmatpush.bf16.msrb.mxu2 %v10681_v50  ;;  %6016 = vmatpush.bf16.msrb.mxu3 %v10682_v63 }
 0xa2e   : > { %v5710_v43 = vpop.f32.mrf.mxu0  ;;  %v5723_v11 = vpop.f32.mrf.mxu1 }
 0xa2f   : > { %v5753_v37 = vadd.f32 %v5710_v43, %v5693_v15  ;;  %v5754_v17 = vadd.f32 %v5723_v11, %v5694_v3 }
 0xa31   : > { %v7989_v52 = vmul.f32 -1.442695, %v5753_v37  ;;  %v7990_v38 = vmul.f32 -1.442695, %v5754_v17 }
 0xa33   : > { %8655 = vpow2.f32 %v7989_v52 }
 0xa34   : > { %8657 = vpow2.f32 %v7990_v38 }
 0xa35   : > { %v5736_v39 = vpop.f32.mrf.mxu2  ;;  %v5749_v26 = vpop.f32.mrf.mxu3 }
 0xa36   : > { %v5755_v40 = vadd.f32 %v5736_v39, %v5695_v56  ;;  %v5712_v19 = vpop.f32.mrf.mxu0  ;;  %v5725_v45 = vpop.f32.mrf.mxu1  ;;  %v5756_v7 = vadd.f32 %v5749_v26, %v5696_v24 }
 0xa37   : > { %v5816_v45 = vrot.slane %v10424_v59, 6 }
 0xa38   : > { %v7991_v5 = vmul.f32 -1.442695, %v5755_v40 }
 0xa39   : > { %v8656_v2 = vpop.eup %8655 }
 0xa3a   : > { %v8658_v33 = vpop.eup %8657  ;;  %v5766_v20 = vadd.f32 1.0, %v8656_v2  ;;  %8659 = vpow2.f32 %v7991_v5 }
 0xa3b   : > { %v5767_v48 = vadd.f32 1.0, %v8658_v33 }
 0xa3c   : > { %8661 = vrcp.f32 %v5766_v20  ;;  %v5780_v15 = vand.u32 2147483648, %v5766_v20  ;;  %v5778_v11 = vand.u32 2147483647, %v5766_v20  ;;  %vm5774_vm6 = vweird.f32 %v5766_v20 }
 0xa3d   : > { %8663 = vrcp.f32 %v5767_v48  ;;  %v5738_v51 = vpop.f32.mrf.mxu2  ;;  %v5751_v46 = vpop.f32.mrf.mxu3  ;;  %v5795_v43 = vand.u32 2147483648, %v5767_v48  ;;  %v5793_v17 = vand.u32 2147483647, %v5767_v48  ;;  %vm5789_vm7 = vweird.f32 %v5767_v48 }
 0xa3e   : > { %v5781_v39 = vor.u32 1.1754944e-38, %v5780_v15  ;;  %vm5779_vm14 = vcmp.eq.f32.partialorder %v5778_v11, 8.507059e+37 }
 0xa3f   : > { %v5796_v40 = vor.u32 1.1754944e-38, %v5795_v43  ;;  %vm5794_vm15 = vcmp.eq.f32.partialorder %v5793_v17, 8.507059e+37 }
 0xa40   : > { %v8660_v23 = vpop.eup %8659 }
 0xa41   : > { %v5768_v55 = vadd.f32 1.0, %v8660_v23 }
 0xa42   : > { %v8662_v12 = vpop.eup %8661 }
 0xa43   : > { %v8664_v61 = vpop.eup %8663  ;;  %v5770_v49 = vmul.f32 %v8662_v12, %v5766_v20  ;;  %8665 = vrcp.f32 %v5768_v55  ;;  %vm5775_vm4 = vweird.f32 %v8662_v12  ;;  %vm5804_vm1 = vweird.f32 %v5768_v55 }
 0xa44   : > { %v5785_v53 = vmul.f32 %v8664_v61, %v5767_v48  ;;  %8667 = vtanh.f32 %v5756_v7  ;;  %vm5790_vm5 = vweird.f32 %v8664_v61  ;;  %vm5776_vm12 = vmor %vm5774_vm6, %vm5775_vm4 }
 0xa45   : > { %v5771_v35 = vsub.f32 1.0, %v5770_v49  ;;  %vm5791_vm13 = vmor %vm5789_vm7, %vm5790_vm5  ;;  %v5810_v49 = vand.u32 2147483648, %v5768_v55 }
 0xa46   : > { %v5786_v57 = vsub.f32 1.0, %v5785_v53 }
 0xa47   : > { %v5772_v3 = vmul.f32 %v8662_v12, %v5771_v35  ;;  %v5811_v53 = vor.u32 1.1754944e-38, %v5810_v49 }
 0xa48   : > { %v5787_v37 = vmul.f32 %v8664_v61, %v5786_v57 }
 0xa49   : > { %v8666_v52 = vpop.eup %8665  ;;  %v5773_v38 = vadd.f32 %v8662_v12, %v5772_v3 }
 0xa4a   : > { %v5800_v56 = vmul.f32 %v8666_v52, %v5768_v55  ;;  %v5788_v26 = vadd.f32 %v8664_v61, %v5787_v37  ;;  %v8668_v5 = vpop.eup %8667  ;;  %vm5805_vm0 = vweird.f32 %v8666_v52 }
 0xa4b   : > { %v5777_v19 = vsel %vm5776_vm12, %v8662_v12, %v5773_v38  ;;  %v5808_v12 = vand.u32 2147483647, %v5768_v55  ;;  %vm5806_vm2 = vmor %vm5804_vm1, %vm5805_vm0 }
 0xa4c   : > { %v5801_v2 = vsub.f32 1.0, %v5800_v56  ;;  %v5782_v33 = vsel %vm5779_vm14, %v5781_v39, %v5777_v19  ;;  %v5792_v51 = vsel %vm5791_vm13, %v8664_v61, %v5788_v26 }
 0xa4d   : > { %v5797_v46 = vsel %vm5794_vm15, %v5796_v40, %v5792_v51  ;;  %v5819_v23 = vmul.f32 %v8668_v5, %v5782_v33  ;;  %vm5809_vm8 = vcmp.eq.f32.partialorder %v5808_v12, 8.507059e+37 }
 0xa4e   : > { %v5802_v24 = vmul.f32 %v8666_v52, %v5801_v2  ;;  %v5818_v20 = vmul.f32 %v5816_v45, %v5797_v46 }
 0xa50   : > { %v10460_v48 = vadd.f32 %v5819_v23, %v5818_v20  ;;  %v5803_v7 = vadd.f32 %v8666_v52, %v5802_v24 }
 0xa52   : > { %8669 = vtanh.f32 %v10460_v48  ;;  %v5807_v59 = vsel %vm5806_vm2, %v8666_v52, %v5803_v7  ;;  %v5955_v5 = vrot.slane %v10460_v48, 6 }
 0xa53   : > { %v5812_v61 = vsel %vm5809_vm8, %v5811_v53, %v5807_v59 }
 0xa58   : > { %v8670_v35 = vpop.eup %8669 }
 0xa59   : > { %v5822_v57 = vmul.f32 %v8670_v35, %v5812_v61 }
 0xa5b   : > { %v5827_v15 = vpack.c.bf16 %v5822_v57, %v5822_v57 }
 0xa5d   : > { %5836 = vmatmul.bf16.vlgmr.msra.gmra.mxu0 %v5827_v15  ;;  %5849 = vmatmul.bf16.vlgmr.msra.gmra.mxu1 %v5827_v15 }
 0xa5e   : > { %5862 = vmatmul.bf16.vlgmr.msra.gmra.mxu2 %v5827_v15  ;;  %5875 = vmatmul.bf16.vlgmr.msra.gmra.mxu3 %v5827_v15 }
 0xa5f   : > { %6112 = vmatpush.bf16.msra.mxu0 %v9913_v9  ;;  %6125 = vmatpush.bf16.msra.mxu1 %v9916_v10 }
 0xa60   : > { %6138 = vmatpush.bf16.msra.mxu2 %v9943_v25  ;;  %6151 = vmatpush.bf16.msra.mxu3 %v9963_v62  ;;  %v5823_v25 = vld [vmem:[#allocation3 + $0x20] sm:$0xc] }
 0xa63   : > { %6113 = vmatpush.bf16.msra.mxu0 %v9925_v32  ;;  %6126 = vmatpush.bf16.msra.mxu1 %v9931_v47 }
 0xa64   : > { %6139 = vmatpush.bf16.msra.mxu2 %v9965_v34  ;;  %6152 = vmatpush.bf16.msra.mxu3 %v9977_v16 }
 0xa67   : > { %6114 = vmatpush.bf16.msra.mxu0 %v9951_v30  ;;  %6127 = vmatpush.bf16.msra.mxu1 %v9957_v28  ;;  %v5824_v30 = vld [vmem:[#allocation3 + $0x28] sm:$0xc] }
 0xa68   : > { %6140 = vmatpush.bf16.msra.mxu2 %v9979_v8  ;;  %6153 = vmatpush.bf16.msra.mxu3 %v10005_v54  ;;  %v5825_v54 = vld [vmem:[#allocation3 + $0x30] sm:$0xc] }
 0xa6b   : > { %6115 = vmatpush.bf16.msra.mxu0 %v9971_v14  ;;  %6128 = vmatpush.bf16.msra.mxu1 %v9973_v13 }
 0xa6c   : > { %6141 = vmatpush.bf16.msra.mxu2 %v10007_v6  ;;  %6154 = vmatpush.bf16.msra.mxu3 %v10019_v42 }
 0xa6f   : > { %6116 = vmatpush.bf16.msra.mxu0 %v9999_v21  ;;  %6129 = vmatpush.bf16.msra.mxu1 %v10001_v22 }
 0xa70   : > { %6142 = vmatpush.bf16.msra.mxu2 %v10021_v0  ;;  %6155 = vmatpush.bf16.msra.mxu3 %v10031_v1 }
 0xa73   : > { %6117 = vmatpush.bf16.msra.mxu0 %v10013_v31  ;;  %6130 = vmatpush.bf16.msra.mxu1 %v10015_v27 }
 0xa74   : > { %6143 = vmatpush.bf16.msra.mxu2 %v10033_v58  ;;  %6156 = vmatpush.bf16.msra.mxu3 %v10674_v44 }
 0xa77   : > { %6118 = vmatpush.bf16.msra.mxu0 %v10675_v41  ;;  %6131 = vmatpush.bf16.msra.mxu1 %v10676_v60 }
 0xa78   : > { %6144 = vmatpush.bf16.msra.mxu2 %v10677_v36  ;;  %6157 = vmatpush.bf16.msra.mxu3 %v10678_v29  ;;  %v5826_v29 = vld [vmem:[#allocation3 + $0x38] sm:$0xc] }
 0xa7b   : > { %6119 = vmatpush.bf16.msra.mxu0 %v10679_v4  ;;  %6132 = vmatpush.bf16.msra.mxu1 %v10680_v18 }
 0xa7c   : > { %6145 = vmatpush.bf16.msra.mxu2 %v10681_v50  ;;  %6158 = vmatpush.bf16.msra.mxu3 %v10682_v63 }
 0xada   : > { %v5837_v9 = vpop.f32.mrf.mxu0  ;;  %v5850_v10 = vpop.f32.mrf.mxu1 }
 0xadb   : > { %v5884_v32 = vrot.slane %v5837_v9, 6  ;;  %v5885_v47 = vrot.slane %v5850_v10, 6 }
 0xadd   : > { %v5892_v28 = vadd.f32 %v5884_v32, %v5823_v25  ;;  %v5893_v62 = vadd.f32 %v5885_v47, %v5824_v30 }
 0xadf   : > { %v7992_v34 = vmul.f32 -1.442695, %v5892_v28  ;;  %v7993_v14 = vmul.f32 -1.442695, %v5893_v62 }
 0xae1   : > { %8671 = vpow2.f32 %v7992_v34  ;;  %v5863_v13 = vpop.f32.mrf.mxu2  ;;  %v5876_v16 = vpop.f32.mrf.mxu3  ;;  %v5962_v34 = vld [vmem:[#allocation3 + $0x20] sm:$0x30] }
 0xae2   : > { %8673 = vpow2.f32 %v7993_v14  ;;  %v5886_v8 = vrot.slane %v5863_v13, 6  ;;  %v5839_v21 = vpop.f32.mrf.mxu0  ;;  %v5852_v22 = vpop.f32.mrf.mxu1  ;;  %v5887_v41 = vrot.slane %v5876_v16, 6  ;;  %v5963_v14 = vld [vmem:[#allocation3 + $0x28] sm:$0x30] }
 0xae4   : > { %v5894_v6 = vadd.f32 %v5886_v8, %v5825_v54  ;;  %v5895_v18 = vadd.f32 %v5887_v41, %v5826_v29 }
 0xae6   : > { %v7994_v31 = vmul.f32 -1.442695, %v5894_v6 }
 0xae7   : > { %v8672_v27 = vpop.eup %8671 }
 0xae8   : > { %v8674_v42 = vpop.eup %8673  ;;  %v5905_v0 = vadd.f32 1.0, %v8672_v27  ;;  %8675 = vpow2.f32 %v7994_v31 }
 0xae9   : > { %v5906_v1 = vadd.f32 1.0, %v8674_v42  ;;  %v5865_v58 = vpop.f32.mrf.mxu2  ;;  %v5878_v44 = vpop.f32.mrf.mxu3  ;;  %v5964_v42 = vld [vmem:[#allocation3 + $0x30] sm:$0x30] }
 0xaea   : > { %8677 = vrcp.f32 %v5905_v0  ;;  %v5919_v11 = vand.u32 2147483648, %v5905_v0  ;;  %v5917_v52 = vand.u32 2147483647, %v5905_v0  ;;  %vm5913_vm10 = vweird.f32 %v5905_v0 }
 0xaeb   : > { %8679 = vrcp.f32 %v5906_v1  ;;  %v5934_v37 = vand.u32 2147483648, %v5906_v1  ;;  %v5932_v56 = vand.u32 2147483647, %v5906_v1  ;;  %vm5928_vm11 = vweird.f32 %v5906_v1 }
 0xaec   : > { %v5920_v19 = vor.u32 1.1754944e-38, %v5919_v11  ;;  %vm5918_vm6 = vcmp.eq.f32.partialorder %v5917_v52, 8.507059e+37 }
 0xaed   : > { %v5935_v2 = vor.u32 1.1754944e-38, %v5934_v37  ;;  %vm5933_vm7 = vcmp.eq.f32.partialorder %v5932_v56, 8.507059e+37 }
 0xaee   : > { %v8676_v60 = vpop.eup %8675 }
 0xaef   : > { %v5907_v36 = vadd.f32 1.0, %v8676_v60 }
 0xaf0   : > { %v8678_v4 = vpop.eup %8677 }
 0xaf1   : > { %v8680_v50 = vpop.eup %8679  ;;  %v5909_v63 = vmul.f32 %v8678_v4, %v5905_v0  ;;  %8681 = vrcp.f32 %v5907_v36  ;;  %vm5914_vm3 = vweird.f32 %v8678_v4  ;;  %v5949_v35 = vand.u32 2147483648, %v5907_v36 }
 0xaf2   : > { %v5924_v55 = vmul.f32 %v8680_v50, %v5906_v1  ;;  %8683 = vtanh.f32 %v5895_v18  ;;  %vm5929_vm9 = vweird.f32 %v8680_v50  ;;  %vm5915_vm4 = vmor %vm5913_vm10, %vm5914_vm3  ;;  %vm5943_vm13 = vweird.f32 %v5907_v36 }
 0xaf3   : > { %v5910_v43 = vsub.f32 1.0, %v5909_v63  ;;  %vm5930_vm5 = vmor %vm5928_vm11, %vm5929_vm9  ;;  %v5947_v48 = vand.u32 2147483647, %v5907_v36  ;;  %v5950_v57 = vor.u32 1.1754944e-38, %v5949_v35  ;;  %v5965_v63 = vld [vmem:[#allocation3 + $0x38] sm:$0x30] }
 0xaf4   : > { %v5925_v3 = vsub.f32 1.0, %v5924_v55 }
 0xaf5   : > { %v5911_v17 = vmul.f32 %v8678_v4, %v5910_v43  ;;  %vm5948_vm15 = vcmp.eq.f32.partialorder %v5947_v48, 8.507059e+37 }
 0xaf6   : > { %v5926_v38 = vmul.f32 %v8680_v50, %v5925_v3 }
 0xaf7   : > { %v8682_v39 = vpop.eup %8681  ;;  %v5912_v26 = vadd.f32 %v8678_v4, %v5911_v17 }
 0xaf8   : > { %v5939_v40 = vmul.f32 %v8682_v39, %v5907_v36  ;;  %v5927_v45 = vadd.f32 %v8680_v50, %v5926_v38  ;;  %v8684_v51 = vpop.eup %8683  ;;  %vm5944_vm12 = vweird.f32 %v8682_v39 }
 0xaf9   : > { %v5916_v33 = vsel %vm5915_vm4, %v8678_v4, %v5912_v26  ;;  %vm5945_vm14 = vmor %vm5943_vm13, %vm5944_vm12 }
 0xafa   : > { %v5940_v46 = vsub.f32 1.0, %v5939_v40  ;;  %v5921_v23 = vsel %vm5918_vm6, %v5920_v19, %v5916_v33  ;;  %v5931_v24 = vsel %vm5930_vm5, %v8680_v50, %v5927_v45 }
 0xafb   : > { %v5936_v20 = vsel %vm5933_vm7, %v5935_v2, %v5931_v24  ;;  %v5958_v7 = vmul.f32 %v8684_v51, %v5921_v23 }
 0xafc   : > { %v5941_v49 = vmul.f32 %v8682_v39, %v5940_v46  ;;  %v5957_v12 = vmul.f32 %v5955_v5, %v5936_v20 }
 0xafe   : > { %v10496_v59 = vadd.f32 %v5958_v7, %v5957_v12  ;;  %v5942_v53 = vadd.f32 %v8682_v39, %v5941_v49 }
 0xb00   : > { %8685 = vtanh.f32 %v10496_v59  ;;  %v5946_v61 = vsel %vm5945_vm14, %v8682_v39, %v5942_v53  ;;  %v6097_v46 = vrot.slane %v10496_v59, 6 }
 0xb01   : > { %v5951_v9 = vsel %vm5948_vm15, %v5950_v57, %v5946_v61 }
 0xb06   : > { %v8686_v15 = vpop.eup %8685 }
 0xb07   : > { %v5961_v10 = vmul.f32 %v8686_v15, %v5951_v9 }
 0xb09   : > { %v5966_v32 = vpack.c.bf16 %v5961_v10, %v5961_v10 }
 0xb0b   : > { %v5968_v47 = vrot.slane %v5966_v32, 1 }
 0xb0d   : > { %5978 = vmatmul.bf16.vlgmr.msrb.gmra.mxu0 %v5968_v47  ;;  %5991 = vmatmul.bf16.vlgmr.msrb.gmra.mxu1 %v5968_v47 }
 0xb0e   : > { %6004 = vmatmul.bf16.vlgmr.msrb.gmra.mxu2 %v5968_v47  ;;  %6017 = vmatmul.bf16.vlgmr.msrb.gmra.mxu3 %v5968_v47 }
 0xb8a   : > { %v5979_v25 = vpop.f32.mrf.mxu0  ;;  %v5992_v30 = vpop.f32.mrf.mxu1 }
 0xb8b   : > { %v6026_v28 = vrot.slane %v5979_v25, 4  ;;  %v6027_v62 = vrot.slane %v5992_v30, 4 }
 0xb8d   : > { %v6034_v13 = vadd.f32 %v6026_v28, %v5962_v34  ;;  %v6035_v16 = vadd.f32 %v6027_v62, %v5963_v14 }
 0xb8f   : > { %v7995_v8 = vmul.f32 -1.442695, %v6034_v13  ;;  %v7996_v21 = vmul.f32 -1.442695, %v6035_v16 }
 0xb91   : > { %8687 = vpow2.f32 %v7995_v8  ;;  %v6005_v22 = vpop.f32.mrf.mxu2  ;;  %v6018_v54 = vpop.f32.mrf.mxu3  ;;  %v6104_v8 = vld [vmem:[#allocation3 + $0x20] sm:$0xc0] }
 0xb92   : > { %8689 = vpow2.f32 %v7996_v21  ;;  %v6028_v6 = vrot.slane %v6005_v22, 4  ;;  %v5981_v31 = vpop.f32.mrf.mxu0  ;;  %v5994_v27 = vpop.f32.mrf.mxu1  ;;  %v6029_v4 = vrot.slane %v6018_v54, 4  ;;  %v6105_v21 = vld [vmem:[#allocation3 + $0x28] sm:$0xc0] }
 0xb93   : > { %v6261_v27 = vld [vmem:[%s10582_s7 + $0x78] sm:$0xff] }
 0xb94   : > { %v6036_v0 = vadd.f32 %v6028_v6, %v5964_v42  ;;  %v6037_v43 = vadd.f32 %v6029_v4, %v5965_v63  ;;  %v6260_v42 = vld [vmem:[%s10582_s7 + $0x70] sm:$0xff]  ;;  %6269 = vmatpush.msrb.mxu0 %v6261_v27  ;;  %v6258_v4 = vld [vmem:[%s10582_s7 + $0x60] sm:$0xff] }
 0xb96   : > { %v7997_v1 = vmul.f32 -1.442695, %v6036_v0  ;;  %6270 = vmatpush.msrb.mxu0 %v6260_v42 }
 0xb97   : > { %v8688_v58 = vpop.eup %8687 }
 0xb98   : > { %v8690_v44 = vpop.eup %8689  ;;  %v6047_v41 = vadd.f32 1.0, %v8688_v58  ;;  %8691 = vpow2.f32 %v7997_v1 }
 0xb99   : > { %v6048_v60 = vadd.f32 1.0, %v8690_v44  ;;  %v6007_v36 = vpop.f32.mrf.mxu2  ;;  %v6020_v29 = vpop.f32.mrf.mxu3 }
 0xb9a   : > { %8693 = vrcp.f32 %v6047_v41  ;;  %v6061_v38 = vand.u32 2147483648, %v6047_v41  ;;  %v6059_v26 = vand.u32 2147483647, %v6047_v41  ;;  %vm6055_vm2 = vweird.f32 %v6047_v41  ;;  %v6106_v36 = vld [vmem:[#allocation3 + $0x30] sm:$0xc0] }
 0xb9b   : > { %8695 = vrcp.f32 %v6048_v60  ;;  %v6076_v56 = vand.u32 2147483648, %v6048_v60  ;;  %v6074_v19 = vand.u32 2147483647, %v6048_v60  ;;  %vm6070_vm8 = vweird.f32 %v6048_v60 }
 0xb9c   : > { %v6062_v33 = vor.u32 1.1754944e-38, %v6061_v38  ;;  %vm6060_vm10 = vcmp.eq.f32.partialorder %v6059_v26, 8.507059e+37  ;;  %v6253_v26 = vld [vmem:[%s10582_s7 + $0x38] sm:$0xff] }
 0xb9d   : > { %v6077_v23 = vor.u32 1.1754944e-38, %v6076_v56  ;;  %vm6075_vm11 = vcmp.eq.f32.partialorder %v6074_v19, 8.507059e+37  ;;  %v6254_v56 = vld [vmem:[%s10582_s7 + $0x40] sm:$0xff]  ;;  %v6107_v19 = vld [vmem:[#allocation3 + $0x38] sm:$0xc0] }
 0xb9e   : > { %v8692_v18 = vpop.eup %8691 }
 0xb9f   : > { %v6049_v50 = vadd.f32 1.0, %v8692_v18 }
 0xba0   : > { %v8694_v55 = vpop.eup %8693 }
 0xba1   : > { %v8696_v3 = vpop.eup %8695  ;;  %v6051_v11 = vmul.f32 %v8694_v55, %v6047_v41  ;;  %8697 = vrcp.f32 %v6049_v50  ;;  %vm6056_vm0 = vweird.f32 %v8694_v55  ;;  %v6091_v9 = vand.u32 2147483648, %v6049_v50 }
 0xba2   : > { %v6066_v37 = vmul.f32 %v8696_v3, %v6048_v60  ;;  %8699 = vtanh.f32 %v6037_v43  ;;  %vm6071_vm1 = vweird.f32 %v8696_v3  ;;  %vm6057_vm3 = vmor %vm6055_vm2, %vm6056_vm0  ;;  %vm6085_vm5 = vweird.f32 %v6049_v50  ;;  %v6259_v60 = vld [vmem:[%s10582_s7 + $0x68] sm:$0xff] }
 0xba3   : > { %v6052_v17 = vsub.f32 1.0, %v6051_v11  ;;  %vm6072_vm9 = vmor %vm6070_vm8, %vm6071_vm1  ;;  %v6089_v59 = vand.u32 2147483647, %v6049_v50  ;;  %v6092_v32 = vor.u32 1.1754944e-38, %v6091_v9  ;;  %6271 = vmatpush.msrb.mxu0 %v6259_v60 }
 0xba4   : > { %v6067_v52 = vsub.f32 1.0, %v6066_v37 }
 0xba5   : > { %v6053_v39 = vmul.f32 %v8694_v55, %v6052_v17  ;;  %vm6090_vm7 = vcmp.eq.f32.partialorder %v6089_v59, 8.507059e+37  ;;  %6272 = vmatpush.msrb.mxu0 %v6258_v4 }
 0xba6   : > { %v6068_v40 = vmul.f32 %v8696_v3, %v6067_v52  ;;  %v6255_v52 = vld [vmem:[%s10582_s7 + $0x48] sm:$0xff] }
 0xba7   : > { %v8698_v45 = vpop.eup %8697  ;;  %v6054_v5 = vadd.f32 %v8694_v55, %v6053_v39 }
 0xba8   : > { %v6081_v2 = vmul.f32 %v8698_v45, %v6049_v50  ;;  %v6069_v51 = vadd.f32 %v8696_v3, %v6068_v40  ;;  %v8700_v20 = vpop.eup %8699  ;;  %vm6086_vm4 = vweird.f32 %v8698_v45  ;;  %v6257_v50 = vld [vmem:[%s10582_s7 + $0x58] sm:$0xff] }
 0xba9   : > { %v6058_v24 = vsel %vm6057_vm3, %v8694_v55, %v6054_v5  ;;  %vm6087_vm6 = vmor %vm6085_vm5, %vm6086_vm4  ;;  %6273 = vmatpush.msrb.mxu0 %v6257_v50 }
 0xbaa   : > { %v6082_v7 = vsub.f32 1.0, %v6081_v2  ;;  %v6063_v49 = vsel %vm6060_vm10, %v6062_v33, %v6058_v24  ;;  %v6073_v12 = vsel %vm6072_vm9, %v8696_v3, %v6069_v51  ;;  %v6256_v3 = vld [vmem:[%s10582_s7 + $0x50] sm:$0xff] }
 0xbab   : > { %v6078_v53 = vsel %vm6075_vm11, %v6077_v23, %v6073_v12  ;;  %v6100_v35 = vmul.f32 %v8700_v20, %v6063_v49  ;;  %6274 = vmatpush.msrb.mxu0 %v6256_v3  ;;  %v6252_v2 = vld [vmem:[%s10582_s7 + $0x30] sm:$0xff]  ;;  %v6251_v23 = vld [vmem:[%s10582_s7 + $0x28] sm:$0xff]  ;;  %v6250_v49 = vld [vmem:[%s10582_s7 + $0x20] sm:$0xff] }
 0xbac   : > { %v6083_v48 = vmul.f32 %v8698_v45, %v6082_v7  ;;  %v6099_v61 = vmul.f32 %v6097_v46, %v6078_v53 }
 0xbad   : > { %6275 = vmatpush.msrb.mxu0 %v6255_v52 }
 0xbae   : > { %v10500_v57 = vadd.f32 %v6100_v35, %v6099_v61  ;;  %v6084_v15 = vadd.f32 %v8698_v45, %v6083_v48 }
 0xbaf   : > { %6276 = vmatpush.msrb.mxu0 %v6254_v56 }
 0xbb0   : > { %8701 = vtanh.f32 %v10500_v57  ;;  %v6088_v10 = vsel %vm6087_vm6, %v8698_v45, %v6084_v15  ;;  %v6249_v15 = vld [vmem:[%s10582_s7 + $0x18] sm:$0xff] }
 0xbb1   : > { %v6093_v25 = vsel %vm6090_vm7, %v6092_v32, %v6088_v10  ;;  %6277 = vmatpush.msrb.mxu0 %v6253_v26  ;;  %vm6308_vm7 = vcmask 1024  }
 0xbb3   : > { %6278 = vmatpush.msrb.mxu0 %v6252_v2 }
 0xbb5   : > { %6279 = vmatpush.msrb.mxu0 %v6251_v23 }
 0xbb6   : > { %v8702_v47 = vpop.eup %8701 }
 0xbb7   : > { %v6103_v30 = vmul.f32 %v8702_v47, %v6093_v25  ;;  %6280 = vmatpush.msrb.mxu0 %v6250_v49  ;;  %v6248_v25 = vld [vmem:[%s10582_s7 + $0x10] sm:$0xff] }
 0xbb9   : > { %v6108_v28 = vpack.c.bf16 %v6103_v30, %v6103_v30  ;;  %v6239_v30 = vrot.slane %v10500_v57, 6  ;;  %6281 = vmatpush.msrb.mxu0 %v6249_v15  ;;  %v6246_v57 = vld [vmem:[%s10582_s7] sm:$0xff] }
 0xbbb   : > { %v6110_v62 = vrot.slane %v6108_v28, 2  ;;  %6282 = vmatpush.msrb.mxu0 %v6248_v25 }
 0xbbd   : > { %6120 = vmatmul.bf16.vlgmr.msra.gmra.mxu0 %v6110_v62  ;;  %6133 = vmatmul.bf16.vlgmr.msra.gmra.mxu1 %v6110_v62 }
 0xbbe   : > { %6146 = vmatmul.bf16.vlgmr.msra.gmra.mxu2 %v6110_v62  ;;  %6159 = vmatmul.bf16.vlgmr.msra.gmra.mxu3 %v6110_v62 }
 0xc3a   : > { %v6121_v34 = vpop.f32.mrf.mxu0  ;;  %v6134_v14 = vpop.f32.mrf.mxu1 }
 0xc3b   : > { %v6168_v13 = vrot.slane %v6121_v34, 2  ;;  %v6169_v16 = vrot.slane %v6134_v14, 2 }
 0xc3d   : > { %v6176_v22 = vadd.f32 %v6168_v13, %v6104_v8  ;;  %v6177_v54 = vadd.f32 %v6169_v16, %v6105_v21  ;;  %v6247_v8 = vld [vmem:[%s10582_s7 + $0x8] sm:$0xff] }
 0xc3e   : > { %6283 = vmatpush.msrb.mxu0 %v6247_v8 }
 0xc3f   : > { %v7998_v6 = vmul.f32 -1.442695, %v6176_v22  ;;  %v7999_v31 = vmul.f32 -1.442695, %v6177_v54 }
 0xc40   : > { %6284 = vmatpush.msrb.mxu0 %v6246_v57 }
 0xc41   : > { %8703 = vpow2.f32 %v7998_v6  ;;  %v6147_v0 = vpop.f32.mrf.mxu2  ;;  %v6160_v1 = vpop.f32.mrf.mxu3 }
 0xc42   : > { %8705 = vpow2.f32 %v7999_v31  ;;  %v6170_v58 = vrot.slane %v6147_v0, 2  ;;  %v6123_v44 = vpop.f32.mrf.mxu0  ;;  %v6136_v41 = vpop.f32.mrf.mxu1  ;;  %v6171_v38 = vrot.slane %v6160_v1, 2 }
 0xc44   : > { %v6178_v29 = vadd.f32 %v6170_v58, %v6106_v36  ;;  %v6179_v5 = vadd.f32 %v6171_v38, %v6107_v19 }
 0xc46   : > { %v8000_v18 = vmul.f32 -1.442695, %v6178_v29  ;;  %v8462_v29 = vld [vmem:[#allocation6] ss:$0 sm:$0xff] }
 0xc47   : > { %v8704_v63 = vpop.eup %8703 }
 0xc48   : > { %v8706_v55 = vpop.eup %8705  ;;  %v6189_v43 = vadd.f32 1.0, %v8704_v63  ;;  %8707 = vpow2.f32 %v8000_v18 }
 0xc49   : > { %v6190_v11 = vadd.f32 1.0, %v8706_v55  ;;  %v6149_v37 = vpop.f32.mrf.mxu2  ;;  %v6162_v17 = vpop.f32.mrf.mxu3 }
 0xc4a   : > { %8709 = vrcp.f32 %v6189_v43  ;;  %v6203_v7 = vand.u32 2147483648, %v6189_v43  ;;  %v6201_v35 = vand.u32 2147483647, %v6189_v43  ;;  %vm6197_vm14 = vweird.f32 %v6189_v43 }
 0xc4b   : > { %8711 = vrcp.f32 %v6190_v11  ;;  %v6218_v12 = vand.u32 2147483648, %v6190_v11  ;;  %v6216_v61 = vand.u32 2147483647, %v6190_v11  ;;  %vm6212_vm15 = vweird.f32 %v6190_v11 }
 0xc4c   : > { %v6204_v32 = vor.u32 1.1754944e-38, %v6203_v7  ;;  %vm6202_vm2 = vcmp.eq.f32.partialorder %v6201_v35, 8.507059e+37 }
 0xc4d   : > { %v6219_v28 = vor.u32 1.1754944e-38, %v6218_v12  ;;  %vm6217_vm8 = vcmp.eq.f32.partialorder %v6216_v61, 8.507059e+37 }
 0xc4e   : > { %v8708_v39 = vpop.eup %8707 }
 0xc4f   : > { %v10530_v40 = vadd.f32 1.0, %v8708_v39 }
 0xc50   : > { %v8710_v45 = vpop.eup %8709 }
 0xc51   : > { %v8712_v33 = vpop.eup %8711  ;;  %v6193_v51 = vmul.f32 %v8710_v45, %v6189_v43  ;;  %8713 = vrcp.f32 %v10530_v40  ;;  %vm6198_vm12 = vweird.f32 %v8710_v45  ;;  %v6233_v42 = vand.u32 2147483648, %v10530_v40 }
 0xc52   : > { %v6208_v46 = vmul.f32 %v8712_v33, %v6190_v11  ;;  %8715 = vtanh.f32 %v6179_v5  ;;  %vm6213_vm13 = vweird.f32 %v8712_v33  ;;  %vm6199_vm0 = vmor %vm6197_vm14, %vm6198_vm12  ;;  %vm6227_vm9 = vweird.f32 %v10530_v40 }
 0xc53   : > { %v6194_v24 = vsub.f32 1.0, %v6193_v51  ;;  %vm6214_vm1 = vmor %vm6212_vm15, %vm6213_vm13  ;;  %v6231_v0 = vand.u32 2147483647, %v10530_v40  ;;  %v6234_v58 = vor.u32 1.1754944e-38, %v6233_v42 }
 0xc54   : > { %v6209_v20 = vsub.f32 1.0, %v6208_v46 }
 0xc55   : > { %v6195_v53 = vmul.f32 %v8710_v45, %v6194_v24  ;;  %vm6232_vm11 = vcmp.eq.f32.partialorder %v6231_v0, 8.507059e+37 }
 0xc56   : > { %v6210_v48 = vmul.f32 %v8712_v33, %v6209_v20 }
 0xc57   : > { %v8714_v9 = vpop.eup %8713  ;;  %v6196_v59 = vadd.f32 %v8710_v45, %v6195_v53 }
 0xc58   : > { %v6223_v10 = vmul.f32 %v8714_v9, %v10530_v40  ;;  %v6211_v47 = vadd.f32 %v8712_v33, %v6210_v48  ;;  %v8716_v34 = vpop.eup %8715  ;;  %vm6228_vm3 = vweird.f32 %v8714_v9 }
 0xc59   : > { %v6200_v62 = vsel %vm6199_vm0, %v8710_v45, %v6196_v59  ;;  %vm6229_vm10 = vmor %vm6227_vm9, %vm6228_vm3 }
 0xc5a   : > { %v6224_v14 = vsub.f32 1.0, %v6223_v10  ;;  %v6205_v13 = vsel %vm6202_vm2, %v6204_v32, %v6200_v62  ;;  %v6215_v16 = vsel %vm6214_vm1, %v8712_v33, %v6211_v47 }
 0xc5b   : > { %v6220_v21 = vsel %vm6217_vm8, %v6219_v28, %v6215_v16  ;;  %v6242_v22 = vmul.f32 %v8716_v34, %v6205_v13 }
 0xc5c   : > { %v6225_v54 = vmul.f32 %v8714_v9, %v6224_v14  ;;  %v6241_v6 = vmul.f32 %v6239_v30, %v6220_v21 }
 0xc5e   : > { %v6243_v31 = vadd.f32 %v6242_v22, %v6241_v6  ;;  %v6226_v27 = vadd.f32 %v8714_v9, %v6225_v54 }
 0xc60   : > { %8717 = vtanh.f32 %v6243_v31  ;;  %v6230_v1 = vsel %vm6229_vm10, %v8714_v9, %v6226_v27 }
 0xc61   : > { %v6235_v41 = vsel %vm6232_vm11, %v6234_v58, %v6230_v1 }
 0xc66   : > { %v8718_v44 = vpop.eup %8717 }
 0xc67   : > { %v6245_v60 = vmul.f32 %v8718_v44, %v6235_v41 }
 0xc69   : > { %v6267_v36 = vrot.slane %v6245_v60, 6 }
 0xc6b   : > { %6285 = vmatmul.f32.vlgmr.msrb.gmra.mxu0 %v6267_v36 }
 0xce8   : > { %v6286_v4 = vpop.f32.mrf.mxu0 }
 0xce9   : > { %v6287_v18 = vadd.f32 %v8462_v29, %v6286_v4 }
 0xceb   : > { %v8001_v50 = vmul.f32 -1.442695, %v6287_v18 }
 0xced   : > { %8719 = vpow2.f32 %v8001_v50 }
 0xcf3   : > { %v8720_v63 = vpop.eup %8719 }
 0xcf4   : > { %v6292_v55 = vadd.f32 1.0, %v8720_v63 }
 0xcf6   : > { %8721 = vrcp.f32 %v6292_v55  ;;  %v6304_v37 = vand.u32 2147483648, %v6292_v55  ;;  %v6302_v52 = vand.u32 2147483647, %v6292_v55  ;;  %vm6298_vm5 = vweird.f32 %v6292_v55 }
 0xcf8   : > { %v6305_v56 = vor.u32 1.1754944e-38, %v6304_v37  ;;  %vm6303_vm12 = vcmp.eq.f32.partialorder %v6302_v52, 8.507059e+37 }
 0xcfc   : > { %v8722_v43 = vpop.eup %8721 }
 0xcfd   : > { %v6294_v3 = vmul.f32 %v8722_v43, %v6292_v55  ;;  %vm6299_vm4 = vweird.f32 %v8722_v43 }
 0xcfe   : > { %vm6300_vm6 = vmor %vm6298_vm5, %vm6299_vm4 }
 0xcff   : > { %v6295_v11 = vsub.f32 1.0, %v6294_v3 }
 0xd01   : > { %v6296_v17 = vmul.f32 %v8722_v43, %v6295_v11 }
 0xd03   : > { %v6297_v38 = vadd.f32 %v8722_v43, %v6296_v17 }
 0xd05   : > { %v6301_v39 = vsel %vm6300_vm6, %v8722_v43, %v6297_v38 }
 0xd06   : > { %v6306_v26 = vsel %vm6303_vm12, %v6305_v56, %v6301_v39 }
 0xd07   : > { %6309 = vst.msk [vmem:[%s10584_s9] sm:$0x3] %vm6308_vm7, %v6306_v26 }
 0xd08 PF: > { %p23_p5 = scmp.ge.s32.totalorder %s8969_s15, 5   ;;  %s10683_s11 = smov %s8875_s12 }
 0xd09   : > { %s10684_s12 = smov %s8879_s13  ;;  %s10685_s13 = smov %s8979_s18 }
 0xd0a   : > { %s10686_s14 = smov %s8969_s15  ;;  %25 = sbr.rel (!%p23_p5) target bundleno = 8 (0x8), region = 173 }
 0xd0f   :  { %6321 = vsyncpa [#allocation9], 1 }
 0xd10   :  { %6323 = vsyncpa [#allocation9 + $0x1], 1 }
 0xd11   :  { %6324 = vsyncpa [#allocation11], 1 }
 0xd12   :  { %6325 = vsyncpa [#allocation14], 1 }

</bundles_post_ra>
